<compile_context>
chip_gen: v7x
topology: tpu7x:2x2x1
jax: 0.10.0
libtpu: 0.0.40
codegen_flags: <defaults>
</compile_context>

<pallas_src>
import functools
import math

import jax
import jax.numpy as jnp
from jax.experimental import pallas as pl
from jax.experimental.pallas import tpu as pltpu

NHEAD = 8
FFN_DIM = 2048        # nn.TransformerEncoderLayer default dim_feedforward
LN_EPS = 1e-5
NEG_INF = -1e30       # large finite negative (robust vs. -inf in softmax)

_SEQ = pltpu.CompilerParams(dimension_semantics=("arbitrary",))


# ----------------------- in-kernel building blocks -------------------------

def _dot(a, b):
    """bf16 MXU matmul with f32 accumulation."""
    return jnp.dot(a.astype(jnp.bfloat16), b.astype(jnp.bfloat16),
                   preferred_element_type=jnp.float32)


def _layernorm(x, g, b):
    mu = jnp.mean(x, axis=-1, keepdims=True)
    var = jnp.mean(jnp.square(x - mu), axis=-1, keepdims=True)
    return (x - mu) * jax.lax.rsqrt(var + LN_EPS) * g + b


def _attention(q, k, v, wo, bias):
    """Whole-batch multi-head attention fused with the output projection.

    q: (Mq, D), k/v: (Mk, D) f32 with batch folded into the row dim; `bias`
    (Mq, Mk) is an additive mask that kills cross-batch (and, for the decoder
    self-attention, non-causal) pairs.  Each head's output projection rows are
    folded into a full-width f32 register accumulator, so head results never
    hit VMEM scratch / masked partial stores.  Returns (Mq, D) f32 (no bias).
    """
    D = q.shape[-1]
    dh = D // NHEAD
    scale = 1.0 / math.sqrt(dh)
    qb = q.astype(jnp.bfloat16)
    kb = k.astype(jnp.bfloat16)
    vb = v.astype(jnp.bfloat16)
    wo = wo.astype(jnp.bfloat16)
    acc = jnp.zeros((q.shape[0], D), jnp.float32)
    # TODO(synk): replace this static head loop with a head-batched dot_general
    #             at realistic head_dim (>= 64); at D=32 (dh=4) the loop bodies
    #             are tiny and robust to lower.
    for h in range(NHEAD):
        sl = slice(h * dh, (h + 1) * dh)
        s = jax.lax.dot_general(
            qb[:, sl], kb[:, sl],
            dimension_numbers=(((1,), (1,)), ((), ())),
            preferred_element_type=jnp.float32) * scale + bias
        s = s - jnp.max(s, axis=-1, keepdims=True)
        p = jnp.exp(s)
        p = p * pl.reciprocal(jnp.sum(p, axis=-1, keepdims=True), approx=True)
        oh = jnp.dot(p.astype(jnp.bfloat16), vb[:, sl],
                     preferred_element_type=jnp.float32)
        acc = acc + jnp.dot(oh.astype(jnp.bfloat16), wo[sl, :],
                            preferred_element_type=jnp.float32)
    return acc


# ------------------------------ kernels ------------------------------------

def _encoder_kernel(src_ref, pe_ref, bias_ref, in_w_ref, in_b_ref,
                    wqkv_ref, bqkv_ref, wo_ref, bo_ref,
                    ln1g_ref, ln1b_ref,
                    w1_ref, b1_ref, w2_ref, b2_ref,
                    ln2g_ref, ln2b_ref,
                    mem_ref):
    """One grid step = one encoder layer; step 0 also does embed+PE.

    mem_ref has a constant output block index -> it stays VMEM-resident across
    the layer grid and doubles as the running activation (accumulator pattern).
    """
    li = pl.program_id(0)

    @pl.when(li == 0)
    def _():
        emb = _dot(src_ref[...], in_w_ref[...]) + in_b_ref[...]
        mem_ref[...] = emb + pe_ref[...]

    x = mem_ref[...]                                     # (B*Ss, D) f32
    D = x.shape[-1]

    # self-attention (packed QKV, all heads + fused out-proj) + add & norm
    qkv = _dot(x, wqkv_ref[...]) + bqkv_ref[...]
    attn = _attention(qkv[:, 0:D], qkv[:, D:2 * D], qkv[:, 2 * D:3 * D],
                      wo_ref[...], bias_ref[...]) + bo_ref[...]
    h = _layernorm(x + attn, ln1g_ref[...], ln1b_ref[...])

    # feed-forward (relu) + add & norm
    ff = jnp.maximum(_dot(h, w1_ref[...]) + b1_ref[...], 0.0)
    ff = _dot(ff, w2_ref[...]) + b2_ref[...]
    mem_ref[...] = _layernorm(h + ff, ln2g_ref[...], ln2b_ref[...])


def _decoder_kernel(tgt_ref, pe_ref, mem_ref, sa_bias_ref, ca_bias_ref,
                    in_w_ref, in_b_ref,
                    sa_wqkv_ref, sa_bqkv_ref, sa_wo_ref, sa_bo_ref,
                    ln1g_ref, ln1b_ref,
                    ca_wq_ref, ca_bq_ref, ca_wkv_ref, ca_bkv_ref,
                    ca_wo_ref, ca_bo_ref,
                    ln2g_ref, ln2b_ref,
                    w1_ref, b1_ref, w2_ref, b2_ref,
                    ln3g_ref, ln3b_ref,
                    out_w_ref, out_b_ref,
                    out_ref, h_ref):
    """One grid step = one decoder layer; step 0 embeds tgt, the last step also
    applies the (lane-padded) output projection."""
    li = pl.program_id(0)
    nl = pl.num_programs(0)

    @pl.when(li == 0)
    def _():
        emb = _dot(tgt_ref[...], in_w_ref[...]) + in_b_ref[...]
        h_ref[...] = emb + pe_ref[...]

    x = h_ref[...]                                       # (B*St, D) f32
    D = x.shape[-1]
    mem = mem_ref[...]                                   # (B*Ss, D) f32

    # causal self-attention + add & norm
    qkv = _dot(x, sa_wqkv_ref[...]) + sa_bqkv_ref[...]
    sa = _attention(qkv[:, 0:D], qkv[:, D:2 * D], qkv[:, 2 * D:3 * D],
                    sa_wo_ref[...], sa_bias_ref[...]) + sa_bo_ref[...]
    h = _layernorm(x + sa, ln1g_ref[...], ln1b_ref[...])

    # cross-attention over encoder memory + add & norm
    q = _dot(h, ca_wq_ref[...]) + ca_bq_ref[...]
    kv = _dot(mem, ca_wkv_ref[...]) + ca_bkv_ref[...]
    ca = _attention(q, kv[:, 0:D], kv[:, D:2 * D],
                    ca_wo_ref[...], ca_bias_ref[...]) + ca_bo_ref[...]
    h = _layernorm(h + ca, ln2g_ref[...], ln2b_ref[...])

    # feed-forward (relu) + add & norm
    ff = jnp.maximum(_dot(h, w1_ref[...]) + b1_ref[...], 0.0)
    ff = _dot(ff, w2_ref[...]) + b2_ref[...]
    h = _layernorm(h + ff, ln3g_ref[...], ln3b_ref[...])
    h_ref[...] = h

    @pl.when(li == nl - 1)
    def _():
        # lane-dense (padded to 128 columns) final projection + store
        out_ref[...] = _dot(h, out_w_ref[...]) + out_b_ref[...]


# ------------------------------ wrappers ------------------------------------

def _const(shape):
    """Full-array block, constant index -> DMA'd once, kept resident."""
    return pl.BlockSpec(shape, lambda li: (0, 0))


def _layer(shape2d):
    """Per-layer stacked parameter: leading layer axis indexed by the grid."""
    return pl.BlockSpec((None,) + tuple(shape2d), lambda li: (li, 0, 0))


def _attn_bias(batch, sq, sk, causal):
    """Additive attention bias for batch-folded rows/cols (built outside the
    kernel; tiny constant array, DMA'd once)."""
    rb = jnp.repeat(jnp.arange(batch), sq)
    cb = jnp.repeat(jnp.arange(batch), sk)
    rp = jnp.tile(jnp.arange(sq), batch)
    cp = jnp.tile(jnp.arange(sk), batch)
    allowed = rb[:, None] == cb[None, :]
    if causal:
        allowed = allowed & (cp[None, :] <= rp[:, None])
    return jnp.where(allowed, 0.0, NEG_INF).astype(jnp.float32)


def run_encoder(src2d, pe2d, bias, in_w, in_b, enc):
    M, In = src2d.shape
    D = in_w.shape[1]
    L = enc["wqkv"].shape[0]
    return pl.pallas_call(
        _encoder_kernel,
        out_shape=jax.ShapeDtypeStruct((M, D), jnp.float32),
        grid=(L,),
        in_specs=[
            _const((M, In)), _const((M, D)), _const((M, M)),
            _const((In, D)), _const((1, D)),
            _layer((D, 3 * D)), _layer((1, 3 * D)),
            _layer((D, D)), _layer((1, D)),
            _layer((1, D)), _layer((1, D)),
            _layer((D, FFN_DIM)), _layer((1, FFN_DIM)),
            _layer((FFN_DIM, D)), _layer((1, D)),
            _layer((1, D)), _layer((1, D)),
        ],
        out_specs=pl.BlockSpec((M, D), lambda li: (0, 0)),
        compiler_params=_SEQ,
    )(src2d, pe2d, bias, in_w, in_b,
      enc["wqkv"], enc["bqkv"], enc["wo"], enc["bo"],
      enc["ln1_g"], enc["ln1_b"],
      enc["w1"], enc["b1"], enc["w2"], enc["b2"],
      enc["ln2_g"], enc["ln2_b"])


def run_decoder(tgt2d, pe2d, memory, sa_bias, ca_bias,
                in_w, in_b, dec, out_w, out_b):
    Mt, In = tgt2d.shape
    Ms = memory.shape[0]
    D = in_w.shape[1]
    Opad = out_w.shape[1]
    L = dec["sa_wqkv"].shape[0]
    return pl.pallas_call(
        _decoder_kernel,
        out_shape=jax.ShapeDtypeStruct((Mt, Opad), jnp.float32),
        grid=(L,),
        in_specs=[
            _const((Mt, In)), _const((Mt, D)), _const((Ms, D)),
            _const((Mt, Mt)), _const((Mt, Ms)),
            _const((In, D)), _const((1, D)),
            _layer((D, 3 * D)), _layer((1, 3 * D)),
            _layer((D, D)), _layer((1, D)),
            _layer((1, D)), _layer((1, D)),
            _layer((D, D)), _layer((1, D)),
            _layer((D, 2 * D)), _layer((1, 2 * D)),
            _layer((D, D)), _layer((1, D)),
            _layer((1, D)), _layer((1, D)),
            _layer((D, FFN_DIM)), _layer((1, FFN_DIM)),
            _layer((FFN_DIM, D)), _layer((1, D)),
            _layer((1, D)), _layer((1, D)),
            _const((D, Opad)), _const((1, Opad)),
        ],
        out_specs=pl.BlockSpec((Mt, Opad), lambda li: (0, 0)),
        scratch_shapes=[pltpu.VMEM((Mt, D), jnp.float32)],
        compiler_params=_SEQ,
    )(tgt2d, pe2d, memory, sa_bias, ca_bias, in_w, in_b,
      dec["sa_wqkv"], dec["sa_bqkv"], dec["sa_wo"], dec["sa_bo"],
      dec["ln1_g"], dec["ln1_b"],
      dec["ca_wq"], dec["ca_bq"], dec["ca_wkv"], dec["ca_bkv"],
      dec["ca_wo"], dec["ca_bo"],
      dec["ln2_g"], dec["ln2_b"],
      dec["w1"], dec["b1"], dec["w2"], dec["b2"],
      dec["ln3_g"], dec["ln3_b"],
      out_w, out_b)


# ------------------------------ model glue ----------------------------------

def positional_encoding_table(max_len, d_model):
    position = jnp.arange(max_len, dtype=jnp.float32)[:, None]
    div_term = jnp.exp(
        jnp.arange(0, d_model, 2, dtype=jnp.float32) * (-math.log(10000.0) / d_model))
    pe = jnp.zeros((max_len, d_model), jnp.float32)
    pe = pe.at[:, 0::2].set(jnp.sin(position * div_term))
    pe = pe.at[:, 1::2].set(jnp.cos(position * div_term))
    return pe


def midi_bass_generator_forward(params, src, tgt, *, output_dim):
    B, Ss, In = src.shape
    _, St, _ = tgt.shape
    pe = params["pe"]

    # batch folded into the row dim (wrapper-side reshape; layout plumbing only)
    src2d = src.reshape(B * Ss, In)
    tgt2d = tgt.reshape(B * St, In)
    pe_src = jnp.tile(pe[:Ss], (B, 1))
    pe_tgt = jnp.tile(pe[:St], (B, 1))

    enc_bias = _attn_bias(B, Ss, Ss, causal=False)
    dec_self_bias = _attn_bias(B, St, St, causal=True)
    dec_cross_bias = _attn_bias(B, St, Ss, causal=False)

    memory = run_encoder(src2d, pe_src, enc_bias,
                         params["in_w"], params["in_b"], params["enc"])
    out_pad = run_decoder(tgt2d, pe_tgt, memory, dec_self_bias, dec_cross_bias,
                          params["in_w"], params["in_b"], params["dec"],
                          params["out_w"], params["out_b"])
    return out_pad.reshape(B, St, -1)[:, :, :output_dim]


# ----------------------------- parameter init -------------------------------

def init_params(key, input_dim, hidden_dim, num_layers, output_dim, max_len=1000):
    D = hidden_dim
    keys = iter(jax.random.split(key, 256))

    def dense(fan_in, fan_out, scale=0.05):
        return jax.random.normal(next(keys), (fan_in, fan_out), jnp.float32) * scale

    def stack_w(fan_in, fan_out, scale=0.05):       # bf16 MXU weights, stacked per layer
        w = jax.random.normal(next(keys), (num_layers, fan_in, fan_out),
                              jnp.float32) * scale
        return w.astype(jnp.bfloat16)

    def zeros_s(n):
        return jnp.zeros((num_layers, 1, n), jnp.float32)

    def ones_s(n):
        return jnp.ones((num_layers, 1, n), jnp.float32)

    enc = dict(
        wqkv=stack_w(D, 3 * D), bqkv=zeros_s(3 * D),
        wo=stack_w(D, D), bo=zeros_s(D),
        ln1_g=ones_s(D), ln1_b=zeros_s(D),
        w1=stack_w(D, FFN_DIM), b1=zeros_s(FFN_DIM),
        w2=stack_w(FFN_DIM, D, scale=0.01), b2=zeros_s(D),
        ln2_g=ones_s(D), ln2_b=zeros_s(D),
    )
    dec = dict(
        sa_wqkv=stack_w(D, 3 * D), sa_bqkv=zeros_s(3 * D),
        sa_wo=stack_w(D, D), sa_bo=zeros_s(D),
        ln1_g=ones_s(D), ln1_b=zeros_s(D),
        ca_wq=stack_w(D, D), ca_bq=zeros_s(D),
        ca_wkv=stack_w(D, 2 * D), ca_bkv=zeros_s(2 * D),
        ca_wo=stack_w(D, D), ca_bo=zeros_s(D),
        ln2_g=ones_s(D), ln2_b=zeros_s(D),
        w1=stack_w(D, FFN_DIM), b1=zeros_s(FFN_DIM),
        w2=stack_w(FFN_DIM, D, scale=0.01), b2=zeros_s(D),
        ln3_g=ones_s(D), ln3_b=zeros_s(D),
    )

    # output projection padded to a 128-lane multiple so the final store is lane-dense
    opad = ((output_dim + 127) // 128) * 128
    out_w = jnp.zeros((D, opad), jnp.float32).at[:, :output_dim].set(
        dense(D, output_dim)).astype(jnp.bfloat16)
    out_b = jnp.zeros((1, opad), jnp.float32)

    return dict(
        in_w=dense(input_dim, D).astype(jnp.bfloat16),
        in_b=jnp.zeros((1, D), jnp.float32),
        out_w=out_w, out_b=out_b,
        pe=positional_encoding_table(max_len, D),
        enc=enc, dec=dec,
    )


# --------------------------------- main --------------------------------------

if __name__ == "__main__":
    input_dim, hidden_dim, num_layers, output_dim = 16, 32, 2, 16
    B, S_src, S_tgt = 2, 10, 8

    key = jax.random.PRNGKey(0)
    kp, ks, kt = jax.random.split(key, 3)
    params = init_params(kp, input_dim, hidden_dim, num_layers, output_dim)

    src = jax.random.normal(ks, (B, S_src, input_dim), jnp.float32)
    tgt = jax.random.normal(kt, (B, S_tgt, input_dim), jnp.float32)

    fwd = jax.jit(functools.partial(midi_bass_generator_forward,
                                    output_dim=output_dim))
    out = jax.block_until_ready(fwd(params, src, tgt))

    assert out.shape == (B, S_tgt, output_dim), out.shape
    assert bool(jnp.all(jnp.isfinite(out)))
    print("KERNEL_OK")
</pallas_src>

<mosaic_0001>
module attributes {stable_mosaic.version = 11 : i64} {
  func.func @_encoder_kernel(%arg0: i32, %arg1: memref<20x16xf32, #tpu.memory_space<vmem>>, %arg2: memref<20x32xf32, #tpu.memory_space<vmem>>, %arg3: memref<20x20xf32, #tpu.memory_space<vmem>>, %arg4: memref<16x32xbf16, #tpu.memory_space<vmem>>, %arg5: memref<1x32xf32, #tpu.memory_space<vmem>>, %arg6: memref<1x32x96xbf16, #tpu.memory_space<vmem>>, %arg7: memref<1x1x96xf32, #tpu.memory_space<vmem>>, %arg8: memref<1x32x32xbf16, #tpu.memory_space<vmem>>, %arg9: memref<1x1x32xf32, #tpu.memory_space<vmem>>, %arg10: memref<1x1x32xf32, #tpu.memory_space<vmem>>, %arg11: memref<1x1x32xf32, #tpu.memory_space<vmem>>, %arg12: memref<1x32x2048xbf16, #tpu.memory_space<vmem>>, %arg13: memref<1x1x2048xf32, #tpu.memory_space<vmem>>, %arg14: memref<1x2048x32xbf16, #tpu.memory_space<vmem>>, %arg15: memref<1x1x32xf32, #tpu.memory_space<vmem>>, %arg16: memref<1x1x32xf32, #tpu.memory_space<vmem>>, %arg17: memref<1x1x32xf32, #tpu.memory_space<vmem>>, %arg18: memref<20x32xf32, #tpu.memory_space<vmem>>) attributes {dimension_semantics = [#tpu.dimension_semantics<arbitrary>], iteration_bounds = array<i64: 2>, scalar_prefetch = 0 : i64, scratch_operands = 0 : i64, tpu.core_type = #tpu.core_type<tc>, window_params = [{pipeline_mode = #tpu.pipeline_mode<synchronous>, transform_indices = @transform_0, window_bounds = array<i64: 20, 16>}, {pipeline_mode = #tpu.pipeline_mode<synchronous>, transform_indices = @transform_1, window_bounds = array<i64: 20, 32>}, {pipeline_mode = #tpu.pipeline_mode<synchronous>, transform_indices = @transform_2, window_bounds = array<i64: 20, 20>}, {pipeline_mode = #tpu.pipeline_mode<synchronous>, transform_indices = @transform_3, window_bounds = array<i64: 16, 32>}, {pipeline_mode = #tpu.pipeline_mode<synchronous>, transform_indices = @transform_4, window_bounds = array<i64: 1, 32>}, {transform_indices = @transform_5, window_bounds = array<i64: 1, 32, 96>}, {transform_indices = @transform_6, window_bounds = array<i64: 1, 1, 96>}, {transform_indices = @transform_7, window_bounds = array<i64: 1, 32, 32>}, {transform_indices = @transform_8, window_bounds = array<i64: 1, 1, 32>}, {transform_indices = @transform_9, window_bounds = array<i64: 1, 1, 32>}, {transform_indices = @transform_10, window_bounds = array<i64: 1, 1, 32>}, {transform_indices = @transform_11, window_bounds = array<i64: 1, 32, 2048>}, {transform_indices = @transform_12, window_bounds = array<i64: 1, 1, 2048>}, {transform_indices = @transform_13, window_bounds = array<i64: 1, 2048, 32>}, {transform_indices = @transform_14, window_bounds = array<i64: 1, 1, 32>}, {transform_indices = @transform_15, window_bounds = array<i64: 1, 1, 32>}, {transform_indices = @transform_16, window_bounds = array<i64: 1, 1, 32>}, {pipeline_mode = #tpu.pipeline_mode<synchronous>, transform_indices = @transform_17, window_bounds = array<i64: 20, 32>}]} {
    %c0_i32 = arith.constant 0 : i32
    %0 = arith.cmpi eq, %arg0, %c0_i32 : i32
    %1 = arith.extui %0 : i1 to i32
    %c0_i32_0 = arith.constant 0 : i32
    %2 = arith.cmpi ne, %1, %c0_i32_0 : i32
    scf.if %2 {
      %c0_104 = arith.constant 0 : index
      %c0_105 = arith.constant 0 : index
      %283 = vector.load %arg1[%c0_104, %c0_105] : memref<20x16xf32, #tpu.memory_space<vmem>>, vector<20x16xf32>
      %c0_106 = arith.constant 0 : index
      %c0_107 = arith.constant 0 : index
      %284 = vector.load %arg4[%c0_106, %c0_107] : memref<16x32xbf16, #tpu.memory_space<vmem>>, vector<16x32xbf16>
      %285 = arith.truncf %283 : vector<20x16xf32> to vector<20x16xbf16>
      %cst_108 = arith.constant dense<0.000000e+00> : vector<20x32xf32>
      %286 = tpu.matmul %285, %284, %cst_108 {dimension_numbers = #tpu.dot_dimension_numbers<[1], [0], [0], [1], [0, 0, 1, 1], [], []>} : vector<20x16xbf16>, vector<16x32xbf16>, vector<20x32xf32> -> vector<20x32xf32>
      %c0_109 = arith.constant 0 : index
      %c0_110 = arith.constant 0 : index
      %287 = vector.load %arg5[%c0_109, %c0_110] : memref<1x32xf32, #tpu.memory_space<vmem>>, vector<1x32xf32>
      %288 = vector.broadcast %287 : vector<1x32xf32> to vector<20x32xf32>
      %289 = arith.addf %286, %288 : vector<20x32xf32>
      %c0_111 = arith.constant 0 : index
      %c0_112 = arith.constant 0 : index
      %290 = vector.load %arg2[%c0_111, %c0_112] : memref<20x32xf32, #tpu.memory_space<vmem>>, vector<20x32xf32>
      %291 = arith.addf %289, %290 : vector<20x32xf32>
      %c0_113 = arith.constant 0 : index
      %c0_114 = arith.constant 0 : index
      %292 = vector.load %arg18[%c0_113, %c0_114] : memref<20x32xf32, #tpu.memory_space<vmem>>, vector<20x32xf32>
      tpu.vector_store %arg18[%c0_113, %c0_114], %291 {strides = array<i32>} : memref<20x32xf32, #tpu.memory_space<vmem>>, vector<20x32xf32>,
    } else {
    }
    %c0 = arith.constant 0 : index
    %c0_1 = arith.constant 0 : index
    %3 = vector.load %arg18[%c0, %c0_1] : memref<20x32xf32, #tpu.memory_space<vmem>>, vector<20x32xf32>
    %c0_2 = arith.constant 0 : index
    %c0_3 = arith.constant 0 : index
    %c0_4 = arith.constant 0 : index
    %4 = vector.load %arg6[%c0_2, %c0_3, %c0_4] : memref<1x32x96xbf16, #tpu.memory_space<vmem>>, vector<1x32x96xbf16>
    %5 = vector.shape_cast %4 : vector<1x32x96xbf16> to vector<32x96xbf16>
    %6 = arith.truncf %3 : vector<20x32xf32> to vector<20x32xbf16>
    %cst = arith.constant dense<0.000000e+00> : vector<20x96xf32>
    %7 = tpu.matmul %6, %5, %cst {dimension_numbers = #tpu.dot_dimension_numbers<[1], [0], [0], [1], [0, 0, 1, 1], [], []>} : vector<20x32xbf16>, vector<32x96xbf16>, vector<20x96xf32> -> vector<20x96xf32>
    %c0_5 = arith.constant 0 : index
    %c0_6 = arith.constant 0 : index
    %c0_7 = arith.constant 0 : index
    %8 = vector.load %arg7[%c0_5, %c0_6, %c0_7] : memref<1x1x96xf32, #tpu.memory_space<vmem>>, vector<1x1x96xf32>
    %9 = vector.shape_cast %8 : vector<1x1x96xf32> to vector<1x96xf32>
    %10 = vector.broadcast %9 : vector<1x96xf32> to vector<20x96xf32>
    %11 = arith.addf %7, %10 : vector<20x96xf32>
    %12 = vector.extract_strided_slice %11 {offsets = [0, 0], sizes = [20, 32], strides = [1, 1]} : vector<20x96xf32> to vector<20x32xf32>
    %13 = vector.extract_strided_slice %11 {offsets = [0, 32], sizes = [20, 32], strides = [1, 1]} : vector<20x96xf32> to vector<20x32xf32>
    %14 = vector.extract_strided_slice %11 {offsets = [0, 64], sizes = [20, 32], strides = [1, 1]} : vector<20x96xf32> to vector<20x32xf32>
    %c0_8 = arith.constant 0 : index
    %c0_9 = arith.constant 0 : index
    %c0_10 = arith.constant 0 : index
    %15 = vector.load %arg8[%c0_8, %c0_9, %c0_10] : memref<1x32x32xbf16, #tpu.memory_space<vmem>>, vector<1x32x32xbf16>
    %16 = vector.shape_cast %15 : vector<1x32x32xbf16> to vector<32x32xbf16>
    %c0_11 = arith.constant 0 : index
    %c0_12 = arith.constant 0 : index
    %17 = vector.load %arg3[%c0_11, %c0_12] : memref<20x20xf32, #tpu.memory_space<vmem>>, vector<20x20xf32>
    %18 = arith.truncf %12 : vector<20x32xf32> to vector<20x32xbf16>
    %19 = arith.truncf %13 : vector<20x32xf32> to vector<20x32xbf16>
    %20 = arith.truncf %14 : vector<20x32xf32> to vector<20x32xbf16>
    %cst_13 = arith.constant 0.000000e+00 : f32
    %21 = vector.broadcast %cst_13 : f32 to vector<20x32xf32>
    %22 = vector.extract_strided_slice %18 {offsets = [0, 0], sizes = [20, 4], strides = [1, 1]} : vector<20x32xbf16> to vector<20x4xbf16>
    %23 = vector.extract_strided_slice %19 {offsets = [0, 0], sizes = [20, 4], strides = [1, 1]} : vector<20x32xbf16> to vector<20x4xbf16>
    %cst_14 = arith.constant dense<0.000000e+00> : vector<20x20xf32>
    %24 = tpu.matmul %22, %23, %cst_14 {dimension_numbers = #tpu.dot_dimension_numbers<[1], [1], [0], [0], [0, 0, 1, 0], [], []>} : vector<20x4xbf16>, vector<20x4xbf16>, vector<20x20xf32> -> vector<20x20xf32>
    %cst_15 = arith.constant 5.000000e-01 : f32
    %25 = vector.broadcast %cst_15 : f32 to vector<20x20xf32>
    %26 = arith.mulf %24, %25 : vector<20x20xf32>
    %27 = arith.addf %26, %17 : vector<20x20xf32>
    %cst_16 = arith.constant dense<0xFF800000> : vector<20xf32>
    %28 = vector.multi_reduction <maximumf>, %27, %cst_16 [1] : vector<20x20xf32> to vector<20xf32>
    %29 = vector.shape_cast %28 : vector<20xf32> to vector<20x1xf32>
    %30 = vector.broadcast %29 : vector<20x1xf32> to vector<20x20xf32>
    %31 = arith.subf %27, %30 : vector<20x20xf32>
    %32 = math.exp %31 : vector<20x20xf32>
    %cst_17 = arith.constant dense<0.000000e+00> : vector<20xf32>
    %33 = vector.multi_reduction <add>, %32, %cst_17 [1] : vector<20x20xf32> to vector<20xf32>
    %34 = vector.shape_cast %33 : vector<20xf32> to vector<20x1xf32>
    %35 = tpu.reciprocal %34 {approx = true} : vector<20x1xf32> -> vector<20x1xf32>
    %36 = vector.broadcast %35 : vector<20x1xf32> to vector<20x20xf32>
    %37 = arith.mulf %32, %36 : vector<20x20xf32>
    %38 = arith.truncf %37 : vector<20x20xf32> to vector<20x20xbf16>
    %39 = vector.extract_strided_slice %20 {offsets = [0, 0], sizes = [20, 4], strides = [1, 1]} : vector<20x32xbf16> to vector<20x4xbf16>
    %cst_18 = arith.constant dense<0.000000e+00> : vector<20x4xf32>
    %40 = tpu.matmul %38, %39, %cst_18 {dimension_numbers = #tpu.dot_dimension_numbers<[1], [0], [0], [1], [0, 0, 1, 1], [], []>} : vector<20x20xbf16>, vector<20x4xbf16>, vector<20x4xf32> -> vector<20x4xf32>
    %41 = arith.truncf %40 : vector<20x4xf32> to vector<20x4xbf16>
    %42 = vector.extract_strided_slice %16 {offsets = [0, 0], sizes = [4, 32], strides = [1, 1]} : vector<32x32xbf16> to vector<4x32xbf16>
    %cst_19 = arith.constant dense<0.000000e+00> : vector<20x32xf32>
    %43 = tpu.matmul %41, %42, %cst_19 {dimension_numbers = #tpu.dot_dimension_numbers<[1], [0], [0], [1], [0, 0, 1, 1], [], []>} : vector<20x4xbf16>, vector<4x32xbf16>, vector<20x32xf32> -> vector<20x32xf32>
    %44 = arith.addf %21, %43 : vector<20x32xf32>
    %45 = vector.extract_strided_slice %18 {offsets = [0, 4], sizes = [20, 4], strides = [1, 1]} : vector<20x32xbf16> to vector<20x4xbf16>
    %46 = vector.extract_strided_slice %19 {offsets = [0, 4], sizes = [20, 4], strides = [1, 1]} : vector<20x32xbf16> to vector<20x4xbf16>
    %cst_20 = arith.constant dense<0.000000e+00> : vector<20x20xf32>
    %47 = tpu.matmul %45, %46, %cst_20 {dimension_numbers = #tpu.dot_dimension_numbers<[1], [1], [0], [0], [0, 0, 1, 0], [], []>} : vector<20x4xbf16>, vector<20x4xbf16>, vector<20x20xf32> -> vector<20x20xf32>
    %cst_21 = arith.constant 5.000000e-01 : f32
    %48 = vector.broadcast %cst_21 : f32 to vector<20x20xf32>
    %49 = arith.mulf %47, %48 : vector<20x20xf32>
    %50 = arith.addf %49, %17 : vector<20x20xf32>
    %cst_22 = arith.constant dense<0xFF800000> : vector<20xf32>
    %51 = vector.multi_reduction <maximumf>, %50, %cst_22 [1] : vector<20x20xf32> to vector<20xf32>
    %52 = vector.shape_cast %51 : vector<20xf32> to vector<20x1xf32>
    %53 = vector.broadcast %52 : vector<20x1xf32> to vector<20x20xf32>
    %54 = arith.subf %50, %53 : vector<20x20xf32>
    %55 = math.exp %54 : vector<20x20xf32>
    %cst_23 = arith.constant dense<0.000000e+00> : vector<20xf32>
    %56 = vector.multi_reduction <add>, %55, %cst_23 [1] : vector<20x20xf32> to vector<20xf32>
    %57 = vector.shape_cast %56 : vector<20xf32> to vector<20x1xf32>
    %58 = tpu.reciprocal %57 {approx = true} : vector<20x1xf32> -> vector<20x1xf32>
    %59 = vector.broadcast %58 : vector<20x1xf32> to vector<20x20xf32>
    %60 = arith.mulf %55, %59 : vector<20x20xf32>
    %61 = arith.truncf %60 : vector<20x20xf32> to vector<20x20xbf16>
    %62 = vector.extract_strided_slice %20 {offsets = [0, 4], sizes = [20, 4], strides = [1, 1]} : vector<20x32xbf16> to vector<20x4xbf16>
    %cst_24 = arith.constant dense<0.000000e+00> : vector<20x4xf32>
    %63 = tpu.matmul %61, %62, %cst_24 {dimension_numbers = #tpu.dot_dimension_numbers<[1], [0], [0], [1], [0, 0, 1, 1], [], []>} : vector<20x20xbf16>, vector<20x4xbf16>, vector<20x4xf32> -> vector<20x4xf32>
    %64 = arith.truncf %63 : vector<20x4xf32> to vector<20x4xbf16>
    %65 = vector.extract_strided_slice %16 {offsets = [4, 0], sizes = [4, 32], strides = [1, 1]} : vector<32x32xbf16> to vector<4x32xbf16>
    %cst_25 = arith.constant dense<0.000000e+00> : vector<20x32xf32>
    %66 = tpu.matmul %64, %65, %cst_25 {dimension_numbers = #tpu.dot_dimension_numbers<[1], [0], [0], [1], [0, 0, 1, 1], [], []>} : vector<20x4xbf16>, vector<4x32xbf16>, vector<20x32xf32> -> vector<20x32xf32>
    %67 = arith.addf %44, %66 : vector<20x32xf32>
    %68 = vector.extract_strided_slice %18 {offsets = [0, 8], sizes = [20, 4], strides = [1, 1]} : vector<20x32xbf16> to vector<20x4xbf16>
    %69 = vector.extract_strided_slice %19 {offsets = [0, 8], sizes = [20, 4], strides = [1, 1]} : vector<20x32xbf16> to vector<20x4xbf16>
    %cst_26 = arith.constant dense<0.000000e+00> : vector<20x20xf32>
    %70 = tpu.matmul %68, %69, %cst_26 {dimension_numbers = #tpu.dot_dimension_numbers<[1], [1], [0], [0], [0, 0, 1, 0], [], []>} : vector<20x4xbf16>, vector<20x4xbf16>, vector<20x20xf32> -> vector<20x20xf32>
    %cst_27 = arith.constant 5.000000e-01 : f32
    %71 = vector.broadcast %cst_27 : f32 to vector<20x20xf32>
    %72 = arith.mulf %70, %71 : vector<20x20xf32>
    %73 = arith.addf %72, %17 : vector<20x20xf32>
    %cst_28 = arith.constant dense<0xFF800000> : vector<20xf32>
    %74 = vector.multi_reduction <maximumf>, %73, %cst_28 [1] : vector<20x20xf32> to vector<20xf32>
    %75 = vector.shape_cast %74 : vector<20xf32> to vector<20x1xf32>
    %76 = vector.broadcast %75 : vector<20x1xf32> to vector<20x20xf32>
    %77 = arith.subf %73, %76 : vector<20x20xf32>
    %78 = math.exp %77 : vector<20x20xf32>
    %cst_29 = arith.constant dense<0.000000e+00> : vector<20xf32>
    %79 = vector.multi_reduction <add>, %78, %cst_29 [1] : vector<20x20xf32> to vector<20xf32>
    %80 = vector.shape_cast %79 : vector<20xf32> to vector<20x1xf32>
    %81 = tpu.reciprocal %80 {approx = true} : vector<20x1xf32> -> vector<20x1xf32>
    %82 = vector.broadcast %81 : vector<20x1xf32> to vector<20x20xf32>
    %83 = arith.mulf %78, %82 : vector<20x20xf32>
    %84 = arith.truncf %83 : vector<20x20xf32> to vector<20x20xbf16>
    %85 = vector.extract_strided_slice %20 {offsets = [0, 8], sizes = [20, 4], strides = [1, 1]} : vector<20x32xbf16> to vector<20x4xbf16>
    %cst_30 = arith.constant dense<0.000000e+00> : vector<20x4xf32>
    %86 = tpu.matmul %84, %85, %cst_30 {dimension_numbers = #tpu.dot_dimension_numbers<[1], [0], [0], [1], [0, 0, 1, 1], [], []>} : vector<20x20xbf16>, vector<20x4xbf16>, vector<20x4xf32> -> vector<20x4xf32>
    %87 = arith.truncf %86 : vector<20x4xf32> to vector<20x4xbf16>
    %88 = vector.extract_strided_slice %16 {offsets = [8, 0], sizes = [4, 32], strides = [1, 1]} : vector<32x32xbf16> to vector<4x32xbf16>
    %cst_31 = arith.constant dense<0.000000e+00> : vector<20x32xf32>
    %89 = tpu.matmul %87, %88, %cst_31 {dimension_numbers = #tpu.dot_dimension_numbers<[1], [0], [0], [1], [0, 0, 1, 1], [], []>} : vector<20x4xbf16>, vector<4x32xbf16>, vector<20x32xf32> -> vector<20x32xf32>
    %90 = arith.addf %67, %89 : vector<20x32xf32>
    %91 = vector.extract_strided_slice %18 {offsets = [0, 12], sizes = [20, 4], strides = [1, 1]} : vector<20x32xbf16> to vector<20x4xbf16>
    %92 = vector.extract_strided_slice %19 {offsets = [0, 12], sizes = [20, 4], strides = [1, 1]} : vector<20x32xbf16> to vector<20x4xbf16>
    %cst_32 = arith.constant dense<0.000000e+00> : vector<20x20xf32>
    %93 = tpu.matmul %91, %92, %cst_32 {dimension_numbers = #tpu.dot_dimension_numbers<[1], [1], [0], [0], [0, 0, 1, 0], [], []>} : vector<20x4xbf16>, vector<20x4xbf16>, vector<20x20xf32> -> vector<20x20xf32>
    %cst_33 = arith.constant 5.000000e-01 : f32
    %94 = vector.broadcast %cst_33 : f32 to vector<20x20xf32>
    %95 = arith.mulf %93, %94 : vector<20x20xf32>
    %96 = arith.addf %95, %17 : vector<20x20xf32>
    %cst_34 = arith.constant dense<0xFF800000> : vector<20xf32>
    %97 = vector.multi_reduction <maximumf>, %96, %cst_34 [1] : vector<20x20xf32> to vector<20xf32>
    %98 = vector.shape_cast %97 : vector<20xf32> to vector<20x1xf32>
    %99 = vector.broadcast %98 : vector<20x1xf32> to vector<20x20xf32>
    %100 = arith.subf %96, %99 : vector<20x20xf32>
    %101 = math.exp %100 : vector<20x20xf32>
    %cst_35 = arith.constant dense<0.000000e+00> : vector<20xf32>
    %102 = vector.multi_reduction <add>, %101, %cst_35 [1] : vector<20x20xf32> to vector<20xf32>
    %103 = vector.shape_cast %102 : vector<20xf32> to vector<20x1xf32>
    %104 = tpu.reciprocal %103 {approx = true} : vector<20x1xf32> -> vector<20x1xf32>
    %105 = vector.broadcast %104 : vector<20x1xf32> to vector<20x20xf32>
    %106 = arith.mulf %101, %105 : vector<20x20xf32>
    %107 = arith.truncf %106 : vector<20x20xf32> to vector<20x20xbf16>
    %108 = vector.extract_strided_slice %20 {offsets = [0, 12], sizes = [20, 4], strides = [1, 1]} : vector<20x32xbf16> to vector<20x4xbf16>
    %cst_36 = arith.constant dense<0.000000e+00> : vector<20x4xf32>
    %109 = tpu.matmul %107, %108, %cst_36 {dimension_numbers = #tpu.dot_dimension_numbers<[1], [0], [0], [1], [0, 0, 1, 1], [], []>} : vector<20x20xbf16>, vector<20x4xbf16>, vector<20x4xf32> -> vector<20x4xf32>
    %110 = arith.truncf %109 : vector<20x4xf32> to vector<20x4xbf16>
    %111 = vector.extract_strided_slice %16 {offsets = [12, 0], sizes = [4, 32], strides = [1, 1]} : vector<32x32xbf16> to vector<4x32xbf16>
    %cst_37 = arith.constant dense<0.000000e+00> : vector<20x32xf32>
    %112 = tpu.matmul %110, %111, %cst_37 {dimension_numbers = #tpu.dot_dimension_numbers<[1], [0], [0], [1], [0, 0, 1, 1], [], []>} : vector<20x4xbf16>, vector<4x32xbf16>, vector<20x32xf32> -> vector<20x32xf32>
    %113 = arith.addf %90, %112 : vector<20x32xf32>
    %114 = vector.extract_strided_slice %18 {offsets = [0, 16], sizes = [20, 4], strides = [1, 1]} : vector<20x32xbf16> to vector<20x4xbf16>
    %115 = vector.extract_strided_slice %19 {offsets = [0, 16], sizes = [20, 4], strides = [1, 1]} : vector<20x32xbf16> to vector<20x4xbf16>
    %cst_38 = arith.constant dense<0.000000e+00> : vector<20x20xf32>
    %116 = tpu.matmul %114, %115, %cst_38 {dimension_numbers = #tpu.dot_dimension_numbers<[1], [1], [0], [0], [0, 0, 1, 0], [], []>} : vector<20x4xbf16>, vector<20x4xbf16>, vector<20x20xf32> -> vector<20x20xf32>
    %cst_39 = arith.constant 5.000000e-01 : f32
    %117 = vector.broadcast %cst_39 : f32 to vector<20x20xf32>
    %118 = arith.mulf %116, %117 : vector<20x20xf32>
    %119 = arith.addf %118, %17 : vector<20x20xf32>
    %cst_40 = arith.constant dense<0xFF800000> : vector<20xf32>
    %120 = vector.multi_reduction <maximumf>, %119, %cst_40 [1] : vector<20x20xf32> to vector<20xf32>
    %121 = vector.shape_cast %120 : vector<20xf32> to vector<20x1xf32>
    %122 = vector.broadcast %121 : vector<20x1xf32> to vector<20x20xf32>
    %123 = arith.subf %119, %122 : vector<20x20xf32>
    %124 = math.exp %123 : vector<20x20xf32>
    %cst_41 = arith.constant dense<0.000000e+00> : vector<20xf32>
    %125 = vector.multi_reduction <add>, %124, %cst_41 [1] : vector<20x20xf32> to vector<20xf32>
    %126 = vector.shape_cast %125 : vector<20xf32> to vector<20x1xf32>
    %127 = tpu.reciprocal %126 {approx = true} : vector<20x1xf32> -> vector<20x1xf32>
    %128 = vector.broadcast %127 : vector<20x1xf32> to vector<20x20xf32>
    %129 = arith.mulf %124, %128 : vector<20x20xf32>
    %130 = arith.truncf %129 : vector<20x20xf32> to vector<20x20xbf16>
    %131 = vector.extract_strided_slice %20 {offsets = [0, 16], sizes = [20, 4], strides = [1, 1]} : vector<20x32xbf16> to vector<20x4xbf16>
    %cst_42 = arith.constant dense<0.000000e+00> : vector<20x4xf32>
    %132 = tpu.matmul %130, %131, %cst_42 {dimension_numbers = #tpu.dot_dimension_numbers<[1], [0], [0], [1], [0, 0, 1, 1], [], []>} : vector<20x20xbf16>, vector<20x4xbf16>, vector<20x4xf32> -> vector<20x4xf32>
    %133 = arith.truncf %132 : vector<20x4xf32> to vector<20x4xbf16>
    %134 = vector.extract_strided_slice %16 {offsets = [16, 0], sizes = [4, 32], strides = [1, 1]} : vector<32x32xbf16> to vector<4x32xbf16>
    %cst_43 = arith.constant dense<0.000000e+00> : vector<20x32xf32>
    %135 = tpu.matmul %133, %134, %cst_43 {dimension_numbers = #tpu.dot_dimension_numbers<[1], [0], [0], [1], [0, 0, 1, 1], [], []>} : vector<20x4xbf16>, vector<4x32xbf16>, vector<20x32xf32> -> vector<20x32xf32>
    %136 = arith.addf %113, %135 : vector<20x32xf32>
    %137 = vector.extract_strided_slice %18 {offsets = [0, 20], sizes = [20, 4], strides = [1, 1]} : vector<20x32xbf16> to vector<20x4xbf16>
    %138 = vector.extract_strided_slice %19 {offsets = [0, 20], sizes = [20, 4], strides = [1, 1]} : vector<20x32xbf16> to vector<20x4xbf16>
    %cst_44 = arith.constant dense<0.000000e+00> : vector<20x20xf32>
    %139 = tpu.matmul %137, %138, %cst_44 {dimension_numbers = #tpu.dot_dimension_numbers<[1], [1], [0], [0], [0, 0, 1, 0], [], []>} : vector<20x4xbf16>, vector<20x4xbf16>, vector<20x20xf32> -> vector<20x20xf32>
    %cst_45 = arith.constant 5.000000e-01 : f32
    %140 = vector.broadcast %cst_45 : f32 to vector<20x20xf32>
    %141 = arith.mulf %139, %140 : vector<20x20xf32>
    %142 = arith.addf %141, %17 : vector<20x20xf32>
    %cst_46 = arith.constant dense<0xFF800000> : vector<20xf32>
    %143 = vector.multi_reduction <maximumf>, %142, %cst_46 [1] : vector<20x20xf32> to vector<20xf32>
    %144 = vector.shape_cast %143 : vector<20xf32> to vector<20x1xf32>
    %145 = vector.broadcast %144 : vector<20x1xf32> to vector<20x20xf32>
    %146 = arith.subf %142, %145 : vector<20x20xf32>
    %147 = math.exp %146 : vector<20x20xf32>
    %cst_47 = arith.constant dense<0.000000e+00> : vector<20xf32>
    %148 = vector.multi_reduction <add>, %147, %cst_47 [1] : vector<20x20xf32> to vector<20xf32>
    %149 = vector.shape_cast %148 : vector<20xf32> to vector<20x1xf32>
    %150 = tpu.reciprocal %149 {approx = true} : vector<20x1xf32> -> vector<20x1xf32>
    %151 = vector.broadcast %150 : vector<20x1xf32> to vector<20x20xf32>
    %152 = arith.mulf %147, %151 : vector<20x20xf32>
    %153 = arith.truncf %152 : vector<20x20xf32> to vector<20x20xbf16>
    %154 = vector.extract_strided_slice %20 {offsets = [0, 20], sizes = [20, 4], strides = [1, 1]} : vector<20x32xbf16> to vector<20x4xbf16>
    %cst_48 = arith.constant dense<0.000000e+00> : vector<20x4xf32>
    %155 = tpu.matmul %153, %154, %cst_48 {dimension_numbers = #tpu.dot_dimension_numbers<[1], [0], [0], [1], [0, 0, 1, 1], [], []>} : vector<20x20xbf16>, vector<20x4xbf16>, vector<20x4xf32> -> vector<20x4xf32>
    %156 = arith.truncf %155 : vector<20x4xf32> to vector<20x4xbf16>
    %157 = vector.extract_strided_slice %16 {offsets = [20, 0], sizes = [4, 32], strides = [1, 1]} : vector<32x32xbf16> to vector<4x32xbf16>
    %cst_49 = arith.constant dense<0.000000e+00> : vector<20x32xf32>
    %158 = tpu.matmul %156, %157, %cst_49 {dimension_numbers = #tpu.dot_dimension_numbers<[1], [0], [0], [1], [0, 0, 1, 1], [], []>} : vector<20x4xbf16>, vector<4x32xbf16>, vector<20x32xf32> -> vector<20x32xf32>
    %159 = arith.addf %136, %158 : vector<20x32xf32>
    %160 = vector.extract_strided_slice %18 {offsets = [0, 24], sizes = [20, 4], strides = [1, 1]} : vector<20x32xbf16> to vector<20x4xbf16>
    %161 = vector.extract_strided_slice %19 {offsets = [0, 24], sizes = [20, 4], strides = [1, 1]} : vector<20x32xbf16> to vector<20x4xbf16>
    %cst_50 = arith.constant dense<0.000000e+00> : vector<20x20xf32>
    %162 = tpu.matmul %160, %161, %cst_50 {dimension_numbers = #tpu.dot_dimension_numbers<[1], [1], [0], [0], [0, 0, 1, 0], [], []>} : vector<20x4xbf16>, vector<20x4xbf16>, vector<20x20xf32> -> vector<20x20xf32>
    %cst_51 = arith.constant 5.000000e-01 : f32
    %163 = vector.broadcast %cst_51 : f32 to vector<20x20xf32>
    %164 = arith.mulf %162, %163 : vector<20x20xf32>
    %165 = arith.addf %164, %17 : vector<20x20xf32>
    %cst_52 = arith.constant dense<0xFF800000> : vector<20xf32>
    %166 = vector.multi_reduction <maximumf>, %165, %cst_52 [1] : vector<20x20xf32> to vector<20xf32>
    %167 = vector.shape_cast %166 : vector<20xf32> to vector<20x1xf32>
    %168 = vector.broadcast %167 : vector<20x1xf32> to vector<20x20xf32>
    %169 = arith.subf %165, %168 : vector<20x20xf32>
    %170 = math.exp %169 : vector<20x20xf32>
    %cst_53 = arith.constant dense<0.000000e+00> : vector<20xf32>
    %171 = vector.multi_reduction <add>, %170, %cst_53 [1] : vector<20x20xf32> to vector<20xf32>
    %172 = vector.shape_cast %171 : vector<20xf32> to vector<20x1xf32>
    %173 = tpu.reciprocal %172 {approx = true} : vector<20x1xf32> -> vector<20x1xf32>
    %174 = vector.broadcast %173 : vector<20x1xf32> to vector<20x20xf32>
    %175 = arith.mulf %170, %174 : vector<20x20xf32>
    %176 = arith.truncf %175 : vector<20x20xf32> to vector<20x20xbf16>
    %177 = vector.extract_strided_slice %20 {offsets = [0, 24], sizes = [20, 4], strides = [1, 1]} : vector<20x32xbf16> to vector<20x4xbf16>
    %cst_54 = arith.constant dense<0.000000e+00> : vector<20x4xf32>
    %178 = tpu.matmul %176, %177, %cst_54 {dimension_numbers = #tpu.dot_dimension_numbers<[1], [0], [0], [1], [0, 0, 1, 1], [], []>} : vector<20x20xbf16>, vector<20x4xbf16>, vector<20x4xf32> -> vector<20x4xf32>
    %179 = arith.truncf %178 : vector<20x4xf32> to vector<20x4xbf16>
    %180 = vector.extract_strided_slice %16 {offsets = [24, 0], sizes = [4, 32], strides = [1, 1]} : vector<32x32xbf16> to vector<4x32xbf16>
    %cst_55 = arith.constant dense<0.000000e+00> : vector<20x32xf32>
    %181 = tpu.matmul %179, %180, %cst_55 {dimension_numbers = #tpu.dot_dimension_numbers<[1], [0], [0], [1], [0, 0, 1, 1], [], []>} : vector<20x4xbf16>, vector<4x32xbf16>, vector<20x32xf32> -> vector<20x32xf32>
    %182 = arith.addf %159, %181 : vector<20x32xf32>
    %183 = vector.extract_strided_slice %18 {offsets = [0, 28], sizes = [20, 4], strides = [1, 1]} : vector<20x32xbf16> to vector<20x4xbf16>
    %184 = vector.extract_strided_slice %19 {offsets = [0, 28], sizes = [20, 4], strides = [1, 1]} : vector<20x32xbf16> to vector<20x4xbf16>
    %cst_56 = arith.constant dense<0.000000e+00> : vector<20x20xf32>
    %185 = tpu.matmul %183, %184, %cst_56 {dimension_numbers = #tpu.dot_dimension_numbers<[1], [1], [0], [0], [0, 0, 1, 0], [], []>} : vector<20x4xbf16>, vector<20x4xbf16>, vector<20x20xf32> -> vector<20x20xf32>
    %cst_57 = arith.constant 5.000000e-01 : f32
    %186 = vector.broadcast %cst_57 : f32 to vector<20x20xf32>
    %187 = arith.mulf %185, %186 : vector<20x20xf32>
    %188 = arith.addf %187, %17 : vector<20x20xf32>
    %cst_58 = arith.constant dense<0xFF800000> : vector<20xf32>
    %189 = vector.multi_reduction <maximumf>, %188, %cst_58 [1] : vector<20x20xf32> to vector<20xf32>
    %190 = vector.shape_cast %189 : vector<20xf32> to vector<20x1xf32>
    %191 = vector.broadcast %190 : vector<20x1xf32> to vector<20x20xf32>
    %192 = arith.subf %188, %191 : vector<20x20xf32>
    %193 = math.exp %192 : vector<20x20xf32>
    %cst_59 = arith.constant dense<0.000000e+00> : vector<20xf32>
    %194 = vector.multi_reduction <add>, %193, %cst_59 [1] : vector<20x20xf32> to vector<20xf32>
    %195 = vector.shape_cast %194 : vector<20xf32> to vector<20x1xf32>
    %196 = tpu.reciprocal %195 {approx = true} : vector<20x1xf32> -> vector<20x1xf32>
    %197 = vector.broadcast %196 : vector<20x1xf32> to vector<20x20xf32>
    %198 = arith.mulf %193, %197 : vector<20x20xf32>
    %199 = arith.truncf %198 : vector<20x20xf32> to vector<20x20xbf16>
    %200 = vector.extract_strided_slice %20 {offsets = [0, 28], sizes = [20, 4], strides = [1, 1]} : vector<20x32xbf16> to vector<20x4xbf16>
    %cst_60 = arith.constant dense<0.000000e+00> : vector<20x4xf32>
    %201 = tpu.matmul %199, %200, %cst_60 {dimension_numbers = #tpu.dot_dimension_numbers<[1], [0], [0], [1], [0, 0, 1, 1], [], []>} : vector<20x20xbf16>, vector<20x4xbf16>, vector<20x4xf32> -> vector<20x4xf32>
    %202 = arith.truncf %201 : vector<20x4xf32> to vector<20x4xbf16>
    %203 = vector.extract_strided_slice %16 {offsets = [28, 0], sizes = [4, 32], strides = [1, 1]} : vector<32x32xbf16> to vector<4x32xbf16>
    %cst_61 = arith.constant dense<0.000000e+00> : vector<20x32xf32>
    %204 = tpu.matmul %202, %203, %cst_61 {dimension_numbers = #tpu.dot_dimension_numbers<[1], [0], [0], [1], [0, 0, 1, 1], [], []>} : vector<20x4xbf16>, vector<4x32xbf16>, vector<20x32xf32> -> vector<20x32xf32>
    %205 = arith.addf %182, %204 : vector<20x32xf32>
    %c0_62 = arith.constant 0 : index
    %c0_63 = arith.constant 0 : index
    %c0_64 = arith.constant 0 : index
    %206 = vector.load %arg9[%c0_62, %c0_63, %c0_64] : memref<1x1x32xf32, #tpu.memory_space<vmem>>, vector<1x1x32xf32>
    %207 = vector.shape_cast %206 : vector<1x1x32xf32> to vector<1x32xf32>
    %208 = vector.broadcast %207 : vector<1x32xf32> to vector<20x32xf32>
    %209 = arith.addf %205, %208 : vector<20x32xf32>
    %210 = arith.addf %3, %209 : vector<20x32xf32>
    %c0_65 = arith.constant 0 : index
    %c0_66 = arith.constant 0 : index
    %c0_67 = arith.constant 0 : index
    %211 = vector.load %arg10[%c0_65, %c0_66, %c0_67] : memref<1x1x32xf32, #tpu.memory_space<vmem>>, vector<1x1x32xf32>
    %212 = vector.shape_cast %211 : vector<1x1x32xf32> to vector<1x32xf32>
    %c0_68 = arith.constant 0 : index
    %c0_69 = arith.constant 0 : index
    %c0_70 = arith.constant 0 : index
    %213 = vector.load %arg11[%c0_68, %c0_69, %c0_70] : memref<1x1x32xf32, #tpu.memory_space<vmem>>, vector<1x1x32xf32>
    %214 = vector.shape_cast %213 : vector<1x1x32xf32> to vector<1x32xf32>
    %cst_71 = arith.constant dense<0.000000e+00> : vector<20xf32>
    %215 = vector.multi_reduction <add>, %210, %cst_71 [1] : vector<20x32xf32> to vector<20xf32>
    %216 = vector.shape_cast %215 : vector<20xf32> to vector<20x1xf32>
    %cst_72 = arith.constant 3.200000e+01 : f32
    %217 = vector.broadcast %cst_72 : f32 to vector<20x1xf32>
    %218 = arith.divf %216, %217 : vector<20x1xf32>
    %219 = vector.broadcast %218 : vector<20x1xf32> to vector<20x32xf32>
    %220 = arith.subf %210, %219 : vector<20x32xf32>
    %221 = arith.mulf %220, %220 : vector<20x32xf32>
    %cst_73 = arith.constant dense<0.000000e+00> : vector<20xf32>
    %222 = vector.multi_reduction <add>, %221, %cst_73 [1] : vector<20x32xf32> to vector<20xf32>
    %223 = vector.shape_cast %222 : vector<20xf32> to vector<20x1xf32>
    %cst_74 = arith.constant 3.200000e+01 : f32
    %224 = vector.broadcast %cst_74 : f32 to vector<20x1xf32>
    %225 = arith.divf %223, %224 : vector<20x1xf32>
    %226 = vector.broadcast %218 : vector<20x1xf32> to vector<20x32xf32>
    %227 = arith.subf %210, %226 : vector<20x32xf32>
    %cst_75 = arith.constant 9.99999974E-6 : f32
    %228 = vector.broadcast %cst_75 : f32 to vector<20x1xf32>
    %229 = arith.addf %225, %228 : vector<20x1xf32>
    %230 = math.rsqrt %229 : vector<20x1xf32>
    %231 = vector.broadcast %230 : vector<20x1xf32> to vector<20x32xf32>
    %232 = arith.mulf %227, %231 : vector<20x32xf32>
    %233 = vector.broadcast %212 : vector<1x32xf32> to vector<20x32xf32>
    %234 = arith.mulf %232, %233 : vector<20x32xf32>
    %235 = vector.broadcast %214 : vector<1x32xf32> to vector<20x32xf32>
    %236 = arith.addf %234, %235 : vector<20x32xf32>
    %c0_76 = arith.constant 0 : index
    %c0_77 = arith.constant 0 : index
    %c0_78 = arith.constant 0 : index
    %237 = vector.load %arg12[%c0_76, %c0_77, %c0_78] : memref<1x32x2048xbf16, #tpu.memory_space<vmem>>, vector<1x32x2048xbf16>
    %238 = vector.shape_cast %237 : vector<1x32x2048xbf16> to vector<32x2048xbf16>
    %239 = arith.truncf %236 : vector<20x32xf32> to vector<20x32xbf16>
    %cst_79 = arith.constant dense<0.000000e+00> : vector<20x2048xf32>
    %240 = tpu.matmul %239, %238, %cst_79 {dimension_numbers = #tpu.dot_dimension_numbers<[1], [0], [0], [1], [0, 0, 1, 1], [], []>} : vector<20x32xbf16>, vector<32x2048xbf16>, vector<20x2048xf32> -> vector<20x2048xf32>
    %c0_80 = arith.constant 0 : index
    %c0_81 = arith.constant 0 : index
    %c0_82 = arith.constant 0 : index
    %241 = vector.load %arg13[%c0_80, %c0_81, %c0_82] : memref<1x1x2048xf32, #tpu.memory_space<vmem>>, vector<1x1x2048xf32>
    %242 = vector.shape_cast %241 : vector<1x1x2048xf32> to vector<1x2048xf32>
    %243 = vector.broadcast %242 : vector<1x2048xf32> to vector<20x2048xf32>
    %244 = arith.addf %240, %243 : vector<20x2048xf32>
    %cst_83 = arith.constant 0.000000e+00 : f32
    %245 = vector.broadcast %cst_83 : f32 to vector<20x2048xf32>
    %246 = arith.maximumf %244, %245 : vector<20x2048xf32>
    %c0_84 = arith.constant 0 : index
    %c0_85 = arith.constant 0 : index
    %c0_86 = arith.constant 0 : index
    %247 = vector.load %arg14[%c0_84, %c0_85, %c0_86] : memref<1x2048x32xbf16, #tpu.memory_space<vmem>>, vector<1x2048x32xbf16>
    %248 = vector.shape_cast %247 : vector<1x2048x32xbf16> to vector<2048x32xbf16>
    %249 = arith.truncf %246 : vector<20x2048xf32> to vector<20x2048xbf16>
    %cst_87 = arith.constant dense<0.000000e+00> : vector<20x32xf32>
    %250 = tpu.matmul %249, %248, %cst_87 {dimension_numbers = #tpu.dot_dimension_numbers<[1], [0], [0], [1], [0, 0, 1, 1], [], []>} : vector<20x2048xbf16>, vector<2048x32xbf16>, vector<20x32xf32> -> vector<20x32xf32>
    %c0_88 = arith.constant 0 : index
    %c0_89 = arith.constant 0 : index
    %c0_90 = arith.constant 0 : index
    %251 = vector.load %arg15[%c0_88, %c0_89, %c0_90] : memref<1x1x32xf32, #tpu.memory_space<vmem>>, vector<1x1x32xf32>
    %252 = vector.shape_cast %251 : vector<1x1x32xf32> to vector<1x32xf32>
    %253 = vector.broadcast %252 : vector<1x32xf32> to vector<20x32xf32>
    %254 = arith.addf %250, %253 : vector<20x32xf32>
    %255 = arith.addf %236, %254 : vector<20x32xf32>
    %c0_91 = arith.constant 0 : index
    %c0_92 = arith.constant 0 : index
    %c0_93 = arith.constant 0 : index
    %256 = vector.load %arg16[%c0_91, %c0_92, %c0_93] : memref<1x1x32xf32, #tpu.memory_space<vmem>>, vector<1x1x32xf32>
    %257 = vector.shape_cast %256 : vector<1x1x32xf32> to vector<1x32xf32>
    %c0_94 = arith.constant 0 : index
    %c0_95 = arith.constant 0 : index
    %c0_96 = arith.constant 0 : index
    %258 = vector.load %arg17[%c0_94, %c0_95, %c0_96] : memref<1x1x32xf32, #tpu.memory_space<vmem>>, vector<1x1x32xf32>
    %259 = vector.shape_cast %258 : vector<1x1x32xf32> to vector<1x32xf32>
    %cst_97 = arith.constant dense<0.000000e+00> : vector<20xf32>
    %260 = vector.multi_reduction <add>, %255, %cst_97 [1] : vector<20x32xf32> to vector<20xf32>
    %261 = vector.shape_cast %260 : vector<20xf32> to vector<20x1xf32>
    %cst_98 = arith.constant 3.200000e+01 : f32
    %262 = vector.broadcast %cst_98 : f32 to vector<20x1xf32>
    %263 = arith.divf %261, %262 : vector<20x1xf32>
    %264 = vector.broadcast %263 : vector<20x1xf32> to vector<20x32xf32>
    %265 = arith.subf %255, %264 : vector<20x32xf32>
    %266 = arith.mulf %265, %265 : vector<20x32xf32>
    %cst_99 = arith.constant dense<0.000000e+00> : vector<20xf32>
    %267 = vector.multi_reduction <add>, %266, %cst_99 [1] : vector<20x32xf32> to vector<20xf32>
    %268 = vector.shape_cast %267 : vector<20xf32> to vector<20x1xf32>
    %cst_100 = arith.constant 3.200000e+01 : f32
    %269 = vector.broadcast %cst_100 : f32 to vector<20x1xf32>
    %270 = arith.divf %268, %269 : vector<20x1xf32>
    %271 = vector.broadcast %263 : vector<20x1xf32> to vector<20x32xf32>
    %272 = arith.subf %255, %271 : vector<20x32xf32>
    %cst_101 = arith.constant 9.99999974E-6 : f32
    %273 = vector.broadcast %cst_101 : f32 to vector<20x1xf32>
    %274 = arith.addf %270, %273 : vector<20x1xf32>
    %275 = math.rsqrt %274 : vector<20x1xf32>
    %276 = vector.broadcast %275 : vector<20x1xf32> to vector<20x32xf32>
    %277 = arith.mulf %272, %276 : vector<20x32xf32>
    %278 = vector.broadcast %257 : vector<1x32xf32> to vector<20x32xf32>
    %279 = arith.mulf %277, %278 : vector<20x32xf32>
    %280 = vector.broadcast %259 : vector<1x32xf32> to vector<20x32xf32>
    %281 = arith.addf %279, %280 : vector<20x32xf32>
    %c0_102 = arith.constant 0 : index
    %c0_103 = arith.constant 0 : index
    %282 = vector.load %arg18[%c0_102, %c0_103] : memref<20x32xf32, #tpu.memory_space<vmem>>, vector<20x32xf32>
    tpu.vector_store %arg18[%c0_102, %c0_103], %281 {strides = array<i32>} : memref<20x32xf32, #tpu.memory_space<vmem>>, vector<20x32xf32>,
    return
  }
  func.func @transform_0(%arg0: i32) -> (i32, i32) {
    %c0_i32 = arith.constant 0 : i32
    %c0_i32_0 = arith.constant 0 : i32
    %c0_i32_1 = arith.constant 0 : i32
    return %c0_i32, %c0_i32_0 : i32, i32
  }
  func.func @transform_1(%arg0: i32) -> (i32, i32) {
    %c0_i32 = arith.constant 0 : i32
    %c0_i32_0 = arith.constant 0 : i32
    %c0_i32_1 = arith.constant 0 : i32
    return %c0_i32, %c0_i32_0 : i32, i32
  }
  func.func @transform_2(%arg0: i32) -> (i32, i32) {
    %c0_i32 = arith.constant 0 : i32
    %c0_i32_0 = arith.constant 0 : i32
    %c0_i32_1 = arith.constant 0 : i32
    return %c0_i32, %c0_i32_0 : i32, i32
  }
  func.func @transform_3(%arg0: i32) -> (i32, i32) {
    %c0_i32 = arith.constant 0 : i32
    %c0_i32_0 = arith.constant 0 : i32
    %c0_i32_1 = arith.constant 0 : i32
    return %c0_i32, %c0_i32_0 : i32, i32
  }
  func.func @transform_4(%arg0: i32) -> (i32, i32) {
    %c0_i32 = arith.constant 0 : i32
    %c0_i32_0 = arith.constant 0 : i32
    %c0_i32_1 = arith.constant 0 : i32
    return %c0_i32, %c0_i32_0 : i32, i32
  }
  func.func @transform_5(%arg0: i32) -> (i32, i32, i32) {
    %c0_i32 = arith.constant 0 : i32
    %c0_i32_0 = arith.constant 0 : i32
    %c0_i32_1 = arith.constant 0 : i32
    return %arg0, %c0_i32, %c0_i32_0 : i32, i32, i32
  }
  func.func @transform_6(%arg0: i32) -> (i32, i32, i32) {
    %c0_i32 = arith.constant 0 : i32
    %c0_i32_0 = arith.constant 0 : i32
    %c0_i32_1 = arith.constant 0 : i32
    return %arg0, %c0_i32, %c0_i32_0 : i32, i32, i32
  }
  func.func @transform_7(%arg0: i32) -> (i32, i32, i32) {
    %c0_i32 = arith.constant 0 : i32
    %c0_i32_0 = arith.constant 0 : i32
    %c0_i32_1 = arith.constant 0 : i32
    return %arg0, %c0_i32, %c0_i32_0 : i32, i32, i32
  }
  func.func @transform_8(%arg0: i32) -> (i32, i32, i32) {
    %c0_i32 = arith.constant 0 : i32
    %c0_i32_0 = arith.constant 0 : i32
    %c0_i32_1 = arith.constant 0 : i32
    return %arg0, %c0_i32, %c0_i32_0 : i32, i32, i32
  }
  func.func @transform_9(%arg0: i32) -> (i32, i32, i32) {
    %c0_i32 = arith.constant 0 : i32
    %c0_i32_0 = arith.constant 0 : i32
    %c0_i32_1 = arith.constant 0 : i32
    return %arg0, %c0_i32, %c0_i32_0 : i32, i32, i32
  }
  func.func @transform_10(%arg0: i32) -> (i32, i32, i32) {
    %c0_i32 = arith.constant 0 : i32
    %c0_i32_0 = arith.constant 0 : i32
    %c0_i32_1 = arith.constant 0 : i32
    return %arg0, %c0_i32, %c0_i32_0 : i32, i32, i32
  }
  func.func @transform_11(%arg0: i32) -> (i32, i32, i32) {
    %c0_i32 = arith.constant 0 : i32
    %c0_i32_0 = arith.constant 0 : i32
    %c0_i32_1 = arith.constant 0 : i32
    return %arg0, %c0_i32, %c0_i32_0 : i32, i32, i32
  }
  func.func @transform_12(%arg0: i32) -> (i32, i32, i32) {
    %c0_i32 = arith.constant 0 : i32
    %c0_i32_0 = arith.constant 0 : i32
    %c0_i32_1 = arith.constant 0 : i32
    return %arg0, %c0_i32, %c0_i32_0 : i32, i32, i32
  }
  func.func @transform_13(%arg0: i32) -> (i32, i32, i32) {
    %c0_i32 = arith.constant 0 : i32
    %c0_i32_0 = arith.constant 0 : i32
    %c0_i32_1 = arith.constant 0 : i32
    return %arg0, %c0_i32, %c0_i32_0 : i32, i32, i32
  }
  func.func @transform_14(%arg0: i32) -> (i32, i32, i32) {
    %c0_i32 = arith.constant 0 : i32
    %c0_i32_0 = arith.constant 0 : i32
    %c0_i32_1 = arith.constant 0 : i32
    return %arg0, %c0_i32, %c0_i32_0 : i32, i32, i32
  }
  func.func @transform_15(%arg0: i32) -> (i32, i32, i32) {
    %c0_i32 = arith.constant 0 : i32
    %c0_i32_0 = arith.constant 0 : i32
    %c0_i32_1 = arith.constant 0 : i32
    return %arg0, %c0_i32, %c0_i32_0 : i32, i32, i32
  }
  func.func @transform_16(%arg0: i32) -> (i32, i32, i32) {
    %c0_i32 = arith.constant 0 : i32
    %c0_i32_0 = arith.constant 0 : i32
    %c0_i32_1 = arith.constant 0 : i32
    return %arg0, %c0_i32, %c0_i32_0 : i32, i32, i32
  }
  func.func @transform_17(%arg0: i32) -> (i32, i32) {
    %c0_i32 = arith.constant 0 : i32
    %c0_i32_0 = arith.constant 0 : i32
    %c0_i32_1 = arith.constant 0 : i32
    return %c0_i32, %c0_i32_0 : i32, i32
  }
}

module attributes {stable_mosaic.version = 11 : i64} {
  func.func @_decoder_kernel(%arg0: i32, %arg1: memref<16x16xf32, #tpu.memory_space<vmem>>, %arg2: memref<16x32xf32, #tpu.memory_space<vmem>>, %arg3: memref<20x32xf32, #tpu.memory_space<vmem>>, %arg4: memref<16x16xf32, #tpu.memory_space<vmem>>, %arg5: memref<16x20xf32, #tpu.memory_space<vmem>>, %arg6: memref<16x32xbf16, #tpu.memory_space<vmem>>, %arg7: memref<1x32xf32, #tpu.memory_space<vmem>>, %arg8: memref<1x32x96xbf16, #tpu.memory_space<vmem>>, %arg9: memref<1x1x96xf32, #tpu.memory_space<vmem>>, %arg10: memref<1x32x32xbf16, #tpu.memory_space<vmem>>, %arg11: memref<1x1x32xf32, #tpu.memory_space<vmem>>, %arg12: memref<1x1x32xf32, #tpu.memory_space<vmem>>, %arg13: memref<1x1x32xf32, #tpu.memory_space<vmem>>, %arg14: memref<1x32x32xbf16, #tpu.memory_space<vmem>>, %arg15: memref<1x1x32xf32, #tpu.memory_space<vmem>>, %arg16: memref<1x32x64xbf16, #tpu.memory_space<vmem>>, %arg17: memref<1x1x64xf32, #tpu.memory_space<vmem>>, %arg18: memref<1x32x32xbf16, #tpu.memory_space<vmem>>, %arg19: memref<1x1x32xf32, #tpu.memory_space<vmem>>, %arg20: memref<1x1x32xf32, #tpu.memory_space<vmem>>, %arg21: memref<1x1x32xf32, #tpu.memory_space<vmem>>, %arg22: memref<1x32x2048xbf16, #tpu.memory_space<vmem>>, %arg23: memref<1x1x2048xf32, #tpu.memory_space<vmem>>, %arg24: memref<1x2048x32xbf16, #tpu.memory_space<vmem>>, %arg25: memref<1x1x32xf32, #tpu.memory_space<vmem>>, %arg26: memref<1x1x32xf32, #tpu.memory_space<vmem>>, %arg27: memref<1x1x32xf32, #tpu.memory_space<vmem>>, %arg28: memref<32x128xbf16, #tpu.memory_space<vmem>>, %arg29: memref<1x128xf32, #tpu.memory_space<vmem>>, %arg30: memref<16x128xf32, #tpu.memory_space<vmem>>, %arg31: memref<16x32xf32, #tpu.memory_space<vmem>>) attributes {dimension_semantics = [#tpu.dimension_semantics<arbitrary>], iteration_bounds = array<i64: 2>, scalar_prefetch = 0 : i64, scratch_operands = 1 : i64, tpu.core_type = #tpu.core_type<tc>, window_params = [{pipeline_mode = #tpu.pipeline_mode<synchronous>, transform_indices = @transform_0, window_bounds = array<i64: 16, 16>}, {pipeline_mode = #tpu.pipeline_mode<synchronous>, transform_indices = @transform_1, window_bounds = array<i64: 16, 32>}, {pipeline_mode = #tpu.pipeline_mode<synchronous>, transform_indices = @transform_2, window_bounds = array<i64: 20, 32>}, {pipeline_mode = #tpu.pipeline_mode<synchronous>, transform_indices = @transform_3, window_bounds = array<i64: 16, 16>}, {pipeline_mode = #tpu.pipeline_mode<synchronous>, transform_indices = @transform_4, window_bounds = array<i64: 16, 20>}, {pipeline_mode = #tpu.pipeline_mode<synchronous>, transform_indices = @transform_5, window_bounds = array<i64: 16, 32>}, {pipeline_mode = #tpu.pipeline_mode<synchronous>, transform_indices = @transform_6, window_bounds = array<i64: 1, 32>}, {transform_indices = @transform_7, window_bounds = array<i64: 1, 32, 96>}, {transform_indices = @transform_8, window_bounds = array<i64: 1, 1, 96>}, {transform_indices = @transform_9, window_bounds = array<i64: 1, 32, 32>}, {transform_indices = @transform_10, window_bounds = array<i64: 1, 1, 32>}, {transform_indices = @transform_11, window_bounds = array<i64: 1, 1, 32>}, {transform_indices = @transform_12, window_bounds = array<i64: 1, 1, 32>}, {transform_indices = @transform_13, window_bounds = array<i64: 1, 32, 32>}, {transform_indices = @transform_14, window_bounds = array<i64: 1, 1, 32>}, {transform_indices = @transform_15, window_bounds = array<i64: 1, 32, 64>}, {transform_indices = @transform_16, window_bounds = array<i64: 1, 1, 64>}, {transform_indices = @transform_17, window_bounds = array<i64: 1, 32, 32>}, {transform_indices = @transform_18, window_bounds = array<i64: 1, 1, 32>}, {transform_indices = @transform_19, window_bounds = array<i64: 1, 1, 32>}, {transform_indices = @transform_20, window_bounds = array<i64: 1, 1, 32>}, {transform_indices = @transform_21, window_bounds = array<i64: 1, 32, 2048>}, {transform_indices = @transform_22, window_bounds = array<i64: 1, 1, 2048>}, {transform_indices = @transform_23, window_bounds = array<i64: 1, 2048, 32>}, {transform_indices = @transform_24, window_bounds = array<i64: 1, 1, 32>}, {transform_indices = @transform_25, window_bounds = array<i64: 1, 1, 32>}, {transform_indices = @transform_26, window_bounds = array<i64: 1, 1, 32>}, {pipeline_mode = #tpu.pipeline_mode<synchronous>, transform_indices = @transform_27, window_bounds = array<i64: 32, 128>}, {pipeline_mode = #tpu.pipeline_mode<synchronous>, transform_indices = @transform_28, window_bounds = array<i64: 1, 128>}, {pipeline_mode = #tpu.pipeline_mode<synchronous>, transform_indices = @transform_29, window_bounds = array<i64: 16, 128>}]} {
    %c0_i32 = arith.constant 0 : i32
    %0 = arith.cmpi eq, %arg0, %c0_i32 : i32
    %1 = arith.extui %0 : i1 to i32
    %c0_i32_0 = arith.constant 0 : i32
    %2 = arith.cmpi ne, %1, %c0_i32_0 : i32
    scf.if %2 {
      %c0_189 = arith.constant 0 : index
      %c0_190 = arith.constant 0 : index
      %527 = vector.load %arg1[%c0_189, %c0_190] : memref<16x16xf32, #tpu.memory_space<vmem>>, vector<16x16xf32>
      %c0_191 = arith.constant 0 : index
      %c0_192 = arith.constant 0 : index
      %528 = vector.load %arg6[%c0_191, %c0_192] : memref<16x32xbf16, #tpu.memory_space<vmem>>, vector<16x32xbf16>
      %529 = arith.truncf %527 : vector<16x16xf32> to vector<16x16xbf16>
      %cst_193 = arith.constant dense<0.000000e+00> : vector<16x32xf32>
      %530 = tpu.matmul %529, %528, %cst_193 {dimension_numbers = #tpu.dot_dimension_numbers<[1], [0], [0], [1], [0, 0, 1, 1], [], []>} : vector<16x16xbf16>, vector<16x32xbf16>, vector<16x32xf32> -> vector<16x32xf32>
      %c0_194 = arith.constant 0 : index
      %c0_195 = arith.constant 0 : index
      %531 = vector.load %arg7[%c0_194, %c0_195] : memref<1x32xf32, #tpu.memory_space<vmem>>, vector<1x32xf32>
      %532 = vector.broadcast %531 : vector<1x32xf32> to vector<16x32xf32>
      %533 = arith.addf %530, %532 : vector<16x32xf32>
      %c0_196 = arith.constant 0 : index
      %c0_197 = arith.constant 0 : index
      %534 = vector.load %arg2[%c0_196, %c0_197] : memref<16x32xf32, #tpu.memory_space<vmem>>, vector<16x32xf32>
      %535 = arith.addf %533, %534 : vector<16x32xf32>
      %c0_198 = arith.constant 0 : index
      %c0_199 = arith.constant 0 : index
      %536 = vector.load %arg31[%c0_198, %c0_199] : memref<16x32xf32, #tpu.memory_space<vmem>>, vector<16x32xf32>
      tpu.vector_store %arg31[%c0_198, %c0_199], %535 {strides = array<i32>} : memref<16x32xf32, #tpu.memory_space<vmem>>, vector<16x32xf32>,
    } else {
    }
    %c0 = arith.constant 0 : index
    %c0_1 = arith.constant 0 : index
    %3 = vector.load %arg31[%c0, %c0_1] : memref<16x32xf32, #tpu.memory_space<vmem>>, vector<16x32xf32>
    %c0_2 = arith.constant 0 : index
    %c0_3 = arith.constant 0 : index
    %4 = vector.load %arg3[%c0_2, %c0_3] : memref<20x32xf32, #tpu.memory_space<vmem>>, vector<20x32xf32>
    %c0_4 = arith.constant 0 : index
    %c0_5 = arith.constant 0 : index
    %c0_6 = arith.constant 0 : index
    %5 = vector.load %arg8[%c0_4, %c0_5, %c0_6] : memref<1x32x96xbf16, #tpu.memory_space<vmem>>, vector<1x32x96xbf16>
    %6 = vector.shape_cast %5 : vector<1x32x96xbf16> to vector<32x96xbf16>
    %7 = arith.truncf %3 : vector<16x32xf32> to vector<16x32xbf16>
    %cst = arith.constant dense<0.000000e+00> : vector<16x96xf32>
    %8 = tpu.matmul %7, %6, %cst {dimension_numbers = #tpu.dot_dimension_numbers<[1], [0], [0], [1], [0, 0, 1, 1], [], []>} : vector<16x32xbf16>, vector<32x96xbf16>, vector<16x96xf32> -> vector<16x96xf32>
    %c0_7 = arith.constant 0 : index
    %c0_8 = arith.constant 0 : index
    %c0_9 = arith.constant 0 : index
    %9 = vector.load %arg9[%c0_7, %c0_8, %c0_9] : memref<1x1x96xf32, #tpu.memory_space<vmem>>, vector<1x1x96xf32>
    %10 = vector.shape_cast %9 : vector<1x1x96xf32> to vector<1x96xf32>
    %11 = vector.broadcast %10 : vector<1x96xf32> to vector<16x96xf32>
    %12 = arith.addf %8, %11 : vector<16x96xf32>
    %13 = vector.extract_strided_slice %12 {offsets = [0, 0], sizes = [16, 32], strides = [1, 1]} : vector<16x96xf32> to vector<16x32xf32>
    %14 = vector.extract_strided_slice %12 {offsets = [0, 32], sizes = [16, 32], strides = [1, 1]} : vector<16x96xf32> to vector<16x32xf32>
    %15 = vector.extract_strided_slice %12 {offsets = [0, 64], sizes = [16, 32], strides = [1, 1]} : vector<16x96xf32> to vector<16x32xf32>
    %c0_10 = arith.constant 0 : index
    %c0_11 = arith.constant 0 : index
    %c0_12 = arith.constant 0 : index
    %16 = vector.load %arg10[%c0_10, %c0_11, %c0_12] : memref<1x32x32xbf16, #tpu.memory_space<vmem>>, vector<1x32x32xbf16>
    %17 = vector.shape_cast %16 : vector<1x32x32xbf16> to vector<32x32xbf16>
    %c0_13 = arith.constant 0 : index
    %c0_14 = arith.constant 0 : index
    %18 = vector.load %arg4[%c0_13, %c0_14] : memref<16x16xf32, #tpu.memory_space<vmem>>, vector<16x16xf32>
    %19 = arith.truncf %13 : vector<16x32xf32> to vector<16x32xbf16>
    %20 = arith.truncf %14 : vector<16x32xf32> to vector<16x32xbf16>
    %21 = arith.truncf %15 : vector<16x32xf32> to vector<16x32xbf16>
    %cst_15 = arith.constant 0.000000e+00 : f32
    %22 = vector.broadcast %cst_15 : f32 to vector<16x32xf32>
    %23 = vector.extract_strided_slice %19 {offsets = [0, 0], sizes = [16, 4], strides = [1, 1]} : vector<16x32xbf16> to vector<16x4xbf16>
    %24 = vector.extract_strided_slice %20 {offsets = [0, 0], sizes = [16, 4], strides = [1, 1]} : vector<16x32xbf16> to vector<16x4xbf16>
    %cst_16 = arith.constant dense<0.000000e+00> : vector<16x16xf32>
    %25 = tpu.matmul %23, %24, %cst_16 {dimension_numbers = #tpu.dot_dimension_numbers<[1], [1], [0], [0], [0, 0, 1, 0], [], []>} : vector<16x4xbf16>, vector<16x4xbf16>, vector<16x16xf32> -> vector<16x16xf32>
    %cst_17 = arith.constant 5.000000e-01 : f32
    %26 = vector.broadcast %cst_17 : f32 to vector<16x16xf32>
    %27 = arith.mulf %25, %26 : vector<16x16xf32>
    %28 = arith.addf %27, %18 : vector<16x16xf32>
    %cst_18 = arith.constant dense<0xFF800000> : vector<16xf32>
    %29 = vector.multi_reduction <maximumf>, %28, %cst_18 [1] : vector<16x16xf32> to vector<16xf32>
    %30 = vector.shape_cast %29 : vector<16xf32> to vector<16x1xf32>
    %31 = vector.broadcast %30 : vector<16x1xf32> to vector<16x16xf32>
    %32 = arith.subf %28, %31 : vector<16x16xf32>
    %33 = math.exp %32 : vector<16x16xf32>
    %cst_19 = arith.constant dense<0.000000e+00> : vector<16xf32>
    %34 = vector.multi_reduction <add>, %33, %cst_19 [1] : vector<16x16xf32> to vector<16xf32>
    %35 = vector.shape_cast %34 : vector<16xf32> to vector<16x1xf32>
    %36 = tpu.reciprocal %35 {approx = true} : vector<16x1xf32> -> vector<16x1xf32>
    %37 = vector.broadcast %36 : vector<16x1xf32> to vector<16x16xf32>
    %38 = arith.mulf %33, %37 : vector<16x16xf32>
    %39 = arith.truncf %38 : vector<16x16xf32> to vector<16x16xbf16>
    %40 = vector.extract_strided_slice %21 {offsets = [0, 0], sizes = [16, 4], strides = [1, 1]} : vector<16x32xbf16> to vector<16x4xbf16>
    %cst_20 = arith.constant dense<0.000000e+00> : vector<16x4xf32>
    %41 = tpu.matmul %39, %40, %cst_20 {dimension_numbers = #tpu.dot_dimension_numbers<[1], [0], [0], [1], [0, 0, 1, 1], [], []>} : vector<16x16xbf16>, vector<16x4xbf16>, vector<16x4xf32> -> vector<16x4xf32>
    %42 = arith.truncf %41 : vector<16x4xf32> to vector<16x4xbf16>
    %43 = vector.extract_strided_slice %17 {offsets = [0, 0], sizes = [4, 32], strides = [1, 1]} : vector<32x32xbf16> to vector<4x32xbf16>
    %cst_21 = arith.constant dense<0.000000e+00> : vector<16x32xf32>
    %44 = tpu.matmul %42, %43, %cst_21 {dimension_numbers = #tpu.dot_dimension_numbers<[1], [0], [0], [1], [0, 0, 1, 1], [], []>} : vector<16x4xbf16>, vector<4x32xbf16>, vector<16x32xf32> -> vector<16x32xf32>
    %45 = arith.addf %22, %44 : vector<16x32xf32>
    %46 = vector.extract_strided_slice %19 {offsets = [0, 4], sizes = [16, 4], strides = [1, 1]} : vector<16x32xbf16> to vector<16x4xbf16>
    %47 = vector.extract_strided_slice %20 {offsets = [0, 4], sizes = [16, 4], strides = [1, 1]} : vector<16x32xbf16> to vector<16x4xbf16>
    %cst_22 = arith.constant dense<0.000000e+00> : vector<16x16xf32>
    %48 = tpu.matmul %46, %47, %cst_22 {dimension_numbers = #tpu.dot_dimension_numbers<[1], [1], [0], [0], [0, 0, 1, 0], [], []>} : vector<16x4xbf16>, vector<16x4xbf16>, vector<16x16xf32> -> vector<16x16xf32>
    %cst_23 = arith.constant 5.000000e-01 : f32
    %49 = vector.broadcast %cst_23 : f32 to vector<16x16xf32>
    %50 = arith.mulf %48, %49 : vector<16x16xf32>
    %51 = arith.addf %50, %18 : vector<16x16xf32>
    %cst_24 = arith.constant dense<0xFF800000> : vector<16xf32>
    %52 = vector.multi_reduction <maximumf>, %51, %cst_24 [1] : vector<16x16xf32> to vector<16xf32>
    %53 = vector.shape_cast %52 : vector<16xf32> to vector<16x1xf32>
    %54 = vector.broadcast %53 : vector<16x1xf32> to vector<16x16xf32>
    %55 = arith.subf %51, %54 : vector<16x16xf32>
    %56 = math.exp %55 : vector<16x16xf32>
    %cst_25 = arith.constant dense<0.000000e+00> : vector<16xf32>
    %57 = vector.multi_reduction <add>, %56, %cst_25 [1] : vector<16x16xf32> to vector<16xf32>
    %58 = vector.shape_cast %57 : vector<16xf32> to vector<16x1xf32>
    %59 = tpu.reciprocal %58 {approx = true} : vector<16x1xf32> -> vector<16x1xf32>
    %60 = vector.broadcast %59 : vector<16x1xf32> to vector<16x16xf32>
    %61 = arith.mulf %56, %60 : vector<16x16xf32>
    %62 = arith.truncf %61 : vector<16x16xf32> to vector<16x16xbf16>
    %63 = vector.extract_strided_slice %21 {offsets = [0, 4], sizes = [16, 4], strides = [1, 1]} : vector<16x32xbf16> to vector<16x4xbf16>
    %cst_26 = arith.constant dense<0.000000e+00> : vector<16x4xf32>
    %64 = tpu.matmul %62, %63, %cst_26 {dimension_numbers = #tpu.dot_dimension_numbers<[1], [0], [0], [1], [0, 0, 1, 1], [], []>} : vector<16x16xbf16>, vector<16x4xbf16>, vector<16x4xf32> -> vector<16x4xf32>
    %65 = arith.truncf %64 : vector<16x4xf32> to vector<16x4xbf16>
    %66 = vector.extract_strided_slice %17 {offsets = [4, 0], sizes = [4, 32], strides = [1, 1]} : vector<32x32xbf16> to vector<4x32xbf16>
    %cst_27 = arith.constant dense<0.000000e+00> : vector<16x32xf32>
    %67 = tpu.matmul %65, %66, %cst_27 {dimension_numbers = #tpu.dot_dimension_numbers<[1], [0], [0], [1], [0, 0, 1, 1], [], []>} : vector<16x4xbf16>, vector<4x32xbf16>, vector<16x32xf32> -> vector<16x32xf32>
    %68 = arith.addf %45, %67 : vector<16x32xf32>
    %69 = vector.extract_strided_slice %19 {offsets = [0, 8], sizes = [16, 4], strides = [1, 1]} : vector<16x32xbf16> to vector<16x4xbf16>
    %70 = vector.extract_strided_slice %20 {offsets = [0, 8], sizes = [16, 4], strides = [1, 1]} : vector<16x32xbf16> to vector<16x4xbf16>
    %cst_28 = arith.constant dense<0.000000e+00> : vector<16x16xf32>
    %71 = tpu.matmul %69, %70, %cst_28 {dimension_numbers = #tpu.dot_dimension_numbers<[1], [1], [0], [0], [0, 0, 1, 0], [], []>} : vector<16x4xbf16>, vector<16x4xbf16>, vector<16x16xf32> -> vector<16x16xf32>
    %cst_29 = arith.constant 5.000000e-01 : f32
    %72 = vector.broadcast %cst_29 : f32 to vector<16x16xf32>
    %73 = arith.mulf %71, %72 : vector<16x16xf32>
    %74 = arith.addf %73, %18 : vector<16x16xf32>
    %cst_30 = arith.constant dense<0xFF800000> : vector<16xf32>
    %75 = vector.multi_reduction <maximumf>, %74, %cst_30 [1] : vector<16x16xf32> to vector<16xf32>
    %76 = vector.shape_cast %75 : vector<16xf32> to vector<16x1xf32>
    %77 = vector.broadcast %76 : vector<16x1xf32> to vector<16x16xf32>
    %78 = arith.subf %74, %77 : vector<16x16xf32>
    %79 = math.exp %78 : vector<16x16xf32>
    %cst_31 = arith.constant dense<0.000000e+00> : vector<16xf32>
    %80 = vector.multi_reduction <add>, %79, %cst_31 [1] : vector<16x16xf32> to vector<16xf32>
    %81 = vector.shape_cast %80 : vector<16xf32> to vector<16x1xf32>
    %82 = tpu.reciprocal %81 {approx = true} : vector<16x1xf32> -> vector<16x1xf32>
    %83 = vector.broadcast %82 : vector<16x1xf32> to vector<16x16xf32>
    %84 = arith.mulf %79, %83 : vector<16x16xf32>
    %85 = arith.truncf %84 : vector<16x16xf32> to vector<16x16xbf16>
    %86 = vector.extract_strided_slice %21 {offsets = [0, 8], sizes = [16, 4], strides = [1, 1]} : vector<16x32xbf16> to vector<16x4xbf16>
    %cst_32 = arith.constant dense<0.000000e+00> : vector<16x4xf32>
    %87 = tpu.matmul %85, %86, %cst_32 {dimension_numbers = #tpu.dot_dimension_numbers<[1], [0], [0], [1], [0, 0, 1, 1], [], []>} : vector<16x16xbf16>, vector<16x4xbf16>, vector<16x4xf32> -> vector<16x4xf32>
    %88 = arith.truncf %87 : vector<16x4xf32> to vector<16x4xbf16>
    %89 = vector.extract_strided_slice %17 {offsets = [8, 0], sizes = [4, 32], strides = [1, 1]} : vector<32x32xbf16> to vector<4x32xbf16>
    %cst_33 = arith.constant dense<0.000000e+00> : vector<16x32xf32>
    %90 = tpu.matmul %88, %89, %cst_33 {dimension_numbers = #tpu.dot_dimension_numbers<[1], [0], [0], [1], [0, 0, 1, 1], [], []>} : vector<16x4xbf16>, vector<4x32xbf16>, vector<16x32xf32> -> vector<16x32xf32>
    %91 = arith.addf %68, %90 : vector<16x32xf32>
    %92 = vector.extract_strided_slice %19 {offsets = [0, 12], sizes = [16, 4], strides = [1, 1]} : vector<16x32xbf16> to vector<16x4xbf16>
    %93 = vector.extract_strided_slice %20 {offsets = [0, 12], sizes = [16, 4], strides = [1, 1]} : vector<16x32xbf16> to vector<16x4xbf16>
    %cst_34 = arith.constant dense<0.000000e+00> : vector<16x16xf32>
    %94 = tpu.matmul %92, %93, %cst_34 {dimension_numbers = #tpu.dot_dimension_numbers<[1], [1], [0], [0], [0, 0, 1, 0], [], []>} : vector<16x4xbf16>, vector<16x4xbf16>, vector<16x16xf32> -> vector<16x16xf32>
    %cst_35 = arith.constant 5.000000e-01 : f32
    %95 = vector.broadcast %cst_35 : f32 to vector<16x16xf32>
    %96 = arith.mulf %94, %95 : vector<16x16xf32>
    %97 = arith.addf %96, %18 : vector<16x16xf32>
    %cst_36 = arith.constant dense<0xFF800000> : vector<16xf32>
    %98 = vector.multi_reduction <maximumf>, %97, %cst_36 [1] : vector<16x16xf32> to vector<16xf32>
    %99 = vector.shape_cast %98 : vector<16xf32> to vector<16x1xf32>
    %100 = vector.broadcast %99 : vector<16x1xf32> to vector<16x16xf32>
    %101 = arith.subf %97, %100 : vector<16x16xf32>
    %102 = math.exp %101 : vector<16x16xf32>
    %cst_37 = arith.constant dense<0.000000e+00> : vector<16xf32>
    %103 = vector.multi_reduction <add>, %102, %cst_37 [1] : vector<16x16xf32> to vector<16xf32>
    %104 = vector.shape_cast %103 : vector<16xf32> to vector<16x1xf32>
    %105 = tpu.reciprocal %104 {approx = true} : vector<16x1xf32> -> vector<16x1xf32>
    %106 = vector.broadcast %105 : vector<16x1xf32> to vector<16x16xf32>
    %107 = arith.mulf %102, %106 : vector<16x16xf32>
    %108 = arith.truncf %107 : vector<16x16xf32> to vector<16x16xbf16>
    %109 = vector.extract_strided_slice %21 {offsets = [0, 12], sizes = [16, 4], strides = [1, 1]} : vector<16x32xbf16> to vector<16x4xbf16>
    %cst_38 = arith.constant dense<0.000000e+00> : vector<16x4xf32>
    %110 = tpu.matmul %108, %109, %cst_38 {dimension_numbers = #tpu.dot_dimension_numbers<[1], [0], [0], [1], [0, 0, 1, 1], [], []>} : vector<16x16xbf16>, vector<16x4xbf16>, vector<16x4xf32> -> vector<16x4xf32>
    %111 = arith.truncf %110 : vector<16x4xf32> to vector<16x4xbf16>
    %112 = vector.extract_strided_slice %17 {offsets = [12, 0], sizes = [4, 32], strides = [1, 1]} : vector<32x32xbf16> to vector<4x32xbf16>
    %cst_39 = arith.constant dense<0.000000e+00> : vector<16x32xf32>
    %113 = tpu.matmul %111, %112, %cst_39 {dimension_numbers = #tpu.dot_dimension_numbers<[1], [0], [0], [1], [0, 0, 1, 1], [], []>} : vector<16x4xbf16>, vector<4x32xbf16>, vector<16x32xf32> -> vector<16x32xf32>
    %114 = arith.addf %91, %113 : vector<16x32xf32>
    %115 = vector.extract_strided_slice %19 {offsets = [0, 16], sizes = [16, 4], strides = [1, 1]} : vector<16x32xbf16> to vector<16x4xbf16>
    %116 = vector.extract_strided_slice %20 {offsets = [0, 16], sizes = [16, 4], strides = [1, 1]} : vector<16x32xbf16> to vector<16x4xbf16>
    %cst_40 = arith.constant dense<0.000000e+00> : vector<16x16xf32>
    %117 = tpu.matmul %115, %116, %cst_40 {dimension_numbers = #tpu.dot_dimension_numbers<[1], [1], [0], [0], [0, 0, 1, 0], [], []>} : vector<16x4xbf16>, vector<16x4xbf16>, vector<16x16xf32> -> vector<16x16xf32>
    %cst_41 = arith.constant 5.000000e-01 : f32
    %118 = vector.broadcast %cst_41 : f32 to vector<16x16xf32>
    %119 = arith.mulf %117, %118 : vector<16x16xf32>
    %120 = arith.addf %119, %18 : vector<16x16xf32>
    %cst_42 = arith.constant dense<0xFF800000> : vector<16xf32>
    %121 = vector.multi_reduction <maximumf>, %120, %cst_42 [1] : vector<16x16xf32> to vector<16xf32>
    %122 = vector.shape_cast %121 : vector<16xf32> to vector<16x1xf32>
    %123 = vector.broadcast %122 : vector<16x1xf32> to vector<16x16xf32>
    %124 = arith.subf %120, %123 : vector<16x16xf32>
    %125 = math.exp %124 : vector<16x16xf32>
    %cst_43 = arith.constant dense<0.000000e+00> : vector<16xf32>
    %126 = vector.multi_reduction <add>, %125, %cst_43 [1] : vector<16x16xf32> to vector<16xf32>
    %127 = vector.shape_cast %126 : vector<16xf32> to vector<16x1xf32>
    %128 = tpu.reciprocal %127 {approx = true} : vector<16x1xf32> -> vector<16x1xf32>
    %129 = vector.broadcast %128 : vector<16x1xf32> to vector<16x16xf32>
    %130 = arith.mulf %125, %129 : vector<16x16xf32>
    %131 = arith.truncf %130 : vector<16x16xf32> to vector<16x16xbf16>
    %132 = vector.extract_strided_slice %21 {offsets = [0, 16], sizes = [16, 4], strides = [1, 1]} : vector<16x32xbf16> to vector<16x4xbf16>
    %cst_44 = arith.constant dense<0.000000e+00> : vector<16x4xf32>
    %133 = tpu.matmul %131, %132, %cst_44 {dimension_numbers = #tpu.dot_dimension_numbers<[1], [0], [0], [1], [0, 0, 1, 1], [], []>} : vector<16x16xbf16>, vector<16x4xbf16>, vector<16x4xf32> -> vector<16x4xf32>
    %134 = arith.truncf %133 : vector<16x4xf32> to vector<16x4xbf16>
    %135 = vector.extract_strided_slice %17 {offsets = [16, 0], sizes = [4, 32], strides = [1, 1]} : vector<32x32xbf16> to vector<4x32xbf16>
    %cst_45 = arith.constant dense<0.000000e+00> : vector<16x32xf32>
    %136 = tpu.matmul %134, %135, %cst_45 {dimension_numbers = #tpu.dot_dimension_numbers<[1], [0], [0], [1], [0, 0, 1, 1], [], []>} : vector<16x4xbf16>, vector<4x32xbf16>, vector<16x32xf32> -> vector<16x32xf32>
    %137 = arith.addf %114, %136 : vector<16x32xf32>
    %138 = vector.extract_strided_slice %19 {offsets = [0, 20], sizes = [16, 4], strides = [1, 1]} : vector<16x32xbf16> to vector<16x4xbf16>
    %139 = vector.extract_strided_slice %20 {offsets = [0, 20], sizes = [16, 4], strides = [1, 1]} : vector<16x32xbf16> to vector<16x4xbf16>
    %cst_46 = arith.constant dense<0.000000e+00> : vector<16x16xf32>
    %140 = tpu.matmul %138, %139, %cst_46 {dimension_numbers = #tpu.dot_dimension_numbers<[1], [1], [0], [0], [0, 0, 1, 0], [], []>} : vector<16x4xbf16>, vector<16x4xbf16>, vector<16x16xf32> -> vector<16x16xf32>
    %cst_47 = arith.constant 5.000000e-01 : f32
    %141 = vector.broadcast %cst_47 : f32 to vector<16x16xf32>
    %142 = arith.mulf %140, %141 : vector<16x16xf32>
    %143 = arith.addf %142, %18 : vector<16x16xf32>
    %cst_48 = arith.constant dense<0xFF800000> : vector<16xf32>
    %144 = vector.multi_reduction <maximumf>, %143, %cst_48 [1] : vector<16x16xf32> to vector<16xf32>
    %145 = vector.shape_cast %144 : vector<16xf32> to vector<16x1xf32>
    %146 = vector.broadcast %145 : vector<16x1xf32> to vector<16x16xf32>
    %147 = arith.subf %143, %146 : vector<16x16xf32>
    %148 = math.exp %147 : vector<16x16xf32>
    %cst_49 = arith.constant dense<0.000000e+00> : vector<16xf32>
    %149 = vector.multi_reduction <add>, %148, %cst_49 [1] : vector<16x16xf32> to vector<16xf32>
    %150 = vector.shape_cast %149 : vector<16xf32> to vector<16x1xf32>
    %151 = tpu.reciprocal %150 {approx = true} : vector<16x1xf32> -> vector<16x1xf32>
    %152 = vector.broadcast %151 : vector<16x1xf32> to vector<16x16xf32>
    %153 = arith.mulf %148, %152 : vector<16x16xf32>
    %154 = arith.truncf %153 : vector<16x16xf32> to vector<16x16xbf16>
    %155 = vector.extract_strided_slice %21 {offsets = [0, 20], sizes = [16, 4], strides = [1, 1]} : vector<16x32xbf16> to vector<16x4xbf16>
    %cst_50 = arith.constant dense<0.000000e+00> : vector<16x4xf32>
    %156 = tpu.matmul %154, %155, %cst_50 {dimension_numbers = #tpu.dot_dimension_numbers<[1], [0], [0], [1], [0, 0, 1, 1], [], []>} : vector<16x16xbf16>, vector<16x4xbf16>, vector<16x4xf32> -> vector<16x4xf32>
    %157 = arith.truncf %156 : vector<16x4xf32> to vector<16x4xbf16>
    %158 = vector.extract_strided_slice %17 {offsets = [20, 0], sizes = [4, 32], strides = [1, 1]} : vector<32x32xbf16> to vector<4x32xbf16>
    %cst_51 = arith.constant dense<0.000000e+00> : vector<16x32xf32>
    %159 = tpu.matmul %157, %158, %cst_51 {dimension_numbers = #tpu.dot_dimension_numbers<[1], [0], [0], [1], [0, 0, 1, 1], [], []>} : vector<16x4xbf16>, vector<4x32xbf16>, vector<16x32xf32> -> vector<16x32xf32>
    %160 = arith.addf %137, %159 : vector<16x32xf32>
    %161 = vector.extract_strided_slice %19 {offsets = [0, 24], sizes = [16, 4], strides = [1, 1]} : vector<16x32xbf16> to vector<16x4xbf16>
    %162 = vector.extract_strided_slice %20 {offsets = [0, 24], sizes = [16, 4], strides = [1, 1]} : vector<16x32xbf16> to vector<16x4xbf16>
    %cst_52 = arith.constant dense<0.000000e+00> : vector<16x16xf32>
    %163 = tpu.matmul %161, %162, %cst_52 {dimension_numbers = #tpu.dot_dimension_numbers<[1], [1], [0], [0], [0, 0, 1, 0], [], []>} : vector<16x4xbf16>, vector<16x4xbf16>, vector<16x16xf32> -> vector<16x16xf32>
    %cst_53 = arith.constant 5.000000e-01 : f32
    %164 = vector.broadcast %cst_53 : f32 to vector<16x16xf32>
    %165 = arith.mulf %163, %164 : vector<16x16xf32>
    %166 = arith.addf %165, %18 : vector<16x16xf32>
    %cst_54 = arith.constant dense<0xFF800000> : vector<16xf32>
    %167 = vector.multi_reduction <maximumf>, %166, %cst_54 [1] : vector<16x16xf32> to vector<16xf32>
    %168 = vector.shape_cast %167 : vector<16xf32> to vector<16x1xf32>
    %169 = vector.broadcast %168 : vector<16x1xf32> to vector<16x16xf32>
    %170 = arith.subf %166, %169 : vector<16x16xf32>
    %171 = math.exp %170 : vector<16x16xf32>
    %cst_55 = arith.constant dense<0.000000e+00> : vector<16xf32>
    %172 = vector.multi_reduction <add>, %171, %cst_55 [1] : vector<16x16xf32> to vector<16xf32>
    %173 = vector.shape_cast %172 : vector<16xf32> to vector<16x1xf32>
    %174 = tpu.reciprocal %173 {approx = true} : vector<16x1xf32> -> vector<16x1xf32>
    %175 = vector.broadcast %174 : vector<16x1xf32> to vector<16x16xf32>
    %176 = arith.mulf %171, %175 : vector<16x16xf32>
    %177 = arith.truncf %176 : vector<16x16xf32> to vector<16x16xbf16>
    %178 = vector.extract_strided_slice %21 {offsets = [0, 24], sizes = [16, 4], strides = [1, 1]} : vector<16x32xbf16> to vector<16x4xbf16>
    %cst_56 = arith.constant dense<0.000000e+00> : vector<16x4xf32>
    %179 = tpu.matmul %177, %178, %cst_56 {dimension_numbers = #tpu.dot_dimension_numbers<[1], [0], [0], [1], [0, 0, 1, 1], [], []>} : vector<16x16xbf16>, vector<16x4xbf16>, vector<16x4xf32> -> vector<16x4xf32>
    %180 = arith.truncf %179 : vector<16x4xf32> to vector<16x4xbf16>
    %181 = vector.extract_strided_slice %17 {offsets = [24, 0], sizes = [4, 32], strides = [1, 1]} : vector<32x32xbf16> to vector<4x32xbf16>
    %cst_57 = arith.constant dense<0.000000e+00> : vector<16x32xf32>
    %182 = tpu.matmul %180, %181, %cst_57 {dimension_numbers = #tpu.dot_dimension_numbers<[1], [0], [0], [1], [0, 0, 1, 1], [], []>} : vector<16x4xbf16>, vector<4x32xbf16>, vector<16x32xf32> -> vector<16x32xf32>
    %183 = arith.addf %160, %182 : vector<16x32xf32>
    %184 = vector.extract_strided_slice %19 {offsets = [0, 28], sizes = [16, 4], strides = [1, 1]} : vector<16x32xbf16> to vector<16x4xbf16>
    %185 = vector.extract_strided_slice %20 {offsets = [0, 28], sizes = [16, 4], strides = [1, 1]} : vector<16x32xbf16> to vector<16x4xbf16>
    %cst_58 = arith.constant dense<0.000000e+00> : vector<16x16xf32>
    %186 = tpu.matmul %184, %185, %cst_58 {dimension_numbers = #tpu.dot_dimension_numbers<[1], [1], [0], [0], [0, 0, 1, 0], [], []>} : vector<16x4xbf16>, vector<16x4xbf16>, vector<16x16xf32> -> vector<16x16xf32>
    %cst_59 = arith.constant 5.000000e-01 : f32
    %187 = vector.broadcast %cst_59 : f32 to vector<16x16xf32>
    %188 = arith.mulf %186, %187 : vector<16x16xf32>
    %189 = arith.addf %188, %18 : vector<16x16xf32>
    %cst_60 = arith.constant dense<0xFF800000> : vector<16xf32>
    %190 = vector.multi_reduction <maximumf>, %189, %cst_60 [1] : vector<16x16xf32> to vector<16xf32>
    %191 = vector.shape_cast %190 : vector<16xf32> to vector<16x1xf32>
    %192 = vector.broadcast %191 : vector<16x1xf32> to vector<16x16xf32>
    %193 = arith.subf %189, %192 : vector<16x16xf32>
    %194 = math.exp %193 : vector<16x16xf32>
    %cst_61 = arith.constant dense<0.000000e+00> : vector<16xf32>
    %195 = vector.multi_reduction <add>, %194, %cst_61 [1] : vector<16x16xf32> to vector<16xf32>
    %196 = vector.shape_cast %195 : vector<16xf32> to vector<16x1xf32>
    %197 = tpu.reciprocal %196 {approx = true} : vector<16x1xf32> -> vector<16x1xf32>
    %198 = vector.broadcast %197 : vector<16x1xf32> to vector<16x16xf32>
    %199 = arith.mulf %194, %198 : vector<16x16xf32>
    %200 = arith.truncf %199 : vector<16x16xf32> to vector<16x16xbf16>
    %201 = vector.extract_strided_slice %21 {offsets = [0, 28], sizes = [16, 4], strides = [1, 1]} : vector<16x32xbf16> to vector<16x4xbf16>
    %cst_62 = arith.constant dense<0.000000e+00> : vector<16x4xf32>
    %202 = tpu.matmul %200, %201, %cst_62 {dimension_numbers = #tpu.dot_dimension_numbers<[1], [0], [0], [1], [0, 0, 1, 1], [], []>} : vector<16x16xbf16>, vector<16x4xbf16>, vector<16x4xf32> -> vector<16x4xf32>
    %203 = arith.truncf %202 : vector<16x4xf32> to vector<16x4xbf16>
    %204 = vector.extract_strided_slice %17 {offsets = [28, 0], sizes = [4, 32], strides = [1, 1]} : vector<32x32xbf16> to vector<4x32xbf16>
    %cst_63 = arith.constant dense<0.000000e+00> : vector<16x32xf32>
    %205 = tpu.matmul %203, %204, %cst_63 {dimension_numbers = #tpu.dot_dimension_numbers<[1], [0], [0], [1], [0, 0, 1, 1], [], []>} : vector<16x4xbf16>, vector<4x32xbf16>, vector<16x32xf32> -> vector<16x32xf32>
    %206 = arith.addf %183, %205 : vector<16x32xf32>
    %c0_64 = arith.constant 0 : index
    %c0_65 = arith.constant 0 : index
    %c0_66 = arith.constant 0 : index
    %207 = vector.load %arg11[%c0_64, %c0_65, %c0_66] : memref<1x1x32xf32, #tpu.memory_space<vmem>>, vector<1x1x32xf32>
    %208 = vector.shape_cast %207 : vector<1x1x32xf32> to vector<1x32xf32>
    %209 = vector.broadcast %208 : vector<1x32xf32> to vector<16x32xf32>
    %210 = arith.addf %206, %209 : vector<16x32xf32>
    %211 = arith.addf %3, %210 : vector<16x32xf32>
    %c0_67 = arith.constant 0 : index
    %c0_68 = arith.constant 0 : index
    %c0_69 = arith.constant 0 : index
    %212 = vector.load %arg12[%c0_67, %c0_68, %c0_69] : memref<1x1x32xf32, #tpu.memory_space<vmem>>, vector<1x1x32xf32>
    %213 = vector.shape_cast %212 : vector<1x1x32xf32> to vector<1x32xf32>
    %c0_70 = arith.constant 0 : index
    %c0_71 = arith.constant 0 : index
    %c0_72 = arith.constant 0 : index
    %214 = vector.load %arg13[%c0_70, %c0_71, %c0_72] : memref<1x1x32xf32, #tpu.memory_space<vmem>>, vector<1x1x32xf32>
    %215 = vector.shape_cast %214 : vector<1x1x32xf32> to vector<1x32xf32>
    %cst_73 = arith.constant dense<0.000000e+00> : vector<16xf32>
    %216 = vector.multi_reduction <add>, %211, %cst_73 [1] : vector<16x32xf32> to vector<16xf32>
    %217 = vector.shape_cast %216 : vector<16xf32> to vector<16x1xf32>
    %cst_74 = arith.constant 3.200000e+01 : f32
    %218 = vector.broadcast %cst_74 : f32 to vector<16x1xf32>
    %219 = arith.divf %217, %218 : vector<16x1xf32>
    %220 = vector.broadcast %219 : vector<16x1xf32> to vector<16x32xf32>
    %221 = arith.subf %211, %220 : vector<16x32xf32>
    %222 = arith.mulf %221, %221 : vector<16x32xf32>
    %cst_75 = arith.constant dense<0.000000e+00> : vector<16xf32>
    %223 = vector.multi_reduction <add>, %222, %cst_75 [1] : vector<16x32xf32> to vector<16xf32>
    %224 = vector.shape_cast %223 : vector<16xf32> to vector<16x1xf32>
    %cst_76 = arith.constant 3.200000e+01 : f32
    %225 = vector.broadcast %cst_76 : f32 to vector<16x1xf32>
    %226 = arith.divf %224, %225 : vector<16x1xf32>
    %227 = vector.broadcast %219 : vector<16x1xf32> to vector<16x32xf32>
    %228 = arith.subf %211, %227 : vector<16x32xf32>
    %cst_77 = arith.constant 9.99999974E-6 : f32
    %229 = vector.broadcast %cst_77 : f32 to vector<16x1xf32>
    %230 = arith.addf %226, %229 : vector<16x1xf32>
    %231 = math.rsqrt %230 : vector<16x1xf32>
    %232 = vector.broadcast %231 : vector<16x1xf32> to vector<16x32xf32>
    %233 = arith.mulf %228, %232 : vector<16x32xf32>
    %234 = vector.broadcast %213 : vector<1x32xf32> to vector<16x32xf32>
    %235 = arith.mulf %233, %234 : vector<16x32xf32>
    %236 = vector.broadcast %215 : vector<1x32xf32> to vector<16x32xf32>
    %237 = arith.addf %235, %236 : vector<16x32xf32>
    %c0_78 = arith.constant 0 : index
    %c0_79 = arith.constant 0 : index
    %c0_80 = arith.constant 0 : index
    %238 = vector.load %arg14[%c0_78, %c0_79, %c0_80] : memref<1x32x32xbf16, #tpu.memory_space<vmem>>, vector<1x32x32xbf16>
    %239 = vector.shape_cast %238 : vector<1x32x32xbf16> to vector<32x32xbf16>
    %240 = arith.truncf %237 : vector<16x32xf32> to vector<16x32xbf16>
    %cst_81 = arith.constant dense<0.000000e+00> : vector<16x32xf32>
    %241 = tpu.matmul %240, %239, %cst_81 {dimension_numbers = #tpu.dot_dimension_numbers<[1], [0], [0], [1], [0, 0, 1, 1], [], []>} : vector<16x32xbf16>, vector<32x32xbf16>, vector<16x32xf32> -> vector<16x32xf32>
    %c0_82 = arith.constant 0 : index
    %c0_83 = arith.constant 0 : index
    %c0_84 = arith.constant 0 : index
    %242 = vector.load %arg15[%c0_82, %c0_83, %c0_84] : memref<1x1x32xf32, #tpu.memory_space<vmem>>, vector<1x1x32xf32>
    %243 = vector.shape_cast %242 : vector<1x1x32xf32> to vector<1x32xf32>
    %244 = vector.broadcast %243 : vector<1x32xf32> to vector<16x32xf32>
    %245 = arith.addf %241, %244 : vector<16x32xf32>
    %c0_85 = arith.constant 0 : index
    %c0_86 = arith.constant 0 : index
    %c0_87 = arith.constant 0 : index
    %246 = vector.load %arg16[%c0_85, %c0_86, %c0_87] : memref<1x32x64xbf16, #tpu.memory_space<vmem>>, vector<1x32x64xbf16>
    %247 = vector.shape_cast %246 : vector<1x32x64xbf16> to vector<32x64xbf16>
    %248 = arith.truncf %4 : vector<20x32xf32> to vector<20x32xbf16>
    %cst_88 = arith.constant dense<0.000000e+00> : vector<20x64xf32>
    %249 = tpu.matmul %248, %247, %cst_88 {dimension_numbers = #tpu.dot_dimension_numbers<[1], [0], [0], [1], [0, 0, 1, 1], [], []>} : vector<20x32xbf16>, vector<32x64xbf16>, vector<20x64xf32> -> vector<20x64xf32>
    %c0_89 = arith.constant 0 : index
    %c0_90 = arith.constant 0 : index
    %c0_91 = arith.constant 0 : index
    %250 = vector.load %arg17[%c0_89, %c0_90, %c0_91] : memref<1x1x64xf32, #tpu.memory_space<vmem>>, vector<1x1x64xf32>
    %251 = vector.shape_cast %250 : vector<1x1x64xf32> to vector<1x64xf32>
    %252 = vector.broadcast %251 : vector<1x64xf32> to vector<20x64xf32>
    %253 = arith.addf %249, %252 : vector<20x64xf32>
    %254 = vector.extract_strided_slice %253 {offsets = [0, 0], sizes = [20, 32], strides = [1, 1]} : vector<20x64xf32> to vector<20x32xf32>
    %255 = vector.extract_strided_slice %253 {offsets = [0, 32], sizes = [20, 32], strides = [1, 1]} : vector<20x64xf32> to vector<20x32xf32>
    %c0_92 = arith.constant 0 : index
    %c0_93 = arith.constant 0 : index
    %c0_94 = arith.constant 0 : index
    %256 = vector.load %arg18[%c0_92, %c0_93, %c0_94] : memref<1x32x32xbf16, #tpu.memory_space<vmem>>, vector<1x32x32xbf16>
    %257 = vector.shape_cast %256 : vector<1x32x32xbf16> to vector<32x32xbf16>
    %c0_95 = arith.constant 0 : index
    %c0_96 = arith.constant 0 : index
    %258 = vector.load %arg5[%c0_95, %c0_96] : memref<16x20xf32, #tpu.memory_space<vmem>>, vector<16x20xf32>
    %259 = arith.truncf %245 : vector<16x32xf32> to vector<16x32xbf16>
    %260 = arith.truncf %254 : vector<20x32xf32> to vector<20x32xbf16>
    %261 = arith.truncf %255 : vector<20x32xf32> to vector<20x32xbf16>
    %cst_97 = arith.constant 0.000000e+00 : f32
    %262 = vector.broadcast %cst_97 : f32 to vector<16x32xf32>
    %263 = vector.extract_strided_slice %259 {offsets = [0, 0], sizes = [16, 4], strides = [1, 1]} : vector<16x32xbf16> to vector<16x4xbf16>
    %264 = vector.extract_strided_slice %260 {offsets = [0, 0], sizes = [20, 4], strides = [1, 1]} : vector<20x32xbf16> to vector<20x4xbf16>
    %cst_98 = arith.constant dense<0.000000e+00> : vector<16x20xf32>
    %265 = tpu.matmul %263, %264, %cst_98 {dimension_numbers = #tpu.dot_dimension_numbers<[1], [1], [0], [0], [0, 0, 1, 0], [], []>} : vector<16x4xbf16>, vector<20x4xbf16>, vector<16x20xf32> -> vector<16x20xf32>
    %cst_99 = arith.constant 5.000000e-01 : f32
    %266 = vector.broadcast %cst_99 : f32 to vector<16x20xf32>
    %267 = arith.mulf %265, %266 : vector<16x20xf32>
    %268 = arith.addf %267, %258 : vector<16x20xf32>
    %cst_100 = arith.constant dense<0xFF800000> : vector<16xf32>
    %269 = vector.multi_reduction <maximumf>, %268, %cst_100 [1] : vector<16x20xf32> to vector<16xf32>
    %270 = vector.shape_cast %269 : vector<16xf32> to vector<16x1xf32>
    %271 = vector.broadcast %270 : vector<16x1xf32> to vector<16x20xf32>
    %272 = arith.subf %268, %271 : vector<16x20xf32>
    %273 = math.exp %272 : vector<16x20xf32>
    %cst_101 = arith.constant dense<0.000000e+00> : vector<16xf32>
    %274 = vector.multi_reduction <add>, %273, %cst_101 [1] : vector<16x20xf32> to vector<16xf32>
    %275 = vector.shape_cast %274 : vector<16xf32> to vector<16x1xf32>
    %276 = tpu.reciprocal %275 {approx = true} : vector<16x1xf32> -> vector<16x1xf32>
    %277 = vector.broadcast %276 : vector<16x1xf32> to vector<16x20xf32>
    %278 = arith.mulf %273, %277 : vector<16x20xf32>
    %279 = arith.truncf %278 : vector<16x20xf32> to vector<16x20xbf16>
    %280 = vector.extract_strided_slice %261 {offsets = [0, 0], sizes = [20, 4], strides = [1, 1]} : vector<20x32xbf16> to vector<20x4xbf16>
    %cst_102 = arith.constant dense<0.000000e+00> : vector<16x4xf32>
    %281 = tpu.matmul %279, %280, %cst_102 {dimension_numbers = #tpu.dot_dimension_numbers<[1], [0], [0], [1], [0, 0, 1, 1], [], []>} : vector<16x20xbf16>, vector<20x4xbf16>, vector<16x4xf32> -> vector<16x4xf32>
    %282 = arith.truncf %281 : vector<16x4xf32> to vector<16x4xbf16>
    %283 = vector.extract_strided_slice %257 {offsets = [0, 0], sizes = [4, 32], strides = [1, 1]} : vector<32x32xbf16> to vector<4x32xbf16>
    %cst_103 = arith.constant dense<0.000000e+00> : vector<16x32xf32>
    %284 = tpu.matmul %282, %283, %cst_103 {dimension_numbers = #tpu.dot_dimension_numbers<[1], [0], [0], [1], [0, 0, 1, 1], [], []>} : vector<16x4xbf16>, vector<4x32xbf16>, vector<16x32xf32> -> vector<16x32xf32>
    %285 = arith.addf %262, %284 : vector<16x32xf32>
    %286 = vector.extract_strided_slice %259 {offsets = [0, 4], sizes = [16, 4], strides = [1, 1]} : vector<16x32xbf16> to vector<16x4xbf16>
    %287 = vector.extract_strided_slice %260 {offsets = [0, 4], sizes = [20, 4], strides = [1, 1]} : vector<20x32xbf16> to vector<20x4xbf16>
    %cst_104 = arith.constant dense<0.000000e+00> : vector<16x20xf32>
    %288 = tpu.matmul %286, %287, %cst_104 {dimension_numbers = #tpu.dot_dimension_numbers<[1], [1], [0], [0], [0, 0, 1, 0], [], []>} : vector<16x4xbf16>, vector<20x4xbf16>, vector<16x20xf32> -> vector<16x20xf32>
    %cst_105 = arith.constant 5.000000e-01 : f32
    %289 = vector.broadcast %cst_105 : f32 to vector<16x20xf32>
    %290 = arith.mulf %288, %289 : vector<16x20xf32>
    %291 = arith.addf %290, %258 : vector<16x20xf32>
    %cst_106 = arith.constant dense<0xFF800000> : vector<16xf32>
    %292 = vector.multi_reduction <maximumf>, %291, %cst_106 [1] : vector<16x20xf32> to vector<16xf32>
    %293 = vector.shape_cast %292 : vector<16xf32> to vector<16x1xf32>
    %294 = vector.broadcast %293 : vector<16x1xf32> to vector<16x20xf32>
    %295 = arith.subf %291, %294 : vector<16x20xf32>
    %296 = math.exp %295 : vector<16x20xf32>
    %cst_107 = arith.constant dense<0.000000e+00> : vector<16xf32>
    %297 = vector.multi_reduction <add>, %296, %cst_107 [1] : vector<16x20xf32> to vector<16xf32>
    %298 = vector.shape_cast %297 : vector<16xf32> to vector<16x1xf32>
    %299 = tpu.reciprocal %298 {approx = true} : vector<16x1xf32> -> vector<16x1xf32>
    %300 = vector.broadcast %299 : vector<16x1xf32> to vector<16x20xf32>
    %301 = arith.mulf %296, %300 : vector<16x20xf32>
    %302 = arith.truncf %301 : vector<16x20xf32> to vector<16x20xbf16>
    %303 = vector.extract_strided_slice %261 {offsets = [0, 4], sizes = [20, 4], strides = [1, 1]} : vector<20x32xbf16> to vector<20x4xbf16>
    %cst_108 = arith.constant dense<0.000000e+00> : vector<16x4xf32>
    %304 = tpu.matmul %302, %303, %cst_108 {dimension_numbers = #tpu.dot_dimension_numbers<[1], [0], [0], [1], [0, 0, 1, 1], [], []>} : vector<16x20xbf16>, vector<20x4xbf16>, vector<16x4xf32> -> vector<16x4xf32>
    %305 = arith.truncf %304 : vector<16x4xf32> to vector<16x4xbf16>
    %306 = vector.extract_strided_slice %257 {offsets = [4, 0], sizes = [4, 32], strides = [1, 1]} : vector<32x32xbf16> to vector<4x32xbf16>
    %cst_109 = arith.constant dense<0.000000e+00> : vector<16x32xf32>
    %307 = tpu.matmul %305, %306, %cst_109 {dimension_numbers = #tpu.dot_dimension_numbers<[1], [0], [0], [1], [0, 0, 1, 1], [], []>} : vector<16x4xbf16>, vector<4x32xbf16>, vector<16x32xf32> -> vector<16x32xf32>
    %308 = arith.addf %285, %307 : vector<16x32xf32>
    %309 = vector.extract_strided_slice %259 {offsets = [0, 8], sizes = [16, 4], strides = [1, 1]} : vector<16x32xbf16> to vector<16x4xbf16>
    %310 = vector.extract_strided_slice %260 {offsets = [0, 8], sizes = [20, 4], strides = [1, 1]} : vector<20x32xbf16> to vector<20x4xbf16>
    %cst_110 = arith.constant dense<0.000000e+00> : vector<16x20xf32>
    %311 = tpu.matmul %309, %310, %cst_110 {dimension_numbers = #tpu.dot_dimension_numbers<[1], [1], [0], [0], [0, 0, 1, 0], [], []>} : vector<16x4xbf16>, vector<20x4xbf16>, vector<16x20xf32> -> vector<16x20xf32>
    %cst_111 = arith.constant 5.000000e-01 : f32
    %312 = vector.broadcast %cst_111 : f32 to vector<16x20xf32>
    %313 = arith.mulf %311, %312 : vector<16x20xf32>
    %314 = arith.addf %313, %258 : vector<16x20xf32>
    %cst_112 = arith.constant dense<0xFF800000> : vector<16xf32>
    %315 = vector.multi_reduction <maximumf>, %314, %cst_112 [1] : vector<16x20xf32> to vector<16xf32>
    %316 = vector.shape_cast %315 : vector<16xf32> to vector<16x1xf32>
    %317 = vector.broadcast %316 : vector<16x1xf32> to vector<16x20xf32>
    %318 = arith.subf %314, %317 : vector<16x20xf32>
    %319 = math.exp %318 : vector<16x20xf32>
    %cst_113 = arith.constant dense<0.000000e+00> : vector<16xf32>
    %320 = vector.multi_reduction <add>, %319, %cst_113 [1] : vector<16x20xf32> to vector<16xf32>
    %321 = vector.shape_cast %320 : vector<16xf32> to vector<16x1xf32>
    %322 = tpu.reciprocal %321 {approx = true} : vector<16x1xf32> -> vector<16x1xf32>
    %323 = vector.broadcast %322 : vector<16x1xf32> to vector<16x20xf32>
    %324 = arith.mulf %319, %323 : vector<16x20xf32>
    %325 = arith.truncf %324 : vector<16x20xf32> to vector<16x20xbf16>
    %326 = vector.extract_strided_slice %261 {offsets = [0, 8], sizes = [20, 4], strides = [1, 1]} : vector<20x32xbf16> to vector<20x4xbf16>
    %cst_114 = arith.constant dense<0.000000e+00> : vector<16x4xf32>
    %327 = tpu.matmul %325, %326, %cst_114 {dimension_numbers = #tpu.dot_dimension_numbers<[1], [0], [0], [1], [0, 0, 1, 1], [], []>} : vector<16x20xbf16>, vector<20x4xbf16>, vector<16x4xf32> -> vector<16x4xf32>
    %328 = arith.truncf %327 : vector<16x4xf32> to vector<16x4xbf16>
    %329 = vector.extract_strided_slice %257 {offsets = [8, 0], sizes = [4, 32], strides = [1, 1]} : vector<32x32xbf16> to vector<4x32xbf16>
    %cst_115 = arith.constant dense<0.000000e+00> : vector<16x32xf32>
    %330 = tpu.matmul %328, %329, %cst_115 {dimension_numbers = #tpu.dot_dimension_numbers<[1], [0], [0], [1], [0, 0, 1, 1], [], []>} : vector<16x4xbf16>, vector<4x32xbf16>, vector<16x32xf32> -> vector<16x32xf32>
    %331 = arith.addf %308, %330 : vector<16x32xf32>
    %332 = vector.extract_strided_slice %259 {offsets = [0, 12], sizes = [16, 4], strides = [1, 1]} : vector<16x32xbf16> to vector<16x4xbf16>
    %333 = vector.extract_strided_slice %260 {offsets = [0, 12], sizes = [20, 4], strides = [1, 1]} : vector<20x32xbf16> to vector<20x4xbf16>
    %cst_116 = arith.constant dense<0.000000e+00> : vector<16x20xf32>
    %334 = tpu.matmul %332, %333, %cst_116 {dimension_numbers = #tpu.dot_dimension_numbers<[1], [1], [0], [0], [0, 0, 1, 0], [], []>} : vector<16x4xbf16>, vector<20x4xbf16>, vector<16x20xf32> -> vector<16x20xf32>
    %cst_117 = arith.constant 5.000000e-01 : f32
    %335 = vector.broadcast %cst_117 : f32 to vector<16x20xf32>
    %336 = arith.mulf %334, %335 : vector<16x20xf32>
    %337 = arith.addf %336, %258 : vector<16x20xf32>
    %cst_118 = arith.constant dense<0xFF800000> : vector<16xf32>
    %338 = vector.multi_reduction <maximumf>, %337, %cst_118 [1] : vector<16x20xf32> to vector<16xf32>
    %339 = vector.shape_cast %338 : vector<16xf32> to vector<16x1xf32>
    %340 = vector.broadcast %339 : vector<16x1xf32> to vector<16x20xf32>
    %341 = arith.subf %337, %340 : vector<16x20xf32>
    %342 = math.exp %341 : vector<16x20xf32>
    %cst_119 = arith.constant dense<0.000000e+00> : vector<16xf32>
    %343 = vector.multi_reduction <add>, %342, %cst_119 [1] : vector<16x20xf32> to vector<16xf32>
    %344 = vector.shape_cast %343 : vector<16xf32> to vector<16x1xf32>
    %345 = tpu.reciprocal %344 {approx = true} : vector<16x1xf32> -> vector<16x1xf32>
    %346 = vector.broadcast %345 : vector<16x1xf32> to vector<16x20xf32>
    %347 = arith.mulf %342, %346 : vector<16x20xf32>
    %348 = arith.truncf %347 : vector<16x20xf32> to vector<16x20xbf16>
    %349 = vector.extract_strided_slice %261 {offsets = [0, 12], sizes = [20, 4], strides = [1, 1]} : vector<20x32xbf16> to vector<20x4xbf16>
    %cst_120 = arith.constant dense<0.000000e+00> : vector<16x4xf32>
    %350 = tpu.matmul %348, %349, %cst_120 {dimension_numbers = #tpu.dot_dimension_numbers<[1], [0], [0], [1], [0, 0, 1, 1], [], []>} : vector<16x20xbf16>, vector<20x4xbf16>, vector<16x4xf32> -> vector<16x4xf32>
    %351 = arith.truncf %350 : vector<16x4xf32> to vector<16x4xbf16>
    %352 = vector.extract_strided_slice %257 {offsets = [12, 0], sizes = [4, 32], strides = [1, 1]} : vector<32x32xbf16> to vector<4x32xbf16>
    %cst_121 = arith.constant dense<0.000000e+00> : vector<16x32xf32>
    %353 = tpu.matmul %351, %352, %cst_121 {dimension_numbers = #tpu.dot_dimension_numbers<[1], [0], [0], [1], [0, 0, 1, 1], [], []>} : vector<16x4xbf16>, vector<4x32xbf16>, vector<16x32xf32> -> vector<16x32xf32>
    %354 = arith.addf %331, %353 : vector<16x32xf32>
    %355 = vector.extract_strided_slice %259 {offsets = [0, 16], sizes = [16, 4], strides = [1, 1]} : vector<16x32xbf16> to vector<16x4xbf16>
    %356 = vector.extract_strided_slice %260 {offsets = [0, 16], sizes = [20, 4], strides = [1, 1]} : vector<20x32xbf16> to vector<20x4xbf16>
    %cst_122 = arith.constant dense<0.000000e+00> : vector<16x20xf32>
    %357 = tpu.matmul %355, %356, %cst_122 {dimension_numbers = #tpu.dot_dimension_numbers<[1], [1], [0], [0], [0, 0, 1, 0], [], []>} : vector<16x4xbf16>, vector<20x4xbf16>, vector<16x20xf32> -> vector<16x20xf32>
    %cst_123 = arith.constant 5.000000e-01 : f32
    %358 = vector.broadcast %cst_123 : f32 to vector<16x20xf32>
    %359 = arith.mulf %357, %358 : vector<16x20xf32>
    %360 = arith.addf %359, %258 : vector<16x20xf32>
    %cst_124 = arith.constant dense<0xFF800000> : vector<16xf32>
    %361 = vector.multi_reduction <maximumf>, %360, %cst_124 [1] : vector<16x20xf32> to vector<16xf32>
    %362 = vector.shape_cast %361 : vector<16xf32> to vector<16x1xf32>
    %363 = vector.broadcast %362 : vector<16x1xf32> to vector<16x20xf32>
    %364 = arith.subf %360, %363 : vector<16x20xf32>
    %365 = math.exp %364 : vector<16x20xf32>
    %cst_125 = arith.constant dense<0.000000e+00> : vector<16xf32>
    %366 = vector.multi_reduction <add>, %365, %cst_125 [1] : vector<16x20xf32> to vector<16xf32>
    %367 = vector.shape_cast %366 : vector<16xf32> to vector<16x1xf32>
    %368 = tpu.reciprocal %367 {approx = true} : vector<16x1xf32> -> vector<16x1xf32>
    %369 = vector.broadcast %368 : vector<16x1xf32> to vector<16x20xf32>
    %370 = arith.mulf %365, %369 : vector<16x20xf32>
    %371 = arith.truncf %370 : vector<16x20xf32> to vector<16x20xbf16>
    %372 = vector.extract_strided_slice %261 {offsets = [0, 16], sizes = [20, 4], strides = [1, 1]} : vector<20x32xbf16> to vector<20x4xbf16>
    %cst_126 = arith.constant dense<0.000000e+00> : vector<16x4xf32>
    %373 = tpu.matmul %371, %372, %cst_126 {dimension_numbers = #tpu.dot_dimension_numbers<[1], [0], [0], [1], [0, 0, 1, 1], [], []>} : vector<16x20xbf16>, vector<20x4xbf16>, vector<16x4xf32> -> vector<16x4xf32>
    %374 = arith.truncf %373 : vector<16x4xf32> to vector<16x4xbf16>
    %375 = vector.extract_strided_slice %257 {offsets = [16, 0], sizes = [4, 32], strides = [1, 1]} : vector<32x32xbf16> to vector<4x32xbf16>
    %cst_127 = arith.constant dense<0.000000e+00> : vector<16x32xf32>
    %376 = tpu.matmul %374, %375, %cst_127 {dimension_numbers = #tpu.dot_dimension_numbers<[1], [0], [0], [1], [0, 0, 1, 1], [], []>} : vector<16x4xbf16>, vector<4x32xbf16>, vector<16x32xf32> -> vector<16x32xf32>
    %377 = arith.addf %354, %376 : vector<16x32xf32>
    %378 = vector.extract_strided_slice %259 {offsets = [0, 20], sizes = [16, 4], strides = [1, 1]} : vector<16x32xbf16> to vector<16x4xbf16>
    %379 = vector.extract_strided_slice %260 {offsets = [0, 20], sizes = [20, 4], strides = [1, 1]} : vector<20x32xbf16> to vector<20x4xbf16>
    %cst_128 = arith.constant dense<0.000000e+00> : vector<16x20xf32>
    %380 = tpu.matmul %378, %379, %cst_128 {dimension_numbers = #tpu.dot_dimension_numbers<[1], [1], [0], [0], [0, 0, 1, 0], [], []>} : vector<16x4xbf16>, vector<20x4xbf16>, vector<16x20xf32> -> vector<16x20xf32>
    %cst_129 = arith.constant 5.000000e-01 : f32
    %381 = vector.broadcast %cst_129 : f32 to vector<16x20xf32>
    %382 = arith.mulf %380, %381 : vector<16x20xf32>
    %383 = arith.addf %382, %258 : vector<16x20xf32>
    %cst_130 = arith.constant dense<0xFF800000> : vector<16xf32>
    %384 = vector.multi_reduction <maximumf>, %383, %cst_130 [1] : vector<16x20xf32> to vector<16xf32>
    %385 = vector.shape_cast %384 : vector<16xf32> to vector<16x1xf32>
    %386 = vector.broadcast %385 : vector<16x1xf32> to vector<16x20xf32>
    %387 = arith.subf %383, %386 : vector<16x20xf32>
    %388 = math.exp %387 : vector<16x20xf32>
    %cst_131 = arith.constant dense<0.000000e+00> : vector<16xf32>
    %389 = vector.multi_reduction <add>, %388, %cst_131 [1] : vector<16x20xf32> to vector<16xf32>
    %390 = vector.shape_cast %389 : vector<16xf32> to vector<16x1xf32>
    %391 = tpu.reciprocal %390 {approx = true} : vector<16x1xf32> -> vector<16x1xf32>
    %392 = vector.broadcast %391 : vector<16x1xf32> to vector<16x20xf32>
    %393 = arith.mulf %388, %392 : vector<16x20xf32>
    %394 = arith.truncf %393 : vector<16x20xf32> to vector<16x20xbf16>
    %395 = vector.extract_strided_slice %261 {offsets = [0, 20], sizes = [20, 4], strides = [1, 1]} : vector<20x32xbf16> to vector<20x4xbf16>
    %cst_132 = arith.constant dense<0.000000e+00> : vector<16x4xf32>
    %396 = tpu.matmul %394, %395, %cst_132 {dimension_numbers = #tpu.dot_dimension_numbers<[1], [0], [0], [1], [0, 0, 1, 1], [], []>} : vector<16x20xbf16>, vector<20x4xbf16>, vector<16x4xf32> -> vector<16x4xf32>
    %397 = arith.truncf %396 : vector<16x4xf32> to vector<16x4xbf16>
    %398 = vector.extract_strided_slice %257 {offsets = [20, 0], sizes = [4, 32], strides = [1, 1]} : vector<32x32xbf16> to vector<4x32xbf16>
    %cst_133 = arith.constant dense<0.000000e+00> : vector<16x32xf32>
    %399 = tpu.matmul %397, %398, %cst_133 {dimension_numbers = #tpu.dot_dimension_numbers<[1], [0], [0], [1], [0, 0, 1, 1], [], []>} : vector<16x4xbf16>, vector<4x32xbf16>, vector<16x32xf32> -> vector<16x32xf32>
    %400 = arith.addf %377, %399 : vector<16x32xf32>
    %401 = vector.extract_strided_slice %259 {offsets = [0, 24], sizes = [16, 4], strides = [1, 1]} : vector<16x32xbf16> to vector<16x4xbf16>
    %402 = vector.extract_strided_slice %260 {offsets = [0, 24], sizes = [20, 4], strides = [1, 1]} : vector<20x32xbf16> to vector<20x4xbf16>
    %cst_134 = arith.constant dense<0.000000e+00> : vector<16x20xf32>
    %403 = tpu.matmul %401, %402, %cst_134 {dimension_numbers = #tpu.dot_dimension_numbers<[1], [1], [0], [0], [0, 0, 1, 0], [], []>} : vector<16x4xbf16>, vector<20x4xbf16>, vector<16x20xf32> -> vector<16x20xf32>
    %cst_135 = arith.constant 5.000000e-01 : f32
    %404 = vector.broadcast %cst_135 : f32 to vector<16x20xf32>
    %405 = arith.mulf %403, %404 : vector<16x20xf32>
    %406 = arith.addf %405, %258 : vector<16x20xf32>
    %cst_136 = arith.constant dense<0xFF800000> : vector<16xf32>
    %407 = vector.multi_reduction <maximumf>, %406, %cst_136 [1] : vector<16x20xf32> to vector<16xf32>
    %408 = vector.shape_cast %407 : vector<16xf32> to vector<16x1xf32>
    %409 = vector.broadcast %408 : vector<16x1xf32> to vector<16x20xf32>
    %410 = arith.subf %406, %409 : vector<16x20xf32>
    %411 = math.exp %410 : vector<16x20xf32>
    %cst_137 = arith.constant dense<0.000000e+00> : vector<16xf32>
    %412 = vector.multi_reduction <add>, %411, %cst_137 [1] : vector<16x20xf32> to vector<16xf32>
    %413 = vector.shape_cast %412 : vector<16xf32> to vector<16x1xf32>
    %414 = tpu.reciprocal %413 {approx = true} : vector<16x1xf32> -> vector<16x1xf32>
    %415 = vector.broadcast %414 : vector<16x1xf32> to vector<16x20xf32>
    %416 = arith.mulf %411, %415 : vector<16x20xf32>
    %417 = arith.truncf %416 : vector<16x20xf32> to vector<16x20xbf16>
    %418 = vector.extract_strided_slice %261 {offsets = [0, 24], sizes = [20, 4], strides = [1, 1]} : vector<20x32xbf16> to vector<20x4xbf16>
    %cst_138 = arith.constant dense<0.000000e+00> : vector<16x4xf32>
    %419 = tpu.matmul %417, %418, %cst_138 {dimension_numbers = #tpu.dot_dimension_numbers<[1], [0], [0], [1], [0, 0, 1, 1], [], []>} : vector<16x20xbf16>, vector<20x4xbf16>, vector<16x4xf32> -> vector<16x4xf32>
    %420 = arith.truncf %419 : vector<16x4xf32> to vector<16x4xbf16>
    %421 = vector.extract_strided_slice %257 {offsets = [24, 0], sizes = [4, 32], strides = [1, 1]} : vector<32x32xbf16> to vector<4x32xbf16>
    %cst_139 = arith.constant dense<0.000000e+00> : vector<16x32xf32>
    %422 = tpu.matmul %420, %421, %cst_139 {dimension_numbers = #tpu.dot_dimension_numbers<[1], [0], [0], [1], [0, 0, 1, 1], [], []>} : vector<16x4xbf16>, vector<4x32xbf16>, vector<16x32xf32> -> vector<16x32xf32>
    %423 = arith.addf %400, %422 : vector<16x32xf32>
    %424 = vector.extract_strided_slice %259 {offsets = [0, 28], sizes = [16, 4], strides = [1, 1]} : vector<16x32xbf16> to vector<16x4xbf16>
    %425 = vector.extract_strided_slice %260 {offsets = [0, 28], sizes = [20, 4], strides = [1, 1]} : vector<20x32xbf16> to vector<20x4xbf16>
    %cst_140 = arith.constant dense<0.000000e+00> : vector<16x20xf32>
    %426 = tpu.matmul %424, %425, %cst_140 {dimension_numbers = #tpu.dot_dimension_numbers<[1], [1], [0], [0], [0, 0, 1, 0], [], []>} : vector<16x4xbf16>, vector<20x4xbf16>, vector<16x20xf32> -> vector<16x20xf32>
    %cst_141 = arith.constant 5.000000e-01 : f32
    %427 = vector.broadcast %cst_141 : f32 to vector<16x20xf32>
    %428 = arith.mulf %426, %427 : vector<16x20xf32>
    %429 = arith.addf %428, %258 : vector<16x20xf32>
    %cst_142 = arith.constant dense<0xFF800000> : vector<16xf32>
    %430 = vector.multi_reduction <maximumf>, %429, %cst_142 [1] : vector<16x20xf32> to vector<16xf32>
    %431 = vector.shape_cast %430 : vector<16xf32> to vector<16x1xf32>
    %432 = vector.broadcast %431 : vector<16x1xf32> to vector<16x20xf32>
    %433 = arith.subf %429, %432 : vector<16x20xf32>
    %434 = math.exp %433 : vector<16x20xf32>
    %cst_143 = arith.constant dense<0.000000e+00> : vector<16xf32>
    %435 = vector.multi_reduction <add>, %434, %cst_143 [1] : vector<16x20xf32> to vector<16xf32>
    %436 = vector.shape_cast %435 : vector<16xf32> to vector<16x1xf32>
    %437 = tpu.reciprocal %436 {approx = true} : vector<16x1xf32> -> vector<16x1xf32>
    %438 = vector.broadcast %437 : vector<16x1xf32> to vector<16x20xf32>
    %439 = arith.mulf %434, %438 : vector<16x20xf32>
    %440 = arith.truncf %439 : vector<16x20xf32> to vector<16x20xbf16>
    %441 = vector.extract_strided_slice %261 {offsets = [0, 28], sizes = [20, 4], strides = [1, 1]} : vector<20x32xbf16> to vector<20x4xbf16>
    %cst_144 = arith.constant dense<0.000000e+00> : vector<16x4xf32>
    %442 = tpu.matmul %440, %441, %cst_144 {dimension_numbers = #tpu.dot_dimension_numbers<[1], [0], [0], [1], [0, 0, 1, 1], [], []>} : vector<16x20xbf16>, vector<20x4xbf16>, vector<16x4xf32> -> vector<16x4xf32>
    %443 = arith.truncf %442 : vector<16x4xf32> to vector<16x4xbf16>
    %444 = vector.extract_strided_slice %257 {offsets = [28, 0], sizes = [4, 32], strides = [1, 1]} : vector<32x32xbf16> to vector<4x32xbf16>
    %cst_145 = arith.constant dense<0.000000e+00> : vector<16x32xf32>
    %445 = tpu.matmul %443, %444, %cst_145 {dimension_numbers = #tpu.dot_dimension_numbers<[1], [0], [0], [1], [0, 0, 1, 1], [], []>} : vector<16x4xbf16>, vector<4x32xbf16>, vector<16x32xf32> -> vector<16x32xf32>
    %446 = arith.addf %423, %445 : vector<16x32xf32>
    %c0_146 = arith.constant 0 : index
    %c0_147 = arith.constant 0 : index
    %c0_148 = arith.constant 0 : index
    %447 = vector.load %arg19[%c0_146, %c0_147, %c0_148] : memref<1x1x32xf32, #tpu.memory_space<vmem>>, vector<1x1x32xf32>
    %448 = vector.shape_cast %447 : vector<1x1x32xf32> to vector<1x32xf32>
    %449 = vector.broadcast %448 : vector<1x32xf32> to vector<16x32xf32>
    %450 = arith.addf %446, %449 : vector<16x32xf32>
    %451 = arith.addf %237, %450 : vector<16x32xf32>
    %c0_149 = arith.constant 0 : index
    %c0_150 = arith.constant 0 : index
    %c0_151 = arith.constant 0 : index
    %452 = vector.load %arg20[%c0_149, %c0_150, %c0_151] : memref<1x1x32xf32, #tpu.memory_space<vmem>>, vector<1x1x32xf32>
    %453 = vector.shape_cast %452 : vector<1x1x32xf32> to vector<1x32xf32>
    %c0_152 = arith.constant 0 : index
    %c0_153 = arith.constant 0 : index
    %c0_154 = arith.constant 0 : index
    %454 = vector.load %arg21[%c0_152, %c0_153, %c0_154] : memref<1x1x32xf32, #tpu.memory_space<vmem>>, vector<1x1x32xf32>
    %455 = vector.shape_cast %454 : vector<1x1x32xf32> to vector<1x32xf32>
    %cst_155 = arith.constant dense<0.000000e+00> : vector<16xf32>
    %456 = vector.multi_reduction <add>, %451, %cst_155 [1] : vector<16x32xf32> to vector<16xf32>
    %457 = vector.shape_cast %456 : vector<16xf32> to vector<16x1xf32>
    %cst_156 = arith.constant 3.200000e+01 : f32
    %458 = vector.broadcast %cst_156 : f32 to vector<16x1xf32>
    %459 = arith.divf %457, %458 : vector<16x1xf32>
    %460 = vector.broadcast %459 : vector<16x1xf32> to vector<16x32xf32>
    %461 = arith.subf %451, %460 : vector<16x32xf32>
    %462 = arith.mulf %461, %461 : vector<16x32xf32>
    %cst_157 = arith.constant dense<0.000000e+00> : vector<16xf32>
    %463 = vector.multi_reduction <add>, %462, %cst_157 [1] : vector<16x32xf32> to vector<16xf32>
    %464 = vector.shape_cast %463 : vector<16xf32> to vector<16x1xf32>
    %cst_158 = arith.constant 3.200000e+01 : f32
    %465 = vector.broadcast %cst_158 : f32 to vector<16x1xf32>
    %466 = arith.divf %464, %465 : vector<16x1xf32>
    %467 = vector.broadcast %459 : vector<16x1xf32> to vector<16x32xf32>
    %468 = arith.subf %451, %467 : vector<16x32xf32>
    %cst_159 = arith.constant 9.99999974E-6 : f32
    %469 = vector.broadcast %cst_159 : f32 to vector<16x1xf32>
    %470 = arith.addf %466, %469 : vector<16x1xf32>
    %471 = math.rsqrt %470 : vector<16x1xf32>
    %472 = vector.broadcast %471 : vector<16x1xf32> to vector<16x32xf32>
    %473 = arith.mulf %468, %472 : vector<16x32xf32>
    %474 = vector.broadcast %453 : vector<1x32xf32> to vector<16x32xf32>
    %475 = arith.mulf %473, %474 : vector<16x32xf32>
    %476 = vector.broadcast %455 : vector<1x32xf32> to vector<16x32xf32>
    %477 = arith.addf %475, %476 : vector<16x32xf32>
    %c0_160 = arith.constant 0 : index
    %c0_161 = arith.constant 0 : index
    %c0_162 = arith.constant 0 : index
    %478 = vector.load %arg22[%c0_160, %c0_161, %c0_162] : memref<1x32x2048xbf16, #tpu.memory_space<vmem>>, vector<1x32x2048xbf16>
    %479 = vector.shape_cast %478 : vector<1x32x2048xbf16> to vector<32x2048xbf16>
    %480 = arith.truncf %477 : vector<16x32xf32> to vector<16x32xbf16>
    %cst_163 = arith.constant dense<0.000000e+00> : vector<16x2048xf32>
    %481 = tpu.matmul %480, %479, %cst_163 {dimension_numbers = #tpu.dot_dimension_numbers<[1], [0], [0], [1], [0, 0, 1, 1], [], []>} : vector<16x32xbf16>, vector<32x2048xbf16>, vector<16x2048xf32> -> vector<16x2048xf32>
    %c0_164 = arith.constant 0 : index
    %c0_165 = arith.constant 0 : index
    %c0_166 = arith.constant 0 : index
    %482 = vector.load %arg23[%c0_164, %c0_165, %c0_166] : memref<1x1x2048xf32, #tpu.memory_space<vmem>>, vector<1x1x2048xf32>
    %483 = vector.shape_cast %482 : vector<1x1x2048xf32> to vector<1x2048xf32>
    %484 = vector.broadcast %483 : vector<1x2048xf32> to vector<16x2048xf32>
    %485 = arith.addf %481, %484 : vector<16x2048xf32>
    %cst_167 = arith.constant 0.000000e+00 : f32
    %486 = vector.broadcast %cst_167 : f32 to vector<16x2048xf32>
    %487 = arith.maximumf %485, %486 : vector<16x2048xf32>
    %c0_168 = arith.constant 0 : index
    %c0_169 = arith.constant 0 : index
    %c0_170 = arith.constant 0 : index
    %488 = vector.load %arg24[%c0_168, %c0_169, %c0_170] : memref<1x2048x32xbf16, #tpu.memory_space<vmem>>, vector<1x2048x32xbf16>
    %489 = vector.shape_cast %488 : vector<1x2048x32xbf16> to vector<2048x32xbf16>
    %490 = arith.truncf %487 : vector<16x2048xf32> to vector<16x2048xbf16>
    %cst_171 = arith.constant dense<0.000000e+00> : vector<16x32xf32>
    %491 = tpu.matmul %490, %489, %cst_171 {dimension_numbers = #tpu.dot_dimension_numbers<[1], [0], [0], [1], [0, 0, 1, 1], [], []>} : vector<16x2048xbf16>, vector<2048x32xbf16>, vector<16x32xf32> -> vector<16x32xf32>
    %c0_172 = arith.constant 0 : index
    %c0_173 = arith.constant 0 : index
    %c0_174 = arith.constant 0 : index
    %492 = vector.load %arg25[%c0_172, %c0_173, %c0_174] : memref<1x1x32xf32, #tpu.memory_space<vmem>>, vector<1x1x32xf32>
    %493 = vector.shape_cast %492 : vector<1x1x32xf32> to vector<1x32xf32>
    %494 = vector.broadcast %493 : vector<1x32xf32> to vector<16x32xf32>
    %495 = arith.addf %491, %494 : vector<16x32xf32>
    %496 = arith.addf %477, %495 : vector<16x32xf32>
    %c0_175 = arith.constant 0 : index
    %c0_176 = arith.constant 0 : index
    %c0_177 = arith.constant 0 : index
    %497 = vector.load %arg26[%c0_175, %c0_176, %c0_177] : memref<1x1x32xf32, #tpu.memory_space<vmem>>, vector<1x1x32xf32>
    %498 = vector.shape_cast %497 : vector<1x1x32xf32> to vector<1x32xf32>
    %c0_178 = arith.constant 0 : index
    %c0_179 = arith.constant 0 : index
    %c0_180 = arith.constant 0 : index
    %499 = vector.load %arg27[%c0_178, %c0_179, %c0_180] : memref<1x1x32xf32, #tpu.memory_space<vmem>>, vector<1x1x32xf32>
    %500 = vector.shape_cast %499 : vector<1x1x32xf32> to vector<1x32xf32>
    %cst_181 = arith.constant dense<0.000000e+00> : vector<16xf32>
    %501 = vector.multi_reduction <add>, %496, %cst_181 [1] : vector<16x32xf32> to vector<16xf32>
    %502 = vector.shape_cast %501 : vector<16xf32> to vector<16x1xf32>
    %cst_182 = arith.constant 3.200000e+01 : f32
    %503 = vector.broadcast %cst_182 : f32 to vector<16x1xf32>
    %504 = arith.divf %502, %503 : vector<16x1xf32>
    %505 = vector.broadcast %504 : vector<16x1xf32> to vector<16x32xf32>
    %506 = arith.subf %496, %505 : vector<16x32xf32>
    %507 = arith.mulf %506, %506 : vector<16x32xf32>
    %cst_183 = arith.constant dense<0.000000e+00> : vector<16xf32>
    %508 = vector.multi_reduction <add>, %507, %cst_183 [1] : vector<16x32xf32> to vector<16xf32>
    %509 = vector.shape_cast %508 : vector<16xf32> to vector<16x1xf32>
    %cst_184 = arith.constant 3.200000e+01 : f32
    %510 = vector.broadcast %cst_184 : f32 to vector<16x1xf32>
    %511 = arith.divf %509, %510 : vector<16x1xf32>
    %512 = vector.broadcast %504 : vector<16x1xf32> to vector<16x32xf32>
    %513 = arith.subf %496, %512 : vector<16x32xf32>
    %cst_185 = arith.constant 9.99999974E-6 : f32
    %514 = vector.broadcast %cst_185 : f32 to vector<16x1xf32>
    %515 = arith.addf %511, %514 : vector<16x1xf32>
    %516 = math.rsqrt %515 : vector<16x1xf32>
    %517 = vector.broadcast %516 : vector<16x1xf32> to vector<16x32xf32>
    %518 = arith.mulf %513, %517 : vector<16x32xf32>
    %519 = vector.broadcast %498 : vector<1x32xf32> to vector<16x32xf32>
    %520 = arith.mulf %518, %519 : vector<16x32xf32>
    %521 = vector.broadcast %500 : vector<1x32xf32> to vector<16x32xf32>
    %522 = arith.addf %520, %521 : vector<16x32xf32>
    %c0_186 = arith.constant 0 : index
    %c0_187 = arith.constant 0 : index
    %523 = vector.load %arg31[%c0_186, %c0_187] : memref<16x32xf32, #tpu.memory_space<vmem>>, vector<16x32xf32>
    tpu.vector_store %arg31[%c0_186, %c0_187], %522 {strides = array<i32>} : memref<16x32xf32, #tpu.memory_space<vmem>>, vector<16x32xf32>,
    %c1_i32 = arith.constant 1 : i32
    %524 = arith.cmpi eq, %arg0, %c1_i32 : i32
    %525 = arith.extui %524 : i1 to i32
    %c0_i32_188 = arith.constant 0 : i32
    %526 = arith.cmpi ne, %525, %c0_i32_188 : i32
    scf.if %526 {
      %c0_189 = arith.constant 0 : index
      %c0_190 = arith.constant 0 : index
      %527 = vector.load %arg28[%c0_189, %c0_190] : memref<32x128xbf16, #tpu.memory_space<vmem>>, vector<32x128xbf16>
      %528 = arith.truncf %522 : vector<16x32xf32> to vector<16x32xbf16>
      %cst_191 = arith.constant dense<0.000000e+00> : vector<16x128xf32>
      %529 = tpu.matmul %528, %527, %cst_191 {dimension_numbers = #tpu.dot_dimension_numbers<[1], [0], [0], [1], [0, 0, 1, 1], [], []>} : vector<16x32xbf16>, vector<32x128xbf16>, vector<16x128xf32> -> vector<16x128xf32>
      %c0_192 = arith.constant 0 : index
      %c0_193 = arith.constant 0 : index
      %530 = vector.load %arg29[%c0_192, %c0_193] : memref<1x128xf32, #tpu.memory_space<vmem>>, vector<1x128xf32>
      %531 = vector.broadcast %530 : vector<1x128xf32> to vector<16x128xf32>
      %532 = arith.addf %529, %531 : vector<16x128xf32>
      %c0_194 = arith.constant 0 : index
      %c0_195 = arith.constant 0 : index
      %533 = vector.load %arg30[%c0_194, %c0_195] : memref<16x128xf32, #tpu.memory_space<vmem>>, vector<16x128xf32>
      tpu.vector_store %arg30[%c0_194, %c0_195], %532 {strides = array<i32>} : memref<16x128xf32, #tpu.memory_space<vmem>>, vector<16x128xf32>,
    } else {
    }
    return
  }
  func.func @transform_0(%arg0: i32) -> (i32, i32) {
    %c0_i32 = arith.constant 0 : i32
    %c0_i32_0 = arith.constant 0 : i32
    %c0_i32_1 = arith.constant 0 : i32
    return %c0_i32, %c0_i32_0 : i32, i32
  }
  func.func @transform_1(%arg0: i32) -> (i32, i32) {
    %c0_i32 = arith.constant 0 : i32
    %c0_i32_0 = arith.constant 0 : i32
    %c0_i32_1 = arith.constant 0 : i32
    return %c0_i32, %c0_i32_0 : i32, i32
  }
  func.func @transform_2(%arg0: i32) -> (i32, i32) {
    %c0_i32 = arith.constant 0 : i32
    %c0_i32_0 = arith.constant 0 : i32
    %c0_i32_1 = arith.constant 0 : i32
    return %c0_i32, %c0_i32_0 : i32, i32
  }
  func.func @transform_3(%arg0: i32) -> (i32, i32) {
    %c0_i32 = arith.constant 0 : i32
    %c0_i32_0 = arith.constant 0 : i32
    %c0_i32_1 = arith.constant 0 : i32
    return %c0_i32, %c0_i32_0 : i32, i32
  }
  func.func @transform_4(%arg0: i32) -> (i32, i32) {
    %c0_i32 = arith.constant 0 : i32
    %c0_i32_0 = arith.constant 0 : i32
    %c0_i32_1 = arith.constant 0 : i32
    return %c0_i32, %c0_i32_0 : i32, i32
  }
  func.func @transform_5(%arg0: i32) -> (i32, i32) {
    %c0_i32 = arith.constant 0 : i32
    %c0_i32_0 = arith.constant 0 : i32
    %c0_i32_1 = arith.constant 0 : i32
    return %c0_i32, %c0_i32_0 : i32, i32
  }
  func.func @transform_6(%arg0: i32) -> (i32, i32) {
    %c0_i32 = arith.constant 0 : i32
    %c0_i32_0 = arith.constant 0 : i32
    %c0_i32_1 = arith.constant 0 : i32
    return %c0_i32, %c0_i32_0 : i32, i32
  }
  func.func @transform_7(%arg0: i32) -> (i32, i32, i32) {
    %c0_i32 = arith.constant 0 : i32
    %c0_i32_0 = arith.constant 0 : i32
    %c0_i32_1 = arith.constant 0 : i32
    return %arg0, %c0_i32, %c0_i32_0 : i32, i32, i32
  }
  func.func @transform_8(%arg0: i32) -> (i32, i32, i32) {
    %c0_i32 = arith.constant 0 : i32
    %c0_i32_0 = arith.constant 0 : i32
    %c0_i32_1 = arith.constant 0 : i32
    return %arg0, %c0_i32, %c0_i32_0 : i32, i32, i32
  }
  func.func @transform_9(%arg0: i32) -> (i32, i32, i32) {
    %c0_i32 = arith.constant 0 : i32
    %c0_i32_0 = arith.constant 0 : i32
    %c0_i32_1 = arith.constant 0 : i32
    return %arg0, %c0_i32, %c0_i32_0 : i32, i32, i32
  }
  func.func @transform_10(%arg0: i32) -> (i32, i32, i32) {
    %c0_i32 = arith.constant 0 : i32
    %c0_i32_0 = arith.constant 0 : i32
    %c0_i32_1 = arith.constant 0 : i32
    return %arg0, %c0_i32, %c0_i32_0 : i32, i32, i32
  }
  func.func @transform_11(%arg0: i32) -> (i32, i32, i32) {
    %c0_i32 = arith.constant 0 : i32
    %c0_i32_0 = arith.constant 0 : i32
    %c0_i32_1 = arith.constant 0 : i32
    return %arg0, %c0_i32, %c0_i32_0 : i32, i32, i32
  }
  func.func @transform_12(%arg0: i32) -> (i32, i32, i32) {
    %c0_i32 = arith.constant 0 : i32
    %c0_i32_0 = arith.constant 0 : i32
    %c0_i32_1 = arith.constant 0 : i32
    return %arg0, %c0_i32, %c0_i32_0 : i32, i32, i32
  }
  func.func @transform_13(%arg0: i32) -> (i32, i32, i32) {
    %c0_i32 = arith.constant 0 : i32
    %c0_i32_0 = arith.constant 0 : i32
    %c0_i32_1 = arith.constant 0 : i32
    return %arg0, %c0_i32, %c0_i32_0 : i32, i32, i32
  }
  func.func @transform_14(%arg0: i32) -> (i32, i32, i32) {
    %c0_i32 = arith.constant 0 : i32
    %c0_i32_0 = arith.constant 0 : i32
    %c0_i32_1 = arith.constant 0 : i32
    return %arg0, %c0_i32, %c0_i32_0 : i32, i32, i32
  }
  func.func @transform_15(%arg0: i32) -> (i32, i32, i32) {
    %c0_i32 = arith.constant 0 : i32
    %c0_i32_0 = arith.constant 0 : i32
    %c0_i32_1 = arith.constant 0 : i32
    return %arg0, %c0_i32, %c0_i32_0 : i32, i32, i32
  }
  func.func @transform_16(%arg0: i32) -> (i32, i32, i32) {
    %c0_i32 = arith.constant 0 : i32
    %c0_i32_0 = arith.constant 0 : i32
    %c0_i32_1 = arith.constant 0 : i32
    return %arg0, %c0_i32, %c0_i32_0 : i32, i32, i32
  }
  func.func @transform_17(%arg0: i32) -> (i32, i32, i32) {
    %c0_i32 = arith.constant 0 : i32
    %c0_i32_0 = arith.constant 0 : i32
    %c0_i32_1 = arith.constant 0 : i32
    return %arg0, %c0_i32, %c0_i32_0 : i32, i32, i32
  }
  func.func @transform_18(%arg0: i32) -> (i32, i32, i32) {
    %c0_i32 = arith.constant 0 : i32
    %c0_i32_0 = arith.constant 0 : i32
    %c0_i32_1 = arith.constant 0 : i32
    return %arg0, %c0_i32, %c0_i32_0 : i32, i32, i32
  }
  func.func @transform_19(%arg0: i32) -> (i32, i32, i32) {
    %c0_i32 = arith.constant 0 : i32
    %c0_i32_0 = arith.constant 0 : i32
    %c0_i32_1 = arith.constant 0 : i32
    return %arg0, %c0_i32, %c0_i32_0 : i32, i32, i32
  }
  func.func @transform_20(%arg0: i32) -> (i32, i32, i32) {
    %c0_i32 = arith.constant 0 : i32
    %c0_i32_0 = arith.constant 0 : i32
    %c0_i32_1 = arith.constant 0 : i32
    return %arg0, %c0_i32, %c0_i32_0 : i32, i32, i32
  }
  func.func @transform_21(%arg0: i32) -> (i32, i32, i32) {
    %c0_i32 = arith.constant 0 : i32
    %c0_i32_0 = arith.constant 0 : i32
    %c0_i32_1 = arith.constant 0 : i32
    return %arg0, %c0_i32, %c0_i32_0 : i32, i32, i32
  }
  func.func @transform_22(%arg0: i32) -> (i32, i32, i32) {
    %c0_i32 = arith.constant 0 : i32
    %c0_i32_0 = arith.constant 0 : i32
    %c0_i32_1 = arith.constant 0 : i32
    return %arg0, %c0_i32, %c0_i32_0 : i32, i32, i32
  }
  func.func @transform_23(%arg0: i32) -> (i32, i32, i32) {
    %c0_i32 = arith.constant 0 : i32
    %c0_i32_0 = arith.constant 0 : i32
    %c0_i32_1 = arith.constant 0 : i32
    return %arg0, %c0_i32, %c0_i32_0 : i32, i32, i32
  }
  func.func @transform_24(%arg0: i32) -> (i32, i32, i32) {
    %c0_i32 = arith.constant 0 : i32
    %c0_i32_0 = arith.constant 0 : i32
    %c0_i32_1 = arith.constant 0 : i32
    return %arg0, %c0_i32, %c0_i32_0 : i32, i32, i32
  }
  func.func @transform_25(%arg0: i32) -> (i32, i32, i32) {
    %c0_i32 = arith.constant 0 : i32
    %c0_i32_0 = arith.constant 0 : i32
    %c0_i32_1 = arith.constant 0 : i32
    return %arg0, %c0_i32, %c0_i32_0 : i32, i32, i32
  }
  func.func @transform_26(%arg0: i32) -> (i32, i32, i32) {
    %c0_i32 = arith.constant 0 : i32
    %c0_i32_0 = arith.constant 0 : i32
    %c0_i32_1 = arith.constant 0 : i32
    return %arg0, %c0_i32, %c0_i32_0 : i32, i32, i32
  }
  func.func @transform_27(%arg0: i32) -> (i32, i32) {
    %c0_i32 = arith.constant 0 : i32
    %c0_i32_0 = arith.constant 0 : i32
    %c0_i32_1 = arith.constant 0 : i32
    return %c0_i32, %c0_i32_0 : i32, i32
  }
  func.func @transform_28(%arg0: i32) -> (i32, i32) {
    %c0_i32 = arith.constant 0 : i32
    %c0_i32_0 = arith.constant 0 : i32
    %c0_i32_1 = arith.constant 0 : i32
    return %c0_i32, %c0_i32_0 : i32, i32
  }
  func.func @transform_29(%arg0: i32) -> (i32, i32) {
    %c0_i32 = arith.constant 0 : i32
    %c0_i32_0 = arith.constant 0 : i32
    %c0_i32_1 = arith.constant 0 : i32
    return %c0_i32, %c0_i32_0 : i32, i32
  }
}

</mosaic_0001>

<bundles_post_ra>
// kernel: tile.24
= control target key start
LH: loop header
LB: loop body
LE: loop exit
PB: predicated region body
PF: predicated region fallthrough
CT: control target
= control target key end

     0   :  { %vm3_vm0 = vcmask 261120   ;;  %s60_s0 = inlined_call_operand.vmem [shape: f32[2,10,32], index: 0, kind: input, shape index: {}]   ;;  %s61_s1 = inlined_call_operand.vmem [shape: f32[20,32], index: 1, kind: output, shape index: {}]  }
   0x1   :  { %v2_v0 = vld [vmem:[%s60_s0] sm:$0xff]   ;;  %v20_v1 = vld [vmem:[%s60_s0 + $0x8] sm:$0x3]   ;;  %v22_v2 = vld [vmem:[%s60_s0 + $0x10] sm:$0xff]  }
   0x2   :  { %4 = vst.msk [vmem:[%s61_s1] sm:$0xff] %vm3_vm0, %v2_v0   ;;  %21 = vst.msk [vmem:[%s61_s1 + $0x8] sm:$0x3] %vm3_vm0, %v20_v1   ;;  %v24_v3 = vld [vmem:[%s60_s0 + $0x18] sm:$0x3]  }
   0x3   :  { %23 = vst.msk [vmem:[%s61_s1 + $0xa] sm:$0xff] %vm3_vm0, %v22_v2   ;;  %25 = vst.msk [vmem:[%s61_s1 + $0x12] sm:$0x3] %vm3_vm0, %v24_v3  }

// kernel: eq.22
= control target key start
LH: loop header
LB: loop body
LE: loop exit
PB: predicated region body
PF: predicated region fallthrough
CT: control target
= control target key end

     0   :  { %vm7_vm0 = vcmask 80896   ;;  %vm13_vm1 = vcmask 162896   ;;  %s39_s0 = inlined_call_operand.vmem [shape: s32[2,10], index: 0, kind: input, shape index: {}]   ;;  %s40_s1 = inlined_call_operand.vmem [shape: s32[20], index: 1, kind: output, shape index: {}]  }
   0x1   :  { %v4_v0 = vld [vmem:[%s39_s0] sm:$0x3]  ;;  %s22_s0 = smov 10  }
   0x2   :  { %5 = vst [vmem:[#allocation1] sm:$0x3] %v4_v0 }
   0x9   :  { %v10_v1 = vld [vmem:[#allocation1 + $0x1] sm:$0x1]   ;;  %v6_v2 = vld [vmem:[#allocation1] sm:$0x1]  }
   0xa   :  { %11 = vrot.lane.b32.xlu0 %v10_v1, %s22_s0  ;;  %8 = vst.msk [vmem:[#allocation0] sm:$0x1] %vm7_vm0, %v6_v2  }
  0x7c   :  { %v12_v3 = vpop.permute.xlu0 %11  }
  0x7d   :  { %14 = vst.msk [vmem:[#allocation0] sm:$0x1] %vm13_vm1, %v12_v3  }
  0x84   :  { %v18_v4 = vld [vmem:[#allocation0] sm:$0x1] }
  0x85   :  { %20 = vst [vmem:[%s40_s1] sm:$0x1] %v18_v4 }

// kernel: le.8
= control target key start
LH: loop header
LB: loop body
LE: loop exit
PB: predicated region body
PF: predicated region fallthrough
CT: control target
= control target key end

     0   :  { %vm7_vm0 = vcmask 64512   ;;  %vm13_vm1 = vcmask 130112   ;;  %s39_s0 = inlined_call_operand.vmem [shape: s32[2,8], index: 0, kind: input, shape index: {}]   ;;  %s40_s1 = inlined_call_operand.vmem [shape: s32[16], index: 1, kind: output, shape index: {}]  }
   0x1   :  { %v4_v0 = vld [vmem:[%s39_s0] sm:$0x3]  ;;  %s22_s0 = smov 8  }
   0x2   :  { %5 = vst [vmem:[#allocation1] sm:$0x3] %v4_v0 }
   0x9   :  { %v10_v1 = vld [vmem:[#allocation1 + $0x1] sm:$0x1]   ;;  %v6_v2 = vld [vmem:[#allocation1] sm:$0x1]  }
   0xa   :  { %11 = vrot.lane.b32.xlu0 %v10_v1, %s22_s0  ;;  %8 = vst.msk [vmem:[#allocation0] sm:$0x1] %vm7_vm0, %v6_v2  }
  0x7c   :  { %v12_v3 = vpop.permute.xlu0 %11  }
  0x7d   :  { %14 = vst.msk [vmem:[#allocation0] sm:$0x1] %vm13_vm1, %v12_v3  }
  0x84   :  { %v18_v4 = vld [vmem:[#allocation0] sm:$0x1] }
  0x85   :  { %20 = vst [vmem:[%s40_s1] sm:$0x1] %v18_v4 }

// kernel: midi_bass_generator_forward.2
= control target key start
LH: loop header
LB: loop body
LE: loop exit
PB: predicated region body
PF: predicated region fallthrough
CT: control target
= control target key end

     0   :  { %s6440_s24 = smov 0   ;;  %s7387_s0 = inlined_call_operand.vmem [shape: f32[20,16], index: 0, kind: input, shape index: {}]   ;;  %s7388_s1 = inlined_call_operand.vmem [shape: f32[20,32], index: 1, kind: input, shape index: {}]   ;;  %s7389_s2 = inlined_call_operand.vmem [shape: f32[20,20], index: 2, kind: input, shape index: {}]   ;;  %s7390_s3 = inlined_call_operand.vmem [shape: bf16[16,32], index: 3, kind: input, shape index: {}]   ;;  %s7391_s4 = inlined_call_operand.vmem [shape: f32[1,32], index: 4, kind: input, shape index: {}]   ;;  %s7392_s5 = inlined_call_operand.vmem [shape: bf16[2,32,96], index: 5, kind: input, shape index: {}]   ;;  %s7393_s6 = inlined_call_operand.vmem [shape: f32[2,1,96], index: 6, kind: input, shape index: {}]   ;;  %s7394_s7 = inlined_call_operand.vmem [shape: bf16[2,32,32], index: 7, kind: input, shape index: {}]   ;;  %s7395_s8 = inlined_call_operand.vmem [shape: f32[2,1,32], index: 8, kind: input, shape index: {}]   ;;  %s7396_s9 = inlined_call_operand.vmem [shape: f32[2,1,32], index: 9, kind: input, shape index: {}]   ;;  %s7397_s10 = inlined_call_operand.vmem [shape: f32[2,1,32], index: 10, kind: input, shape index: {}]   ;;  %s7398_s11 = inlined_call_operand.vmem [shape: bf16[2,32,2048], index: 11, kind: input, shape index: {}]   ;;  %s7399_s12 = inlined_call_operand.vmem [shape: f32[2,1,2048], index: 12, kind: input, shape index: {}]   ;;  %s7400_s13 = inlined_call_operand.vmem [shape: bf16[2,2048,32], index: 13, kind: input, shape index: {}]   ;;  %s7401_s14 = inlined_call_operand.vmem [shape: f32[2,1,32], index: 14, kind: input, shape index: {}]   ;;  %s7402_s15 = inlined_call_operand.vmem [shape: f32[2,1,32], index: 15, kind: input, shape index: {}]   ;;  %s7403_s16 = inlined_call_operand.vmem [shape: f32[2,1,32], index: 16, kind: input, shape index: {}]   ;;  %s7404_s17 = inlined_call_operand.vmem [shape: f32[20,32], index: 17, kind: output, shape index: {}]  }
   0x1   :  { %7411 = sst [smem:[#allocation3_spill]] %s7387_s0 }
   0x2   :  { %7412 = sst [smem:[#allocation4_spill]] %s7388_s1 }
   0x3   :  { %7413 = sst [smem:[#allocation5_spill]] %s7389_s2 }
   0x4   :  { %7414 = sst [smem:[#allocation6_spill]] %s7391_s4 }
   0x5   :  { %7415 = sst [smem:[#allocation7_spill]] %s7392_s5 }
   0x6   :  { %7416 = sst [smem:[#allocation8_spill]] %s7393_s6 }
   0x7   :  { %7417 = sst [smem:[#allocation9_spill]] %s7394_s7 }
   0x8   :  { %7418 = sst [smem:[#allocation10_spill]] %s7404_s17 }
   0x9 LB: > { %7419 = sst [smem:[#allocation2_spill]] %s6324_s24  ;;  %s5233_s25 = sadd.s32 4294967295, %s6324_s24   ;;  %s6324_s24 = sphi %s6440_s24, %s27_s24  }
   0xa   : > { %p5236_p0 = scmp.ge.s32.totalorder %s6324_s24, 1  ;;  %p577_p1 = scmp.lt.s32.totalorder %s6324_s24, 3 }
   0xc   : > { %p578_p2 = pnand %p5236_p0, %p577_p1 }
   0xd   : > { %p664_p3 = scmp.lt.s32.totalorder (!%p578_p2), %s5233_s25, 1  ;;  %s7421_s5 = sld [smem:[#allocation7_spill]] (!%p578_p2) }
   0xe   : > { %581 = sbr.rel (%p578_p2) target bundleno = 5418 (0x152a), region = 88  ;;  %s7422_s7 = sld [smem:[#allocation9_spill]] (!%p578_p2) }
   0xf   : > { %p5246_p4 = scmp.ne.s32.totalorder (!%p578_p2), %s5233_s25, 0 }
  0x15   : > { %s6448_s26 = scalar_select %p664_p3, %s5233_s25, 1 }
  0x16   : > { %713 = sbr.rel (%p5246_p4) target bundleno = 252 (0xfc), region = 92  ;;  %v6069_v0 = vld [vmem:[%s7390_s3] sm:$0xff] (!%p5246_p4)   ;;  %s7423_s2 = sld [smem:[#allocation3_spill]] (!%p5246_p4)  ;;  %vm734_vm0 = vcmask (!%p5246_p4), 130048   ;;  %vm798_vm1 = vcmask (!%p5246_p4), 257024   ;;  %vm795_vm2 = vcmask (!%p5246_p4), 261120  }
  0x17   : > { %s5492_s27 = sshll.u32 %s6448_s26, 4  ;;  %s5494_s30 = sshll.u32 %s6448_s26, 8  ;;  %5815 = vmatprep.subr.bf16.mxu0 (!%p5246_p4), %v6069_v0 }
  0x18   : > { %s6458_s19 = scalar_lea.vmem %s7421_s5, %s5492_s27  ;;  %s6463_s21 = scalar_lea.vmem %s7422_s7, %s5492_s27  ;;  %5816 = vmatpush3.bf16.msra.mxu0 (!%p5246_p4), %v6069_v0 }
  0x19   : > { %s6481_s6 = scalar_lea.vmem %s7398_s11, %s5494_s30  ;;  %s6486_s7 = scalar_lea.vmem %s7399_s12, %s5492_s27 }
  0x1a   : > { %s5495_s22 = sshll.u32 %s6448_s26, 10  ;;  %s705_s5 = scalar_lea.vmem %s7402_s15, %s6448_s26 }
  0x1b   : > { %s6496_s28 = scalar_lea.vmem %s7400_s13, %s5495_s22  ;;  %s708_s1 = scalar_lea.vmem %s7403_s16, %s6448_s26 }
  0x1c   : > { %v714_v1 = vld [vmem:[%s7423_s2] sm:$0xff] (!%p5246_p4)  ;;  %v715_v2 = vld [vmem:[%s7423_s2 + $0x8] sm:$0xff] (!%p5246_p4)  ;;  %v716_v3 = vld [vmem:[%s7423_s2 + $0x10] sm:$0xf] (!%p5246_p4)  ;;  %s7424_s30 = sld [smem:[#allocation6_spill]] (!%p5246_p4)  ;;  %s7425_s20 = sld [smem:[#allocation4_spill]] (!%p5246_p4) }
  0x1d   : > { %v719_v4 = vpack.c.bf16 %v715_v2, %v714_v1  ;;  %v720_v5 = vpack.c.bf16 %v716_v3, %v716_v3  ;;  %s7426_s25 = sld [smem:[#allocation10_spill]] }
  0x1f   : > { %5817 = vmatprep.mubr.msk.bf16.mxu0 %vm734_vm0, %v719_v4 }
  0x20   : > { %5818 = vmatmul.mubr.msk.bf16.vlgmr.msra.gmra.mrb[0].mxu0 %vm734_vm0, %v720_v5 }
  0x22   : > { %v5247_v6 = vld [vmem:[%s7424_s30] ss:$0 sm:$0xff]  ;;  %v791_v8 = vld [vmem:[%s7425_s20 + $0x10] sm:$0xf]  ;;  %v790_v16 = vld [vmem:[%s7425_s20 + $0x8] sm:$0xff] }
  0x23   : > { %v789_v11 = vld [vmem:[%s7425_s20] sm:$0xff] }
  0xf3   : > { %v5819_v7 = vpop.f32.mrb[0].mxu0 }
  0xf4   : > { %v784_v9 = vadd.f32 %v5819_v7, %v5247_v6  ;;  %v775_v10 = vpop.f32.mrb[1].mxu0 }
  0xf5   : > { %v776_v12 = vadd.f32 %v5247_v6, %v775_v10  ;;  %v5820_v13 = vpop.f32.mrb[2].mxu0 }
  0xf6   : > { %v794_v14 = vadd.f32 %v791_v8, %v784_v9  ;;  %v778_v15 = vpop.f32.mrb[3].mxu0 }
  0xf7   : > { %v792_v17 = vadd.f32 %v789_v11, %v776_v12  ;;  %v779_v18 = vadd.f32 %v5247_v6, %v778_v15 }
  0xf8   : > { %799 = vst.msk [vmem:[%s7426_s25 + $0x10] sm:$0xf] %vm798_vm1, %v794_v14 }
  0xf9   : > { %796 = vst.msk [vmem:[%s7426_s25] sm:$0xff] %vm795_vm2, %v792_v17  ;;  %v793_v19 = vadd.f32 %v790_v16, %v779_v18 }
  0xfb   : > { %797 = vst.msk [vmem:[%s7426_s25 + $0x8] sm:$0xff] %vm795_vm2, %v793_v19 }
  0xfc PF: > { %v6070_v20 = vld [vmem:[%s6458_s19] sm:$0xff]   ;;  %v6071_v21 = vld [vmem:[%s6458_s19 + $0x8] sm:$0xff]   ;;  %s7427_s4 = sld [smem:[#allocation10_spill]]  ;;  %vm828_vm3 = vcmask 261120   ;;  %s7428_s30 = sld [smem:[#allocation8_spill]]  ;;  %vm898_vm4 = vcmask 31744  }
  0xfd   : > { %5821 = vmatprep.subr.bf16.mxu0 %v6070_v20  ;;  %s6326_s27 = smov 96   ;;  %s7430_s22 = sld [smem:[#allocation5_spill]]  ;;  %vm972_vm5 = vcmask 158720   ;;  %vm965_vm6 = vcmask 162816   ;;  %vm1013_vm7 = vcmask 1041408   ;;  %vm2789_vm8 = vcmask 257024  }
  0xfe   : > { %5822 = vmatpush3.bf16.msra.mxu0 %v6070_v20  ;;  %s6327_s25 = smov 92   ;;  %s6331_s24 = smov 88  }
  0xff   : > { %5823 = vmatprep.subr.bf16.mxu0 %v6071_v21  ;;  %s6332_s23 = smov 120   ;;  %s6333_s0 = smov 84  }
 0x100   : > { %s6334_s17 = smov 116   ;;  %s6335_s29 = smov 56  }
 0x101   : > { %s6336_s19 = smov 80  }
 0x102   : > { %v800_v22 = vld [vmem:[%s7427_s4] sm:$0xff]  ;;  %v801_v23 = vld [vmem:[%s7427_s4 + $0x8] sm:$0xff]  ;;  %v802_v24 = vld [vmem:[%s7427_s4 + $0x10] sm:$0xf]  ;;  %5824 = vmatpush3.bf16.msra.mxu0 %v6071_v21  ;;  %s7429_s18 = scalar_lea.vmem %s7428_s30, %s6448_s26  ;;  %s6328_s30 = smov 64  }
 0x103   : > { %v807_v25 = vpack.c.bf16 %v801_v23, %v800_v22  ;;  %v808_v26 = vpack.c.bf16 %v802_v24, %v802_v24  ;;  %v5251_v28 = vld [vmem:[%s7429_s18] ss:$0 sm:$0xff]  ;;  %v6574_v42 = vld [vmem:[%s7430_s22 + $0x10] sm:$0xf]  ;;  %v6585_v50 = vld [vmem:[%s7430_s22 + $0x8] sm:$0xff]  ;;  %s6329_s18 = smov 124  }
 0x104   : > { %v6579_v45 = vld [vmem:[%s7430_s22] sm:$0xff] }
 0x105   : > { %5825 = vmatprep.mubr.msk.bf16.mxu0 %vm828_vm3, %v807_v25 }
 0x106   : > { %5826 = vmatmul.mubr.msk.bf16.vlgmr.msra.gmra.mrb[0].mxu0 %vm828_vm3, %v808_v26 }
 0x1d9   : > { %v5827_v27 = vpop.f32.mrb[0].mxu0 }
 0x1da   : > { %v869_v29 = vpop.f32.mrb[1].mxu0  ;;  %v878_v34 = vadd.f32 %v5827_v27, %v5251_v28 }
 0x1db   : > { %v5828_v30 = vpop.f32.mrb[2].mxu0  ;;  %v870_v32 = vadd.f32 %v5251_v28, %v869_v29 }
 0x1dc   : > { %v872_v31 = vpop.f32.mrb[3].mxu0  ;;  %v6562_v36 = vpack.c.bf16 %v878_v34, %v878_v34 }
 0x1dd   : > { %v873_v33 = vadd.f32 %v5251_v28, %v872_v31  ;;  %v6612_v28 = vld [vmem:[%s6463_s21] sm:$0xf] }
 0x1de   : > { %v1308_v29 = vsel %vm1013_vm7, %v6612_v28, 0 }
 0x1df   : > { %v6557_v35 = vpack.c.bf16 %v873_v33, %v870_v32 }
 0x1e1   : > { %894 = vrot.lane.b32.xlu0 %v6557_v35, %s6326_s27  ;;  %5833 = vmatprep.mubr.msk.bf16.mxu1 %vm898_vm4, %v6557_v35 }
 0x1e5   : > { %896 = vrot.lane.b32.xlu0 %v6562_v36, %s6326_s27  ;;  %s6330_s27 = smov 60  }
 0x253   : > { %v895_v37 = vpop.permute.xlu0 %894 }
 0x254   : > { %6005 = vmatprep.subr.msk.bf16.mxu1 %vm898_vm4, %v895_v37  ;;  %v906_v38 = vsel %vm898_vm4, %v895_v37, 0 }
 0x255   : > { %5830 = vmatpush3.bf16.xpose.msra.mxu1 %v906_v38 }
 0x257   : > { %v897_v39 = vpop.permute.xlu0 %896 }
 0x258   : > { %6006 = vmatprep.subr.msk.bf16.mxu1 %vm898_vm4, %v897_v39  ;;  %v909_v40 = vsel %vm898_vm4, %v897_v39, 0 }
 0x25d   : > { %5832 = vmatpush3.bf16.xpose.msra.mxu1 %v909_v40 }
 0x264   : > { %5834 = vmatmul.mubr.msk.bf16.vlgmr.msra.gmra.mrb[0].mxu1 %vm898_vm4, %v6562_v36 }
 0x337   : > { %v5835_v41 = vpop.f32.mrb[0].mxu1 }
 0x338   : > { %v961_v43 = vmul.f32 0.5, %v5835_v41  ;;  %v945_v44 = vpop.f32.mrb[1].mxu1 }
 0x339   : > { %v959_v46 = vmul.f32 0.5, %v945_v44  ;;  %v5836_v47 = vpop.f32.mrb[2].mxu1 }
 0x33a   : > { %v948_v48 = vpop.f32.mrb[3].mxu1  ;;  %v964_v49 = vadd.f32 %v961_v43, %v6574_v42 }
 0x33b   : > { %v960_v51 = vmul.f32 0.5, %v948_v48  ;;  %v962_v52 = vadd.f32 %v959_v46, %v6579_v45 }
 0x33c   : > { %v973_v53 = vsel %vm972_vm5, %v964_v49, -inf }
 0x33d   : > { %974 = vmax.xlane.f32.xlu0 %v973_v53  ;;  %v966_v54 = vsel %vm965_vm6, %v962_v52, -inf  ;;  %v963_v55 = vadd.f32 %v960_v51, %v6585_v50 }
 0x33e   : > { %967 = vmax.xlane.f32.xlu1 %v966_v54 }
 0x33f   : > { %v969_v56 = vsel %vm965_vm6, %v963_v55, -inf }
 0x342   : > { %970 = vmax.xlane.f32.xlu1 %v969_v56 }
 0x353   : > { %1071 = vrot.lane.b32.xlu0 %v6557_v35, %s6327_s25  ;;  %1002 = vrot.lane.b32.xlu1 %v6557_v35, %s6328_s30 }
 0x3ca   : > { %v975_v57 = vpop.xlane.xlu0 %974 }
 0x3cb   : > { %v978_v58 = vsub.f32 %v964_v49, %v975_v57  ;;  %v968_v59 = vpop.xlane.xlu1 %967 }
 0x3cc   : > { %v976_v60 = vsub.f32 %v962_v52, %v968_v59 }
 0x3cd   : > { %v983_v61 = vmul.f32 1.442695, %v978_v58 }
 0x3ce   : > { %v979_v62 = vmul.f32 1.442695, %v976_v60  ;;  %v1072_v14 = vpop.permute.xlu0 %1071 }
 0x3cf   : > { %6204 = vpow2.f32 %v983_v61  ;;  %v971_v63 = vpop.xlane.xlu1 %970  ;;  %v1082_v24 = vsel %vm898_vm4, %v1072_v14, 0 }
 0x3d0   : > { %v977_v0 = vsub.f32 %v963_v55, %v971_v63  ;;  %6206 = vpow2.f32 %v979_v62 }
 0x3d2   : > { %v981_v1 = vmul.f32 1.442695, %v977_v0 }
 0x3d3   : > { %v1003_v2 = vpop.permute.xlu1 %1002 }
 0x3d4   : > { %5837 = vmatprep.subr.bf16.mxu0 %v1003_v2  ;;  %6208 = vpow2.f32 %v981_v1 }
 0x3d5   : > { %5838 = vmatpush3.bf16.msra.mxu0 %v1003_v2 }
 0x3d9   : > { %v6205_v3 = vpop.eup %6204 }
 0x3da   : > { %v991_v4 = vsel %vm972_vm5, %v6205_v3, 0.0  ;;  %v6207_v5 = vpop.eup %6206 }
 0x3db   : > { %992 = vadd.xlane.f32.xlu1 %v991_v4  ;;  %v985_v6 = vsel %vm965_vm6, %v6207_v5, 0.0 }
 0x3de   : > { %v6209_v7 = vpop.eup %6208 }
 0x3df   : > { %986 = vadd.xlane.f32.xlu1 %v985_v6  ;;  %v988_v8 = vsel %vm965_vm6, %v6209_v7, 0.0 }
 0x3e3   : > { %989 = vadd.xlane.f32.xlu1 %v988_v8 }
 0x3f4   : > { %1004 = vrot.lane.b32.xlu1 %v6562_v36, %s6328_s30  ;;  %s6338_s30 = smov 52  }
 0x3f8   : > { %1073 = vrot.lane.b32.xlu1 %v6562_v36, %s6327_s25  ;;  %s6337_s25 = smov 112  }
 0x3fc   : > { %1067 = vrot.lane.b32.xlu1 %v6557_v35, %s6329_s18 }
 0x400   : > { %1069 = vrot.lane.b32.xlu1 %v6562_v36, %s6329_s18  ;;  %s6339_s18 = smov 76  }
 0x468   : > { %v993_v9 = vpop.xlane.xlu1 %992 }
 0x469   : > { %6210 = vrcp.f32 %v993_v9 }
 0x46c   : > { %v987_v10 = vpop.xlane.xlu1 %986 }
 0x46d   : > { %6212 = vrcp.f32 %v987_v10 }
 0x470   : > { %v990_v11 = vpop.xlane.xlu1 %989 }
 0x471   : > { %6214 = vrcp.f32 %v990_v11 }
 0x473   : > { %v6211_v15 = vpop.eup %6210 }
 0x474   : > { %v1005_v12 = vpop.permute.xlu1 %1004  ;;  %v999_v19 = vmul.f32 %v6211_v15, %v6205_v3 }
 0x475   : > { %6007 = vmatprep.subr.msk.bf16.mxu0 %vm1013_vm7, %v1005_v12  ;;  %v1015_v13 = vsel %vm1013_vm7, %v1005_v12, 0  ;;  %v5264_v12 = vcombine.low %v6612_v28, %v6612_v28 }
 0x476   : > { %5840 = vmatpush3.bf16.msra.mxu0 %v1015_v13  ;;  %v1001_v23 = vpack.c.bf16 %v999_v19, %v999_v19 }
 0x477   : > { %6008 = vmatprep.subr.msk.bf16.mxu0 %vm898_vm4, %v1072_v14  ;;  %v6213_v16 = vpop.eup %6212  ;;  %v1243_v14 = vrot.slane %v5264_v12, 2 }
 0x478   : > { %v1074_v18 = vpop.permute.xlu1 %1073  ;;  %v997_v20 = vmul.f32 %v6213_v16, %v6207_v5 }
 0x479   : > { %v1085_v26 = vsel %vm898_vm4, %v1074_v18, 0 }
 0x47b   : > { %v6215_v17 = vpop.eup %6214 }
 0x47c   : > { %v998_v21 = vmul.f32 %v6215_v17, %v6209_v7  ;;  %v1068_v25 = vpop.permute.xlu1 %1067 }
 0x47e   : > { %v1000_v22 = vpack.c.bf16 %v998_v21, %v997_v20 }
 0x480   : > { %5841 = vmatprep.mubr.msk.bf16.mxu0 %vm965_vm6, %v1000_v22  ;;  %v1070_v27 = vpop.permute.xlu1 %1069 }
 0x481   : > { %5842 = vmatmul.mubr.msk.bf16.vlgmr.msra.gmra.mrb[4].mxu0 %vm965_vm6, %v1001_v23 }
 0x482   : > { %5846 = vmatpush3.bf16.xpose.msra.mxu0 %v1082_v24  ;;  %5849 = vmatprep.mubr.msk.bf16.mxu0 %vm898_vm4, %v1068_v25  ;;  %v1251_v25 = vsel %vm1013_vm7, %v1243_v14, 0 }
 0x483   : > { %6009 = vmatprep.subr.msk.bf16.mxu0 %vm898_vm4, %v1074_v18 }
 0x48a   : > { %5848 = vmatpush3.bf16.xpose.msra.mxu0 %v1085_v26 }
 0x48b   : > { %6012 = vmatprep.subr.msk.bf16.mxu0 %vm1013_vm7, %v6612_v28 }
 0x491   : > { %5850 = vmatmul.mubr.msk.bf16.vlgmr.msra.gmra.mrb[8].mxu0 %vm898_vm4, %v1070_v27 }
 0x492   : > { %5868 = vmatpush3.bf16.msra.mxu0 %v1308_v29 }
 0x554   : > { %v5843_v30 = vpop.f32.mrb[4].mxu0 }
 0x555   : > { %v1051_v31 = vpop.f32.mrb[5].mxu0  ;;  %v1066_v37 = vpack.c.bf16 %v5843_v30, %v5843_v30 }
 0x556   : > { %v5844_v32 = vpop.f32.mrb[6].mxu0 }
 0x557   : > { %v1054_v33 = vpop.f32.mrb[7].mxu0 }
 0x558   : > { %v1065_v34 = vpack.c.bf16 %v1054_v33, %v1051_v31 }
 0x55a   : > { %5869 = vmatprep.mubr.msk.bf16.mxu0 %vm898_vm4, %v1065_v34 }
 0x55b   : > { %5870 = vmatmul.mubr.msk.bf16.vlgmr.msra.gmra.mrb[12].mxu0 %vm898_vm4, %v1066_v37 }
 0x564   : > { %v5851_v38 = vpop.f32.mrb[8].mxu0 }
 0x565   : > { %v1121_v39 = vpop.f32.mrb[9].mxu0  ;;  %v1137_v40 = vmul.f32 0.5, %v5851_v38 }
 0x566   : > { %v1135_v41 = vmul.f32 0.5, %v1121_v39  ;;  %v5852_v43 = vpop.f32.mrb[10].mxu0 }
 0x567   : > { %v1124_v44 = vpop.f32.mrb[11].mxu0  ;;  %v1140_v51 = vadd.f32 %v1137_v40, %v6574_v42 }
 0x568   : > { %v1136_v46 = vmul.f32 0.5, %v1124_v44  ;;  %v1138_v47 = vadd.f32 %v1135_v41, %v6579_v45 }
 0x569   : > { %v1147_v53 = vsel %vm972_vm5, %v1140_v51, -inf }
 0x56a   : > { %v1141_v48 = vsel %vm965_vm6, %v1138_v47, -inf  ;;  %v1139_v49 = vadd.f32 %v1136_v46, %v6585_v50 }
 0x56b   : > { %1142 = vmax.xlane.f32.xlu1 %v1141_v48 }
 0x56c   : > { %v1144_v52 = vsel %vm965_vm6, %v1139_v49, -inf }
 0x56d   : > { %1145 = vmax.xlane.f32.xlu0 %v1144_v52 }
 0x56f   : > { %1148 = vmax.xlane.f32.xlu1 %v1147_v53 }
 0x5f8   : > { %v1143_v54 = vpop.xlane.xlu1 %1142 }
 0x5f9   : > { %v1150_v56 = vsub.f32 %v1138_v47, %v1143_v54 }
 0x5fa   : > { %v1146_v55 = vpop.xlane.xlu0 %1145 }
 0x5fb   : > { %v1151_v57 = vsub.f32 %v1139_v49, %v1146_v55  ;;  %v1153_v61 = vmul.f32 1.442695, %v1150_v56 }
 0x5fc   : > { %v1149_v58 = vpop.xlane.xlu1 %1148 }
 0x5fd   : > { %v1155_v59 = vmul.f32 1.442695, %v1151_v57  ;;  %v1152_v60 = vsub.f32 %v1140_v51, %v1149_v58 }
 0x5ff   : > { %6216 = vpow2.f32 %v1155_v59  ;;  %v1157_v62 = vmul.f32 1.442695, %v1152_v60 }
 0x601   : > { %6218 = vpow2.f32 %v1157_v62 }
 0x602   : > { %6220 = vpow2.f32 %v1153_v61 }
 0x609   : > { %v6217_v63 = vpop.eup %6216 }
 0x60a   : > { %v1162_v0 = vsel %vm965_vm6, %v6217_v63, 0.0 }
 0x60b   : > { %v6219_v1 = vpop.eup %6218  ;;  %1163 = vadd.xlane.f32.xlu1 %v1162_v0 }
 0x60c   : > { %v1165_v2 = vsel %vm972_vm5, %v6219_v1, 0.0  ;;  %v6221_v3 = vpop.eup %6220 }
 0x60d   : > { %1166 = vadd.xlane.f32.xlu0 %v1165_v2  ;;  %v1159_v4 = vsel %vm965_vm6, %v6221_v3, 0.0 }
 0x611   : > { %1160 = vadd.xlane.f32.xlu0 %v1159_v4 }
 0x61c   : > { %1176 = vrot.lane.b32.xlu1 %v6557_v35, %s6330_s27 }
 0x620   : > { %1362 = vrot.lane.b32.xlu1 %v6557_v35, %s6331_s24 }
 0x624   : > { %1364 = vrot.lane.b32.xlu1 %v6562_v36, %s6331_s24  ;;  %s6341_s24 = smov 48  }
 0x627   : > { %1178 = vrot.lane.b32.xlu0 %v6562_v36, %s6330_s27  ;;  %s6340_s27 = smov 108  }
 0x628   : > { %1360 = vrot.lane.b32.xlu1 %v6562_v36, %s6332_s23 }
 0x62b   : > { %1358 = vrot.lane.b32.xlu0 %v6557_v35, %s6332_s23  ;;  %s6342_s23 = smov 72  }
 0x62c   : > { %1597 = vrot.lane.b32.xlu1 %v6562_v36, %s6333_s0 }
 0x62e   : > { %v6636_v5 = vpop.f32.mrb[12].mxu0 }
 0x62f   : > { %1595 = vrot.lane.b32.xlu0 %v6557_v35, %s6333_s0  ;;  %v6639_v6 = vpop.f32.mrb[13].mxu0  ;;  %s6343_s0 = smov 104  }
 0x630   : > { %1593 = vrot.lane.b32.xlu1 %v6562_v36, %s6334_s17  ;;  %v5872_v7 = vpop.f32.mrb[14].mxu0 }
 0x631   : > { %v6642_v8 = vpop.f32.mrb[15].mxu0 }
 0x633   : > { %1591 = vrot.lane.b32.xlu0 %v6557_v35, %s6334_s17  ;;  %s6344_s17 = smov 44  }
 0x698   : > { %v1164_v9 = vpop.xlane.xlu1 %1163 }
 0x69a   : > { %v1167_v10 = vpop.xlane.xlu0 %1166 }
 0x69b   : > { %6222 = vrcp.f32 %v1167_v10 }
 0x69c   : > { %v1177_v11 = vpop.permute.xlu1 %1176  ;;  %6224 = vrcp.f32 %v1164_v9 }
 0x69d   : > { %5853 = vmatprep.subr.bf16.mxu1 %v1177_v11 }
 0x69e   : > { %5854 = vmatpush3.bf16.msra.mxu1 %v1177_v11  ;;  %v1161_v13 = vpop.xlane.xlu0 %1160 }
 0x69f   : > { %6226 = vrcp.f32 %v1161_v13 }
 0x6a0   : > { %v1363_v26 = vpop.permute.xlu1 %1362 }
 0x6a1   : > { %v1373_v33 = vsel %vm898_vm4, %v1363_v26, 0 }
 0x6a2   : > { %v1179_v15 = vpop.permute.xlu0 %1178 }
 0x6a3   : > { %v1188_v16 = vsel %vm1013_vm7, %v1179_v15, 0  ;;  %6010 = vmatprep.subr.msk.bf16.mxu1 %vm1013_vm7, %v1179_v15 }
 0x6a4   : > { %5856 = vmatpush3.bf16.msra.mxu1 %v1188_v16  ;;  %v1365_v37 = vpop.permute.xlu1 %1364 }
 0x6a5   : > { %6011 = vmatprep.subr.msk.bf16.mxu1 %vm1013_vm7, %v1243_v14  ;;  %v6223_v17 = vpop.eup %6222  ;;  %v1376_v38 = vsel %vm898_vm4, %v1365_v37, 0 }
 0x6a6   : > { %v6225_v18 = vpop.eup %6224  ;;  %v1173_v20 = vmul.f32 %v6223_v17, %v6219_v1  ;;  %v1359_v34 = vpop.permute.xlu0 %1358 }
 0x6a7   : > { %v1172_v22 = vmul.f32 %v6225_v18, %v6217_v63 }
 0x6a8   : > { %v1175_v24 = vpack.c.bf16 %v1173_v20, %v1173_v20  ;;  %v1361_v40 = vpop.permute.xlu1 %1360 }
 0x6a9   : > { %v6227_v19 = vpop.eup %6226 }
 0x6aa   : > { %v1171_v21 = vmul.f32 %v6227_v19, %v6221_v3  ;;  %v1596_v39 = vpop.permute.xlu0 %1595 }
 0x6ab   : > { %v1606_v41 = vsel %vm898_vm4, %v1596_v39, 0 }
 0x6ac   : > { %v1174_v23 = vpack.c.bf16 %v1172_v22, %v1171_v21  ;;  %v1598_v44 = vpop.permute.xlu1 %1597 }
 0x6ad   : > { %v1609_v46 = vsel %vm898_vm4, %v1598_v44, 0 }
 0x6ae   : > { %5857 = vmatprep.mubr.msk.bf16.mxu1 %vm965_vm6, %v1174_v23  ;;  %v1592_v43 = vpop.permute.xlu0 %1591 }
 0x6af   : > { %5858 = vmatmul.mubr.msk.bf16.vlgmr.msra.gmra.mrb[4].mxu1 %vm965_vm6, %v1175_v24 }
 0x6b0   : > { %5862 = vmatpush3.bf16.msra.mxu1 %v1251_v25  ;;  %v1594_v47 = vpop.permute.xlu1 %1593 }
 0x6b1   : > { %6013 = vmatprep.subr.msk.bf16.mxu1 %vm898_vm4, %v1363_v26 }
 0x782   : > { %v5859_v27 = vpop.f32.mrb[4].mxu1 }
 0x783   : > { %v1224_v28 = vpop.f32.mrb[5].mxu1  ;;  %v1239_v32 = vpack.c.bf16 %v5859_v27, %v5859_v27 }
 0x784   : > { %v5860_v29 = vpop.f32.mrb[6].mxu1 }
 0x785   : > { %v1227_v30 = vpop.f32.mrb[7].mxu1 }
 0x786   : > { %v1238_v31 = vpack.c.bf16 %v1227_v30, %v1224_v28 }
 0x788   : > { %5863 = vmatprep.mubr.msk.bf16.mxu1 %vm898_vm4, %v1238_v31 }
 0x789   : > { %5864 = vmatmul.mubr.msk.bf16.vlgmr.msra.gmra.mrb[8].mxu1 %vm898_vm4, %v1239_v32 }
 0x78a   : > { %5874 = vmatpush3.bf16.xpose.msra.mxu1 %v1373_v33  ;;  %5877 = vmatprep.mubr.msk.bf16.mxu1 %vm898_vm4, %v1359_v34 }
 0x78b   : > { %6014 = vmatprep.subr.msk.bf16.mxu1 %vm898_vm4, %v1365_v37 }
 0x792   : > { %5876 = vmatpush3.bf16.xpose.msra.mxu1 %v1376_v38 }
 0x793   : > { %6017 = vmatprep.subr.msk.bf16.mxu1 %vm898_vm4, %v1596_v39 }
 0x799   : > { %5878 = vmatmul.mubr.msk.bf16.vlgmr.msra.gmra.mrb[12].mxu1 %vm898_vm4, %v1361_v40 }
 0x79a   : > { %5896 = vmatpush3.bf16.xpose.msra.mxu1 %v1606_v41  ;;  %5899 = vmatprep.mubr.msk.bf16.mxu1 %vm898_vm4, %v1592_v43 }
 0x79b   : > { %6018 = vmatprep.subr.msk.bf16.mxu1 %vm898_vm4, %v1598_v44 }
 0x7a2   : > { %5898 = vmatpush3.bf16.xpose.msra.mxu1 %v1609_v46 }
 0x7a9   : > { %5900 = vmatmul.mubr.msk.bf16.vlgmr.msra.gmra.mrb[16].mxu1 %vm898_vm4, %v1594_v47 }
 0x85c   : > { %v5865_v48 = vpop.f32.mrb[8].mxu1 }
 0x85d   : > { %v6668_v49 = vadd.f32 %v6636_v5, %v5865_v48  ;;  %v1287_v51 = vpop.f32.mrb[9].mxu1 }
 0x85e   : > { %v6671_v52 = vadd.f32 %v6639_v6, %v1287_v51  ;;  %v5866_v53 = vpop.f32.mrb[10].mxu1 }
 0x85f   : > { %v1290_v54 = vpop.f32.mrb[11].mxu1 }
 0x860   : > { %v6674_v55 = vadd.f32 %v6642_v8, %v1290_v54 }
 0x86c   : > { %v5879_v56 = vpop.f32.mrb[12].mxu1 }
 0x86d   : > { %v1412_v57 = vpop.f32.mrb[13].mxu1  ;;  %v1428_v58 = vmul.f32 0.5, %v5879_v56 }
 0x86e   : > { %v1426_v59 = vmul.f32 0.5, %v1412_v57  ;;  %v5880_v60 = vpop.f32.mrb[14].mxu1 }
 0x86f   : > { %v1415_v61 = vpop.f32.mrb[15].mxu1  ;;  %v1431_v2 = vadd.f32 %v1428_v58, %v6574_v42 }
 0x870   : > { %v1427_v62 = vmul.f32 0.5, %v1415_v61  ;;  %v1429_v63 = vadd.f32 %v1426_v59, %v6579_v45 }
 0x871   : > { %v1438_v4 = vsel %vm972_vm5, %v1431_v2, -inf }
 0x872   : > { %v1432_v0 = vsel %vm965_vm6, %v1429_v63, -inf  ;;  %v1430_v1 = vadd.f32 %v1427_v62, %v6585_v50 }
 0x873   : > { %1433 = vmax.xlane.f32.xlu0 %v1432_v0 }
 0x874   : > { %v1435_v3 = vsel %vm965_vm6, %v1430_v1, -inf }
 0x875   : > { %1436 = vmax.xlane.f32.xlu1 %v1435_v3 }
 0x877   : > { %1439 = vmax.xlane.f32.xlu0 %v1438_v4 }
 0x87c   : > { %v5901_v5 = vpop.f32.mrb[16].mxu1 }
 0x87d   : > { %v1645_v6 = vpop.f32.mrb[17].mxu1  ;;  %v1661_v26 = vmul.f32 0.5, %v5901_v5 }
 0x87e   : > { %v5902_v7 = vpop.f32.mrb[18].mxu1  ;;  %v1659_v24 = vmul.f32 0.5, %v1645_v6 }
 0x87f   : > { %v1648_v8 = vpop.f32.mrb[19].mxu1  ;;  %v1664_v30 = vadd.f32 %v1661_v26, %v6574_v42 }
 0x880   : > { %v1660_v25 = vmul.f32 0.5, %v1648_v8  ;;  %v1662_v27 = vadd.f32 %v1659_v24, %v6579_v45 }
 0x881   : > { %v1671_v32 = vsel %vm972_vm5, %v1664_v30, -inf }
 0x882   : > { %v1663_v28 = vadd.f32 %v1660_v25, %v6585_v50  ;;  %v1665_v29 = vsel %vm965_vm6, %v1662_v27, -inf }
 0x884   : > { %v1668_v31 = vsel %vm965_vm6, %v1663_v28, -inf }
 0x900   : > { %v1434_v9 = vpop.xlane.xlu0 %1433 }
 0x901   : > { %v1441_v11 = vsub.f32 %v1429_v63, %v1434_v9 }
 0x902   : > { %v1437_v10 = vpop.xlane.xlu1 %1436 }
 0x903   : > { %v1442_v12 = vsub.f32 %v1430_v1, %v1437_v10  ;;  %v1444_v16 = vmul.f32 1.442695, %v1441_v11 }
 0x904   : > { %v1440_v13 = vpop.xlane.xlu0 %1439 }
 0x905   : > { %v1446_v14 = vmul.f32 1.442695, %v1442_v12  ;;  %v1443_v15 = vsub.f32 %v1431_v2, %v1440_v13  ;;  %v884_v12 = vld [vmem:[%s6463_s21 + $0x4] sm:$0xf] }
 0x906   : > { %v1538_v13 = vsel %vm1013_vm7, %v884_v12, 0 }
 0x907   : > { %6228 = vpow2.f32 %v1446_v14  ;;  %v1448_v17 = vmul.f32 1.442695, %v1443_v15 }
 0x909   : > { %6230 = vpow2.f32 %v1448_v17 }
 0x90a   : > { %6232 = vpow2.f32 %v1444_v16 }
 0x911   : > { %v6229_v18 = vpop.eup %6228 }
 0x912   : > { %v1453_v19 = vsel %vm965_vm6, %v6229_v18, 0.0 }
 0x913   : > { %v6231_v20 = vpop.eup %6230  ;;  %1454 = vadd.xlane.f32.xlu1 %v1453_v19 }
 0x914   : > { %v1456_v21 = vsel %vm972_vm5, %v6231_v20, 0.0  ;;  %v6233_v22 = vpop.eup %6232 }
 0x915   : > { %1457 = vadd.xlane.f32.xlu0 %v1456_v21  ;;  %v1450_v23 = vsel %vm965_vm6, %v6233_v22, 0.0 }
 0x919   : > { %1451 = vadd.xlane.f32.xlu0 %v1450_v23 }
 0x924   : > { %1467 = vrot.lane.b32.xlu1 %v6557_v35, %s6335_s29 }
 0x928   : > { %1832 = vrot.lane.b32.xlu1 %v6557_v35, %s6336_s19 }
 0x92c   : > { %1834 = vrot.lane.b32.xlu1 %v6562_v36, %s6336_s19  ;;  %s6346_s19 = smov 100  }
 0x92f   : > { %1469 = vrot.lane.b32.xlu0 %v6562_v36, %s6335_s29  ;;  %s6345_s29 = smov 68  }
 0x930   : > { %1830 = vrot.lane.b32.xlu1 %v6562_v36, %s6337_s25 }
 0x933   : > { %1828 = vrot.lane.b32.xlu0 %v6557_v35, %s6337_s25  ;;  %s7433_s25 = scalar_lea.vmem %s7397_s10, %s6448_s26 }
 0x952   : > { %1666 = vmax.xlane.f32.xlu0 %v1665_v29 }
 0x954   : > { %1669 = vmax.xlane.f32.xlu1 %v1668_v31 }
 0x956   : > { %1672 = vmax.xlane.f32.xlu0 %v1671_v32 }
 0x9a0   : > { %v1455_v33 = vpop.xlane.xlu1 %1454 }
 0x9a2   : > { %v1458_v34 = vpop.xlane.xlu0 %1457 }
 0x9a3   : > { %6234 = vrcp.f32 %v1458_v34 }
 0x9a4   : > { %v1468_v37 = vpop.permute.xlu1 %1467  ;;  %6236 = vrcp.f32 %v1455_v33 }
 0x9a5   : > { %5881 = vmatprep.subr.bf16.mxu0 %v1468_v37 }
 0x9a6   : > { %5882 = vmatpush3.bf16.msra.mxu0 %v1468_v37  ;;  %v1452_v38 = vpop.xlane.xlu0 %1451  ;;  %v5279_v37 = vcombine.low %v884_v12, %v884_v12 }
 0x9a7   : > { %6238 = vrcp.f32 %v1452_v38 }
 0x9a8   : > { %v1833_v39 = vpop.permute.xlu1 %1832 }
 0x9a9   : > { %v1843_v40 = vsel %vm898_vm4, %v1833_v39, 0  ;;  %6021 = vmatprep.subr.msk.bf16.mxu1 %vm898_vm4, %v1833_v39 }
 0x9aa   : > { %5918 = vmatpush3.bf16.xpose.msra.mxu1 %v1843_v40  ;;  %v1470_v41 = vpop.permute.xlu0 %1469 }
 0x9ab   : > { %v1479_v43 = vsel %vm1013_vm7, %v1470_v41, 0  ;;  %6015 = vmatprep.subr.msk.bf16.mxu0 %vm1013_vm7, %v1470_v41 }
 0x9ac   : > { %v1835_v44 = vpop.permute.xlu1 %1834  ;;  %5884 = vmatpush3.bf16.msra.mxu0 %v1479_v43 }
 0x9ad   : > { %6022 = vmatprep.subr.msk.bf16.mxu1 %vm898_vm4, %v1835_v44  ;;  %v6235_v46 = vpop.eup %6234  ;;  %v1846_v54 = vsel %vm898_vm4, %v1835_v44, 0  ;;  %6016 = vmatprep.subr.msk.bf16.mxu0 %vm1013_vm7, %v884_v12 }
 0x9ae   : > { %v1829_v47 = vpop.permute.xlu0 %1828  ;;  %v6237_v48 = vpop.eup %6236  ;;  %v1464_v53 = vmul.f32 %v6235_v46, %v6231_v20 }
 0x9af   : > { %5921 = vmatprep.mubr.msk.bf16.mxu1 %vm898_vm4, %v1829_v47  ;;  %v1463_v57 = vmul.f32 %v6237_v48, %v6229_v18 }
 0x9b0   : > { %v1466_v59 = vpack.c.bf16 %v1464_v53, %v1464_v53  ;;  %v1831_v60 = vpop.permute.xlu1 %1830 }
 0x9b1   : > { %v6239_v51 = vpop.eup %6238 }
 0x9b2   : > { %5920 = vmatpush3.bf16.xpose.msra.mxu1 %v1846_v54  ;;  %v1462_v56 = vmul.f32 %v6239_v51, %v6233_v22 }
 0x9b4   : > { %v1465_v58 = vpack.c.bf16 %v1463_v57, %v1462_v56  ;;  %v1767_v56 = vrot.slane %v5279_v37, 2 }
 0x9b6   : > { %5885 = vmatprep.mubr.msk.bf16.mxu0 %vm965_vm6, %v1465_v58 }
 0x9b7   : > { %5886 = vmatmul.mubr.msk.bf16.vlgmr.msra.gmra.mrb[16].mxu0 %vm965_vm6, %v1466_v59 }
 0x9b8   : > { %5890 = vmatpush3.bf16.msra.mxu0 %v1538_v13 }
 0x9b9   : > { %5922 = vmatmul.mubr.msk.bf16.vlgmr.msra.gmra.mrb[20].mxu1 %vm898_vm4, %v1831_v60 }
 0x9df   : > { %v1667_v61 = vpop.xlane.xlu0 %1666 }
 0x9e0   : > { %v1674_v63 = vsub.f32 %v1662_v27, %v1667_v61 }
 0x9e1   : > { %v1670_v62 = vpop.xlane.xlu1 %1669 }
 0x9e2   : > { %v1675_v0 = vsub.f32 %v1663_v28, %v1670_v62  ;;  %v1677_v4 = vmul.f32 1.442695, %v1674_v63  ;;  %v1775_v63 = vsel %vm1013_vm7, %v1767_v56, 0 }
 0x9e3   : > { %v1673_v1 = vpop.xlane.xlu0 %1672 }
 0x9e4   : > { %v1679_v2 = vmul.f32 1.442695, %v1675_v0  ;;  %v1676_v3 = vsub.f32 %v1664_v30, %v1673_v1 }
 0x9e6   : > { %6240 = vpow2.f32 %v1679_v2  ;;  %v1681_v5 = vmul.f32 1.442695, %v1676_v3 }
 0x9e8   : > { %6242 = vpow2.f32 %v1681_v5 }
 0x9e9   : > { %6244 = vpow2.f32 %v1677_v4 }
 0x9f0   : > { %v6241_v6 = vpop.eup %6240 }
 0x9f1   : > { %v1686_v7 = vsel %vm965_vm6, %v6241_v6, 0.0 }
 0x9f2   : > { %v6708_v8 = vpop.eup %6242  ;;  %1687 = vadd.xlane.f32.xlu1 %v1686_v7 }
 0x9f3   : > { %v1689_v9 = vsel %vm972_vm5, %v6708_v8, 0.0  ;;  %v6245_v10 = vpop.eup %6244 }
 0x9f4   : > { %1690 = vadd.xlane.f32.xlu0 %v1689_v9  ;;  %v1683_v11 = vsel %vm965_vm6, %v6245_v10, 0.0 }
 0x9f8   : > { %1684 = vadd.xlane.f32.xlu0 %v1683_v11 }
 0xa03   : > { %1700 = vrot.lane.b32.xlu1 %v6557_v35, %s6338_s30 }
 0xa07   : > { %2065 = vrot.lane.b32.xlu1 %v6557_v35, %s6339_s18 }
 0xa0b   : > { %2067 = vrot.lane.b32.xlu1 %v6562_v36, %s6339_s18 }
 0xa0e   : > { %1702 = vrot.lane.b32.xlu0 %v6562_v36, %s6338_s30 }
 0xa0f   : > { %2063 = vrot.lane.b32.xlu1 %v6562_v36, %s6340_s27 }
 0xa12   : > { %2061 = vrot.lane.b32.xlu0 %v6557_v35, %s6340_s27 }
 0xa7f   : > { %v1688_v14 = vpop.xlane.xlu1 %1687 }
 0xa80   : > { %6246 = vrcp.f32 %v1688_v14 }
 0xa81   : > { %v1691_v15 = vpop.xlane.xlu0 %1690 }
 0xa82   : > { %6248 = vrcp.f32 %v1691_v15 }
 0xa83   : > { %v1701_v16 = vpop.permute.xlu1 %1700 }
 0xa84   : > { %5903 = vmatprep.subr.bf16.mxu0 %v1701_v16 }
 0xa85   : > { %v1685_v17 = vpop.xlane.xlu0 %1684 }
 0xa86   : > { %6250 = vrcp.f32 %v1685_v17 }
 0xa87   : > { %v2066_v18 = vpop.permute.xlu1 %2065 }
 0xa88   : > { %v2076_v19 = vsel %vm898_vm4, %v2066_v18, 0  ;;  %6025 = vmatprep.subr.msk.bf16.mxu1 %vm898_vm4, %v2066_v18 }
 0xa89   : > { %5940 = vmatpush3.bf16.xpose.msra.mxu1 %v2076_v19  ;;  %v1703_v20 = vpop.permute.xlu0 %1702 }
 0xa8a   : > { %v5887_v21 = vpop.f32.mrb[16].mxu0  ;;  %v6247_v28 = vpop.eup %6246  ;;  %v1712_v59 = vsel %vm1013_vm7, %v1703_v20, 0 }
 0xa8b   : > { %v2068_v22 = vpop.permute.xlu1 %2067  ;;  %v1515_v23 = vpop.f32.mrb[17].mxu0  ;;  %v1530_v38 = vpack.c.bf16 %v5887_v21, %v5887_v21  ;;  %v1696_v47 = vmul.f32 %v6247_v28, %v6241_v6 }
 0xa8c   : > { %v5888_v24 = vpop.f32.mrb[18].mxu0  ;;  %v5923_v25 = vpop.f32.mrb[20].mxu1  ;;  %6026 = vmatprep.subr.msk.bf16.mxu1 %vm898_vm4, %v2068_v22  ;;  %v2079_v41 = vsel %vm898_vm4, %v2068_v22, 0 }
 0xa8d   : > { %v1518_v26 = vpop.f32.mrb[19].mxu0  ;;  %v1882_v27 = vpop.f32.mrb[21].mxu1  ;;  %v1898_v29 = vmul.f32 0.5, %v5923_v25 }
 0xa8e   : > { %v1529_v30 = vpack.c.bf16 %v1518_v26, %v1515_v23  ;;  %v1896_v31 = vmul.f32 0.5, %v1882_v27  ;;  %v2062_v32 = vpop.permute.xlu0 %2061  ;;  %v5924_v33 = vpop.f32.mrb[22].mxu1 }
 0xa8f   : > { %v6249_v34 = vpop.eup %6248  ;;  %5943 = vmatprep.mubr.msk.bf16.mxu1 %vm898_vm4, %v2062_v32  ;;  %v1885_v39 = vpop.f32.mrb[23].mxu1  ;;  %v1901_v53 = vadd.f32 %v1898_v29, %v6574_v42 }
 0xa90   : > { %v6251_v40 = vpop.eup %6250  ;;  %v1897_v43 = vmul.f32 0.5, %v1885_v39  ;;  %5891 = vmatprep.mubr.msk.bf16.mxu0 %vm898_vm4, %v1529_v30  ;;  %v1899_v44 = vadd.f32 %v1896_v31, %v6579_v45  ;;  %v1697_v54 = vmul.f32 %v6249_v34, %v6708_v8  ;;  %v2064_v61 = vpop.permute.xlu1 %2063 }
 0xa91   : > { %5892 = vmatmul.mubr.msk.bf16.vlgmr.msra.gmra.mrb[20].mxu0 %vm898_vm4, %v1530_v38  ;;  %5942 = vmatpush3.bf16.xpose.msra.mxu1 %v2079_v41  ;;  %v1695_v46 = vmul.f32 %v6251_v40, %v6245_v10  ;;  %v1908_v60 = vsel %vm972_vm5, %v1901_v53, -inf }
 0xa92   : > { %5904 = vmatpush3.bf16.msra.mxu0 %v1701_v16  ;;  %v1902_v48 = vsel %vm965_vm6, %v1899_v44, -inf  ;;  %v1900_v51 = vadd.f32 %v1897_v43, %v6585_v50  ;;  %v1699_v62 = vpack.c.bf16 %v1697_v54, %v1697_v54 }
 0xa93   : > { %6019 = vmatprep.subr.msk.bf16.mxu0 %vm1013_vm7, %v1703_v20  ;;  %1903 = vmax.xlane.f32.xlu0 %v1902_v48  ;;  %v1698_v57 = vpack.c.bf16 %v1696_v47, %v1695_v46 }
 0xa94   : > { %v1905_v58 = vsel %vm965_vm6, %v1900_v51, -inf }
 0xa95   : > { %1906 = vmax.xlane.f32.xlu1 %v1905_v58  ;;  %5907 = vmatprep.mubr.msk.bf16.mxu0 %vm965_vm6, %v1698_v57 }
 0xa96   : > { %5906 = vmatpush3.bf16.msra.mxu0 %v1712_v59 }
 0xa97   : > { %1909 = vmax.xlane.f32.xlu0 %v1908_v60  ;;  %6020 = vmatprep.subr.msk.bf16.mxu0 %vm1013_vm7, %v1767_v56 }
 0xa98   : > { %5944 = vmatmul.mubr.msk.bf16.vlgmr.msra.gmra.mrb[24].mxu1 %vm898_vm4, %v2064_v61 }
 0xa99   : > { %5908 = vmatmul.mubr.msk.bf16.vlgmr.msra.gmra.mrb[24].mxu0 %vm965_vm6, %v1699_v62 }
 0xa9a   : > { %5912 = vmatpush3.bf16.msra.mxu0 %v1775_v63 }
 0xb20   : > { %v1904_v0 = vpop.xlane.xlu0 %1903 }
 0xb21   : > { %v1911_v2 = vsub.f32 %v1899_v44, %v1904_v0 }
 0xb22   : > { %v1907_v1 = vpop.xlane.xlu1 %1906 }
 0xb23   : > { %v1912_v3 = vsub.f32 %v1900_v51, %v1907_v1  ;;  %v1914_v7 = vmul.f32 1.442695, %v1911_v2 }
 0xb24   : > { %v1910_v4 = vpop.xlane.xlu0 %1909 }
 0xb25   : > { %v1916_v5 = vmul.f32 1.442695, %v1912_v3  ;;  %v1913_v6 = vsub.f32 %v1901_v53, %v1910_v4 }
 0xb27   : > { %6252 = vpow2.f32 %v1916_v5  ;;  %v1918_v8 = vmul.f32 1.442695, %v1913_v6 }
 0xb29   : > { %6254 = vpow2.f32 %v1918_v8 }
 0xb2a   : > { %6256 = vpow2.f32 %v1914_v7 }
 0xb31   : > { %v6743_v9 = vpop.eup %6252 }
 0xb32   : > { %v1923_v10 = vsel %vm965_vm6, %v6743_v9, 0.0 }
 0xb33   : > { %v6747_v11 = vpop.eup %6254  ;;  %1924 = vadd.xlane.f32.xlu1 %v1923_v10 }
 0xb34   : > { %v1926_v12 = vsel %vm972_vm5, %v6747_v11, 0.0  ;;  %v6751_v13 = vpop.eup %6256 }
 0xb35   : > { %1927 = vadd.xlane.f32.xlu0 %v1926_v12  ;;  %v1920_v14 = vsel %vm965_vm6, %v6751_v13, 0.0 }
 0xb39   : > { %1921 = vadd.xlane.f32.xlu0 %v1920_v14  ;;  %v6804_v14 = vld [vmem:[%s6463_s21 + $0x8] sm:$0xf] }
 0xb44   : > { %1937 = vrot.lane.b32.xlu1 %v6557_v35, %s6341_s24 }
 0xb48   : > { %2302 = vrot.lane.b32.xlu1 %v6557_v35, %s6342_s23 }
 0xb4c   : > { %2304 = vrot.lane.b32.xlu1 %v6562_v36, %s6342_s23 }
 0xb4f   : > { %1939 = vrot.lane.b32.xlu0 %v6562_v36, %s6341_s24 }
 0xb50   : > { %2300 = vrot.lane.b32.xlu1 %v6562_v36, %s6343_s0 }
 0xb53   : > { %2298 = vrot.lane.b32.xlu0 %v6557_v35, %s6343_s0  ;;  %s6347_s0 = smov 40  }
 0xb64   : > { %v5893_v15 = vpop.f32.mrb[20].mxu0 }
 0xb65   : > { %v6762_v16 = vadd.f32 %v5893_v15, %v6668_v49  ;;  %v1574_v17 = vpop.f32.mrb[21].mxu0  ;;  %v2008_v15 = vsel %vm1013_vm7, %v6804_v14, 0 }
 0xb66   : > { %v6765_v18 = vadd.f32 %v1574_v17, %v6671_v52  ;;  %v5894_v19 = vpop.f32.mrb[22].mxu0 }
 0xb67   : > { %v1577_v20 = vpop.f32.mrb[23].mxu0 }
 0xb68   : > { %v6768_v21 = vadd.f32 %v1577_v20, %v6674_v55 }
 0xb6b   : > { %v5945_v22 = vpop.f32.mrb[24].mxu1 }
 0xb6c   : > { %v5909_v23 = vpop.f32.mrb[24].mxu0  ;;  %v2115_v24 = vpop.f32.mrb[25].mxu1  ;;  %v2131_v25 = vmul.f32 0.5, %v5945_v22 }
 0xb6d   : > { %v2129_v26 = vmul.f32 0.5, %v2115_v24  ;;  %v1748_v27 = vpop.f32.mrb[25].mxu0  ;;  %v5946_v28 = vpop.f32.mrb[26].mxu1  ;;  %v1763_v33 = vpack.c.bf16 %v5909_v23, %v5909_v23 }
 0xb6e   : > { %v5910_v29 = vpop.f32.mrb[26].mxu0  ;;  %v2118_v30 = vpop.f32.mrb[27].mxu1  ;;  %v2134_v37 = vadd.f32 %v2131_v25, %v6574_v42 }
 0xb6f   : > { %v2130_v49 = vmul.f32 0.5, %v2118_v30  ;;  %v1751_v31 = vpop.f32.mrb[27].mxu0  ;;  %v2132_v32 = vadd.f32 %v2129_v26, %v6579_v45 }
 0xb70   : > { %v1762_v52 = vpack.c.bf16 %v1751_v31, %v1748_v27  ;;  %v2141_v39 = vsel %vm972_vm5, %v2134_v37, -inf }
 0xb71   : > { %v2135_v34 = vsel %vm965_vm6, %v2132_v32, -inf  ;;  %v2133_v55 = vadd.f32 %v2130_v49, %v6585_v50 }
 0xb72   : > { %5913 = vmatprep.mubr.msk.bf16.mxu0 %vm898_vm4, %v1762_v52  ;;  %2136 = vmax.xlane.f32.xlu0 %v2135_v34 }
 0xb73   : > { %5914 = vmatmul.mubr.msk.bf16.vlgmr.msra.gmra.mrb[28].mxu0 %vm898_vm4, %v1763_v33  ;;  %v2138_v38 = vsel %vm965_vm6, %v2133_v55, -inf }
 0xb74   : > { %2139 = vmax.xlane.f32.xlu1 %v2138_v38 }
 0xb76   : > { %2142 = vmax.xlane.f32.xlu0 %v2141_v39 }
 0xbc0   : > { %v1925_v45 = vpop.xlane.xlu1 %1924 }
 0xbc2   : > { %v1928_v40 = vpop.xlane.xlu0 %1927 }
 0xbc3   : > { %6258 = vrcp.f32 %v1928_v40 }
 0xbc4   : > { %v1938_v41 = vpop.permute.xlu1 %1937  ;;  %6260 = vrcp.f32 %v1925_v45 }
 0xbc5   : > { %5925 = vmatprep.subr.bf16.mxu0 %v1938_v41 }
 0xbc6   : > { %5926 = vmatpush3.bf16.msra.mxu0 %v1938_v41  ;;  %v1922_v50 = vpop.xlane.xlu0 %1921 }
 0xbc7   : > { %6262 = vrcp.f32 %v1922_v50  ;;  %v5292_v50 = vcombine.low %v6804_v14, %v6804_v14 }
 0xbc8   : > { %v2303_v42 = vpop.permute.xlu1 %2302 }
 0xbc9   : > { %v2313_v43 = vsel %vm898_vm4, %v2303_v42, 0  ;;  %6029 = vmatprep.subr.msk.bf16.mxu1 %vm898_vm4, %v2303_v42 }
 0xbca   : > { %5962 = vmatpush3.bf16.xpose.msra.mxu1 %v2313_v43  ;;  %v1940_v44 = vpop.permute.xlu0 %1939 }
 0xbcb   : > { %v1949_v46 = vsel %vm1013_vm7, %v1940_v44, 0  ;;  %6023 = vmatprep.subr.msk.bf16.mxu0 %vm1013_vm7, %v1940_v44 }
 0xbcc   : > { %v2305_v47 = vpop.permute.xlu1 %2304  ;;  %5928 = vmatpush3.bf16.msra.mxu0 %v1949_v46 }
 0xbcd   : > { %6030 = vmatprep.subr.msk.bf16.mxu1 %vm898_vm4, %v2305_v47  ;;  %v6259_v48 = vpop.eup %6258  ;;  %v2316_v57 = vsel %vm898_vm4, %v2305_v47, 0  ;;  %6024 = vmatprep.subr.msk.bf16.mxu0 %vm1013_vm7, %v6804_v14 }
 0xbce   : > { %v2299_v51 = vpop.permute.xlu0 %2298  ;;  %v6261_v53 = vpop.eup %6260  ;;  %v1934_v56 = vmul.f32 %v6259_v48, %v6747_v11  ;;  %v6836_v48 = vld [vmem:[%s7430_s22] sm:$0xff] }
 0xbcf   : > { %5965 = vmatprep.mubr.msk.bf16.mxu1 %vm898_vm4, %v2299_v51  ;;  %v1933_v59 = vmul.f32 %v6261_v53, %v6743_v9 }
 0xbd0   : > { %v1936_v61 = vpack.c.bf16 %v1934_v56, %v1934_v56  ;;  %v2301_v62 = vpop.permute.xlu1 %2300 }
 0xbd1   : > { %v6263_v54 = vpop.eup %6262 }
 0xbd2   : > { %5964 = vmatpush3.bf16.xpose.msra.mxu1 %v2316_v57  ;;  %v1932_v58 = vmul.f32 %v6263_v54, %v6751_v13  ;;  %v6846_v57 = vld [vmem:[%s7430_s22 + $0x8] sm:$0xff] }
 0xbd4   : > { %v1935_v60 = vpack.c.bf16 %v1933_v59, %v1932_v58  ;;  %v6852_v59 = vld [vmem:[%s7430_s22 + $0x10] sm:$0xf] }
 0xbd6   : > { %5929 = vmatprep.mubr.msk.bf16.mxu0 %vm965_vm6, %v1935_v60 }
 0xbd7   : > { %5930 = vmatmul.mubr.msk.bf16.vlgmr.msra.gmra.mrb[32].mxu0 %vm965_vm6, %v1936_v61 }
 0xbd8   : > { %5934 = vmatpush3.bf16.msra.mxu0 %v2008_v15 }
 0xbd9   : > { %5966 = vmatmul.mubr.msk.bf16.vlgmr.msra.gmra.mrb[28].mxu1 %vm898_vm4, %v2301_v62  ;;  %v2237_v62 = vrot.slane %v5292_v50, 2 }
 0xbff   : > { %v2137_v63 = vpop.xlane.xlu0 %2136 }
 0xc00   : > { %v2144_v1 = vsub.f32 %v2132_v32, %v2137_v63 }
 0xc01   : > { %v2140_v0 = vpop.xlane.xlu1 %2139 }
 0xc02   : > { %v2145_v2 = vsub.f32 %v2133_v55, %v2140_v0  ;;  %v2147_v6 = vmul.f32 1.442695, %v2144_v1 }
 0xc03   : > { %v2143_v3 = vpop.xlane.xlu0 %2142 }
 0xc04   : > { %v2149_v4 = vmul.f32 1.442695, %v2145_v2  ;;  %v2146_v5 = vsub.f32 %v2134_v37, %v2143_v3 }
 0xc06   : > { %6264 = vpow2.f32 %v2149_v4  ;;  %v2151_v7 = vmul.f32 1.442695, %v2146_v5  ;;  %v2245_v5 = vsel %vm1013_vm7, %v2237_v62, 0 }
 0xc08   : > { %6266 = vpow2.f32 %v2151_v7 }
 0xc09   : > { %6268 = vpow2.f32 %v2147_v6 }
 0xc10   : > { %v6791_v8 = vpop.eup %6264 }
 0xc11   : > { %v2156_v9 = vsel %vm965_vm6, %v6791_v8, 0.0 }
 0xc12   : > { %v6795_v10 = vpop.eup %6266  ;;  %2157 = vadd.xlane.f32.xlu1 %v2156_v9 }
 0xc13   : > { %v2159_v11 = vsel %vm972_vm5, %v6795_v10, 0.0  ;;  %v6799_v12 = vpop.eup %6268 }
 0xc14   : > { %2160 = vadd.xlane.f32.xlu0 %v2159_v11  ;;  %v2153_v13 = vsel %vm965_vm6, %v6799_v12, 0.0 }
 0xc18   : > { %2154 = vadd.xlane.f32.xlu0 %v2153_v13 }
 0xc23   : > { %2170 = vrot.lane.b32.xlu1 %v6557_v35, %s6344_s17 }
 0xc27   : > { %2535 = vrot.lane.b32.xlu1 %v6557_v35, %s6345_s29 }
 0xc2b   : > { %2537 = vrot.lane.b32.xlu1 %v6562_v36, %s6345_s29 }
 0xc2e   : > { %2172 = vrot.lane.b32.xlu0 %v6562_v36, %s6344_s17  ;;  %s6348_s17 = smov 36  }
 0xc2f   : > { %2533 = vrot.lane.b32.xlu1 %v6562_v36, %s6346_s19 }
 0xc32   : > { %2531 = vrot.lane.b32.xlu0 %v6557_v35, %s6346_s19  ;;  %s7431_s19 = scalar_lea.vmem %s7395_s8, %s6448_s26 }
 0xc46   : > { %v5915_v17 = vpop.f32.mrb[28].mxu0 }
 0xc47   : > { %v6817_v19 = vadd.f32 %v5915_v17, %v6762_v16  ;;  %v1811_v20 = vpop.f32.mrb[29].mxu0 }
 0xc48   : > { %v6820_v22 = vadd.f32 %v1811_v20, %v6765_v18  ;;  %v5916_v23 = vpop.f32.mrb[30].mxu0 }
 0xc49   : > { %v1814_v24 = vpop.f32.mrb[31].mxu0 }
 0xc4a   : > { %v6823_v25 = vadd.f32 %v1814_v24, %v6768_v21 }
 0xc9f   : > { %v2158_v26 = vpop.xlane.xlu1 %2157 }
 0xca0   : > { %6270 = vrcp.f32 %v2158_v26 }
 0xca1   : > { %v2161_v27 = vpop.xlane.xlu0 %2160 }
 0xca2   : > { %6272 = vrcp.f32 %v2161_v27 }
 0xca3   : > { %v2171_v28 = vpop.permute.xlu1 %2170 }
 0xca4   : > { %5947 = vmatprep.subr.bf16.mxu0 %v2171_v28 }
 0xca5   : > { %v2155_v29 = vpop.xlane.xlu0 %2154 }
 0xca6   : > { %6274 = vrcp.f32 %v2155_v29 }
 0xca7   : > { %v2536_v30 = vpop.permute.xlu1 %2535 }
 0xca8   : > { %v2546_v16 = vsel %vm898_vm4, %v2536_v30, 0  ;;  %6033 = vmatprep.subr.msk.bf16.mxu1 %vm898_vm4, %v2536_v30 }
 0xca9   : > { %5984 = vmatpush3.bf16.xpose.msra.mxu1 %v2546_v16  ;;  %v2173_v18 = vpop.permute.xlu0 %2172 }
 0xcaa   : > { %v5931_v49 = vpop.f32.mrb[32].mxu0  ;;  %v6271_v55 = vpop.eup %6270  ;;  %v2182_v1 = vsel %vm1013_vm7, %v2173_v18, 0 }
 0xcab   : > { %v2538_v31 = vpop.permute.xlu1 %2537  ;;  %v1985_v32 = vpop.f32.mrb[33].mxu0  ;;  %v2000_v42 = vpack.c.bf16 %v5931_v49, %v5931_v49  ;;  %v2166_v54 = vmul.f32 %v6271_v55, %v6791_v8 }
 0xcac   : > { %v5932_v21 = vpop.f32.mrb[34].mxu0  ;;  %v5967_v52 = vpop.f32.mrb[28].mxu1  ;;  %6034 = vmatprep.subr.msk.bf16.mxu1 %vm898_vm4, %v2538_v31  ;;  %v2549_v46 = vsel %vm898_vm4, %v2538_v31, 0 }
 0xcad   : > { %v1988_v33 = vpop.f32.mrb[35].mxu0  ;;  %v2352_v34 = vpop.f32.mrb[29].mxu1  ;;  %v2368_v37 = vmul.f32 0.5, %v5967_v52 }
 0xcae   : > { %v1999_v38 = vpack.c.bf16 %v1988_v33, %v1985_v32  ;;  %v2366_v39 = vmul.f32 0.5, %v2352_v34  ;;  %v2532_v45 = vpop.permute.xlu0 %2531  ;;  %v5968_v40 = vpop.f32.mrb[30].mxu1 }
 0xcaf   : > { %v6273_v41 = vpop.eup %6272  ;;  %5987 = vmatprep.mubr.msk.bf16.mxu1 %vm898_vm4, %v2532_v45  ;;  %v2355_v43 = vpop.f32.mrb[31].mxu1  ;;  %v2371_v60 = vadd.f32 %v6852_v59, %v2368_v37 }
 0xcb0   : > { %v6275_v44 = vpop.eup %6274  ;;  %v2367_v47 = vmul.f32 0.5, %v2355_v43  ;;  %5935 = vmatprep.mubr.msk.bf16.mxu0 %vm898_vm4, %v1999_v38  ;;  %v2369_v51 = vadd.f32 %v6836_v48, %v2366_v39  ;;  %v2167_v61 = vmul.f32 %v6273_v41, %v6795_v10  ;;  %v2534_v3 = vpop.permute.xlu1 %2533 }
 0xcb1   : > { %5936 = vmatmul.mubr.msk.bf16.vlgmr.msra.gmra.mrb[36].mxu0 %vm898_vm4, %v2000_v42  ;;  %5986 = vmatpush3.bf16.xpose.msra.mxu1 %v2549_v46  ;;  %v2165_v53 = vmul.f32 %v6275_v44, %v6799_v12  ;;  %v2378_v2 = vsel %vm972_vm5, %v2371_v60, -inf }
 0xcb2   : > { %5948 = vmatpush3.bf16.msra.mxu0 %v2171_v28  ;;  %v2372_v56 = vsel %vm965_vm6, %v2369_v51, -inf  ;;  %v2370_v58 = vadd.f32 %v6846_v57, %v2367_v47  ;;  %v2169_v4 = vpack.c.bf16 %v2167_v61, %v2167_v61 }
 0xcb3   : > { %6027 = vmatprep.subr.msk.bf16.mxu0 %vm1013_vm7, %v2173_v18  ;;  %2373 = vmax.xlane.f32.xlu0 %v2372_v56  ;;  %v2168_v63 = vpack.c.bf16 %v2166_v54, %v2165_v53 }
 0xcb4   : > { %v2375_v0 = vsel %vm965_vm6, %v2370_v58, -inf }
 0xcb5   : > { %2376 = vmax.xlane.f32.xlu1 %v2375_v0  ;;  %5951 = vmatprep.mubr.msk.bf16.mxu0 %vm965_vm6, %v2168_v63 }
 0xcb6   : > { %5950 = vmatpush3.bf16.msra.mxu0 %v2182_v1 }
 0xcb7   : > { %2379 = vmax.xlane.f32.xlu0 %v2378_v2  ;;  %6028 = vmatprep.subr.msk.bf16.mxu0 %vm1013_vm7, %v2237_v62 }
 0xcb8   : > { %5988 = vmatmul.mubr.msk.bf16.vlgmr.msra.gmra.mrb[32].mxu1 %vm898_vm4, %v2534_v3 }
 0xcb9   : > { %5952 = vmatmul.mubr.msk.bf16.vlgmr.msra.gmra.mrb[40].mxu0 %vm965_vm6, %v2169_v4 }
 0xcba   : > { %5956 = vmatpush3.bf16.msra.mxu0 %v2245_v5 }
 0xd40   : > { %v2374_v6 = vpop.xlane.xlu0 %2373 }
 0xd41   : > { %v2381_v8 = vsub.f32 %v2369_v51, %v2374_v6 }
 0xd42   : > { %v2377_v7 = vpop.xlane.xlu1 %2376 }
 0xd43   : > { %v2382_v9 = vsub.f32 %v2370_v58, %v2377_v7  ;;  %v2384_v13 = vmul.f32 1.442695, %v2381_v8 }
 0xd44   : > { %v2380_v10 = vpop.xlane.xlu0 %2379 }
 0xd45   : > { %v2386_v11 = vmul.f32 1.442695, %v2382_v9  ;;  %v2383_v12 = vsub.f32 %v2371_v60, %v2380_v10 }
 0xd47   : > { %6276 = vpow2.f32 %v2386_v11  ;;  %v2388_v14 = vmul.f32 1.442695, %v2383_v12 }
 0xd49   : > { %6278 = vpow2.f32 %v2388_v14  ;;  %v886_v14 = vld [vmem:[%s6463_s21 + $0xc] sm:$0xf]  ;;  %s7432_s21 = scalar_lea.vmem %s7396_s9, %s6448_s26 }
 0xd4a   : > { %6280 = vpow2.f32 %v2384_v13 }
 0xd51   : > { %v6277_v15 = vpop.eup %6276 }
 0xd52   : > { %v2393_v17 = vsel %vm965_vm6, %v6277_v15, 0.0 }
 0xd53   : > { %v6279_v20 = vpop.eup %6278  ;;  %2394 = vadd.xlane.f32.xlu1 %v2393_v17 }
 0xd54   : > { %v2396_v23 = vsel %vm972_vm5, %v6279_v20, 0.0  ;;  %v6281_v24 = vpop.eup %6280 }
 0xd55   : > { %2397 = vadd.xlane.f32.xlu0 %v2396_v23  ;;  %v2390_v26 = vsel %vm965_vm6, %v6281_v24, 0.0 }
 0xd59   : > { %2391 = vadd.xlane.f32.xlu0 %v2390_v26 }
 0xd64   : > { %2407 = vrot.lane.b32.xlu1 %v6557_v35, %s6347_s0 }
 0xd6f   : > { %2409 = vrot.lane.b32.xlu0 %v6562_v36, %s6347_s0 }
 0xd84   : > { %v5937_v27 = vpop.f32.mrb[36].mxu0 }
 0xd85   : > { %v6871_v28 = vadd.f32 %v5937_v27, %v6817_v19  ;;  %v2044_v29 = vpop.f32.mrb[37].mxu0 }
 0xd86   : > { %v6874_v30 = vadd.f32 %v2044_v29, %v6820_v22  ;;  %v5938_v16 = vpop.f32.mrb[38].mxu0 }
 0xd87   : > { %v2047_v18 = vpop.f32.mrb[39].mxu0 }
 0xd88   : > { %v6877_v49 = vadd.f32 %v2047_v18, %v6823_v25 }
 0xd8b   : > { %v5989_v31 = vpop.f32.mrb[32].mxu1 }
 0xd8c   : > { %v5953_v32 = vpop.f32.mrb[40].mxu0  ;;  %v2585_v21 = vpop.f32.mrb[33].mxu1  ;;  %v2601_v52 = vmul.f32 0.5, %v5989_v31 }
 0xd8d   : > { %v2599_v33 = vmul.f32 0.5, %v2585_v21  ;;  %v2218_v34 = vpop.f32.mrb[41].mxu0  ;;  %v5990_v55 = vpop.f32.mrb[34].mxu1  ;;  %v2233_v40 = vpack.c.bf16 %v5953_v32, %v5953_v32 }
 0xd8e   : > { %v5954_v37 = vpop.f32.mrb[42].mxu0  ;;  %v2588_v38 = vpop.f32.mrb[35].mxu1  ;;  %v2604_v50 = vadd.f32 %v6852_v59, %v2601_v52 }
 0xd8f   : > { %v2600_v19 = vmul.f32 0.5, %v2588_v38  ;;  %v2221_v39 = vpop.f32.mrb[43].mxu0  ;;  %v2602_v45 = vadd.f32 %v6836_v48, %v2599_v33 }
 0xd90   : > { %v2232_v22 = vpack.c.bf16 %v2221_v39, %v2218_v34  ;;  %v2611_v43 = vsel %vm972_vm5, %v2604_v50, -inf }
 0xd91   : > { %v2605_v41 = vsel %vm965_vm6, %v2602_v45, -inf  ;;  %v2603_v25 = vadd.f32 %v6846_v57, %v2600_v19 }
 0xd92   : > { %5957 = vmatprep.mubr.msk.bf16.mxu0 %vm898_vm4, %v2232_v22  ;;  %2606 = vmax.xlane.f32.xlu1 %v2605_v41 }
 0xd93   : > { %5958 = vmatmul.mubr.msk.bf16.vlgmr.msra.gmra.mrb[44].mxu0 %vm898_vm4, %v2233_v40  ;;  %v2608_v42 = vsel %vm965_vm6, %v2603_v25, -inf }
 0xd94   : > { %2609 = vmax.xlane.f32.xlu0 %v2608_v42 }
 0xd96   : > { %2612 = vmax.xlane.f32.xlu1 %v2611_v43 }
 0xde0   : > { %v2395_v44 = vpop.xlane.xlu1 %2394 }
 0xde2   : > { %v2398_v46 = vpop.xlane.xlu0 %2397 }
 0xde3   : > { %6282 = vrcp.f32 %v2398_v46 }
 0xde4   : > { %v2408_v47 = vpop.permute.xlu1 %2407  ;;  %6284 = vrcp.f32 %v2395_v44 }
 0xde5   : > { %5969 = vmatprep.subr.bf16.mxu0 %v2408_v47 }
 0xde6   : > { %5970 = vmatpush3.bf16.msra.mxu0 %v2408_v47  ;;  %v2392_v48 = vpop.xlane.xlu0 %2391 }
 0xde7   : > { %6286 = vrcp.f32 %v2392_v48 }
 0xdea   : > { %v2410_v51 = vpop.permute.xlu0 %2409 }
 0xdeb   : > { %v2419_v53 = vsel %vm1013_vm7, %v2410_v51, 0  ;;  %6031 = vmatprep.subr.msk.bf16.mxu0 %vm1013_vm7, %v2410_v51 }
 0xdec   : > { %5972 = vmatpush3.bf16.msra.mxu0 %v2419_v53 }
 0xded   : > { %v6283_v54 = vpop.eup %6282  ;;  %6032 = vmatprep.subr.msk.bf16.mxu0 %vm1013_vm7, %v886_v14 }
 0xdee   : > { %v6285_v56 = vpop.eup %6284  ;;  %v2404_v58 = vmul.f32 %v6283_v54, %v6279_v20 }
 0xdef   : > { %v2403_v60 = vmul.f32 %v6285_v56, %v6277_v15  ;;  %v2478_v15 = vsel %vm1013_vm7, %v886_v14, 0 }
 0xdf0   : > { %v2406_v62 = vpack.c.bf16 %v2404_v58, %v2404_v58 }
 0xdf1   : > { %v6287_v57 = vpop.eup %6286 }
 0xdf2   : > { %v2402_v59 = vmul.f32 %v6287_v57, %v6281_v24 }
 0xdf4   : > { %v2405_v61 = vpack.c.bf16 %v2403_v60, %v2402_v59 }
 0xdf6   : > { %5973 = vmatprep.mubr.msk.bf16.mxu0 %vm965_vm6, %v2405_v61  ;;  %v5308_v61 = vld [vmem:[%s7431_s19] ss:$0 sm:$0xff] }
 0xdf7   : > { %5974 = vmatmul.mubr.msk.bf16.vlgmr.msra.gmra.mrb[48].mxu0 %vm965_vm6, %v2406_v62 }
 0xdf8   : > { %5978 = vmatpush3.bf16.msra.mxu0 %v2478_v15 }
 0xe1f   : > { %v2607_v63 = vpop.xlane.xlu1 %2606 }
 0xe20   : > { %v2614_v1 = vsub.f32 %v2602_v45, %v2607_v63 }
 0xe21   : > { %v2610_v0 = vpop.xlane.xlu0 %2609 }
 0xe22   : > { %v2615_v2 = vsub.f32 %v2603_v25, %v2610_v0  ;;  %v2617_v6 = vmul.f32 1.442695, %v2614_v1 }
 0xe23   : > { %v2613_v3 = vpop.xlane.xlu1 %2612 }
 0xe24   : > { %v2619_v4 = vmul.f32 1.442695, %v2615_v2  ;;  %v2616_v5 = vsub.f32 %v2604_v50, %v2613_v3 }
 0xe26   : > { %6288 = vpow2.f32 %v2619_v4  ;;  %v2621_v7 = vmul.f32 1.442695, %v2616_v5 }
 0xe28   : > { %6290 = vpow2.f32 %v2621_v7 }
 0xe29   : > { %6292 = vpow2.f32 %v2617_v6  ;;  %v6315_v6 = vld [vmem:[%s7427_s4] sm:$0xff] }
 0xe30   : > { %v6289_v8 = vpop.eup %6288 }
 0xe31   : > { %v2626_v9 = vsel %vm965_vm6, %v6289_v8, 0.0 }
 0xe32   : > { %v6291_v10 = vpop.eup %6290  ;;  %2627 = vadd.xlane.f32.xlu1 %v2626_v9  ;;  %v6316_v9 = vld [vmem:[%s7427_s4 + $0x8] sm:$0xff] }
 0xe33   : > { %v2629_v11 = vsel %vm972_vm5, %v6291_v10, 0.0  ;;  %v6293_v12 = vpop.eup %6292 }
 0xe34   : > { %2630 = vadd.xlane.f32.xlu0 %v2629_v11  ;;  %v2623_v13 = vsel %vm965_vm6, %v6293_v12, 0.0  ;;  %v6317_v11 = vld [vmem:[%s7427_s4 + $0x10] sm:$0xf] }
 0xe38   : > { %2624 = vadd.xlane.f32.xlu0 %v2623_v13 }
 0xe43   : > { %2640 = vrot.lane.b32.xlu1 %v6557_v35, %s6348_s17 }
 0xe4e   : > { %2642 = vrot.lane.b32.xlu0 %v6562_v36, %s6348_s17 }
 0xe66   : > { %v5959_v17 = vpop.f32.mrb[44].mxu0 }
 0xe67   : > { %v2297_v20 = vadd.f32 %v5959_v17, %v6871_v28  ;;  %v2281_v23 = vpop.f32.mrb[45].mxu0 }
 0xe68   : > { %v2295_v24 = vadd.f32 %v2281_v23, %v6874_v30  ;;  %v5960_v26 = vpop.f32.mrb[46].mxu0  ;;  %v5305_v30 = vcombine.low %v886_v14, %v886_v14 }
 0xe69   : > { %v2284_v27 = vpop.f32.mrb[47].mxu0 }
 0xe6a   : > { %v2296_v29 = vadd.f32 %v2284_v27, %v6877_v49  ;;  %v2707_v45 = vrot.slane %v5305_v30, 2  ;;  %v2851_v30 = vld [vmem:[%s6481_s6 + $0x48] sm:$0xff] }
 0xe6c   : > { %v2715_v25 = vsel %vm1013_vm7, %v2707_v45, 0 }
 0xebf   : > { %v2628_v16 = vpop.xlane.xlu1 %2627 }
 0xec0   : > { %6294 = vrcp.f32 %v2628_v16 }
 0xec1   : > { %v2631_v18 = vpop.xlane.xlu0 %2630 }
 0xec2   : > { %6296 = vrcp.f32 %v2631_v18 }
 0xec3   : > { %v2641_v35 = vpop.permute.xlu1 %2640 }
 0xec4   : > { %5991 = vmatprep.subr.bf16.mxu0 %v2641_v35 }
 0xec5   : > { %v2625_v31 = vpop.xlane.xlu0 %2624 }
 0xec6   : > { %6298 = vrcp.f32 %v2625_v31 }
 0xec9   : > { %v2643_v19 = vpop.permute.xlu0 %2642 }
 0xeca   : > { %v5975_v32 = vpop.f32.mrb[48].mxu0  ;;  %v6295_v28 = vpop.eup %6294  ;;  %v2652_v40 = vsel %vm1013_vm7, %v2643_v19, 0 }
 0xecb   : > { %v2455_v36 = vpop.f32.mrb[49].mxu0  ;;  %v2470_v55 = vpack.c.bf16 %v5975_v32, %v5975_v32  ;;  %v2636_v38 = vmul.f32 %v6295_v28, %v6289_v8  ;;  %v2850_v28 = vld [vmem:[%s6481_s6 + $0x40] sm:$0xff] }
 0xecc   : > { %v5976_v21 = vpop.f32.mrb[50].mxu0  ;;  %v6297_v34 = vpop.eup %6296 }
 0xecd   : > { %v2458_v52 = vpop.f32.mrb[51].mxu0  ;;  %v2637_v39 = vmul.f32 %v6297_v34, %v6291_v10 }
 0xece   : > { %v2469_v33 = vpack.c.bf16 %v2458_v52, %v2455_v36  ;;  %v2842_v52 = vld [vmem:[%s6481_s6] sm:$0xff] }
 0xecf   : > { %v2639_v41 = vpack.c.bf16 %v2637_v39, %v2637_v39  ;;  %v5312_v34 = vcombine.high %v2842_v52, %v2850_v28  ;;  %v2859_v39 = vld [vmem:[%s6481_s6 + $0x88] sm:$0xff] }
 0xed0   : > { %v6299_v37 = vpop.eup %6298  ;;  %5979 = vmatprep.mubr.msk.bf16.mxu0 %vm898_vm4, %v2469_v33  ;;  %v2843_v33 = vld [vmem:[%s6481_s6 + $0x8] sm:$0xff] }
 0xed1   : > { %5980 = vmatmul.mubr.msk.bf16.vlgmr.msra.gmra.mrb[52].mxu0 %vm898_vm4, %v2470_v55  ;;  %v2635_v49 = vmul.f32 %v6299_v37, %v6293_v12  ;;  %v5311_v55 = vcombine.low %v2842_v52, %v2850_v28  ;;  %v5313_v37 = vcombine.low %v2843_v33, %v2851_v30  ;;  %3126 = vmatprep.subr.bf16.mxu1 %v5312_v34  ;;  %v2862_v52 = vld [vmem:[%s6481_s6 + $0xa0] sm:$0xff]  ;;  %v2871_v34 = vld [vmem:[%s6481_s6 + $0xe8] sm:$0xff] }
 0xed2   : > { %5992 = vmatpush3.bf16.msra.mxu0 %v2641_v35  ;;  %v2870_v28 = vld [vmem:[%s6481_s6 + $0xe0] sm:$0xff] }
 0xed3   : > { %6035 = vmatprep.subr.msk.bf16.mxu0 %vm1013_vm7, %v2643_v19  ;;  %v2638_v22 = vpack.c.bf16 %v2636_v38, %v2635_v49  ;;  %v5314_v49 = vcombine.high %v2843_v33, %v2851_v30  ;;  %3127 = vmatpush1.bf16.msra.mxu1 %v5311_v55  ;;  %v2858_v38 = vld [vmem:[%s6481_s6 + $0x80] sm:$0xff]  ;;  %v2863_v33 = vld [vmem:[%s6481_s6 + $0xa8] sm:$0xff] }
 0xed4   : > { %v2866_v19 = vld [vmem:[%s6481_s6 + $0xc0] sm:$0xff] }
 0xed5   : > { %5995 = vmatprep.mubr.msk.bf16.mxu0 %vm965_vm6, %v2638_v22  ;;  %v2867_v22 = vld [vmem:[%s6481_s6 + $0xc8] sm:$0xff] }
 0xed6   : > { %5994 = vmatpush3.bf16.msra.mxu0 %v2652_v40  ;;  %v5327_v40 = vcombine.low %v2858_v38, %v2866_v19 }
 0xed7   : > { %6036 = vmatprep.subr.msk.bf16.mxu0 %vm1013_vm7, %v2707_v45  ;;  %v5328_v45 = vcombine.high %v2858_v38, %v2866_v19  ;;  %v2848_v38 = vld [vmem:[%s6481_s6 + $0x30] sm:$0xff] }
 0xed8   : > { %v2856_v19 = vld [vmem:[%s6481_s6 + $0x70] sm:$0xff] }
 0xed9   : > { %5996 = vmatmul.mubr.msk.bf16.vlgmr.msra.gmra.mrb[56].mxu0 %vm965_vm6, %v2639_v41  ;;  %v5329_v41 = vcombine.low %v2859_v39, %v2867_v22  ;;  %3128 = vmatprep.subr.bf16.mxu1 %v5328_v45  ;;  %v2857_v45 = vld [vmem:[%s6481_s6 + $0x78] sm:$0xff] }
 0xeda   : > { %6000 = vmatpush3.bf16.msra.mxu0 %v2715_v25  ;;  %v5330_v25 = vcombine.high %v2859_v39, %v2867_v22  ;;  %3129 = vmatpush1.bf16.msra.mxu1 %v5327_v40  ;;  %v2849_v39 = vld [vmem:[%s6481_s6 + $0x38] sm:$0xff]  ;;  %v5335_v22 = vcombine.low %v2862_v52, %v2870_v28  ;;  %v5337_v40 = vcombine.low %v2863_v33, %v2871_v34 }
 0xedb   : > { %3177 = vmatprep.subr.bf16.mxu0 %v5314_v49  ;;  %v5338_v49 = vcombine.high %v2863_v33, %v2871_v34  ;;  %v7090_v34 = vld [vmem:[%s6486_s7] sm:$0xff] }
 0xfa4   : > { %v5981_v50 = vpop.f32.mrb[52].mxu0 }
 0xfa5   : > { %v2530_v42 = vadd.f32 %v5981_v50, %v2297_v20  ;;  %v2514_v43 = vpop.f32.mrb[53].mxu0  ;;  %v6349_v50 = vmov 0  }
 0xfa6   : > { %v2528_v44 = vadd.f32 %v2514_v43, %v2295_v24  ;;  %v5982_v46 = vpop.f32.mrb[54].mxu0  ;;  %3158 = vmatprep.mubr.bf16.mxu1 %v6349_v50  ;;  %v2852_v43 = vld [vmem:[%s6481_s6 + $0x50] sm:$0xff] }
 0xfa7   : > { %v2517_v47 = vpop.f32.mrb[55].mxu0 }
 0xfa8   : > { %v2529_v48 = vadd.f32 %v2517_v47, %v2296_v29  ;;  %v2853_v47 = vld [vmem:[%s6481_s6 + $0x58] sm:$0xff] }
 0xfac   : > { %v5997_v51 = vpop.f32.mrb[56].mxu0 }
 0xfad   : > { %v2688_v53 = vpop.f32.mrb[57].mxu0  ;;  %v2703_v58 = vpack.c.bf16 %v5997_v51, %v5997_v51 }
 0xfae   : > { %v5998_v54 = vpop.f32.mrb[58].mxu0 }
 0xfaf   : > { %v2691_v56 = vpop.f32.mrb[59].mxu0 }
 0xfb0   : > { %v2702_v57 = vpack.c.bf16 %v2691_v56, %v2688_v53 }
 0xfb2   : > { %6001 = vmatprep.mubr.msk.bf16.mxu0 %vm898_vm4, %v2702_v57 }
 0xfb3   : > { %6002 = vmatmul.mubr.msk.bf16.vlgmr.msra.gmra.mrb[60].mxu0 %vm898_vm4, %v2703_v58 }
 0xfb4   : > { %3178 = vmatpush1.bf16.msra.mxu0 %v5313_v37  ;;  %3209 = vmatprep.mubr.bf16.mxu0 %v6349_v50  ;;  %v5336_v37 = vcombine.high %v2862_v52, %v2870_v28 }
 0xfb5   : > { %3179 = vmatprep.subr.bf16.mxu0 %v5330_v25  ;;  %v5326_v25 = vcombine.high %v2849_v39, %v2857_v45 }
 0xfb8   : > { %3180 = vmatpush1.bf16.msra.mxu0 %v5329_v41  ;;  %v5324_v41 = vcombine.high %v2848_v38, %v2856_v19 }
0x1086   : > { %v6003_v59 = vpop.f32.mrb[60].mxu0 }
0x1087   : > { %v2767_v60 = vadd.f32 %v6003_v59, %v2530_v42  ;;  %v2751_v62 = vpop.f32.mrb[61].mxu0  ;;  %v2844_v42 = vld [vmem:[%s6481_s6 + $0x10] sm:$0xff] }
0x1088   : > { %v2765_v63 = vadd.f32 %v2751_v62, %v2528_v44  ;;  %v6004_v0 = vpop.f32.mrb[62].mxu0  ;;  %v2845_v44 = vld [vmem:[%s6481_s6 + $0x18] sm:$0xff]  ;;  %v5316_v46 = vcombine.high %v2844_v42, %v2852_v43 }
0x1089   : > { %v2754_v1 = vpop.f32.mrb[63].mxu0  ;;  %v2777_v2 = vadd.f32 %v5308_v61, %v2767_v60  ;;  %v5317_v51 = vcombine.low %v2845_v44, %v2853_v47  ;;  %v5318_v53 = vcombine.high %v2845_v44, %v2853_v47  ;;  %v2865_v44 = vld [vmem:[%s6481_s6 + $0xb8] sm:$0xff]  ;;  %v5323_v47 = vcombine.low %v2848_v38, %v2856_v19 }
0x108a   : > { %v2775_v3 = vadd.f32 %v5308_v61, %v2765_v63  ;;  %v2766_v4 = vadd.f32 %v2754_v1, %v2529_v48  ;;  %v5315_v48 = vcombine.low %v2844_v42, %v2852_v43  ;;  %3228 = vmatprep.subr.bf16.mxu1 %v5316_v46  ;;  %v5309_v1 = vld [vmem:[%s7432_s21] ss:$0 sm:$0xff]  ;;  %v2864_v42 = vld [vmem:[%s6481_s6 + $0xb0] sm:$0xff]  ;;  %v2873_v46 = vld [vmem:[%s6481_s6 + $0xf8] sm:$0xff] }
0x108b   : > { %v2780_v12 = vadd.f32 %v6317_v11, %v2777_v2  ;;  %3279 = vmatprep.subr.bf16.mxu0 %v5318_v53  ;;  %v2872_v43 = vld [vmem:[%s6481_s6 + $0xf0] sm:$0xff]  ;;  %v5342_v53 = vcombine.high %v2865_v44, %v2873_v46 }
0x108c   : > { %v2776_v5 = vadd.f32 %v5308_v61, %v2766_v4  ;;  %v2778_v7 = vadd.f32 %v6315_v6, %v2775_v3 }
0x108d   : > { %v2790_v14 = vsel %vm2789_vm8, %v2780_v12, 0.0 }
0x108e   : > { %v2783_v8 = vsel %vm828_vm3, %v2778_v7, 0.0  ;;  %v2779_v10 = vadd.f32 %v6316_v9, %v2776_v5 }
0x108f   : > { %2784 = vadd.xlane.f32.xlu1 %v2783_v8 }
0x1090   : > { %v2786_v13 = vsel %vm828_vm3, %v2779_v10, 0.0 }
0x1091   : > { %2787 = vadd.xlane.f32.xlu0 %v2786_v13  ;;  %v2868_v13 = vld [vmem:[%s6481_s6 + $0xd0] sm:$0xff] }
0x1093   : > { %2791 = vadd.xlane.f32.xlu1 %v2790_v14  ;;  %v2861_v14 = vld [vmem:[%s6481_s6 + $0x98] sm:$0xff] }
0x111c   : > { %v2785_v15 = vpop.xlane.xlu1 %2784 }
0x111d   : > { %v2794_v17 = vmul.f32 0.03125, %v2785_v15  ;;  %v2869_v15 = vld [vmem:[%s6481_s6 + $0xd8] sm:$0xff] }
0x111e   : > { %v2788_v20 = vpop.xlane.xlu0 %2787 }
0x111f   : > { %v6929_v23 = vsub.f32 %v2778_v7, %v2794_v17  ;;  %v2795_v24 = vmul.f32 0.03125, %v2788_v20  ;;  %v5310_v7 = vld [vmem:[%s7433_s25] ss:$0 sm:$0xff] }
0x1120   : > { %v2792_v26 = vpop.xlane.xlu1 %2791 }
0x1121   : > { %v6931_v27 = vsub.f32 %v2779_v10, %v2795_v24  ;;  %v2796_v29 = vmul.f32 0.03125, %v2792_v26  ;;  %v2800_v16 = vmul.f32 %v6929_v23, %v6929_v23  ;;  %v2860_v10 = vld [vmem:[%s6481_s6 + $0x90] sm:$0xff]  ;;  %v5334_v24 = vcombine.high %v2861_v14, %v2869_v15  ;;  %v2846_v26 = vld [vmem:[%s6481_s6 + $0x20] sm:$0xff] }
0x1123   : > { %v6935_v18 = vsub.f32 %v2780_v12, %v2796_v29  ;;  %v2803_v35 = vsel %vm828_vm3, %v2800_v16, 0.0  ;;  %v2801_v31 = vmul.f32 %v6931_v27, %v6931_v27  ;;  %v2847_v29 = vld [vmem:[%s6481_s6 + $0x28] sm:$0xff] }
0x1124   : > { %2804 = vadd.xlane.f32.xlu0 %v2803_v35  ;;  %v2855_v16 = vld [vmem:[%s6481_s6 + $0x68] sm:$0xff]  ;;  %v5331_v35 = vcombine.low %v2860_v10, %v2868_v13 }
0x1125   : > { %v2806_v32 = vsel %vm828_vm3, %v2801_v31, 0.0  ;;  %v2802_v36 = vmul.f32 %v6935_v18, %v6935_v18  ;;  %v5333_v31 = vcombine.low %v2861_v14, %v2869_v15  ;;  %v5321_v55 = vcombine.low %v2847_v29, %v2855_v16  ;;  %v6096_v14 = vld [vmem:[%s6496_s28 + $0x68] sm:$0xff]  }
0x1126   : > { %2807 = vadd.xlane.f32.xlu1 %v2806_v32  ;;  %v6097_v15 = vld [vmem:[%s6496_s28 + $0xe8] sm:$0xff]  }
0x1127   : > { %v2809_v21 = vsel %vm2789_vm8, %v2802_v36, 0.0  ;;  %v5322_v36 = vcombine.high %v2847_v29, %v2855_v16  ;;  %v6104_v29 = vld [vmem:[%s6496_s28 + $0x78] sm:$0xff]  }
0x1128   : > { %2810 = vadd.xlane.f32.xlu0 %v2809_v21  ;;  %v6105_v16 = vld [vmem:[%s6496_s28 + $0xf8] sm:$0xff]  }
0x11b1   : > { %v2805_v54 = vpop.xlane.xlu0 %2804 }
0x11b2   : > { %v2812_v56 = vmul.f32 0.03125, %v2805_v54  ;;  %v5339_v54 = vcombine.low %v2864_v42, %v2872_v43 }
0x11b3   : > { %v2808_v57 = vpop.xlane.xlu1 %2807 }
0x11b4   : > { %v2815_v58 = vadd.f32 1e-05, %v2812_v56  ;;  %v2813_v59 = vmul.f32 0.03125, %v2808_v57  ;;  %v5341_v56 = vcombine.low %v2865_v44, %v2873_v46  ;;  %v6076_v57 = vld [vmem:[%s6496_s28 + $0x40] sm:$0xff]  }
0x11b5   : > { %v2811_v60 = vpop.xlane.xlu0 %2810 }
0x11b6   : > { %6300 = vrsqrt.f32 %v2815_v58  ;;  %v2816_v61 = vadd.f32 1e-05, %v2813_v59  ;;  %v2814_v62 = vmul.f32 0.03125, %v2811_v60  ;;  %v6077_v58 = vld [vmem:[%s6496_s28 + $0xc0] sm:$0xff]  }
0x11b7   : > { %v6078_v59 = vld [vmem:[%s6496_s28] sm:$0xff]  }
0x11b8   : > { %6302 = vrsqrt.f32 %v2816_v61  ;;  %v2817_v63 = vadd.f32 1e-05, %v2814_v62  ;;  %v6079_v60 = vld [vmem:[%s6496_s28 + $0x80] sm:$0xff]   ;;  %v6080_v61 = vld [vmem:[%s6496_s28 + $0x48] sm:$0xff]  }
0x11b9   : > { %v6081_v62 = vld [vmem:[%s6496_s28 + $0xc8] sm:$0xff]  }
0x11ba   : > { %6304 = vrsqrt.f32 %v2817_v63  ;;  %v6082_v63 = vld [vmem:[%s6496_s28 + $0x8] sm:$0xff]  }
0x11c0   : > { %v6301_v0 = vpop.eup %6300 }
0x11c1   : > { %v2821_v2 = vmul.f32 %v6301_v0, %v6929_v23  ;;  %v5332_v23 = vcombine.high %v2860_v10, %v2868_v13  ;;  %v6083_v0 = vld [vmem:[%s6496_s28 + $0x88] sm:$0xff]   ;;  %v6094_v10 = vld [vmem:[%s6496_s28 + $0x20] sm:$0xff]  }
0x11c2   : > { %v6303_v3 = vpop.eup %6302  ;;  %v6095_v13 = vld [vmem:[%s6496_s28 + $0xa0] sm:$0xff]  }
0x11c3   : > { %v2830_v4 = vmul.f32 %v5309_v1, %v2821_v2  ;;  %v2822_v5 = vmul.f32 %v6303_v3, %v6931_v27  ;;  %v2854_v27 = vld [vmem:[%s6481_s6 + $0x60] sm:$0xff]  ;;  %v6085_v2 = vld [vmem:[%s6496_s28 + $0xd0] sm:$0xff]  }
0x11c4   : > { %v6305_v6 = vpop.eup %6304  ;;  %v5320_v32 = vcombine.high %v2846_v26, %v2854_v27  ;;  %v5319_v30 = vcombine.low %v2846_v26, %v2854_v27  ;;  %v6086_v3 = vld [vmem:[%s6496_s28 + $0x10] sm:$0xff]  }
0x11c5   : > { %v2831_v8 = vmul.f32 %v5309_v1, %v2822_v5  ;;  %v2823_v9 = vmul.f32 %v6305_v6, %v6935_v18  ;;  %v6972_v11 = vadd.f32 %v5310_v7, %v2830_v4  ;;  %v6087_v4 = vld [vmem:[%s6496_s28 + $0x90] sm:$0xff]   ;;  %v6089_v5 = vld [vmem:[%s6496_s28 + $0xd8] sm:$0xff]  }
0x11c6   : > { %v6090_v6 = vld [vmem:[%s6496_s28 + $0x18] sm:$0xff]   ;;  %v6102_v26 = vld [vmem:[%s6496_s28 + $0x30] sm:$0xff]  }
0x11c7   : > { %v6974_v12 = vadd.f32 %v5310_v7, %v2831_v8  ;;  %v2832_v20 = vmul.f32 %v5309_v1, %v2823_v9  ;;  %v6084_v1 = vld [vmem:[%s6496_s28 + $0x50] sm:$0xff]   ;;  %v6092_v8 = vld [vmem:[%s6496_s28 + $0x60] sm:$0xff]  }
0x11c8   : > { %v6093_v9 = vld [vmem:[%s6496_s28 + $0xe0] sm:$0xff]   ;;  %v6103_v27 = vld [vmem:[%s6496_s28 + $0xb0] sm:$0xff]  }
0x11c9   : > { %v6981_v17 = vpack.c.bf16 %v6974_v12, %v6972_v11  ;;  %v6993_v18 = vadd.f32 %v5310_v7, %v2832_v20  ;;  %v6091_v7 = vld [vmem:[%s6496_s28 + $0x98] sm:$0xff]   ;;  %v6099_v20 = vld [vmem:[%s6496_s28 + $0xa8] sm:$0xff]  }
0x11cb   : > { %5343 = vmatmul.mubr.msk.bf16.vlgmr.msra.gmra.mrb[36].mxu1 %vm828_vm3, %v6981_v17  ;;  %5345 = vmatmul.mubr.msk.bf16.vlgmr.msra.gmra.mrb[64].mxu0 %vm828_vm3, %v6981_v17  ;;  %v6997_v21 = vpack.c.bf16 %v6993_v18, %v6993_v18 }
0x11cc   : > { %3168 = vmatprep.mubr.bf16.mxu1 %v6349_v50  ;;  %3219 = vmatprep.mubr.bf16.mxu0 %v6349_v50 }
0x11cd   : > { %3229 = vmatpush1.bf16.msra.mxu1 %v5315_v48  ;;  %3280 = vmatpush1.bf16.msra.mxu0 %v5317_v51  ;;  %v5325_v48 = vcombine.low %v2849_v39, %v2857_v45  ;;  %v5340_v51 = vcombine.high %v2864_v42, %v2872_v43 }
0x11ce   : > { %3230 = vmatprep.subr.bf16.mxu1 %v5332_v23  ;;  %3281 = vmatprep.subr.bf16.mxu0 %v5334_v24  ;;  %v6100_v23 = vld [vmem:[%s6496_s28 + $0x70] sm:$0xff]  }
0x11cf   : > { %v6101_v24 = vld [vmem:[%s6496_s28 + $0xf0] sm:$0xff]  }
0x11d1   : > { %3231 = vmatpush1.bf16.msra.mxu1 %v5331_v35  ;;  %3282 = vmatpush1.bf16.msra.mxu0 %v5333_v31  ;;  %v6106_v35 = vld [vmem:[%s6496_s28 + $0x38] sm:$0xff]  }
0x11d2   : > { %3330 = vmatprep.subr.bf16.mxu1 %v5320_v32  ;;  %3381 = vmatprep.subr.bf16.mxu0 %v5322_v36  ;;  %v6107_v31 = vld [vmem:[%s6496_s28 + $0xb8] sm:$0xff]   ;;  %v6108_v32 = vld [vmem:[%s6496_s28 + $0x140] sm:$0xff]  }
0x11d3   : > { %5344 = vmatmul.mubr.msk.bf16.gmra.mrb[40].mxu1 %vm828_vm3, %v6997_v21  ;;  %5346 = vmatmul.mubr.msk.bf16.gmra.mrb[68].mxu0 %vm828_vm3, %v6997_v21  ;;  %v6109_v36 = vld [vmem:[%s6496_s28 + $0x1c0] sm:$0xff]  }
0x11d4   : > { %3260 = vmatprep.mubr.bf16.mxu1 %v6349_v50  ;;  %3311 = vmatprep.mubr.bf16.mxu0 %v6349_v50 }
0x11db   : > { %5347 = vmatmul.mubr.msk.bf16.vlgmr.msra.gmra.mrb[44].mxu1 %vm828_vm3, %v6981_v17  ;;  %5349 = vmatmul.mubr.msk.bf16.vlgmr.msra.gmra.mrb[72].mxu0 %vm828_vm3, %v6981_v17 }
0x11dc   : > { %3270 = vmatprep.mubr.bf16.mxu1 %v6349_v50  ;;  %3321 = vmatprep.mubr.bf16.mxu0 %v6349_v50 }
0x11dd   : > { %3331 = vmatpush1.bf16.msra.mxu1 %v5319_v30  ;;  %3382 = vmatpush1.bf16.msra.mxu0 %v5321_v55 }
0x11de   : > { %3332 = vmatprep.subr.bf16.mxu1 %v5336_v37  ;;  %3383 = vmatprep.subr.bf16.mxu0 %v5338_v49 }
0x11e1   : > { %3333 = vmatpush1.bf16.msra.mxu1 %v5335_v22  ;;  %3384 = vmatpush1.bf16.msra.mxu0 %v5337_v40 }
0x11e2   : > { %3432 = vmatprep.subr.bf16.mxu1 %v5324_v41  ;;  %3483 = vmatprep.subr.bf16.mxu0 %v5326_v25 }
0x11e3   : > { %5348 = vmatmul.mubr.msk.bf16.gmra.mrb[48].mxu1 %vm828_vm3, %v6997_v21  ;;  %5350 = vmatmul.mubr.msk.bf16.gmra.mrb[76].mxu0 %vm828_vm3, %v6997_v21 }
0x11e4   : > { %3362 = vmatprep.mubr.bf16.mxu1 %v6349_v50  ;;  %3413 = vmatprep.mubr.bf16.mxu0 %v6349_v50 }
0x11eb   : > { %5351 = vmatmul.mubr.msk.bf16.vlgmr.msra.gmra.mrb[52].mxu1 %vm828_vm3, %v6981_v17  ;;  %5353 = vmatmul.mubr.msk.bf16.vlgmr.msra.gmra.mrb[80].mxu0 %vm828_vm3, %v6981_v17 }
0x11ec   : > { %3372 = vmatprep.mubr.bf16.mxu1 %v6349_v50  ;;  %3423 = vmatprep.mubr.bf16.mxu0 %v6349_v50 }
0x11ed   : > { %3433 = vmatpush1.bf16.msra.mxu1 %v5323_v47  ;;  %3484 = vmatpush1.bf16.msra.mxu0 %v5325_v48 }
0x11ee   : > { %3434 = vmatprep.subr.bf16.mxu1 %v5340_v51  ;;  %3485 = vmatprep.subr.bf16.mxu0 %v5342_v53 }
0x11f1   : > { %3435 = vmatpush1.bf16.msra.mxu1 %v5339_v54  ;;  %3486 = vmatpush1.bf16.msra.mxu0 %v5341_v56 }
0x11f2   : > { %5591 = vmatprep.subr.bf16.mxu1 %v6076_v57  ;;  %5619 = vmatprep.subr.bf16.mxu0 %v6077_v58 }
0x11f3   : > { %5352 = vmatmul.mubr.msk.bf16.gmra.mrb[56].mxu1 %vm828_vm3, %v6997_v21  ;;  %5354 = vmatmul.mubr.msk.bf16.gmra.mrb[84].mxu0 %vm828_vm3, %v6997_v21 }
0x11f4   : > { %3464 = vmatprep.mubr.bf16.mxu1 %v6349_v50  ;;  %3515 = vmatprep.mubr.bf16.mxu0 %v6349_v50 }
0x11fb   : > { %5355 = vmatmul.mubr.msk.bf16.vlgmr.msra.gmra.mrb[60].mxu1 %vm828_vm3, %v6981_v17  ;;  %5357 = vmatmul.mubr.msk.bf16.vlgmr.msra.gmra.mrb[88].mxu0 %vm828_vm3, %v6981_v17  ;;  %v6098_v17 = vld [vmem:[%s6496_s28 + $0x28] sm:$0xff]  }
0x11fc   : > { %3474 = vmatprep.mubr.bf16.mxu1 %v6349_v50  ;;  %3525 = vmatprep.mubr.bf16.mxu0 %v6349_v50  ;;  %v6088_v50 = vld [vmem:[%s6496_s28 + $0x58] sm:$0xff]  }
0x11fd   : > { %5592 = vmatpush3.bf16.msra.mxu1 %v6078_v59  ;;  %5620 = vmatpush3.bf16.msra.mxu0 %v6079_v60 }
0x11fe   : > { %5593 = vmatprep.subr.bf16.mxu1 %v6080_v61  ;;  %5621 = vmatprep.subr.bf16.mxu0 %v6081_v62 }
0x1201   : > { %5594 = vmatpush3.bf16.msra.mxu1 %v6082_v63  ;;  %5622 = vmatpush3.bf16.msra.mxu0 %v6083_v0 }
0x1202   : > { %5595 = vmatprep.subr.bf16.mxu1 %v6084_v1  ;;  %5623 = vmatprep.subr.bf16.mxu0 %v6085_v2 }
0x1203   : > { %5356 = vmatmul.mubr.msk.bf16.gmra.mrb[64].mxu1 %vm828_vm3, %v6997_v21  ;;  %5358 = vmatmul.mubr.msk.bf16.gmra.mrb[92].mxu0 %vm828_vm3, %v6997_v21  ;;  %v2880_v21 = vlaneseq }
0x1205   : > { %5596 = vmatpush3.bf16.msra.mxu1 %v6086_v3  ;;  %5624 = vmatpush3.bf16.msra.mxu0 %v6087_v4  ;;  %v7085_v52 = vshrl.u32 %v2880_v21, 7 }
0x1206   : > { %5597 = vmatprep.subr.bf16.mxu1 %v6088_v50  ;;  %5625 = vmatprep.subr.bf16.mxu0 %v6089_v5 }
0x1207   : > { %v2882_v28 = vsub.s32 0, %v7085_v52  ;;  %v2890_v33 = vsub.s32 2, %v7085_v52  ;;  %v2886_v30 = vsub.s32 1, %v7085_v52  ;;  %v2894_v55 = vsub.s32 3, %v7085_v52 }
0x1209   : > { %5598 = vmatpush3.bf16.msra.mxu1 %v6090_v6  ;;  %5626 = vmatpush3.bf16.msra.mxu0 %v6091_v7  ;;  %v2883_v37 = vrot.slane %v7090_v34, %v2882_v28  ;;  %v2891_v49 = vrot.slane %v7090_v34, %v2890_v33  ;;  %v2887_v38 = vrot.slane %v7090_v34, %v2886_v30  ;;  %v6110_v6 = vld [vmem:[%s6496_s28 + $0x100] sm:$0xff]  }
0x120a   : > { %5599 = vmatprep.subr.bf16.mxu1 %v6092_v8  ;;  %5627 = vmatprep.subr.bf16.mxu0 %v6093_v9  ;;  %v2895_v19 = vrot.slane %v7090_v34, %v2894_v55  ;;  %v6111_v7 = vld [vmem:[%s6496_s28 + $0x180] sm:$0xff]  }
0x120d   : > { %5600 = vmatpush3.bf16.msra.mxu1 %v6094_v10  ;;  %5628 = vmatpush3.bf16.msra.mxu0 %v6095_v13 }
0x120e   : > { %5601 = vmatprep.subr.bf16.mxu1 %v6096_v14  ;;  %5629 = vmatprep.subr.bf16.mxu0 %v6097_v15  ;;  %v6112_v14 = vld [vmem:[%s6496_s28 + $0x148] sm:$0xff]  }
0x120f   : > { %v6113_v15 = vld [vmem:[%s6496_s28 + $0x1c8] sm:$0xff]  }
0x1211   : > { %5602 = vmatpush3.bf16.msra.mxu1 %v6098_v17  ;;  %5630 = vmatpush3.bf16.msra.mxu0 %v6099_v20  ;;  %v2898_v17 = vsub.s32 4, %v7085_v52  ;;  %v2906_v20 = vsub.s32 6, %v7085_v52 }
0x1212   : > { %5603 = vmatprep.subr.bf16.mxu1 %v6100_v23  ;;  %5631 = vmatprep.subr.bf16.mxu0 %v6101_v24 }
0x1215   : > { %5604 = vmatpush3.bf16.msra.mxu1 %v6102_v26  ;;  %5632 = vmatpush3.bf16.msra.mxu0 %v6103_v27 }
0x1216   : > { %5605 = vmatprep.subr.bf16.mxu1 %v6104_v29  ;;  %5633 = vmatprep.subr.bf16.mxu0 %v6105_v16  ;;  %v2902_v29 = vsub.s32 5, %v7085_v52  ;;  %v2910_v16 = vsub.s32 7, %v7085_v52 }
0x1219   : > { %5606 = vmatpush3.bf16.msra.mxu1 %v6106_v35  ;;  %5634 = vmatpush3.bf16.msra.mxu0 %v6107_v31 }
0x121a   : > { %5647 = vmatprep.subr.bf16.mxu1 %v6108_v32  ;;  %5675 = vmatprep.subr.bf16.mxu0 %v6109_v36 }
0x129e   : > { %v3160_v39 = vpop.f32.mrb[36].mxu1  ;;  %v3211_v45 = vpop.f32.mrb[64].mxu0 }
0x129f   : > { %v3161_v22 = vadd.f32 %v3160_v39, %v2883_v37  ;;  %v3212_v40 = vadd.f32 %v3211_v45, %v2891_v49  ;;  %v3162_v41 = vpop.f32.mrb[37].mxu1  ;;  %v3213_v25 = vpop.f32.mrb[65].mxu0  ;;  %v7124_v39 = vrot.slane %v7090_v34, %v2906_v20 }
0x12a0   : > { %v3163_v42 = vadd.f32 %v3162_v41, %v2887_v38  ;;  %v3214_v43 = vadd.f32 %v3213_v25, %v2895_v19  ;;  %v3164_v44 = vpop.f32.mrb[38].mxu1  ;;  %v3215_v46 = vpop.f32.mrb[66].mxu0  ;;  %v7134_v41 = vrot.slane %v7090_v34, %v2910_v16  ;;  %v6116_v25 = vld [vmem:[%s6496_s28 + $0x150] sm:$0xff]  }
0x12a1   : > { %v3165_v47 = vadd.f32 %v3164_v44, %v2883_v37  ;;  %v3216_v48 = vadd.f32 %v3215_v46, %v2891_v49  ;;  %v3166_v51 = vpop.f32.mrb[39].mxu1  ;;  %v3217_v53 = vpop.f32.mrb[67].mxu0  ;;  %v3534_v57 = vmax.f32 %v3161_v22, 0.0  ;;  %v3536_v58 = vmax.f32 %v3212_v40, 0.0 }
0x12a2   : > { %v3167_v54 = vadd.f32 %v3166_v51, %v2887_v38  ;;  %v3218_v56 = vadd.f32 %v3217_v53, %v2895_v19  ;;  %v3535_v61 = vmax.f32 %v3163_v42, 0.0  ;;  %v3537_v62 = vmax.f32 %v3214_v43, 0.0  ;;  %v6117_v42 = vld [vmem:[%s6496_s28 + $0x1d0] sm:$0xff]  }
0x12a3   : > { %v3550_v59 = vmax.f32 %v3165_v47, 0.0  ;;  %v3552_v60 = vmax.f32 %v3216_v48, 0.0  ;;  %v7129_v40 = vrot.slane %v7090_v34, %v2902_v29  ;;  %v6118_v47 = vld [vmem:[%s6496_s28 + $0x110] sm:$0xff]  }
0x12a4   : > { %v3551_v63 = vmax.f32 %v3167_v54, 0.0  ;;  %v3553_v0 = vmax.f32 %v3218_v56, 0.0  ;;  %v6119_v48 = vld [vmem:[%s6496_s28 + $0x190] sm:$0xff]  }
0x12a5   : > { %v3838_v1 = vpack.c.bf16 %v3550_v59, %v3534_v57  ;;  %v3840_v2 = vpack.c.bf16 %v3552_v60, %v3536_v58  ;;  %v6120_v57 = vld [vmem:[%s6496_s28 + $0x158] sm:$0xff]  }
0x12a6   : > { %v3839_v3 = vpack.c.bf16 %v3551_v63, %v3535_v61  ;;  %v3841_v4 = vpack.c.bf16 %v3553_v0, %v3537_v62  ;;  %v3170_v50 = vpop.f32.mrb[40].mxu1  ;;  %v3221_v5 = vpop.f32.mrb[68].mxu0  ;;  %v6121_v58 = vld [vmem:[%s6496_s28 + $0x1d8] sm:$0xff]  }
0x12a7   : > { %v3171_v8 = vadd.f32 %v3170_v50, %v2883_v37  ;;  %v3222_v9 = vadd.f32 %v3221_v5, %v2891_v49  ;;  %v3172_v10 = vpop.f32.mrb[41].mxu1  ;;  %v3223_v13 = vpop.f32.mrb[69].mxu0  ;;  %v6114_v37 = vld [vmem:[%s6496_s28 + $0x108] sm:$0xff]   ;;  %v6122_v50 = vld [vmem:[%s6496_s28 + $0x118] sm:$0xff]  }
0x12a8   : > { %v3173_v23 = vadd.f32 %v3172_v10, %v2887_v38  ;;  %v3224_v24 = vadd.f32 %v3223_v13, %v2895_v19  ;;  %v3174_v26 = vpop.f32.mrb[42].mxu1  ;;  %v3225_v27 = vpop.f32.mrb[70].mxu0  ;;  %4677 = vmatprep.mubr.bf16.mxu1 %v3839_v3  ;;  %4725 = vmatprep.mubr.bf16.mxu0 %v3841_v4  ;;  %v6115_v49 = vld [vmem:[%s6496_s28 + $0x188] sm:$0xff]   ;;  %v7119_v19 = vrot.slane %v7090_v34, %v2898_v17  ;;  %v6123_v5 = vld [vmem:[%s6496_s28 + $0x198] sm:$0xff]   ;;  %v6124_v10 = vld [vmem:[%s6496_s28 + $0x160] sm:$0xff]  }
0x12a9   : > { %v3175_v35 = vpop.f32.mrb[43].mxu1  ;;  %v3226_v31 = vpop.f32.mrb[71].mxu0  ;;  %4678 = vmatmul.mubr.bf16.vlgmr.msra.gmra.mrb[68].mxu1 %v3838_v1  ;;  %4726 = vmatmul.mubr.bf16.vlgmr.msra.gmra.mrb[96].mxu0 %v3840_v2  ;;  %v3566_v32 = vmax.f32 %v3171_v8, 0.0  ;;  %v3568_v38 = vmax.f32 %v3222_v9, 0.0  ;;  %v6125_v13 = vld [vmem:[%s6496_s28 + $0x1e0] sm:$0xff]  }
0x12aa   : > { %v3567_v36 = vmax.f32 %v3173_v23, 0.0  ;;  %v3569_v21 = vmax.f32 %v3224_v24, 0.0  ;;  %5648 = vmatpush3.bf16.msra.mxu1 %v6110_v6  ;;  %5676 = vmatpush3.bf16.msra.mxu0 %v6111_v7 }
0x12ab   : > { %5649 = vmatprep.subr.bf16.mxu1 %v6112_v14  ;;  %5677 = vmatprep.subr.bf16.mxu0 %v6113_v15  ;;  %v3854_v43 = vpack.c.bf16 %v3566_v32, %v3566_v32  ;;  %v3856_v51 = vpack.c.bf16 %v3568_v38, %v3568_v38 }
0x12ac   : > { %v3855_v45 = vpack.c.bf16 %v3567_v36, %v3567_v36  ;;  %v3857_v22 = vpack.c.bf16 %v3569_v21, %v3569_v21  ;;  %v6126_v21 = vld [vmem:[%s6496_s28 + $0x120] sm:$0xff]  }
0x12ae   : > { %5650 = vmatpush3.bf16.msra.mxu1 %v6114_v37  ;;  %5678 = vmatpush3.bf16.msra.mxu0 %v6115_v49  ;;  %v3262_v44 = vpop.f32.mrb[44].mxu1  ;;  %v3313_v46 = vpop.f32.mrb[72].mxu0  ;;  %v6127_v37 = vld [vmem:[%s6496_s28 + $0x1a0] sm:$0xff]  }
0x12af   : > { %v3263_v53 = vadd.f32 %v3262_v44, %v7119_v19  ;;  %v3314_v54 = vadd.f32 %v3313_v46, %v7124_v39  ;;  %4685 = vmatprep.mubr.bf16.mxu1 %v3855_v45  ;;  %4733 = vmatprep.mubr.bf16.mxu0 %v3857_v22  ;;  %v3264_v34 = vpop.f32.mrb[45].mxu1  ;;  %v3315_v56 = vpop.f32.mrb[73].mxu0  ;;  %v6128_v45 = vld [vmem:[%s6496_s28 + $0x168] sm:$0xff]  }
0x12b0   : > { %v3265_v59 = vadd.f32 %v3264_v34, %v7129_v40  ;;  %v3316_v60 = vadd.f32 %v3315_v56, %v7134_v41  ;;  %v3266_v61 = vpop.f32.mrb[46].mxu1  ;;  %v3317_v62 = vpop.f32.mrb[74].mxu0  ;;  %5651 = vmatprep.subr.bf16.mxu1 %v6116_v25  ;;  %5679 = vmatprep.subr.bf16.mxu0 %v6117_v42  ;;  %v6129_v22 = vld [vmem:[%s6496_s28 + $0x1e8] sm:$0xff]   ;;  %v6133_v34 = vld [vmem:[%s6496_s28 + $0x1f0] sm:$0xff]  }
0x12b1   : > { %v3267_v63 = vadd.f32 %v3266_v61, %v7119_v19  ;;  %v3318_v0 = vadd.f32 %v3317_v62, %v7124_v39  ;;  %v3268_v1 = vpop.f32.mrb[47].mxu1  ;;  %v3319_v2 = vpop.f32.mrb[75].mxu0  ;;  %4686 = vmatmul.mubr.bf16.gmra.mrb[72].mxu1 %v3854_v43  ;;  %4734 = vmatmul.mubr.bf16.gmra.mrb[100].mxu0 %v3856_v51  ;;  %v3538_v6 = vmax.f32 %v3263_v53, 0.0  ;;  %v3540_v7 = vmax.f32 %v3314_v54, 0.0  ;;  %v7167_v43 = vld [vmem:[%s6486_s7 + $0x8] sm:$0xff]  ;;  %v6132_v54 = vld [vmem:[%s6496_s28 + $0x170] sm:$0xff]  }
0x12b2   : > { %v3269_v3 = vadd.f32 %v3268_v1, %v7129_v40  ;;  %v3320_v4 = vadd.f32 %v3319_v2, %v7134_v41  ;;  %5652 = vmatpush3.bf16.msra.mxu1 %v6118_v47  ;;  %5680 = vmatpush3.bf16.msra.mxu0 %v6119_v48  ;;  %v3539_v14 = vmax.f32 %v3265_v59, 0.0  ;;  %v3541_v15 = vmax.f32 %v3316_v60, 0.0  ;;  %v6130_v47 = vld [vmem:[%s6496_s28 + $0x128] sm:$0xff]   ;;  %v6134_v60 = vld [vmem:[%s6496_s28 + $0x130] sm:$0xff]   ;;  %v6137_v1 = vld [vmem:[%s6496_s28 + $0x1f8] sm:$0xff]  }
0x12b3   : > { %v3554_v8 = vmax.f32 %v3267_v63, 0.0  ;;  %v3556_v9 = vmax.f32 %v3318_v0, 0.0  ;;  %5653 = vmatprep.subr.bf16.mxu1 %v6120_v57  ;;  %5681 = vmatprep.subr.bf16.mxu0 %v6121_v58  ;;  %v6131_v48 = vld [vmem:[%s6496_s28 + $0x1a8] sm:$0xff]   ;;  %v7174_v51 = vrot.slane %v7167_v43, %v2882_v28  ;;  %v2923_v53 = vrot.slane %v7167_v43, %v2890_v33  ;;  %v6135_v61 = vld [vmem:[%s6496_s28 + $0x1b0] sm:$0xff]  }
0x12b4   : > { %v3555_v23 = vmax.f32 %v3269_v3, 0.0  ;;  %v3557_v24 = vmax.f32 %v3320_v4, 0.0  ;;  %v7184_v56 = vrot.slane %v7167_v43, %v2886_v30  ;;  %v7189_v57 = vrot.slane %v7167_v43, %v2894_v55  ;;  %v6136_v55 = vld [vmem:[%s6496_s28 + $0x178] sm:$0xff]  }
0x12b5   : > { %v7154_v26 = vpack.c.bf16 %v3554_v8, %v3538_v6  ;;  %v7156_v27 = vpack.c.bf16 %v3556_v9, %v3540_v7 }
0x12b6   : > { %v3843_v35 = vpack.c.bf16 %v3555_v23, %v3539_v14  ;;  %v3845_v31 = vpack.c.bf16 %v3557_v24, %v3541_v15  ;;  %5654 = vmatpush3.bf16.msra.mxu1 %v6122_v50  ;;  %5682 = vmatpush3.bf16.msra.mxu0 %v6123_v5  ;;  %v7158_v32 = vpop.f32.mrb[48].mxu1  ;;  %v7160_v36 = vpop.f32.mrb[76].mxu0  ;;  %v6139_v14 = vld [vmem:[%s6496_s28 + $0x1b8] sm:$0xff]  }
0x12b7   : > { %v3274_v49 = vpop.f32.mrb[49].mxu1  ;;  %v3325_v38 = vpop.f32.mrb[77].mxu0  ;;  %5655 = vmatprep.subr.bf16.mxu1 %v6124_v10  ;;  %5683 = vmatprep.subr.bf16.mxu0 %v6125_v13  ;;  %v6138_v13 = vld [vmem:[%s6496_s28 + $0x138] sm:$0xff]  }
0x12b8   : > { %v3276_v25 = vpop.f32.mrb[50].mxu1  ;;  %v3327_v42 = vpop.f32.mrb[78].mxu0  ;;  %4773 = vmatprep.mubr.bf16.mxu1 %v3843_v35  ;;  %4821 = vmatprep.mubr.bf16.mxu0 %v3845_v31  ;;  %v3275_v28 = vadd.f32 %v3274_v49, %v7129_v40  ;;  %v3326_v58 = vadd.f32 %v3325_v38, %v7134_v41  ;;  %v6140_v31 = vld [vmem:[%s6496_s28 + $0x240] sm:$0xff]  }
0x12b9   : > { %v3277_v44 = vpop.f32.mrb[51].mxu1  ;;  %v3328_v46 = vpop.f32.mrb[79].mxu0  ;;  %v3273_v42 = vadd.f32 %v7158_v32, %v7119_v19  ;;  %v6142_v19 = vld [vmem:[%s6496_s28 + $0x200] sm:$0xff]  }
0x12ba   : > { %5656 = vmatpush3.bf16.msra.mxu1 %v6126_v21  ;;  %5684 = vmatpush3.bf16.msra.mxu0 %v6127_v37  ;;  %v3571_v7 = vmax.f32 %v3275_v28, 0.0  ;;  %v3573_v8 = vmax.f32 %v3326_v58, 0.0  ;;  %v6141_v21 = vld [vmem:[%s6496_s28 + $0x2c0] sm:$0xff]  }
0x12bb   : > { %5657 = vmatprep.subr.bf16.mxu1 %v6128_v45  ;;  %5685 = vmatprep.subr.bf16.mxu0 %v6129_v22  ;;  %v6143_v32 = vld [vmem:[%s6496_s28 + $0x280] sm:$0xff]  }
0x12be   : > { %5658 = vmatpush3.bf16.msra.mxu1 %v6130_v47  ;;  %5686 = vmatpush3.bf16.msra.mxu0 %v6131_v48  ;;  %v3364_v33 = vpop.f32.mrb[52].mxu1  ;;  %v3415_v59 = vpop.f32.mrb[80].mxu0 }
0x12bf   : > { %v3365_v30 = vadd.f32 %v3364_v33, %v7174_v51  ;;  %v3416_v62 = vadd.f32 %v3415_v59, %v2923_v53  ;;  %v3366_v63 = vpop.f32.mrb[53].mxu1  ;;  %v3417_v0 = vpop.f32.mrb[81].mxu0  ;;  %5659 = vmatprep.subr.bf16.mxu1 %v6132_v54  ;;  %5687 = vmatprep.subr.bf16.mxu0 %v6133_v34  ;;  %v3324_v54 = vadd.f32 %v7160_v36, %v7124_v39 }
0x12c0   : > { %v3367_v40 = vadd.f32 %v3366_v63, %v7184_v56  ;;  %v3418_v41 = vadd.f32 %v3417_v0, %v7189_v57  ;;  %v3368_v2 = vpop.f32.mrb[54].mxu1  ;;  %v3419_v3 = vpop.f32.mrb[82].mxu0  ;;  %v3859_v33 = vpack.c.bf16 %v3571_v7, %v3571_v7  ;;  %v3861_v59 = vpack.c.bf16 %v3573_v8, %v3573_v8  ;;  %v6146_v0 = vld [vmem:[%s6496_s28 + $0x208] sm:$0xff]   ;;  %v6150_v7 = vld [vmem:[%s6496_s28 + $0x210] sm:$0xff]  }
0x12c1   : > { %v3369_v4 = vadd.f32 %v3368_v2, %v7174_v51  ;;  %v3420_v50 = vadd.f32 %v3419_v3, %v2923_v53  ;;  %v3370_v5 = vpop.f32.mrb[55].mxu1  ;;  %v3421_v6 = vpop.f32.mrb[83].mxu0  ;;  %v3542_v15 = vmax.f32 %v3365_v30, 0.0  ;;  %v3544_v23 = vmax.f32 %v3416_v62, 0.0  ;;  %v6144_v30 = vld [vmem:[%s6496_s28 + $0x248] sm:$0xff]   ;;  %v6151_v8 = vld [vmem:[%s6496_s28 + $0x290] sm:$0xff]  }
0x12c2   : > { %v3371_v9 = vadd.f32 %v3370_v5, %v7184_v56  ;;  %v3422_v10 = vadd.f32 %v3421_v6, %v7189_v57  ;;  %5660 = vmatpush3.bf16.msra.mxu1 %v6134_v60  ;;  %5688 = vmatpush3.bf16.msra.mxu0 %v6135_v61  ;;  %v3543_v37 = vmax.f32 %v3367_v40, 0.0  ;;  %v3545_v49 = vmax.f32 %v3418_v41, 0.0  ;;  %v6145_v62 = vld [vmem:[%s6496_s28 + $0x2c8] sm:$0xff]   ;;  %v6148_v41 = vld [vmem:[%s6496_s28 + $0x250] sm:$0xff]  }
0x12c3   : > { %v3558_v24 = vmax.f32 %v3369_v4, 0.0  ;;  %v3560_v35 = vmax.f32 %v3420_v50, 0.0  ;;  %5661 = vmatprep.subr.bf16.mxu1 %v6136_v55  ;;  %5689 = vmatprep.subr.bf16.mxu0 %v6137_v1  ;;  %v3572_v63 = vmax.f32 %v3324_v54, 0.0  ;;  %v6147_v55 = vld [vmem:[%s6496_s28 + $0x288] sm:$0xff]   ;;  %v2931_v1 = vrot.slane %v7167_v43, %v2898_v17  ;;  %v6149_v17 = vld [vmem:[%s6496_s28 + $0x2d0] sm:$0xff]  }
0x12c4   : > { %v3559_v38 = vmax.f32 %v3371_v9, 0.0  ;;  %v3561_v45 = vmax.f32 %v3422_v10, 0.0  ;;  %v7249_v40 = vrot.slane %v7167_v43, %v2910_v16  ;;  %v6152_v10 = vld [vmem:[%s6496_s28 + $0x258] sm:$0xff]  }
0x12c5   : > { %v7207_v22 = vpack.c.bf16 %v3558_v24, %v3542_v15  ;;  %v7209_v25 = vpack.c.bf16 %v3560_v35, %v3544_v23 }
0x12c6   : > { %v7213_v44 = vpack.c.bf16 %v3559_v38, %v3543_v37  ;;  %v7215_v46 = vpack.c.bf16 %v3561_v45, %v3545_v49  ;;  %5662 = vmatpush3.bf16.msra.mxu1 %v6138_v13  ;;  %5690 = vmatpush3.bf16.msra.mxu0 %v6139_v14  ;;  %v7217_v47 = vpop.f32.mrb[56].mxu1  ;;  %v3425_v48 = vpop.f32.mrb[84].mxu0  ;;  %v6153_v13 = vld [vmem:[%s6496_s28 + $0x2d8] sm:$0xff]  }
0x12c7   : > { %v7221_v34 = vadd.f32 %v3425_v48, %v2923_v53  ;;  %v7223_v28 = vpop.f32.mrb[57].mxu1  ;;  %v7225_v58 = vpop.f32.mrb[85].mxu0  ;;  %5703 = vmatprep.subr.bf16.mxu1 %v6140_v31  ;;  %5731 = vmatprep.subr.bf16.mxu0 %v6141_v21  ;;  %v3570_v53 = vmax.f32 %v3273_v42, 0.0  ;;  %v6154_v45 = vld [vmem:[%s6496_s28 + $0x218] sm:$0xff]  }
0x12c8   : > { %v3378_v60 = vpop.f32.mrb[58].mxu1  ;;  %v3429_v61 = vpop.f32.mrb[86].mxu0  ;;  %v6155_v42 = vld [vmem:[%s6496_s28 + $0x298] sm:$0xff]  }
0x12c9   : > { %4774 = vmatmul.mubr.bf16.vlgmr.msra.gmra.mrb[76].mxu1 %v7154_v26  ;;  %4822 = vmatmul.mubr.bf16.vlgmr.msra.gmra.mrb[104].mxu0 %v7156_v27  ;;  %v3379_v39 = vpop.f32.mrb[59].mxu1  ;;  %v3430_v36 = vpop.f32.mrb[87].mxu0  ;;  %v2939_v26 = vrot.slane %v7167_v43, %v2906_v20  ;;  %v7244_v27 = vrot.slane %v7167_v43, %v2902_v29  ;;  %v3858_v2 = vpack.c.bf16 %v3570_v53, %v3570_v53 }
0x12ca   : > { %4781 = vmatprep.mubr.bf16.mxu1 %v3859_v33  ;;  %4829 = vmatprep.mubr.bf16.mxu0 %v3861_v59  ;;  %v3860_v20 = vpack.c.bf16 %v3572_v63, %v3572_v63  ;;  %v6157_v33 = vld [vmem:[%s6496_s28 + $0x2e0] sm:$0xff]  }
0x12cb   : > { %5704 = vmatpush3.bf16.msra.mxu1 %v6142_v19  ;;  %5732 = vmatpush3.bf16.msra.mxu0 %v6143_v32 }
0x12cc   : > { %5705 = vmatprep.subr.bf16.mxu1 %v6144_v30  ;;  %5733 = vmatprep.subr.bf16.mxu0 %v6145_v62 }
0x12ce   : > { %v3466_v3 = vpop.f32.mrb[60].mxu1  ;;  %v3517_v4 = vpop.f32.mrb[88].mxu0 }
0x12cf   : > { %5706 = vmatpush3.bf16.msra.mxu1 %v6146_v0  ;;  %5734 = vmatpush3.bf16.msra.mxu0 %v6147_v55  ;;  %v3467_v50 = vadd.f32 %v3466_v3, %v2931_v1  ;;  %v3518_v5 = vadd.f32 %v3517_v4, %v2939_v26  ;;  %v3468_v6 = vpop.f32.mrb[61].mxu1  ;;  %v3519_v29 = vpop.f32.mrb[89].mxu0  ;;  %v6158_v0 = vld [vmem:[%s6496_s28 + $0x220] sm:$0xff]   ;;  %v6162_v4 = vld [vmem:[%s6496_s28 + $0x228] sm:$0xff]  }
0x12d0   : > { %v3469_v52 = vadd.f32 %v3468_v6, %v7244_v27  ;;  %v3520_v16 = vadd.f32 %v3519_v29, %v7249_v40  ;;  %v3470_v43 = vpop.f32.mrb[62].mxu1  ;;  %v3521_v9 = vpop.f32.mrb[90].mxu0  ;;  %5707 = vmatprep.subr.bf16.mxu1 %v6148_v41  ;;  %5735 = vmatprep.subr.bf16.mxu0 %v6149_v17  ;;  %v6159_v55 = vld [vmem:[%s6496_s28 + $0x2a0] sm:$0xff]   ;;  %v6166_v6 = vld [vmem:[%s6496_s28 + $0x230] sm:$0xff]  }
0x12d1   : > { %v3471_v14 = vadd.f32 %v3470_v43, %v2931_v1  ;;  %v3522_v15 = vadd.f32 %v3521_v9, %v2939_v26  ;;  %4782 = vmatmul.mubr.bf16.gmra.mrb[80].mxu1 %v3858_v2  ;;  %4830 = vmatmul.mubr.bf16.gmra.mrb[108].mxu0 %v3860_v20  ;;  %v3472_v23 = vpop.f32.mrb[63].mxu1  ;;  %v3523_v24 = vpop.f32.mrb[91].mxu0  ;;  %v3546_v21 = vmax.f32 %v3467_v50, 0.0  ;;  %v3548_v37 = vmax.f32 %v3518_v5, 0.0  ;;  %v6161_v2 = vld [vmem:[%s6496_s28 + $0x2e8] sm:$0xff]   ;;  %v6164_v50 = vld [vmem:[%s6496_s28 + $0x270] sm:$0xff]  }
0x12d2   : > { %v3473_v35 = vadd.f32 %v3472_v23, %v7244_v27  ;;  %v3524_v31 = vadd.f32 %v3523_v24, %v7249_v40  ;;  %4869 = vmatprep.mubr.bf16.mxu1 %v7213_v44  ;;  %4917 = vmatprep.mubr.bf16.mxu0 %v7215_v46  ;;  %v3547_v48 = vmax.f32 %v3469_v52, 0.0  ;;  %v3549_v54 = vmax.f32 %v3520_v16, 0.0  ;;  %v6156_v44 = vld [vmem:[%s6496_s28 + $0x260] sm:$0xff]   ;;  %v6163_v20 = vld [vmem:[%s6496_s28 + $0x2a8] sm:$0xff]   ;;  %v6165_v5 = vld [vmem:[%s6496_s28 + $0x2f0] sm:$0xff]  }
0x12d3   : > { %v3562_v49 = vmax.f32 %v3471_v14, 0.0  ;;  %v3564_v38 = vmax.f32 %v3522_v15, 0.0  ;;  %5708 = vmatpush3.bf16.msra.mxu1 %v6150_v7  ;;  %5736 = vmatpush3.bf16.msra.mxu0 %v6151_v8  ;;  %v6167_v29 = vld [vmem:[%s6496_s28 + $0x2b0] sm:$0xff]   ;;  %v6168_v7 = vld [vmem:[%s6496_s28 + $0x278] sm:$0xff]   ;;  %v3377_v52 = vadd.f32 %v7223_v28, %v7184_v56  ;;  %v3428_v16 = vadd.f32 %v7225_v58, %v7189_v57  ;;  %v6174_v57 = vld [vmem:[%s6496_s28 + $0x300] sm:$0xff]  }
0x12d4   : > { %v3563_v19 = vmax.f32 %v3473_v35, 0.0  ;;  %v3565_v32 = vmax.f32 %v3524_v31, 0.0  ;;  %5709 = vmatprep.subr.bf16.mxu1 %v6152_v10  ;;  %5737 = vmatprep.subr.bf16.mxu0 %v6153_v13  ;;  %v6169_v8 = vld [vmem:[%s6496_s28 + $0x2f8] sm:$0xff]   ;;  %v6172_v10 = vld [vmem:[%s6496_s28 + $0x340] sm:$0xff]   ;;  %v3375_v56 = vadd.f32 %v7217_v47, %v7174_v51  ;;  %v6176_v24 = vld [vmem:[%s6496_s28 + $0x348] sm:$0xff]   ;;  %v3576_v47 = vmax.f32 %v7221_v34, 0.0 }
0x12d5   : > { %v7267_v46 = vpack.c.bf16 %v3562_v49, %v3546_v21  ;;  %v7269_v59 = vpack.c.bf16 %v3564_v38, %v3548_v37  ;;  %v6170_v43 = vld [vmem:[%s6496_s28 + $0x238] sm:$0xff]   ;;  %v6173_v13 = vld [vmem:[%s6496_s28 + $0x3c0] sm:$0xff]   ;;  %v3575_v14 = vmax.f32 %v3377_v52, 0.0  ;;  %v3577_v15 = vmax.f32 %v3428_v16, 0.0  ;;  %v6177_v35 = vld [vmem:[%s6496_s28 + $0x3c8] sm:$0xff]  }
0x12d6   : > { %v7271_v60 = vpack.c.bf16 %v3563_v19, %v3547_v48  ;;  %v7273_v61 = vpack.c.bf16 %v3565_v32, %v3549_v54  ;;  %v3476_v30 = vpop.f32.mrb[64].mxu1  ;;  %v3527_v62 = vpop.f32.mrb[92].mxu0  ;;  %v6171_v9 = vld [vmem:[%s6496_s28 + $0x2b8] sm:$0xff]   ;;  %v6175_v28 = vld [vmem:[%s6496_s28 + $0x380] sm:$0xff]   ;;  %v3574_v51 = vmax.f32 %v3375_v56, 0.0  ;;  %v6178_v31 = vld [vmem:[%s6496_s28 + $0x308] sm:$0xff]  }
0x12d7   : > { %5710 = vmatpush3.bf16.msra.mxu1 %v6154_v45  ;;  %5738 = vmatpush3.bf16.msra.mxu0 %v6155_v42  ;;  %v7275_v39 = vadd.f32 %v3476_v30, %v2931_v1  ;;  %v7277_v36 = vadd.f32 %v3527_v62, %v2939_v26  ;;  %v7279_v53 = vpop.f32.mrb[65].mxu1  ;;  %v7281_v63 = vpop.f32.mrb[93].mxu0  ;;  %v6160_v1 = vld [vmem:[%s6496_s28 + $0x268] sm:$0xff]   ;;  %v3863_v58 = vpack.c.bf16 %v3575_v14, %v3575_v14  ;;  %v6180_v37 = vld [vmem:[%s6496_s28 + $0x350] sm:$0xff]   ;;  %v6184_v34 = vld [vmem:[%s6496_s28 + $0x358] sm:$0xff]  }
0x12d8   : > { %v3480_v41 = vpop.f32.mrb[66].mxu1  ;;  %v3531_v17 = vpop.f32.mrb[94].mxu0  ;;  %5711 = vmatprep.subr.bf16.mxu1 %v6156_v44  ;;  %5739 = vmatprep.subr.bf16.mxu0 %v6157_v33  ;;  %v3865_v23 = vpack.c.bf16 %v3577_v15, %v3577_v15  ;;  %v6179_v21 = vld [vmem:[%s6496_s28 + $0x388] sm:$0xff]   ;;  %v6181_v49 = vld [vmem:[%s6496_s28 + $0x3d0] sm:$0xff]   ;;  %v6185_v42 = vld [vmem:[%s6496_s28 + $0x3d8] sm:$0xff]  }
0x12d9   : > { %v3481_v3 = vpop.f32.mrb[67].mxu1  ;;  %v3532_v26 = vpop.f32.mrb[95].mxu0  ;;  %v6182_v38 = vld [vmem:[%s6496_s28 + $0x310] sm:$0xff]   ;;  %v6186_v48 = vld [vmem:[%s6496_s28 + $0x318] sm:$0xff]   ;;  %v6188_v19 = vld [vmem:[%s6496_s28 + $0x360] sm:$0xff]  }
0x12da   : > { %v6183_v45 = vld [vmem:[%s6496_s28 + $0x390] sm:$0xff]   ;;  %v6187_v54 = vld [vmem:[%s6496_s28 + $0x398] sm:$0xff]   ;;  %v6189_v32 = vld [vmem:[%s6496_s28 + $0x3e0] sm:$0xff]   ;;  %v3479_v3 = vadd.f32 %v7279_v53, %v7244_v27  ;;  %v3530_v26 = vadd.f32 %v7281_v63, %v7249_v40  ;;  %v3578_v27 = vmax.f32 %v7275_v39, 0.0  ;;  %v3580_v40 = vmax.f32 %v7277_v36, 0.0 }
0x12db   : > { %5712 = vmatpush3.bf16.msra.mxu1 %v6158_v0  ;;  %5740 = vmatpush3.bf16.msra.mxu0 %v6159_v55  ;;  %v6190_v44 = vld [vmem:[%s6496_s28 + $0x320] sm:$0xff]   ;;  %v6194_v30 = vld [vmem:[%s6496_s28 + $0x328] sm:$0xff]   ;;  %v6196_v0 = vld [vmem:[%s6496_s28 + $0x370] sm:$0xff]  }
0x12dc   : > { %5713 = vmatprep.subr.bf16.mxu1 %v6160_v1  ;;  %5741 = vmatprep.subr.bf16.mxu0 %v6161_v2  ;;  %v6191_v33 = vld [vmem:[%s6496_s28 + $0x3a0] sm:$0xff]   ;;  %v6195_v62 = vld [vmem:[%s6496_s28 + $0x3a8] sm:$0xff]   ;;  %v6197_v55 = vld [vmem:[%s6496_s28 + $0x3f0] sm:$0xff]   ;;  %v3866_v53 = vpack.c.bf16 %v3578_v27, %v3578_v27  ;;  %v3868_v63 = vpack.c.bf16 %v3580_v40, %v3580_v40 }
0x12dd   : > { %v6198_v41 = vld [vmem:[%s6496_s28 + $0x330] sm:$0xff]   ;;  %v6200_v1 = vld [vmem:[%s6496_s28 + $0x378] sm:$0xff]  }
0x12de   : > { %v6199_v17 = vld [vmem:[%s6496_s28 + $0x3b0] sm:$0xff]   ;;  %v6201_v2 = vld [vmem:[%s6496_s28 + $0x3f8] sm:$0xff]  }
0x12df   : > { %5714 = vmatpush3.bf16.msra.mxu1 %v6162_v4  ;;  %5742 = vmatpush3.bf16.msra.mxu0 %v6163_v20  ;;  %v6202_v4 = vld [vmem:[%s6496_s28 + $0x338] sm:$0xff]  }
0x12e0   : > { %5715 = vmatprep.subr.bf16.mxu1 %v6164_v50  ;;  %5743 = vmatprep.subr.bf16.mxu0 %v6165_v5  ;;  %v6203_v20 = vld [vmem:[%s6496_s28 + $0x3b8] sm:$0xff]   ;;  %v3579_v50 = vmax.f32 %v3479_v3, 0.0  ;;  %v3581_v5 = vmax.f32 %v3530_v26, 0.0 }
0x12e3   : > { %5716 = vmatpush3.bf16.msra.mxu1 %v6166_v6  ;;  %5744 = vmatpush3.bf16.msra.mxu0 %v6167_v29  ;;  %v3867_v6 = vpack.c.bf16 %v3579_v50, %v3579_v50  ;;  %v3869_v29 = vpack.c.bf16 %v3581_v5, %v3581_v5 }
0x12e4   : > { %5717 = vmatprep.subr.bf16.mxu1 %v6168_v7  ;;  %5745 = vmatprep.subr.bf16.mxu0 %v6169_v8 }
0x12e7   : > { %5718 = vmatpush3.bf16.msra.mxu1 %v6170_v43  ;;  %5746 = vmatpush3.bf16.msra.mxu0 %v6171_v9 }
0x12e8   : > { %5759 = vmatprep.subr.bf16.mxu1 %v6172_v10  ;;  %5787 = vmatprep.subr.bf16.mxu0 %v6173_v13 }
0x12ea   : > { %4870 = vmatmul.mubr.bf16.vlgmr.msra.gmra.mrb[84].mxu1 %v7207_v22  ;;  %4918 = vmatmul.mubr.bf16.vlgmr.msra.gmra.mrb[112].mxu0 %v7209_v25  ;;  %v3862_v22 = vpack.c.bf16 %v3574_v51, %v3574_v51  ;;  %v3864_v25 = vpack.c.bf16 %v3576_v47, %v3576_v47 }
0x12eb   : > { %4877 = vmatprep.mubr.bf16.mxu1 %v3863_v58  ;;  %4925 = vmatprep.mubr.bf16.mxu0 %v3865_v23 }
0x12ec   : > { %5760 = vmatpush3.bf16.msra.mxu1 %v6174_v57  ;;  %5788 = vmatpush3.bf16.msra.mxu0 %v6175_v28 }
0x12ed   : > { %5761 = vmatprep.subr.bf16.mxu1 %v6176_v24  ;;  %5789 = vmatprep.subr.bf16.mxu0 %v6177_v35 }
0x12f0   : > { %5762 = vmatpush3.bf16.msra.mxu1 %v6178_v31  ;;  %5790 = vmatpush3.bf16.msra.mxu0 %v6179_v21 }
0x12f1   : > { %5763 = vmatprep.subr.bf16.mxu1 %v6180_v37  ;;  %5791 = vmatprep.subr.bf16.mxu0 %v6181_v49 }
0x12f2   : > { %4878 = vmatmul.mubr.bf16.gmra.mrb[88].mxu1 %v3862_v22  ;;  %4926 = vmatmul.mubr.bf16.gmra.mrb[116].mxu0 %v3864_v25 }
0x12f3   : > { %4965 = vmatprep.mubr.bf16.mxu1 %v7271_v60  ;;  %5013 = vmatprep.mubr.bf16.mxu0 %v7273_v61  ;;  %v6192_v60 = vld [vmem:[%s6496_s28 + $0x368] sm:$0xff]  }
0x12f4   : > { %5764 = vmatpush3.bf16.msra.mxu1 %v6182_v38  ;;  %5792 = vmatpush3.bf16.msra.mxu0 %v6183_v45  ;;  %v6193_v61 = vld [vmem:[%s6496_s28 + $0x3e8] sm:$0xff]   ;;  %s7434_s28 = scalar_lea.vmem %s7401_s14, %s6448_s26 }
0x12f5   : > { %5765 = vmatprep.subr.bf16.mxu1 %v6184_v34  ;;  %5793 = vmatprep.subr.bf16.mxu0 %v6185_v42  ;;  %v5359_v52 = vld [vmem:[%s7434_s28] ss:$0 sm:$0xff] }
0x12f8   : > { %5766 = vmatpush3.bf16.msra.mxu1 %v6186_v48  ;;  %5794 = vmatpush3.bf16.msra.mxu0 %v6187_v54 }
0x12f9   : > { %5767 = vmatprep.subr.bf16.mxu1 %v6188_v19  ;;  %5795 = vmatprep.subr.bf16.mxu0 %v6189_v32 }
0x12fc   : > { %5768 = vmatpush3.bf16.msra.mxu1 %v6190_v44  ;;  %5796 = vmatpush3.bf16.msra.mxu0 %v6191_v33 }
0x12fd   : > { %5769 = vmatprep.subr.bf16.mxu1 %v6192_v60  ;;  %5797 = vmatprep.subr.bf16.mxu0 %v6193_v61 }
0x1300   : > { %5770 = vmatpush3.bf16.msra.mxu1 %v6194_v30  ;;  %5798 = vmatpush3.bf16.msra.mxu0 %v6195_v62 }
0x1301   : > { %5771 = vmatprep.subr.bf16.mxu1 %v6196_v0  ;;  %5799 = vmatprep.subr.bf16.mxu0 %v6197_v55 }
0x1304   : > { %5772 = vmatpush3.bf16.msra.mxu1 %v6198_v41  ;;  %5800 = vmatpush3.bf16.msra.mxu0 %v6199_v17 }
0x1305   : > { %5773 = vmatprep.subr.bf16.mxu1 %v6200_v1  ;;  %5801 = vmatprep.subr.bf16.mxu0 %v6201_v2 }
0x1308   : > { %5774 = vmatpush3.bf16.msra.mxu1 %v6202_v4  ;;  %5802 = vmatpush3.bf16.msra.mxu0 %v6203_v20 }
0x130b   : > { %4966 = vmatmul.mubr.bf16.vlgmr.msra.gmra.mrb[92].mxu1 %v7267_v46  ;;  %5014 = vmatmul.mubr.bf16.vlgmr.msra.gmra.mrb[120].mxu0 %v7269_v59 }
0x130c   : > { %4973 = vmatprep.mubr.bf16.mxu1 %v3867_v6  ;;  %5021 = vmatprep.mubr.bf16.mxu0 %v3869_v29 }
0x1313   : > { %4974 = vmatmul.mubr.bf16.gmra.mrb[96].mxu1 %v3866_v53  ;;  %5022 = vmatmul.mubr.bf16.gmra.mrb[124].mxu0 %v3868_v63 }
0x137c   : > { %v5607_v7 = vpop.f32.mrb[68].mxu1  ;;  %v5635_v8 = vpop.f32.mrb[96].mxu0 }
0x137d   : > { %v5608_v46 = vpop.f32.mrb[69].mxu1  ;;  %v5636_v16 = vpop.f32.mrb[97].mxu0 }
0x137e   : > { %v5609_v59 = vadd.f32 %v5608_v46, %v5607_v7  ;;  %v5637_v43 = vadd.f32 %v5636_v16, %v5635_v8  ;;  %v5610_v9 = vpop.f32.mrb[70].mxu1  ;;  %v5638_v10 = vpop.f32.mrb[98].mxu0 }
0x137f   : > { %v5611_v39 = vpop.f32.mrb[71].mxu1  ;;  %v5639_v13 = vpop.f32.mrb[99].mxu0 }
0x1380   : > { %v4680_v36 = vadd.f32 %v5609_v59, %v5359_v52  ;;  %v5612_v14 = vadd.f32 %v5611_v39, %v5610_v9  ;;  %v5640_v15 = vadd.f32 %v5639_v13, %v5638_v10 }
0x1382   : > { %v4728_v56 = vadd.f32 %v5637_v43, %v4680_v36  ;;  %v4683_v57 = vadd.f32 %v5612_v14, %v5359_v52 }
0x1384   : > { %v4731_v28 = vadd.f32 %v5640_v15, %v4683_v57  ;;  %v5613_v58 = vpop.f32.mrb[72].mxu1  ;;  %v5641_v23 = vpop.f32.mrb[100].mxu0 }
0x1385   : > { %v5614_v24 = vpop.f32.mrb[73].mxu1  ;;  %v5642_v35 = vpop.f32.mrb[101].mxu0 }
0x1386   : > { %v5615_v51 = vadd.f32 %v5614_v24, %v5613_v58  ;;  %v5643_v47 = vadd.f32 %v5642_v35, %v5641_v23  ;;  %v5616_v31 = vpop.f32.mrb[74].mxu1  ;;  %v5644_v21 = vpop.f32.mrb[102].mxu0 }
0x1387   : > { %v5617_v37 = vpop.f32.mrb[75].mxu1  ;;  %v5645_v49 = vpop.f32.mrb[103].mxu0 }
0x1388   : > { %v4688_v22 = vadd.f32 %v5615_v51, %v5359_v52 }
0x138a   : > { %v4736_v25 = vadd.f32 %v5643_v47, %v4688_v22 }
0x139c   : > { %v5663_v38 = vpop.f32.mrb[76].mxu1  ;;  %v5691_v45 = vpop.f32.mrb[104].mxu0 }
0x139d   : > { %v5664_v34 = vpop.f32.mrb[77].mxu1  ;;  %v5692_v42 = vpop.f32.mrb[105].mxu0 }
0x139e   : > { %v5665_v48 = vadd.f32 %v5664_v34, %v5663_v38  ;;  %v5693_v54 = vadd.f32 %v5692_v42, %v5691_v45  ;;  %v5666_v19 = vpop.f32.mrb[78].mxu1  ;;  %v5694_v32 = vpop.f32.mrb[106].mxu0 }
0x139f   : > { %v5667_v44 = vpop.f32.mrb[79].mxu1  ;;  %v5695_v33 = vpop.f32.mrb[107].mxu0 }
0x13a0   : > { %v4776_v60 = vadd.f32 %v5665_v48, %v4728_v56  ;;  %v5668_v61 = vadd.f32 %v5667_v44, %v5666_v19  ;;  %v5696_v30 = vadd.f32 %v5695_v33, %v5694_v32 }
0x13a2   : > { %v4824_v62 = vadd.f32 %v5693_v54, %v4776_v60  ;;  %v4779_v0 = vadd.f32 %v5668_v61, %v4731_v28 }
0x13a4   : > { %v4827_v55 = vadd.f32 %v5696_v30, %v4779_v0  ;;  %v5669_v41 = vpop.f32.mrb[80].mxu1  ;;  %v5697_v17 = vpop.f32.mrb[108].mxu0 }
0x13a5   : > { %v5670_v1 = vpop.f32.mrb[81].mxu1  ;;  %v5698_v2 = vpop.f32.mrb[109].mxu0 }
0x13a6   : > { %v5671_v3 = vadd.f32 %v5670_v1, %v5669_v41  ;;  %v5699_v26 = vadd.f32 %v5698_v2, %v5697_v17  ;;  %v5672_v4 = vpop.f32.mrb[82].mxu1  ;;  %v5700_v20 = vpop.f32.mrb[110].mxu0 }
0x13a7   : > { %v5673_v50 = vpop.f32.mrb[83].mxu1  ;;  %v5701_v5 = vpop.f32.mrb[111].mxu0 }
0x13a8   : > { %v4784_v6 = vadd.f32 %v5671_v3, %v4736_v25 }
0x13aa   : > { %v4832_v29 = vadd.f32 %v5699_v26, %v4784_v6 }
0x13bd   : > { %v5719_v27 = vpop.f32.mrb[84].mxu1  ;;  %v5747_v40 = vpop.f32.mrb[112].mxu0 }
0x13be   : > { %v5720_v53 = vpop.f32.mrb[85].mxu1  ;;  %v5748_v63 = vpop.f32.mrb[113].mxu0 }
0x13bf   : > { %v5721_v7 = vadd.f32 %v5720_v53, %v5719_v27  ;;  %v5749_v8 = vadd.f32 %v5748_v63, %v5747_v40  ;;  %v5722_v52 = vpop.f32.mrb[86].mxu1  ;;  %v5750_v46 = vpop.f32.mrb[114].mxu0 }
0x13c0   : > { %v5723_v16 = vpop.f32.mrb[87].mxu1  ;;  %v5751_v59 = vpop.f32.mrb[115].mxu0 }
0x13c1   : > { %v4872_v43 = vadd.f32 %v5721_v7, %v4824_v62  ;;  %v5724_v9 = vadd.f32 %v5723_v16, %v5722_v52  ;;  %v5752_v10 = vadd.f32 %v5751_v59, %v5750_v46 }
0x13c3   : > { %v4920_v39 = vadd.f32 %v5749_v8, %v4872_v43  ;;  %v4875_v13 = vadd.f32 %v5724_v9, %v4827_v55 }
0x13c5   : > { %v4923_v36 = vadd.f32 %v5752_v10, %v4875_v13  ;;  %v5725_v14 = vpop.f32.mrb[88].mxu1  ;;  %v5753_v15 = vpop.f32.mrb[116].mxu0 }
0x13c6   : > { %v5726_v56 = vpop.f32.mrb[89].mxu1  ;;  %v5754_v57 = vpop.f32.mrb[117].mxu0 }
0x13c7   : > { %v5727_v28 = vadd.f32 %v5726_v56, %v5725_v14  ;;  %v5755_v58 = vadd.f32 %v5754_v57, %v5753_v15  ;;  %v5728_v23 = vpop.f32.mrb[90].mxu1  ;;  %v5756_v24 = vpop.f32.mrb[118].mxu0 }
0x13c8   : > { %v5729_v35 = vpop.f32.mrb[91].mxu1  ;;  %v5757_v51 = vpop.f32.mrb[119].mxu0  ;;  %v5488_v24 = vld [vmem:[%s705_s5] ss:$0 sm:$0xff] }
0x13c9   : > { %v4880_v47 = vadd.f32 %v5727_v28, %v4832_v29 }
0x13cb   : > { %v4928_v31 = vadd.f32 %v5755_v58, %v4880_v47  ;;  %v5489_v47 = vld [vmem:[%s708_s1] ss:$0 sm:$0xff] }
0x13de   : > { %v5775_v21 = vpop.f32.mrb[92].mxu1  ;;  %v5803_v37 = vpop.f32.mrb[120].mxu0 }
0x13df   : > { %v5776_v49 = vpop.f32.mrb[93].mxu1  ;;  %v5804_v22 = vpop.f32.mrb[121].mxu0 }
0x13e0   : > { %v5777_v25 = vadd.f32 %v5776_v49, %v5775_v21  ;;  %v5805_v38 = vadd.f32 %v5804_v22, %v5803_v37  ;;  %v5778_v45 = vpop.f32.mrb[94].mxu1  ;;  %v5806_v34 = vpop.f32.mrb[122].mxu0 }
0x13e1   : > { %v5779_v42 = vpop.f32.mrb[95].mxu1  ;;  %v5807_v48 = vpop.f32.mrb[123].mxu0 }
0x13e2   : > { %v4968_v54 = vadd.f32 %v5777_v25, %v4920_v39  ;;  %v5780_v19 = vadd.f32 %v5779_v42, %v5778_v45  ;;  %v5808_v32 = vadd.f32 %v5807_v48, %v5806_v34 }
0x13e4   : > { %v5016_v44 = vadd.f32 %v5805_v38, %v4968_v54  ;;  %v4971_v33 = vadd.f32 %v5780_v19, %v4923_v36 }
0x13e6   : > { %v5019_v60 = vadd.f32 %v5808_v32, %v4971_v33  ;;  %v5781_v61 = vpop.f32.mrb[96].mxu1  ;;  %v5809_v30 = vpop.f32.mrb[124].mxu0  ;;  %v5029_v62 = vadd.f32 %v5016_v44, %v6972_v11 }
0x13e7   : > { %v5782_v0 = vpop.f32.mrb[97].mxu1  ;;  %v5810_v55 = vpop.f32.mrb[125].mxu0 }
0x13e8   : > { %v5783_v41 = vadd.f32 %v5782_v0, %v5781_v61  ;;  %v5811_v17 = vadd.f32 %v5810_v55, %v5809_v30  ;;  %v5784_v1 = vpop.f32.mrb[98].mxu1  ;;  %v5812_v2 = vpop.f32.mrb[126].mxu0  ;;  %v5034_v3 = vsel %vm828_vm3, %v5029_v62, 0.0  ;;  %v5030_v26 = vadd.f32 %v5019_v60, %v6974_v12 }
0x13e9   : > { %v5785_v4 = vpop.f32.mrb[99].mxu1  ;;  %v5813_v20 = vpop.f32.mrb[127].mxu0  ;;  %5035 = vadd.xlane.f32.xlu1 %v5034_v3 }
0x13ea   : > { %v4976_v50 = vadd.f32 %v5783_v41, %v4928_v31  ;;  %v5037_v5 = vsel %vm828_vm3, %v5030_v26, 0.0 }
0x13eb   : > { %5038 = vadd.xlane.f32.xlu0 %v5037_v5 }
0x13ec   : > { %v5024_v6 = vadd.f32 %v5811_v17, %v4976_v50 }
0x13ee   : > { %v5031_v11 = vadd.f32 %v5024_v6, %v6993_v18 }
0x13f0   : > { %v5040_v29 = vsel %vm2789_vm8, %v5031_v11, 0.0 }
0x13f1   : > { %5041 = vadd.xlane.f32.xlu1 %v5040_v29 }
0x1476   : > { %v5036_v27 = vpop.xlane.xlu1 %5035 }
0x1477   : > { %v5043_v40 = vmul.f32 0.03125, %v5036_v27 }
0x1478   : > { %v5039_v53 = vpop.xlane.xlu0 %5038 }
0x1479   : > { %v5046_v63 = vsub.f32 %v5029_v62, %v5043_v40  ;;  %v5044_v7 = vmul.f32 0.03125, %v5039_v53 }
0x147b   : > { %v5047_v8 = vsub.f32 %v5030_v26, %v5044_v7  ;;  %v5049_v12 = vmul.f32 %v5046_v63, %v5046_v63 }
0x147d   : > { %v5052_v52 = vsel %vm828_vm3, %v5049_v12, 0.0  ;;  %v5050_v46 = vmul.f32 %v5047_v8, %v5047_v8 }
0x147e   : > { %5053 = vadd.xlane.f32.xlu0 %v5052_v52  ;;  %v5042_v16 = vpop.xlane.xlu1 %5041 }
0x147f   : > { %v5045_v59 = vmul.f32 0.03125, %v5042_v16  ;;  %v5055_v43 = vsel %vm828_vm3, %v5050_v46, 0.0 }
0x1480   : > { %5056 = vadd.xlane.f32.xlu1 %v5055_v43 }
0x1481   : > { %v5048_v18 = vsub.f32 %v5031_v11, %v5045_v59 }
0x1483   : > { %v5051_v9 = vmul.f32 %v5048_v18, %v5048_v18 }
0x1485   : > { %v5058_v10 = vsel %vm2789_vm8, %v5051_v9, 0.0 }
0x1486   : > { %5059 = vadd.xlane.f32.xlu0 %v5058_v10 }
0x150b   : > { %v5054_v39 = vpop.xlane.xlu0 %5053 }
0x150c   : > { %v5061_v13 = vmul.f32 0.03125, %v5054_v39 }
0x150d   : > { %v5057_v36 = vpop.xlane.xlu1 %5056 }
0x150e   : > { %v5064_v14 = vadd.f32 1e-05, %v5061_v13  ;;  %v5062_v15 = vmul.f32 0.03125, %v5057_v36 }
0x1510   : > { %6306 = vrsqrt.f32 %v5064_v14  ;;  %v5065_v56 = vadd.f32 1e-05, %v5062_v15 }
0x1512   : > { %6308 = vrsqrt.f32 %v5065_v56 }
0x1513   : > { %v5060_v57 = vpop.xlane.xlu0 %5059 }
0x1514   : > { %v5063_v28 = vmul.f32 0.03125, %v5060_v57 }
0x1516   : > { %v5066_v58 = vadd.f32 1e-05, %v5063_v28 }
0x1518   : > { %6310 = vrsqrt.f32 %v5066_v58 }
0x151a   : > { %v6307_v23 = vpop.eup %6306 }
0x151b   : > { %v5070_v35 = vmul.f32 %v6307_v23, %v5046_v63 }
0x151c   : > { %v6309_v51 = vpop.eup %6308 }
0x151d   : > { %v5079_v31 = vmul.f32 %v5488_v24, %v5070_v35  ;;  %v5071_v21 = vmul.f32 %v6309_v51, %v5047_v8 }
0x151f   : > { %v5088_v37 = vadd.f32 %v5489_v47, %v5079_v31  ;;  %v5080_v49 = vmul.f32 %v5488_v24, %v5071_v21 }
0x1521   : > { %5091 = vst.msk [vmem:[%s7427_s4] sm:$0xff] %vm828_vm3, %v5088_v37  ;;  %v5089_v22 = vadd.f32 %v5489_v47, %v5080_v49 }
0x1522   : > { %v6311_v25 = vpop.eup %6310 }
0x1523   : > { %5092 = vst.msk [vmem:[%s7427_s4 + $0x8] sm:$0xff] %vm828_vm3, %v5089_v22  ;;  %v5072_v38 = vmul.f32 %v6311_v25, %v5048_v18 }
0x1525   : > { %v5081_v45 = vmul.f32 %v5488_v24, %v5072_v38 }
0x1527   : > { %v5090_v34 = vadd.f32 %v5489_v47, %v5081_v45 }
0x1529   : > { %5093 = vst.msk [vmem:[%s7427_s4 + $0x10] sm:$0xf] %vm2789_vm8, %v5090_v34 }
0x152a PF: > { %s7435_s21 = sld [smem:[#allocation2_spill]] }
0x1530   : > { %s27_s24 = sadd.s32 1, %s7435_s21  }
0x1531   : > { %p24_p5 = scmp.ge.s32.totalorder %s27_s24, 4  }
0x1533   :  { %26 = sbr.rel (!%p24_p5) target bundleno = 9 (0x9), region = 151 }

// kernel: midi_bass_generator_forward.3
= control target key start
LH: loop header
LB: loop body
LE: loop exit
PB: predicated region body
PF: predicated region fallthrough
CT: control target
= control target key end

     0   :  { %s8290_s6 = smov 1   ;;  %s8291_s10 = smov 2   ;;  %s9505_s0 = inlined_call_operand.smem [shape: u32[30], index: -1, kind: input, shape index: {}] }
   0x1   :  { %s8360_s5 = sld [smem:[%s9505_s0]]   ;;  %s8292_s14 = smov 3  }
   0x2   :  { %s8365_s9 = sld [smem:[%s9505_s0 + %s8290_s6]]   ;;  %s8293_s18 = smov 4  }
   0x3   :  { %s8370_s13 = sld [smem:[%s9505_s0 + %s8291_s10]]   ;;  %s8294_s22 = smov 5  }
   0x4   :  { %s8375_s17 = sld [smem:[%s9505_s0 + %s8292_s14]]   ;;  %s8295_s26 = smov 6  }
   0x5   :  { %s8380_s21 = sld [smem:[%s9505_s0 + %s8293_s18]]   ;;  %s8296_s30 = smov 7  }
   0x6   :  { %s8385_s25 = sld [smem:[%s9505_s0 + %s8294_s22]]   ;;  %s8297_s4 = smov 8  }
   0x7   :  { %9529 = sst [smem:[#allocation6_spill]] %s8360_s5  ;;  %s8298_s10 = smov 9  }
   0x8   :  { %9530 = sst [smem:[#allocation7_spill]] %s8365_s9  ;;  %s8299_s15 = smov 10  }
   0x9   :  { %9531 = sst [smem:[#allocation8_spill]] %s8370_s13  ;;  %s8300_s20 = smov 11  }
   0xa   :  { %9532 = sst [smem:[#allocation9_spill]] %s8375_s17  ;;  %s8302_s1 = smov 13  }
   0xb   :  { %9533 = sst [smem:[#allocation10_spill]] %s8380_s21  ;;  %s8303_s7 = smov 14  }
   0xc   :  { %9534 = sst [smem:[#allocation11_spill]] %s8385_s25  ;;  %s8305_s22 = smov 16  }
   0xd   :  { %s8390_s29 = sld [smem:[%s9505_s0 + %s8295_s26]]   ;;  %s8301_s26 = smov 12  }
   0xe   :  { %s8395_s3 = sld [smem:[%s9505_s0 + %s8296_s30]]   ;;  %s8306_s28 = smov 17  }
   0xf   :  { %s8400_s8 = sld [smem:[%s9505_s0 + %s8297_s4]]  }
  0x10   :  { %s8405_s14 = sld [smem:[%s9505_s0 + %s8298_s10]]  }
  0x11   :  { %s8410_s19 = sld [smem:[%s9505_s0 + %s8299_s15]]   ;;  %s8304_s15 = smov 15  }
  0x12   :  { %s8415_s24 = sld [smem:[%s9505_s0 + %s8300_s20]]  }
  0x13   :  { %9535 = sst [smem:[#allocation12_spill]] %s8390_s29 }
  0x14   :  { %9536 = sst [smem:[#allocation13_spill]] %s8395_s3 }
  0x15   :  { %9537 = sst [smem:[#allocation14_spill]] %s8400_s8 }
  0x16   :  { %9538 = sst [smem:[#allocation15_spill]] %s8405_s14 }
  0x17   :  { %s8420_s30 = sld [smem:[%s9505_s0 + %s8301_s26]]  }
  0x18   :  { %9539 = sst [smem:[#allocation16_spill]] %s8415_s24 }
  0x19   :  { %s8425_s6 = sld [smem:[%s9505_s0 + %s8302_s1]]  }
  0x1a   :  { %s8430_s12 = sld [smem:[%s9505_s0 + %s8303_s7]]   ;;  %s8307_s7 = smov 18  }
  0x1b   :  { %s8435_s20 = sld [smem:[%s9505_s0 + %s8304_s15]]   ;;  %s8308_s15 = smov 19  }
  0x1c   :  { %s8440_s27 = sld [smem:[%s9505_s0 + %s8305_s22]]   ;;  %s8309_s22 = smov 20  }
  0x1d   :  { %9540 = sst [smem:[#allocation17_spill]] %s8420_s30 }
  0x1e   :  { %s8445_s4 = sld [smem:[%s9505_s0 + %s8306_s28]]   ;;  %s8310_s28 = smov 21  }
  0x1f   :  { %9541 = sst [smem:[#allocation18_spill]] %s8425_s6 }
  0x20   :  { %s8450_s21 = sld [smem:[%s9505_s0 + %s8307_s7]]   ;;  %s8311_s7 = smov 22  }
  0x21   :  { %s8455_s13 = sld [smem:[%s9505_s0 + %s8308_s15]]   ;;  %s8312_s15 = smov 23  }
  0x22   :  { %s8460_s17 = sld [smem:[%s9505_s0 + %s8309_s22]]   ;;  %s8313_s22 = smov 24  }
  0x23   :  { %s8465_s9 = sld [smem:[%s9505_s0 + %s8310_s28]]   ;;  %s8314_s28 = smov 25  }
  0x24   :  { %9542 = sst [smem:[#allocation19_spill]] %s8445_s4 }
  0x25   :  { %s8470_s29 = sld [smem:[%s9505_s0 + %s8311_s7]]   ;;  %s8315_s7 = smov 26  }
  0x26   :  { %s8475_s5 = sld [smem:[%s9505_s0 + %s8312_s15]]   ;;  %s8316_s15 = smov 27  }
  0x27   :  { %s8480_s25 = sld [smem:[%s9505_s0 + %s8313_s22]]   ;;  %s8317_s22 = smov 28  }
  0x29   :  { %9543 = sst [smem:[#allocation20_spill]] %s8465_s9 }
  0x2a   :  { %s8485_s9 = sld [smem:[%s9505_s0 + %s8314_s28]]   ;;  %s8318_s28 = smov 29  }
  0x2b   :  { %9544 = sst [smem:[#allocation21_spill]] %s8470_s29 }
  0x2c   :  { %9545 = sst [smem:[#allocation22_spill]] %s8475_s5 }
  0x2d   :  { %9546 = sst [smem:[#allocation23_spill]] %s8480_s25 }
  0x2e   :  { %s8490_s29 = sld [smem:[%s9505_s0 + %s8315_s7]]  }
  0x2f   :  { %s8495_s5 = sld [smem:[%s9505_s0 + %s8316_s15]]  }
  0x30   :  { %9547 = sst [smem:[#allocation24_spill]] %s8485_s9 }
  0x31   :  { %s8500_s25 = sld [smem:[%s9505_s0 + %s8317_s22]]  }
  0x32   :  { %s8505_s9 = sld [smem:[%s9505_s0 + %s8318_s28]]  }
  0x35   :  { %9548 = sst [smem:[#allocation25_spill]] %s8495_s5 }
  0x37   :  { %9549 = sst [smem:[#allocation26_spill]] %s8500_s25 }
  0x38   :  { %9550 = sst [smem:[#allocation27_spill]] %s8505_s9 }
  0x39   :  { %64 = vsyncpa [#allocation4], 0  ;;  %s8507_s7 = smov 0  }
  0x3a LB: > { %9551 = sst [smem:[#allocation28_spill]] %s8288_s7  ;;  %s8513_s10 = sadd.s32 4294967295, %s8288_s7   ;;  %s8288_s7 = sphi %s8507_s7, %s70_s7  }
  0x3b   : > { %9552 = sst [smem:[#allocation29_spill]] %s8513_s10  ;;  %p6946_p0 = scmp.ge.s32.totalorder %s8288_s7, 1 }
  0x3c   : > { %p978_p1 = scmp.lt.s32.totalorder %s8288_s7, 3 }
  0x3e   : > { %p979_p2 = pnand %p6946_p0, %p978_p1 }
  0x40   : > { %982 = sbr.rel (%p979_p2) target bundleno = 10678 (0x29b6), region = 136 }
  0x47   : > { %s9554_s3 = sld [smem:[#allocation13_spill]]  ;;  %s9555_s14 = sld [smem:[#allocation15_spill]] }
  0x48   : > { %s9558_s6 = sld [smem:[#allocation18_spill]]  ;;  %s9559_s4 = sld [smem:[#allocation19_spill]] }
  0x49   : > { %p1119_p3 = scmp.lt.s32.totalorder %s8513_s10, 1  ;;  %s9560_s15 = sld [smem:[#allocation20_spill]] }
  0x4a   : > { %s9561_s18 = sld [smem:[#allocation21_spill]]  ;;  %s9565_s1 = sld [smem:[#allocation22_spill]] }
  0x4b   : > { %s8519_s0 = scalar_select %p1119_p3, %s8513_s10, 1 }
  0x4c   : > { %s9568_s5 = sld [smem:[#allocation29_spill]] }
  0x4d   : > { %s7221_s11 = sshll.u32 %s8519_s0, 4  ;;  %s7226_s10 = sshll.u32 %s8519_s0, 8 }
  0x4e   : > { %s8525_s22 = scalar_lea.vmem %s9554_s3, %s7221_s11  ;;  %s8528_s23 = scalar_lea.vmem %s9555_s14, %s7221_s11 }
  0x4f   : > { %9562 = sst [smem:[#allocation30_spill]] %s8525_s22  ;;  %s8537_s25 = scalar_lea.vmem %s9558_s6, %s7221_s11 }
  0x50   : > { %9563 = sst [smem:[#allocation31_spill]] %s8528_s23  ;;  %s8542_s16 = scalar_lea.vmem %s8435_s20, %s7221_s11 }
  0x51   : > { %9567 = sst [smem:[#allocation32_spill]] %s8537_s25  ;;  %s8547_s8 = scalar_lea.vmem %s9559_s4, %s7221_s11 }
  0x52   : > { %s8557_s28 = scalar_lea.vmem %s9560_s15, %s7226_s10  ;;  %s8560_s2 = scalar_lea.vmem %s9561_s18, %s7221_s11 }
  0x53   : > { %s7227_s24 = sshll.u32 %s8519_s0, 10  ;;  %p6962_p4 = scmp.ne.s32.totalorder %s9568_s5, 0 }
  0x54   : > { %s8566_s30 = scalar_lea.vmem %s9565_s1, %s7227_s24  ;;  %s9569_s3 = sld [smem:[#allocation11_spill]] (!%p6962_p4)  ;;  %v8319_v1 = vmov (!%p6962_p4), 0.0   ;;  %vm8320_vm0 = vmmov (!%p6962_p4), 0   ;;  %vm1217_vm1 = vcmask (!%p6962_p4), 130048   ;;  %vm1266_vm2 = vcmask (!%p6962_p4), 261120  }
  0x55   : > { %1198 = sbr.rel (%p6962_p4) target bundleno = 313 (0x139), region = 140  ;;  %s9570_s4 = sld [smem:[#allocation6_spill]] (!%p6962_p4)  ;;  %7531 = vmatprep.subr.bf16.mxu0 (!%p6962_p4), %v8319_v1  ;;  %7533 = vmatprep.mubr.msk.bf16.mxu0 (!%p6962_p4), %vm8320_vm0, %v8319_v1 }
  0x56   : > { %s9571_s14 = sld [smem:[#allocation12_spill]] (!%p6962_p4)  ;;  %s9572_s23 = sld [smem:[#allocation7_spill]] (!%p6962_p4) }
  0x5a   : > { %v7965_v0 = vld [vmem:[%s9569_s3] sm:$0xff] (!%p6962_p4)  }
  0x5b   : > { %v1199_v2 = vld [vmem:[%s9570_s4] sm:$0xff] (!%p6962_p4)  ;;  %v1200_v3 = vld [vmem:[%s9570_s4 + $0x8] sm:$0xff] (!%p6962_p4)  ;;  %7532 = vmatpush3.bf16.msra.mxu0 (!%p6962_p4), %v7965_v0 }
  0x5c   : > { %v1203_v4 = vpack.c.bf16 %v1200_v3, %v1199_v2  ;;  %v6963_v5 = vld [vmem:[%s9571_s14] ss:$0 sm:$0xff]  ;;  %v1263_v11 = vld [vmem:[%s9572_s23 + $0x8] sm:$0xff] }
  0x5d   : > { %v1262_v7 = vld [vmem:[%s9572_s23] sm:$0xff] }
  0x5e   : > { %7534 = vmatmul.mubr.msk.bf16.vlgmr.msra.gmra.mrb[0].mxu0 %vm1217_vm1, %v1203_v4 }
 0x131   : > { %v1255_v6 = vpop.f32.mrb[0].mxu0 }
 0x132   : > { %v1256_v8 = vadd.f32 %v6963_v5, %v1255_v6  ;;  %v7535_v9 = vpop.f32.mrb[1].mxu0 }
 0x133   : > { %v1258_v10 = vpop.f32.mrb[2].mxu0 }
 0x134   : > { %v1264_v12 = vadd.f32 %v1262_v7, %v1256_v8  ;;  %v1259_v13 = vadd.f32 %v6963_v5, %v1258_v10  ;;  %v7536_v14 = vpop.f32.mrb[3].mxu0 }
 0x136   : > { %1267 = vst.msk [vmem:[#allocation2] sm:$0xff] %vm1266_vm2, %v1264_v12  ;;  %v1265_v15 = vadd.f32 %v1263_v11, %v1259_v13 }
 0x138   : > { %1268 = vst.msk [vmem:[#allocation2 + $0x8] sm:$0xff] %vm1266_vm2, %v1265_v15 }
 0x139 PF: > { %s9573_s5 = sld [smem:[#allocation30_spill]]  ;;  %v8321_v17 = vmov 0.0   ;;  %vm8322_vm3 = vmmov 0   ;;  %vm1298_vm4 = vcmask 261120   ;;  %s8323_s24 = smov 124   ;;  %vm1353_vm5 = vcmask 31744  }
 0x13a   : > { %7537 = vmatprep.subr.bf16.mxu0 %v8321_v17  ;;  %s9574_s3 = sld [smem:[#allocation14_spill]]  ;;  %7545 = vmatprep.subr.bf16.mxu1 %v8321_v17  ;;  %s8324_s7 = smov 96   ;;  %vm1405_vm6 = vcmask 130048   ;;  %vm1610_vm7 = vcmask 1041408   ;;  %vm3030_vm8 = vcmask 162816  }
 0x13b   : > { %7541 = vmatprep.mubr.msk.bf16.mxu0 %vm8322_vm3, %v8321_v17  ;;  %7547 = vmatprep.mubr.msk.bf16.mxu1 %vm8322_vm3, %v8321_v17  ;;  %s8325_s10 = smov 92   ;;  %s9576_s11 = sld [smem:[#allocation9_spill]] }
 0x13c   : > { %s8326_s15 = smov 60   ;;  %s8327_s18 = smov 64  }
 0x13d   : > { %v1269_v19 = vld [vmem:[#allocation2] sm:$0xff]  ;;  %s8328_s26 = smov 88   ;;  %s8329_s1 = smov 120  }
 0x13e   : > { %s9521_s25 = smov 76   ;;  %s8337_s6 = smov 48  }
 0x13f   : > { %v7966_v16 = vld [vmem:[%s9573_s5] sm:$0xff]   ;;  %v7967_v18 = vld [vmem:[%s9573_s5 + $0x8] sm:$0xff]   ;;  %s9577_s5 = sld [smem:[#allocation31_spill]]  ;;  %s8338_s9 = smov 108  }
 0x140   : > { %7538 = vmatpush3.bf16.msra.mxu0 %v7966_v16  ;;  %v1270_v20 = vld [vmem:[#allocation2 + $0x8] sm:$0xff]  ;;  %s9575_s14 = scalar_lea.vmem %s9574_s3, %s8519_s0  ;;  %s8330_s3 = smov 84  }
 0x141   : > { %7539 = vmatprep.subr.bf16.mxu0 %v8321_v17  ;;  %v1278_v21 = vpack.c.bf16 %v1270_v20, %v1269_v19  ;;  %v6966_v22 = vld [vmem:[%s9575_s14] ss:$0 sm:$0xff]  ;;  %v8618_v40 = vld [vmem:[%s9576_s11 + $0x8] sm:$0xff]  ;;  %s8331_s14 = smov 56   ;;  %s9523_s22 = smov 104  }
 0x142   : > { %v8615_v36 = vld [vmem:[%s9576_s11] sm:$0xff] }
 0x144   : > { %7540 = vmatpush3.bf16.msra.mxu0 %v7967_v18 }
 0x145   : > { %7551 = vmatprep.subr.bf16.mxu0 %v8321_v17 }
 0x147   : > { %7542 = vmatmul.mubr.msk.bf16.vlgmr.msra.gmra.mrb[0].mxu0 %vm1298_vm4, %v1278_v21 }
 0x148   : > { %7553 = vmatprep.mubr.msk.bf16.mxu0 %vm8322_vm3, %v8321_v17 }
 0x21a   : > { %v1336_v23 = vpop.f32.mrb[0].mxu0 }
 0x21b   : > { %v7543_v24 = vpop.f32.mrb[1].mxu0  ;;  %v1337_v26 = vadd.f32 %v6966_v22, %v1336_v23 }
 0x21c   : > { %v1339_v25 = vpop.f32.mrb[2].mxu0 }
 0x21d   : > { %v1340_v27 = vadd.f32 %v6966_v22, %v1339_v25  ;;  %v7544_v28 = vpop.f32.mrb[3].mxu0 }
 0x21f   : > { %v8595_v29 = vpack.c.bf16 %v1340_v27, %v1337_v26 }
 0x221   : > { %1477 = vrot.lane.b32.xlu1 %v8595_v29, %s8323_s24  ;;  %1351 = vrot.lane.b32.xlu0 %v8595_v29, %s8324_s7 }
 0x225   : > { %1479 = vrot.lane.b32.xlu0 %v8595_v29, %s8325_s10 }
 0x293   : > { %v1352_v30 = vpop.permute.xlu0 %1351  ;;  %v1478_v34 = vpop.permute.xlu1 %1477 }
 0x294   : > { %v1358_v31 = vsel %vm1353_vm5, %v1352_v30, 0 }
 0x295   : > { %7546 = vmatpush3.bf16.xpose.msra.mxu1 %v1358_v31  ;;  %v1343_v31 = vld [vmem:[%s9577_s5] sm:$0xf] }
 0x296   : > { %7557 = vmatprep.subr.bf16.mxu1 %v8321_v17 }
 0x297   : > { %v1480_v32 = vpop.permute.xlu0 %1479 }
 0x298   : > { %v1485_v33 = vsel %vm1353_vm5, %v1480_v32, 0  ;;  %v6974_v32 = vcombine.low %v1343_v31, %v1343_v31 }
 0x29c   : > { %7548 = vmatmul.mubr.msk.bf16.vlgmr.msra.gmra.mrb[0].mxu1 %vm1353_vm5, %v8595_v29 }
 0x29d   : > { %7558 = vmatpush3.bf16.xpose.msra.mxu1 %v1485_v33  ;;  %7559 = vmatprep.mubr.msk.bf16.mxu1 %vm8322_vm3, %v8321_v17  ;;  %v1659_v33 = vsel %vm1610_vm7, %v1343_v31, 0 }
 0x29e   : > { %7569 = vmatprep.subr.bf16.mxu1 %v8321_v17 }
 0x2a4   : > { %7560 = vmatmul.mubr.msk.bf16.vlgmr.msra.gmra.mrb[4].mxu1 %vm1353_vm5, %v1478_v34  ;;  %v1606_v34 = vrot.slane %v6974_v32, 2 }
 0x2a5   : > { %7571 = vmatprep.mubr.msk.bf16.mxu1 %vm8322_vm3, %v8321_v17 }
 0x36f   : > { %v1394_v35 = vpop.f32.mrb[0].mxu1 }
 0x370   : > { %v1401_v37 = vmul.f32 0.5, %v1394_v35  ;;  %v7549_v38 = vpop.f32.mrb[1].mxu1  ;;  %v1612_v35 = vsel %vm1610_vm7, %v1606_v34, 0 }
 0x371   : > { %v1397_v39 = vpop.f32.mrb[2].mxu1  ;;  %7570 = vmatpush3.bf16.msra.mxu1 %v1612_v35 }
 0x372   : > { %v1402_v41 = vmul.f32 0.5, %v1397_v39  ;;  %v7550_v42 = vpop.f32.mrb[3].mxu1  ;;  %v1403_v43 = vadd.f32 %v1401_v37, %v8615_v36  ;;  %7581 = vmatprep.subr.bf16.mxu1 %v8321_v17 }
 0x374   : > { %v1406_v44 = vsel %vm1405_vm6, %v1403_v43, -inf  ;;  %v1404_v45 = vadd.f32 %v1402_v41, %v8618_v40 }
 0x375   : > { %1407 = vmax.xlane.f32.xlu1 %v1406_v44 }
 0x376   : > { %v1409_v46 = vsel %vm1405_vm6, %v1404_v45, -inf }
 0x377   : > { %1410 = vmax.xlane.f32.xlu0 %v1409_v46  ;;  %v1521_v47 = vpop.f32.mrb[4].mxu1 }
 0x378   : > { %v1528_v48 = vmul.f32 0.5, %v1521_v47  ;;  %v7561_v49 = vpop.f32.mrb[5].mxu1 }
 0x379   : > { %v1524_v50 = vpop.f32.mrb[6].mxu1 }
 0x37a   : > { %v1529_v51 = vmul.f32 0.5, %v1524_v50  ;;  %v7562_v52 = vpop.f32.mrb[7].mxu1  ;;  %v1530_v53 = vadd.f32 %v1528_v48, %v8615_v36 }
 0x37c   : > { %v1532_v54 = vsel %vm1405_vm6, %v1530_v53, -inf  ;;  %v1531_v55 = vadd.f32 %v1529_v51, %v8618_v40 }
 0x37d   : > { %1533 = vmax.xlane.f32.xlu0 %v1532_v54 }
 0x37e   : > { %v1535_v56 = vsel %vm1405_vm6, %v1531_v55, -inf }
 0x37f   : > { %1536 = vmax.xlane.f32.xlu1 %v1535_v56 }
 0x402   : > { %v1408_v57 = vpop.xlane.xlu1 %1407 }
 0x403   : > { %v1412_v58 = vsub.f32 %v1403_v43, %v1408_v57 }
 0x404   : > { %v1411_v59 = vpop.xlane.xlu0 %1410 }
 0x405   : > { %v1414_v60 = vmul.f32 1.442695, %v1412_v58  ;;  %v1413_v61 = vsub.f32 %v1404_v45, %v1411_v59 }
 0x407   : > { %8108 = vpow2.f32 %v1414_v60  ;;  %v1416_v62 = vmul.f32 1.442695, %v1413_v61 }
 0x409   : > { %8110 = vpow2.f32 %v1416_v62 }
 0x40a   : > { %v1534_v63 = vpop.xlane.xlu0 %1533 }
 0x40b   : > { %v1538_v0 = vsub.f32 %v1530_v53, %v1534_v63 }
 0x40c   : > { %v1537_v1 = vpop.xlane.xlu1 %1536 }
 0x40d   : > { %v1540_v2 = vmul.f32 1.442695, %v1538_v0  ;;  %v1539_v3 = vsub.f32 %v1531_v55, %v1537_v1 }
 0x40f   : > { %8112 = vpow2.f32 %v1540_v2  ;;  %v1542_v4 = vmul.f32 1.442695, %v1539_v3 }
 0x411   : > { %v8109_v5 = vpop.eup %8108  ;;  %8114 = vpow2.f32 %v1542_v4 }
 0x412   : > { %v1418_v6 = vsel %vm1405_vm6, %v8109_v5, 0.0 }
 0x413   : > { %v8111_v7 = vpop.eup %8110  ;;  %1419 = vadd.xlane.f32.xlu0 %v1418_v6 }
 0x414   : > { %v1421_v8 = vsel %vm1405_vm6, %v8111_v7, 0.0 }
 0x415   : > { %1422 = vadd.xlane.f32.xlu1 %v1421_v8 }
 0x419   : > { %v8113_v9 = vpop.eup %8112 }
 0x41a   : > { %v1544_v10 = vsel %vm1405_vm6, %v8113_v9, 0.0 }
 0x41b   : > { %v8115_v11 = vpop.eup %8114  ;;  %1545 = vadd.xlane.f32.xlu0 %v1544_v10 }
 0x41c   : > { %v1547_v12 = vsel %vm1405_vm6, %v8115_v11, 0.0 }
 0x41d   : > { %1548 = vadd.xlane.f32.xlu1 %v1547_v12 }
 0x42e   : > { %1555 = vrot.lane.b32.xlu1 %v8595_v29, %s8326_s15  ;;  %s8332_s15 = smov 116  }
 0x431   : > { %1429 = vrot.lane.b32.xlu0 %v8595_v29, %s8327_s18  ;;  %s8333_s18 = smov 52  }
 0x432   : > { %1704 = vrot.lane.b32.xlu1 %v8595_v29, %s8328_s26 }
 0x435   : > { %1702 = vrot.lane.b32.xlu0 %v8595_v29, %s8329_s1 }
 0x4a0   : > { %v1420_v13 = vpop.xlane.xlu0 %1419 }
 0x4a1   : > { %8116 = vrcp.f32 %v1420_v13 }
 0x4a2   : > { %v1423_v14 = vpop.xlane.xlu1 %1422 }
 0x4a3   : > { %8118 = vrcp.f32 %v1423_v14 }
 0x4a8   : > { %v1546_v15 = vpop.xlane.xlu0 %1545 }
 0x4a9   : > { %8120 = vrcp.f32 %v1546_v15 }
 0x4aa   : > { %v1549_v16 = vpop.xlane.xlu1 %1548 }
 0x4ab   : > { %v8117_v18 = vpop.eup %8116  ;;  %8122 = vrcp.f32 %v1549_v16 }
 0x4ac   : > { %v1430_v19 = vpop.permute.xlu0 %1429  ;;  %v1426_v21 = vmul.f32 %v8117_v18, %v8109_v5 }
 0x4ad   : > { %v8119_v20 = vpop.eup %8118  ;;  %7552 = vmatpush3.bf16.msra.mxu0 %v1430_v19 }
 0x4ae   : > { %v1427_v22 = vmul.f32 %v8119_v20, %v8111_v7  ;;  %7563 = vmatprep.subr.bf16.mxu0 %v8321_v17  ;;  %v1556_v24 = vpop.permute.xlu1 %1555 }
 0x4b0   : > { %v1428_v23 = vpack.c.bf16 %v1427_v22, %v1426_v21  ;;  %v1703_v50 = vpop.permute.xlu0 %1702 }
 0x4b2   : > { %7554 = vmatmul.mubr.msk.bf16.vlgmr.msra.gmra.mrb[4].mxu0 %vm1405_vm6, %v1428_v23  ;;  %v1705_v45 = vpop.permute.xlu1 %1704 }
 0x4b3   : > { %v8121_v25 = vpop.eup %8120  ;;  %7564 = vmatpush3.bf16.msra.mxu0 %v1556_v24  ;;  %7565 = vmatprep.mubr.msk.bf16.mxu0 %vm8322_vm3, %v8321_v17  ;;  %v1710_v49 = vsel %vm1353_vm5, %v1705_v45, 0 }
 0x4b4   : > { %7575 = vmatprep.subr.bf16.mxu0 %v8321_v17  ;;  %v1552_v27 = vmul.f32 %v8121_v25, %v8113_v9 }
 0x4b5   : > { %v8123_v26 = vpop.eup %8122 }
 0x4b6   : > { %v1553_v28 = vmul.f32 %v8123_v26, %v8115_v11 }
 0x4b8   : > { %v1554_v30 = vpack.c.bf16 %v1553_v28, %v1552_v27 }
 0x4ba   : > { %7566 = vmatmul.mubr.msk.bf16.vlgmr.msra.gmra.mrb[8].mxu0 %vm1405_vm6, %v1554_v30  ;;  %v8687_v30 = vld [vmem:[%s9577_s5 + $0x4] sm:$0xf] }
 0x4bb   : > { %7577 = vmatprep.mubr.msk.bf16.mxu0 %vm8322_vm3, %v8321_v17  ;;  %7576 = vmatpush3.bf16.msra.mxu0 %v1659_v33  ;;  %v1832_v31 = vsel %vm1610_vm7, %v8687_v30, 0 }
 0x4bc   : > { %7587 = vmatprep.subr.bf16.mxu0 %v8321_v17 }
 0x585   : > { %v1469_v37 = vpop.f32.mrb[4].mxu0 }
 0x586   : > { %v7555_v38 = vpop.f32.mrb[5].mxu0 }
 0x587   : > { %v1472_v39 = vpop.f32.mrb[6].mxu0 }
 0x588   : > { %v1476_v41 = vpack.c.bf16 %v1472_v39, %v1469_v37  ;;  %v7556_v42 = vpop.f32.mrb[7].mxu0 }
 0x58a   : > { %7578 = vmatmul.mubr.msk.bf16.vlgmr.msra.gmra.mrb[12].mxu0 %vm1353_vm5, %v1476_v41 }
 0x58b   : > { %7589 = vmatprep.mubr.msk.bf16.mxu0 %vm8322_vm3, %v8321_v17 }
 0x58d   : > { %v1595_v43 = vpop.f32.mrb[8].mxu0 }
 0x58e   : > { %v7567_v44 = vpop.f32.mrb[9].mxu0 }
 0x58f   : > { %v1598_v46 = vpop.f32.mrb[10].mxu0 }
 0x590   : > { %v1602_v47 = vpack.c.bf16 %v1598_v46, %v1595_v43  ;;  %v7568_v48 = vpop.f32.mrb[11].mxu0 }
 0x592   : > { %7572 = vmatmul.mubr.msk.bf16.vlgmr.msra.gmra.mrb[8].mxu1 %vm1353_vm5, %v1602_v47 }
 0x593   : > { %7582 = vmatpush3.bf16.xpose.msra.mxu1 %v1710_v49  ;;  %7583 = vmatprep.mubr.msk.bf16.mxu1 %vm8322_vm3, %v8321_v17 }
 0x594   : > { %7593 = vmatprep.subr.bf16.mxu1 %v8321_v17 }
 0x59a   : > { %7584 = vmatmul.mubr.msk.bf16.vlgmr.msra.gmra.mrb[12].mxu1 %vm1353_vm5, %v1703_v50 }
 0x59b   : > { %7595 = vmatprep.mubr.msk.bf16.mxu1 %vm8322_vm3, %v8321_v17  ;;  %7594 = vmatpush3.bf16.msra.mxu1 %v1832_v31 }
 0x59c   : > { %7605 = vmatprep.subr.bf16.mxu1 %v8321_v17 }
 0x65d   : > { %v1695_v51 = vpop.f32.mrb[12].mxu0 }
 0x65e   : > { %v7579_v52 = vpop.f32.mrb[13].mxu0 }
 0x65f   : > { %v1698_v53 = vpop.f32.mrb[14].mxu0 }
 0x660   : > { %v7580_v54 = vpop.f32.mrb[15].mxu0 }
 0x665   : > { %v1648_v55 = vpop.f32.mrb[8].mxu1 }
 0x666   : > { %v8662_v56 = vadd.f32 %v1695_v51, %v1648_v55  ;;  %v7573_v57 = vpop.f32.mrb[9].mxu1 }
 0x667   : > { %v1651_v58 = vpop.f32.mrb[10].mxu1 }
 0x668   : > { %v8664_v59 = vadd.f32 %v1698_v53, %v1651_v58  ;;  %v7574_v60 = vpop.f32.mrb[11].mxu1 }
 0x66d   : > { %v1746_v61 = vpop.f32.mrb[12].mxu1 }
 0x66e   : > { %v1753_v62 = vmul.f32 0.5, %v1746_v61  ;;  %v7585_v63 = vpop.f32.mrb[13].mxu1 }
 0x66f   : > { %v1749_v0 = vpop.f32.mrb[14].mxu1 }
 0x670   : > { %v1754_v1 = vmul.f32 0.5, %v1749_v0  ;;  %v7586_v2 = vpop.f32.mrb[15].mxu1  ;;  %v1755_v3 = vadd.f32 %v1753_v62, %v8615_v36 }
 0x672   : > { %v1757_v4 = vsel %vm1405_vm6, %v1755_v3, -inf  ;;  %v1756_v5 = vadd.f32 %v1754_v1, %v8618_v40 }
 0x673   : > { %1758 = vmax.xlane.f32.xlu1 %v1757_v4 }
 0x674   : > { %v1760_v6 = vsel %vm1405_vm6, %v1756_v5, -inf }
 0x675   : > { %1761 = vmax.xlane.f32.xlu0 %v1760_v6 }
 0x700   : > { %v1759_v7 = vpop.xlane.xlu1 %1758 }
 0x701   : > { %v1763_v8 = vsub.f32 %v1755_v3, %v1759_v7 }
 0x702   : > { %v1762_v9 = vpop.xlane.xlu0 %1761 }
 0x703   : > { %v1765_v10 = vmul.f32 1.442695, %v1763_v8  ;;  %v1764_v11 = vsub.f32 %v1756_v5, %v1762_v9 }
 0x705   : > { %8124 = vpow2.f32 %v1765_v10  ;;  %v1767_v12 = vmul.f32 1.442695, %v1764_v11 }
 0x707   : > { %8126 = vpow2.f32 %v1767_v12 }
 0x70f   : > { %v8125_v13 = vpop.eup %8124 }
 0x710   : > { %v1769_v14 = vsel %vm1405_vm6, %v8125_v13, 0.0 }
 0x711   : > { %v8127_v15 = vpop.eup %8126  ;;  %1770 = vadd.xlane.f32.xlu0 %v1769_v14 }
 0x712   : > { %v1772_v16 = vsel %vm1405_vm6, %v8127_v15, 0.0 }
 0x713   : > { %1773 = vadd.xlane.f32.xlu1 %v1772_v16 }
 0x724   : > { %1879 = vrot.lane.b32.xlu1 %v8595_v29, %s8330_s3 }
 0x727   : > { %1780 = vrot.lane.b32.xlu0 %v8595_v29, %s8331_s14  ;;  %s8334_s14 = smov 112  }
 0x728   : > { %1877 = vrot.lane.b32.xlu1 %v8595_v29, %s8332_s15 }
 0x79e   : > { %v1771_v18 = vpop.xlane.xlu0 %1770 }
 0x79f   : > { %8128 = vrcp.f32 %v1771_v18 }
 0x7a0   : > { %v1774_v19 = vpop.xlane.xlu1 %1773 }
 0x7a1   : > { %8130 = vrcp.f32 %v1774_v19 }
 0x7a2   : > { %v1781_v20 = vpop.permute.xlu0 %1780 }
 0x7a3   : > { %7588 = vmatpush3.bf16.msra.mxu0 %v1781_v20 }
 0x7a4   : > { %7599 = vmatprep.subr.bf16.mxu0 %v8321_v17  ;;  %v1880_v25 = vpop.permute.xlu1 %1879 }
 0x7a5   : > { %v1885_v27 = vsel %vm1353_vm5, %v1880_v25, 0 }
 0x7a8   : > { %v1878_v28 = vpop.permute.xlu1 %1877 }
 0x7a9   : > { %v8129_v21 = vpop.eup %8128 }
 0x7aa   : > { %v1777_v23 = vmul.f32 %v8129_v21, %v8125_v13 }
 0x7ab   : > { %v8131_v22 = vpop.eup %8130 }
 0x7ac   : > { %v1778_v24 = vmul.f32 %v8131_v22, %v8127_v15 }
 0x7ae   : > { %v1779_v26 = vpack.c.bf16 %v1778_v24, %v1777_v23 }
 0x7b0   : > { %7590 = vmatmul.mubr.msk.bf16.vlgmr.msra.gmra.mrb[16].mxu0 %vm1405_vm6, %v1779_v26 }
 0x7b1   : > { %7600 = vmatpush3.bf16.xpose.msra.mxu0 %v1885_v27  ;;  %7601 = vmatprep.mubr.msk.bf16.mxu0 %vm8322_vm3, %v8321_v17 }
 0x7b2   : > { %7611 = vmatprep.subr.bf16.mxu0 %v8321_v17 }
 0x7b8   : > { %7602 = vmatmul.mubr.msk.bf16.vlgmr.msra.gmra.mrb[20].mxu0 %vm1353_vm5, %v1878_v28 }
 0x7b9   : > { %7613 = vmatprep.mubr.msk.bf16.mxu0 %vm8322_vm3, %v8321_v17 }
 0x883   : > { %v1820_v32 = vpop.f32.mrb[16].mxu0 }
 0x884   : > { %v7591_v33 = vpop.f32.mrb[17].mxu0 }
 0x885   : > { %v1823_v34 = vpop.f32.mrb[18].mxu0 }
 0x886   : > { %v1827_v35 = vpack.c.bf16 %v1823_v34, %v1820_v32  ;;  %v7592_v37 = vpop.f32.mrb[19].mxu0 }
 0x888   : > { %7596 = vmatmul.mubr.msk.bf16.vlgmr.msra.gmra.mrb[16].mxu1 %vm1353_vm5, %v1827_v35 }
 0x889   : > { %7607 = vmatprep.mubr.msk.bf16.mxu1 %vm8322_vm3, %v8321_v17 }
 0x88b   : > { %v1921_v38 = vpop.f32.mrb[20].mxu0 }
 0x88c   : > { %v1928_v39 = vmul.f32 0.5, %v1921_v38  ;;  %v7603_v41 = vpop.f32.mrb[21].mxu0 }
 0x88d   : > { %v1924_v42 = vpop.f32.mrb[22].mxu0 }
 0x88e   : > { %v1929_v43 = vmul.f32 0.5, %v1924_v42  ;;  %v7604_v44 = vpop.f32.mrb[23].mxu0  ;;  %v1930_v45 = vadd.f32 %v1928_v39, %v8615_v36 }
 0x890   : > { %v1932_v46 = vsel %vm1405_vm6, %v1930_v45, -inf  ;;  %v1931_v47 = vadd.f32 %v1929_v43, %v8618_v40 }
 0x891   : > { %1933 = vmax.xlane.f32.xlu0 %v1932_v46 }
 0x892   : > { %v1935_v48 = vsel %vm1405_vm6, %v1931_v47, -inf }
 0x893   : > { %1936 = vmax.xlane.f32.xlu1 %v1935_v48 }
 0x8a4   : > { %1955 = vrot.lane.b32.xlu1 %v8595_v29, %s8333_s18  ;;  %s8335_s18 = smov 80  }
 0x8a8   : > { %2056 = vrot.lane.b32.xlu1 %v8595_v29, %s8334_s14 }
 0x91e   : > { %v1934_v49 = vpop.xlane.xlu0 %1933 }
 0x91f   : > { %v1938_v50 = vsub.f32 %v1930_v45, %v1934_v49 }
 0x920   : > { %v1937_v51 = vpop.xlane.xlu1 %1936 }
 0x921   : > { %v1940_v52 = vmul.f32 1.442695, %v1938_v50  ;;  %v1939_v53 = vsub.f32 %v1931_v47, %v1937_v51 }
 0x923   : > { %8132 = vpow2.f32 %v1940_v52  ;;  %v1942_v54 = vmul.f32 1.442695, %v1939_v53 }
 0x924   : > { %v1956_v55 = vpop.permute.xlu1 %1955 }
 0x925   : > { %8134 = vpow2.f32 %v1942_v54  ;;  %7606 = vmatpush3.bf16.msra.mxu1 %v1956_v55 }
 0x926   : > { %7617 = vmatprep.subr.bf16.mxu1 %v8321_v17 }
 0x92d   : > { %v8133_v57 = vpop.eup %8132 }
 0x92e   : > { %v1944_v58 = vsel %vm1405_vm6, %v8133_v57, 0.0 }
 0x92f   : > { %v8135_v60 = vpop.eup %8134  ;;  %1945 = vadd.xlane.f32.xlu0 %v1944_v58 }
 0x930   : > { %v1947_v61 = vsel %vm1405_vm6, %v8135_v60, 0.0 }
 0x933   : > { %1948 = vadd.xlane.f32.xlu0 %v1947_v61 }
 0x949   : > { %2058 = vrot.lane.b32.xlu0 %v8595_v29, %s8335_s18 }
 0x95b   : > { %v1868_v62 = vpop.f32.mrb[16].mxu1 }
 0x95c   : > { %v8708_v63 = vadd.f32 %v1868_v62, %v8662_v56  ;;  %v7597_v0 = vpop.f32.mrb[17].mxu1  ;;  %v2057_v56 = vpop.permute.xlu1 %2056 }
 0x95d   : > { %v1871_v1 = vpop.f32.mrb[18].mxu1 }
 0x95e   : > { %v8711_v2 = vadd.f32 %v1871_v1, %v8664_v59  ;;  %v7598_v3 = vpop.f32.mrb[19].mxu1  ;;  %v6982_v59 = vcombine.low %v8687_v30, %v8687_v30 }
 0x960   : > { %v2006_v13 = vrot.slane %v6982_v59, 2 }
 0x962   : > { %v2011_v14 = vsel %vm1610_vm7, %v2006_v13, 0 }
 0x963   : > { %7612 = vmatpush3.bf16.msra.mxu0 %v2011_v14 }
 0x964   : > { %7623 = vmatprep.subr.bf16.mxu0 %v8321_v17 }
 0x9bc   : > { %v1946_v4 = vpop.xlane.xlu0 %1945 }
 0x9bd   : > { %8136 = vrcp.f32 %v1946_v4 }
 0x9c0   : > { %v1949_v5 = vpop.xlane.xlu0 %1948 }
 0x9c1   : > { %8138 = vrcp.f32 %v1949_v5 }
 0x9c4   : > { %v2059_v10 = vpop.permute.xlu0 %2058 }
 0x9c5   : > { %v2064_v12 = vsel %vm1353_vm5, %v2059_v10, 0 }
 0x9c7   : > { %v8137_v6 = vpop.eup %8136 }
 0x9c8   : > { %v1952_v8 = vmul.f32 %v8137_v6, %v8133_v57 }
 0x9cb   : > { %v8139_v7 = vpop.eup %8138 }
 0x9cc   : > { %v1953_v9 = vmul.f32 %v8139_v7, %v8135_v60 }
 0x9ce   : > { %v1954_v11 = vpack.c.bf16 %v1953_v9, %v1952_v8 }
 0x9d0   : > { %7608 = vmatmul.mubr.msk.bf16.vlgmr.msra.gmra.mrb[20].mxu1 %vm1405_vm6, %v1954_v11 }
 0x9d1   : > { %7618 = vmatpush3.bf16.xpose.msra.mxu1 %v2064_v12  ;;  %7619 = vmatprep.mubr.msk.bf16.mxu1 %vm8322_vm3, %v8321_v17 }
 0x9d2   : > { %7629 = vmatprep.subr.bf16.mxu1 %v8321_v17 }
 0x9d8   : > { %7620 = vmatmul.mubr.msk.bf16.vlgmr.msra.gmra.mrb[24].mxu1 %vm1353_vm5, %v2057_v56 }
 0x9d9   : > { %7631 = vmatprep.mubr.msk.bf16.mxu1 %vm8322_vm3, %v8321_v17 }
 0xaa3   : > { %v1995_v15 = vpop.f32.mrb[20].mxu1 }
 0xaa4   : > { %v7609_v16 = vpop.f32.mrb[21].mxu1 }
 0xaa5   : > { %v1998_v18 = vpop.f32.mrb[22].mxu1 }
 0xaa6   : > { %v2002_v19 = vpack.c.bf16 %v1998_v18, %v1995_v15  ;;  %v7610_v20 = vpop.f32.mrb[23].mxu1 }
 0xaa8   : > { %7614 = vmatmul.mubr.msk.bf16.vlgmr.msra.gmra.mrb[24].mxu0 %vm1353_vm5, %v2002_v19 }
 0xaa9   : > { %7625 = vmatprep.mubr.msk.bf16.mxu0 %vm8322_vm3, %v8321_v17 }
 0xaab   : > { %v2100_v21 = vpop.f32.mrb[24].mxu1 }
 0xaac   : > { %v2107_v22 = vmul.f32 0.5, %v2100_v21  ;;  %v7621_v23 = vpop.f32.mrb[25].mxu1 }
 0xaad   : > { %v2103_v24 = vpop.f32.mrb[26].mxu1 }
 0xaae   : > { %v2108_v25 = vmul.f32 0.5, %v2103_v24  ;;  %v7622_v26 = vpop.f32.mrb[27].mxu1  ;;  %v2109_v27 = vadd.f32 %v2107_v22, %v8615_v36 }
 0xab0   : > { %v2111_v28 = vsel %vm1405_vm6, %v2109_v27, -inf  ;;  %v2110_v30 = vadd.f32 %v2108_v25, %v8618_v40 }
 0xab1   : > { %2112 = vmax.xlane.f32.xlu1 %v2111_v28 }
 0xab2   : > { %v2114_v31 = vsel %vm1405_vm6, %v2110_v30, -inf }
 0xab3   : > { %2115 = vmax.xlane.f32.xlu0 %v2114_v31 }
 0xb3e   : > { %v2113_v32 = vpop.xlane.xlu1 %2112 }
 0xb3f   : > { %v2117_v33 = vsub.f32 %v2109_v27, %v2113_v32 }
 0xb40   : > { %v2116_v34 = vpop.xlane.xlu0 %2115 }
 0xb41   : > { %v2119_v35 = vmul.f32 1.442695, %v2117_v33  ;;  %v2118_v37 = vsub.f32 %v2110_v30, %v2116_v34 }
 0xb43   : > { %8140 = vpow2.f32 %v2119_v35  ;;  %v2121_v38 = vmul.f32 1.442695, %v2118_v37 }
 0xb45   : > { %8142 = vpow2.f32 %v2121_v38 }
 0xb4d   : > { %v8141_v39 = vpop.eup %8140 }
 0xb4e   : > { %v2123_v41 = vsel %vm1405_vm6, %v8141_v39, 0.0 }
 0xb4f   : > { %v8143_v42 = vpop.eup %8142  ;;  %2124 = vadd.xlane.f32.xlu0 %v2123_v41 }
 0xb50   : > { %v2126_v43 = vsel %vm1405_vm6, %v8143_v42, 0.0 }
 0xb51   : > { %2127 = vadd.xlane.f32.xlu1 %v2126_v43 }
 0xb62   : > { %2233 = vrot.lane.b32.xlu1 %v8595_v29, %s9521_s25  ;;  %s8343_s25 = smov 40  }
 0xb65   : > { %2134 = vrot.lane.b32.xlu0 %v8595_v29, %s8337_s6  ;;  %s8339_s6 = smov 44  }
 0xb66   : > { %2231 = vrot.lane.b32.xlu1 %v8595_v29, %s8338_s9 }
 0xb7b   : > { %v2047_v44 = vpop.f32.mrb[24].mxu0 }
 0xb7c   : > { %v8740_v45 = vadd.f32 %v2047_v44, %v8708_v63  ;;  %v7615_v46 = vpop.f32.mrb[25].mxu0  ;;  %v8755_v63 = vld [vmem:[%s9577_s5 + $0x8] sm:$0xf] }
 0xb7d   : > { %v2050_v47 = vpop.f32.mrb[26].mxu0  ;;  %v2186_v0 = vsel %vm1610_vm7, %v8755_v63, 0 }
 0xb7e   : > { %v8743_v48 = vadd.f32 %v2050_v47, %v8711_v2  ;;  %v7616_v49 = vpop.f32.mrb[27].mxu0  ;;  %7630 = vmatpush3.bf16.msra.mxu1 %v2186_v0 }
 0xb7f   : > { %7641 = vmatprep.subr.bf16.mxu1 %v8321_v17 }
 0xbdc   : > { %v2125_v50 = vpop.xlane.xlu0 %2124 }
 0xbdd   : > { %8144 = vrcp.f32 %v2125_v50 }
 0xbde   : > { %v2128_v51 = vpop.xlane.xlu1 %2127 }
 0xbdf   : > { %8146 = vrcp.f32 %v2128_v51 }
 0xbe0   : > { %v2135_v52 = vpop.permute.xlu0 %2134 }
 0xbe1   : > { %7624 = vmatpush3.bf16.msra.mxu0 %v2135_v52 }
 0xbe2   : > { %7635 = vmatprep.subr.bf16.mxu0 %v8321_v17  ;;  %v2234_v58 = vpop.permute.xlu1 %2233 }
 0xbe3   : > { %v2239_v61 = vsel %vm1353_vm5, %v2234_v58, 0 }
 0xbe6   : > { %v2232_v62 = vpop.permute.xlu1 %2231 }
 0xbe7   : > { %v8145_v53 = vpop.eup %8144 }
 0xbe8   : > { %v2131_v55 = vmul.f32 %v8145_v53, %v8141_v39 }
 0xbe9   : > { %v8147_v54 = vpop.eup %8146 }
 0xbea   : > { %v2132_v57 = vmul.f32 %v8147_v54, %v8143_v42 }
 0xbec   : > { %v2133_v60 = vpack.c.bf16 %v2132_v57, %v2131_v55 }
 0xbee   : > { %7626 = vmatmul.mubr.msk.bf16.vlgmr.msra.gmra.mrb[28].mxu0 %vm1405_vm6, %v2133_v60 }
 0xbef   : > { %7636 = vmatpush3.bf16.xpose.msra.mxu0 %v2239_v61  ;;  %7637 = vmatprep.mubr.msk.bf16.mxu0 %vm8322_vm3, %v8321_v17 }
 0xbf0   : > { %7647 = vmatprep.subr.bf16.mxu0 %v8321_v17 }
 0xbf6   : > { %7638 = vmatmul.mubr.msk.bf16.vlgmr.msra.gmra.mrb[32].mxu0 %vm1353_vm5, %v2232_v62 }
 0xbf7   : > { %7649 = vmatprep.mubr.msk.bf16.mxu0 %vm8322_vm3, %v8321_v17 }
 0xcc1   : > { %v2174_v1 = vpop.f32.mrb[28].mxu0 }
 0xcc2   : > { %v7627_v2 = vpop.f32.mrb[29].mxu0 }
 0xcc3   : > { %v2177_v3 = vpop.f32.mrb[30].mxu0 }
 0xcc4   : > { %v2181_v4 = vpack.c.bf16 %v2177_v3, %v2174_v1  ;;  %v7628_v5 = vpop.f32.mrb[31].mxu0 }
 0xcc6   : > { %7632 = vmatmul.mubr.msk.bf16.vlgmr.msra.gmra.mrb[28].mxu1 %vm1353_vm5, %v2181_v4 }
 0xcc7   : > { %7643 = vmatprep.mubr.msk.bf16.mxu1 %vm8322_vm3, %v8321_v17 }
 0xcc9   : > { %v2275_v6 = vpop.f32.mrb[32].mxu0 }
 0xcca   : > { %v2282_v7 = vmul.f32 0.5, %v2275_v6  ;;  %v7639_v8 = vpop.f32.mrb[33].mxu0 }
 0xccb   : > { %v2278_v9 = vpop.f32.mrb[34].mxu0 }
 0xccc   : > { %v2283_v10 = vmul.f32 0.5, %v2278_v9  ;;  %v7640_v11 = vpop.f32.mrb[35].mxu0  ;;  %v2284_v12 = vadd.f32 %v2282_v7, %v8615_v36 }
 0xcce   : > { %v2286_v56 = vsel %vm1405_vm6, %v2284_v12, -inf  ;;  %v2285_v59 = vadd.f32 %v2283_v10, %v8618_v40 }
 0xccf   : > { %2287 = vmax.xlane.f32.xlu0 %v2286_v56 }
 0xcd0   : > { %v2289_v13 = vsel %vm1405_vm6, %v2285_v59, -inf }
 0xcd1   : > { %2290 = vmax.xlane.f32.xlu1 %v2289_v13 }
 0xce2   : > { %2309 = vrot.lane.b32.xlu1 %v8595_v29, %s8339_s6  ;;  %s9519_s6 = smov 72  }
 0xce6   : > { %2410 = vrot.lane.b32.xlu1 %v8595_v29, %s9523_s22  ;;  %s9527_s22 = smov 100  }
 0xd5c   : > { %v2288_v14 = vpop.xlane.xlu0 %2287 }
 0xd5d   : > { %v2292_v15 = vsub.f32 %v2284_v12, %v2288_v14 }
 0xd5e   : > { %v2291_v16 = vpop.xlane.xlu1 %2290 }
 0xd5f   : > { %v2294_v18 = vmul.f32 1.442695, %v2292_v15  ;;  %v2293_v19 = vsub.f32 %v2285_v59, %v2291_v16 }
 0xd61   : > { %8148 = vpow2.f32 %v2294_v18  ;;  %v2296_v20 = vmul.f32 1.442695, %v2293_v19 }
 0xd62   : > { %v2310_v21 = vpop.permute.xlu1 %2309 }
 0xd63   : > { %8150 = vpow2.f32 %v2296_v20  ;;  %7642 = vmatpush3.bf16.msra.mxu1 %v2310_v21 }
 0xd64   : > { %7653 = vmatprep.subr.bf16.mxu1 %v8321_v17 }
 0xd66   : > { %v2411_v44 = vpop.permute.xlu1 %2410 }
 0xd6b   : > { %v8149_v22 = vpop.eup %8148 }
 0xd6c   : > { %v2298_v23 = vsel %vm1405_vm6, %v8149_v22, 0.0 }
 0xd6d   : > { %v8151_v24 = vpop.eup %8150  ;;  %2299 = vadd.xlane.f32.xlu0 %v2298_v23 }
 0xd6e   : > { %v2301_v25 = vsel %vm1405_vm6, %v8151_v24, 0.0 }
 0xd71   : > { %2302 = vadd.xlane.f32.xlu0 %v2301_v25 }
 0xd87   : > { %2412 = vrot.lane.b32.xlu0 %v8595_v29, %s9519_s6  ;;  %s9525_s6 = smov 68  }
 0xd99   : > { %v2222_v26 = vpop.f32.mrb[28].mxu1 }
 0xd9a   : > { %v8776_v27 = vadd.f32 %v2222_v26, %v8740_v45  ;;  %v7633_v28 = vpop.f32.mrb[29].mxu1  ;;  %v6989_v45 = vcombine.low %v8755_v63, %v8755_v63 }
 0xd9b   : > { %v2225_v30 = vpop.f32.mrb[30].mxu1 }
 0xd9c   : > { %v8779_v31 = vadd.f32 %v2225_v30, %v8743_v48  ;;  %v7634_v32 = vpop.f32.mrb[31].mxu1  ;;  %v2360_v46 = vrot.slane %v6989_v45, 2 }
 0xd9e   : > { %v2365_v47 = vsel %vm1610_vm7, %v2360_v46, 0 }
 0xd9f   : > { %7648 = vmatpush3.bf16.msra.mxu0 %v2365_v47 }
 0xda0   : > { %7659 = vmatprep.subr.bf16.mxu0 %v8321_v17 }
 0xdfa   : > { %v2300_v33 = vpop.xlane.xlu0 %2299 }
 0xdfb   : > { %8152 = vrcp.f32 %v2300_v33 }
 0xdfe   : > { %v2303_v34 = vpop.xlane.xlu0 %2302 }
 0xdff   : > { %8154 = vrcp.f32 %v2303_v34 }
 0xe02   : > { %v2413_v41 = vpop.permute.xlu0 %2412 }
 0xe03   : > { %v2418_v43 = vsel %vm1353_vm5, %v2413_v41, 0 }
 0xe05   : > { %v8153_v35 = vpop.eup %8152 }
 0xe06   : > { %v2306_v38 = vmul.f32 %v8153_v35, %v8149_v22 }
 0xe09   : > { %v8155_v37 = vpop.eup %8154 }
 0xe0a   : > { %v2307_v39 = vmul.f32 %v8155_v37, %v8151_v24 }
 0xe0c   : > { %v2308_v42 = vpack.c.bf16 %v2307_v39, %v2306_v38 }
 0xe0e   : > { %7644 = vmatmul.mubr.msk.bf16.vlgmr.msra.gmra.mrb[32].mxu1 %vm1405_vm6, %v2308_v42 }
 0xe0f   : > { %7654 = vmatpush3.bf16.xpose.msra.mxu1 %v2418_v43  ;;  %7655 = vmatprep.mubr.msk.bf16.mxu1 %vm8322_vm3, %v8321_v17 }
 0xe10   : > { %7665 = vmatprep.subr.bf16.mxu1 %v8321_v17 }
 0xe16   : > { %7656 = vmatmul.mubr.msk.bf16.vlgmr.msra.gmra.mrb[36].mxu1 %vm1353_vm5, %v2411_v44 }
 0xe17   : > { %7667 = vmatprep.mubr.msk.bf16.mxu1 %vm8322_vm3, %v8321_v17 }
 0xee1   : > { %v2349_v48 = vpop.f32.mrb[32].mxu1 }
 0xee2   : > { %v7645_v49 = vpop.f32.mrb[33].mxu1 }
 0xee3   : > { %v2352_v50 = vpop.f32.mrb[34].mxu1 }
 0xee4   : > { %v2356_v51 = vpack.c.bf16 %v2352_v50, %v2349_v48  ;;  %v7646_v52 = vpop.f32.mrb[35].mxu1 }
 0xee6   : > { %7650 = vmatmul.mubr.msk.bf16.vlgmr.msra.gmra.mrb[36].mxu0 %vm1353_vm5, %v2356_v51 }
 0xee7   : > { %7661 = vmatprep.mubr.msk.bf16.mxu0 %vm8322_vm3, %v8321_v17 }
 0xee9   : > { %v2454_v53 = vpop.f32.mrb[36].mxu1 }
 0xeea   : > { %v2461_v54 = vmul.f32 0.5, %v2454_v53  ;;  %v7657_v55 = vpop.f32.mrb[37].mxu1 }
 0xeeb   : > { %v2457_v57 = vpop.f32.mrb[38].mxu1 }
 0xeec   : > { %v2462_v58 = vmul.f32 0.5, %v2457_v57  ;;  %v7658_v60 = vpop.f32.mrb[39].mxu1  ;;  %v2463_v61 = vadd.f32 %v2461_v54, %v8615_v36 }
 0xeee   : > { %v2465_v62 = vsel %vm1405_vm6, %v2463_v61, -inf  ;;  %v2464_v63 = vadd.f32 %v2462_v58, %v8618_v40 }
 0xeef   : > { %2466 = vmax.xlane.f32.xlu1 %v2465_v62 }
 0xef0   : > { %v2468_v0 = vsel %vm1405_vm6, %v2464_v63, -inf }
 0xef1   : > { %2469 = vmax.xlane.f32.xlu0 %v2468_v0 }
 0xf7c   : > { %v2467_v1 = vpop.xlane.xlu1 %2466 }
 0xf7d   : > { %v2471_v2 = vsub.f32 %v2463_v61, %v2467_v1 }
 0xf7e   : > { %v2470_v3 = vpop.xlane.xlu0 %2469 }
 0xf7f   : > { %v2473_v4 = vmul.f32 1.442695, %v2471_v2  ;;  %v2472_v5 = vsub.f32 %v2464_v63, %v2470_v3 }
 0xf81   : > { %8156 = vpow2.f32 %v2473_v4  ;;  %v2475_v6 = vmul.f32 1.442695, %v2472_v5 }
 0xf83   : > { %8158 = vpow2.f32 %v2475_v6 }
 0xf8b   : > { %v8157_v7 = vpop.eup %8156 }
 0xf8c   : > { %v2477_v8 = vsel %vm1405_vm6, %v8157_v7, 0.0 }
 0xf8d   : > { %v8159_v9 = vpop.eup %8158  ;;  %2478 = vadd.xlane.f32.xlu0 %v2477_v8 }
 0xf8e   : > { %v2480_v10 = vsel %vm1405_vm6, %v8159_v9, 0.0 }
 0xf8f   : > { %2481 = vadd.xlane.f32.xlu1 %v2480_v10 }
 0xfa0   : > { %2587 = vrot.lane.b32.xlu1 %v8595_v29, %s9525_s6  ;;  %s9582_s6 = sld [smem:[#allocation17_spill]] }
 0xfa3   : > { %2488 = vrot.lane.b32.xlu0 %v8595_v29, %s8343_s25  ;;  %s8345_s25 = smov 36  }
 0xfa4   : > { %2585 = vrot.lane.b32.xlu1 %v8595_v29, %s9527_s22 }
 0xfa6   : > { %s9584_s22 = scalar_lea.vmem %s9582_s6, %s8519_s0  ;;  %s9587_s6 = scalar_lea.vmem %s8430_s12, %s8519_s0 }
 0xfb9   : > { %v2401_v11 = vpop.f32.mrb[36].mxu0 }
 0xfba   : > { %v8808_v12 = vadd.f32 %v2401_v11, %v8776_v27  ;;  %v7651_v56 = vpop.f32.mrb[37].mxu0  ;;  %v1346_v27 = vld [vmem:[%s9577_s5 + $0xc] sm:$0xf]  ;;  %s9578_s5 = scalar_lea.vmem %s8410_s19, %s8519_s0 }
 0xfbb   : > { %v2404_v59 = vpop.f32.mrb[38].mxu0  ;;  %v2540_v28 = vsel %vm1610_vm7, %v1346_v27, 0  ;;  %v6996_v6 = vcombine.low %v1346_v27, %v1346_v27 }
 0xfbc   : > { %v8811_v13 = vadd.f32 %v2404_v59, %v8779_v31  ;;  %v7652_v14 = vpop.f32.mrb[39].mxu0  ;;  %7666 = vmatpush3.bf16.msra.mxu1 %v2540_v28  ;;  %v7972_v28 = vld [vmem:[%s8542_s16] sm:$0xff]  }
 0xfbd   : > { %7677 = vmatprep.subr.bf16.mxu1 %v8321_v17 }
0x101a   : > { %v2479_v15 = vpop.xlane.xlu0 %2478 }
0x101b   : > { %8160 = vrcp.f32 %v2479_v15 }
0x101c   : > { %v2482_v16 = vpop.xlane.xlu1 %2481 }
0x101d   : > { %8162 = vrcp.f32 %v2482_v16 }
0x101e   : > { %v2489_v18 = vpop.permute.xlu0 %2488 }
0x101f   : > { %7660 = vmatpush3.bf16.msra.mxu0 %v2489_v18 }
0x1020   : > { %7671 = vmatprep.subr.bf16.mxu0 %v8321_v17  ;;  %v2588_v23 = vpop.permute.xlu1 %2587 }
0x1021   : > { %v2593_v25 = vsel %vm1353_vm5, %v2588_v23, 0 }
0x1024   : > { %v2586_v26 = vpop.permute.xlu1 %2585 }
0x1025   : > { %v8161_v19 = vpop.eup %8160 }
0x1026   : > { %v2485_v21 = vmul.f32 %v8161_v19, %v8157_v7  ;;  %v2714_v7 = vrot.slane %v6996_v6, 2 }
0x1027   : > { %v8163_v20 = vpop.eup %8162 }
0x1028   : > { %v2486_v22 = vmul.f32 %v8163_v20, %v8159_v9  ;;  %v2719_v8 = vsel %vm1610_vm7, %v2714_v7, 0 }
0x102a   : > { %v2487_v24 = vpack.c.bf16 %v2486_v22, %v2485_v21  ;;  %v8248_v22 = vld [vmem:[#allocation2] sm:$0xff] }
0x102c   : > { %7662 = vmatmul.mubr.msk.bf16.vlgmr.msra.gmra.mrb[40].mxu0 %vm1405_vm6, %v2487_v24 }
0x102d   : > { %7672 = vmatpush3.bf16.xpose.msra.mxu0 %v2593_v25  ;;  %7673 = vmatprep.mubr.msk.bf16.mxu0 %vm8322_vm3, %v8321_v17  ;;  %v8249_v25 = vld [vmem:[#allocation2 + $0x8] sm:$0xff] }
0x102e   : > { %7683 = vmatprep.subr.bf16.mxu0 %v8321_v17 }
0x1034   : > { %7674 = vmatmul.mubr.msk.bf16.vlgmr.msra.gmra.mrb[44].mxu0 %vm1353_vm5, %v2586_v26 }
0x1035   : > { %7685 = vmatprep.mubr.msk.bf16.mxu0 %vm8322_vm3, %v8321_v17  ;;  %7684 = vmatpush3.bf16.msra.mxu0 %v2719_v8 }
0x1036   : > { %7697 = vmatprep.subr.bf16.mxu0 %v7972_v28 }
0x10ff   : > { %v2528_v30 = vpop.f32.mrb[40].mxu0 }
0x1100   : > { %v7663_v31 = vpop.f32.mrb[41].mxu0 }
0x1101   : > { %v2531_v32 = vpop.f32.mrb[42].mxu0 }
0x1102   : > { %v2535_v33 = vpack.c.bf16 %v2531_v32, %v2528_v30  ;;  %v7664_v34 = vpop.f32.mrb[43].mxu0  ;;  %v7973_v30 = vld [vmem:[%s8542_s16 + $0x8] sm:$0xff]   ;;  %s9581_s16 = sld [smem:[#allocation16_spill]] }
0x1104   : > { %7668 = vmatmul.mubr.msk.bf16.vlgmr.msra.gmra.mrb[40].mxu1 %vm1353_vm5, %v2535_v33 }
0x1105   : > { %7679 = vmatprep.mubr.msk.bf16.mxu1 %vm8322_vm3, %v8321_v17 }
0x1107   : > { %v2629_v35 = vpop.f32.mrb[44].mxu0 }
0x1108   : > { %v2636_v37 = vmul.f32 0.5, %v2629_v35  ;;  %v7675_v38 = vpop.f32.mrb[45].mxu0 }
0x1109   : > { %v2632_v39 = vpop.f32.mrb[46].mxu0 }
0x110a   : > { %v2637_v41 = vmul.f32 0.5, %v2632_v39  ;;  %v7676_v42 = vpop.f32.mrb[47].mxu0  ;;  %v2638_v43 = vadd.f32 %v2636_v37, %v8615_v36 }
0x110c   : > { %v2640_v44 = vsel %vm1405_vm6, %v2638_v43, -inf  ;;  %v2639_v45 = vadd.f32 %v2637_v41, %v8618_v40 }
0x110d   : > { %2641 = vmax.xlane.f32.xlu0 %v2640_v44 }
0x110e   : > { %v2643_v46 = vsel %vm1405_vm6, %v2639_v45, -inf }
0x110f   : > { %2644 = vmax.xlane.f32.xlu1 %v2643_v46 }
0x1120   : > { %2663 = vrot.lane.b32.xlu1 %v8595_v29, %s8345_s25  ;;  %s9579_s25 = sld [smem:[#allocation8_spill]] }
0x1126   : > { %v1272_v44 = vld [vmem:[%s9579_s25 + $0x8] sm:$0xff]  ;;  %v1273_v46 = vld [vmem:[%s9579_s25 + $0x10] sm:$0xf] }
0x119a   : > { %v2642_v47 = vpop.xlane.xlu0 %2641 }
0x119b   : > { %v2646_v48 = vsub.f32 %v2638_v43, %v2642_v47  ;;  %v1271_v43 = vld [vmem:[%s9579_s25] sm:$0xff]  ;;  %v2893_v47 = vpack.c.bf16 %v1273_v46, %v1273_v46 }
0x119c   : > { %v2645_v49 = vpop.xlane.xlu1 %2644 }
0x119d   : > { %v2648_v50 = vmul.f32 1.442695, %v2646_v48  ;;  %v2647_v51 = vsub.f32 %v2639_v45, %v2645_v49  ;;  %v2892_v45 = vpack.c.bf16 %v1272_v44, %v1271_v43 }
0x119f   : > { %8164 = vpow2.f32 %v2648_v50  ;;  %v2650_v52 = vmul.f32 1.442695, %v2647_v51 }
0x11a0   : > { %v2664_v53 = vpop.permute.xlu1 %2663 }
0x11a1   : > { %8166 = vpow2.f32 %v2650_v52  ;;  %7678 = vmatpush3.bf16.msra.mxu1 %v2664_v53 }
0x11a2   : > { %7689 = vmatprep.subr.bf16.mxu1 %v8321_v17 }
0x11a9   : > { %v8165_v36 = vpop.eup %8164 }
0x11aa   : > { %v2652_v40 = vsel %vm1405_vm6, %v8165_v36, 0.0 }
0x11ab   : > { %v8167_v54 = vpop.eup %8166  ;;  %2653 = vadd.xlane.f32.xlu0 %v2652_v40 }
0x11ac   : > { %v2655_v55 = vsel %vm1405_vm6, %v8167_v54, 0.0 }
0x11af   : > { %2656 = vadd.xlane.f32.xlu0 %v2655_v55 }
0x11d7   : > { %v2576_v29 = vpop.f32.mrb[40].mxu1 }
0x11d8   : > { %v2583_v57 = vadd.f32 %v2576_v29, %v8808_v12  ;;  %v7669_v58 = vpop.f32.mrb[41].mxu1 }
0x11d9   : > { %v2579_v60 = vpop.f32.mrb[42].mxu1 }
0x11da   : > { %v2584_v61 = vadd.f32 %v2579_v60, %v8811_v13  ;;  %v7670_v62 = vpop.f32.mrb[43].mxu1  ;;  %v6998_v13 = vld [vmem:[%s9578_s5] ss:$0 sm:$0xff]  ;;  %s9580_s5 = sld [smem:[#allocation32_spill]] }
0x11e0   : > { %v7974_v48 = vld [vmem:[%s9580_s5] sm:$0xff]   ;;  %v7975_v49 = vld [vmem:[%s9580_s5 + $0x8] sm:$0xff]   ;;  %s9583_s5 = scalar_lea.vmem %s9581_s16, %s8519_s0  ;;  %s9585_s16 = scalar_lea.vmem %s8440_s27, %s8519_s0 }
0x11e1   : > { %v6999_v29 = vld [vmem:[%s9583_s5] ss:$0 sm:$0xff] }
0x1238   : > { %v2654_v63 = vpop.xlane.xlu0 %2653 }
0x1239   : > { %8168 = vrcp.f32 %v2654_v63 }
0x123c   : > { %v2657_v0 = vpop.xlane.xlu0 %2656 }
0x123d   : > { %8170 = vrcp.f32 %v2657_v0 }
0x1243   : > { %v8169_v1 = vpop.eup %8168 }
0x1244   : > { %v2660_v3 = vmul.f32 %v8169_v1, %v8165_v36 }
0x1247   : > { %v8171_v2 = vpop.eup %8170 }
0x1248   : > { %v2661_v4 = vmul.f32 %v8171_v2, %v8167_v54  ;;  %v7005_v2 = vld [vmem:[%s9585_s16] ss:$0 sm:$0xff] }
0x124a   : > { %v2662_v5 = vpack.c.bf16 %v2661_v4, %v2660_v3 }
0x124c   : > { %7680 = vmatmul.mubr.msk.bf16.vlgmr.msra.gmra.mrb[44].mxu1 %vm1405_vm6, %v2662_v5 }
0x124d   : > { %7693 = vmatprep.mubr.msk.bf16.mxu1 %vm8322_vm3, %v8321_v17  ;;  %7690 = vmatpush3.bf16.msra.mxu1 %v7974_v48 }
0x124e   : > { %7691 = vmatprep.subr.bf16.mxu1 %v8321_v17 }
0x1251   : > { %7692 = vmatpush3.bf16.msra.mxu1 %v7975_v49 }
0x1252   : > { %7705 = vmatprep.subr.bf16.mxu1 %v8321_v17 }
0x131f   : > { %v2703_v9 = vpop.f32.mrb[44].mxu1 }
0x1320   : > { %v7681_v10 = vpop.f32.mrb[45].mxu1 }
0x1321   : > { %v2706_v11 = vpop.f32.mrb[46].mxu1 }
0x1322   : > { %v2710_v12 = vpack.c.bf16 %v2706_v11, %v2703_v9  ;;  %v7682_v56 = vpop.f32.mrb[47].mxu1 }
0x1324   : > { %7686 = vmatmul.mubr.msk.bf16.vlgmr.msra.gmra.mrb[48].mxu0 %vm1353_vm5, %v2710_v12 }
0x1325   : > { %7698 = vmatpush3.bf16.msra.mxu0 %v7972_v28  ;;  %7701 = vmatprep.mubr.msk.bf16.mxu0 %vm1298_vm4, %v2892_v45 }
0x1326   : > { %7699 = vmatprep.subr.bf16.mxu0 %v7973_v30 }
0x1329   : > { %7700 = vmatpush3.bf16.msra.mxu0 %v7973_v30 }
0x132a   : > { %7713 = vmatprep.subr.bf16.mxu0 %v8321_v17 }
0x132c   : > { %7702 = vmatmul.mubr.msk.bf16.vlgmr.msra.gmra.mrb[52].mxu0 %vm1298_vm4, %v2893_v47 }
0x132d   : > { %7717 = vmatprep.mubr.msk.bf16.mxu0 %vm8322_vm3, %v8321_v17 }
0x13f7   : > { %v2755_v59 = vpop.f32.mrb[48].mxu0 }
0x13f8   : > { %v2762_v14 = vadd.f32 %v2755_v59, %v2583_v57  ;;  %v7687_v15 = vpop.f32.mrb[49].mxu0  ;;  %v7001_v59 = vld [vmem:[%s9587_s6] ss:$0 sm:$0xff] }
0x13f9   : > { %v2758_v16 = vpop.f32.mrb[50].mxu0 }
0x13fa   : > { %v2771_v18 = vadd.f32 %v6998_v13, %v2762_v14  ;;  %v2763_v19 = vadd.f32 %v2758_v16, %v2584_v61  ;;  %v7688_v20 = vpop.f32.mrb[51].mxu0  ;;  %v7000_v61 = vld [vmem:[%s9584_s22] ss:$0 sm:$0xff]  ;;  %s9586_s22 = sld [smem:[#allocation10_spill]] }
0x13fc   : > { %v2772_v21 = vadd.f32 %v6998_v13, %v2763_v19  ;;  %v2773_v23 = vadd.f32 %v8248_v22, %v2771_v18 }
0x13fe   : > { %v2777_v24 = vsel %vm1298_vm4, %v2773_v23, 0.0  ;;  %v2774_v26 = vadd.f32 %v8249_v25, %v2772_v21 }
0x13ff   : > { %2778 = vadd.xlane.f32.xlu0 %v2777_v24  ;;  %v7703_v3 = vpop.f32.mrb[52].mxu0 }
0x1400   : > { %v2780_v27 = vsel %vm1298_vm4, %v2774_v26, 0.0  ;;  %v2953_v4 = vpop.f32.mrb[53].mxu0  ;;  %v2962_v9 = vadd.f32 %v7703_v3, %v7005_v2  ;;  %v8902_v22 = vld [vmem:[%s9586_s22] sm:$0xff] }
0x1401   : > { %v2954_v5 = vadd.f32 %v7005_v2, %v2953_v4  ;;  %v7704_v6 = vpop.f32.mrb[54].mxu0 }
0x1402   : > { %v2956_v7 = vpop.f32.mrb[55].mxu0  ;;  %v8886_v12 = vpack.c.bf16 %v2962_v9, %v2962_v9 }
0x1403   : > { %2781 = vadd.xlane.f32.xlu0 %v2780_v27  ;;  %v2957_v8 = vadd.f32 %v7005_v2, %v2956_v7 }
0x1404   : > { %v2983_v56 = vsel %vm1353_vm5, %v8886_v12, 0 }
0x1405   : > { %v8882_v10 = vpack.c.bf16 %v2957_v8, %v2954_v5 }
0x1407   : > { %v2980_v11 = vsel %vm1353_vm5, %v8882_v10, 0 }
0x148c   : > { %v2779_v31 = vpop.xlane.xlu0 %2778 }
0x148d   : > { %v2784_v32 = vmul.f32 0.03125, %v2779_v31 }
0x148f   : > { %v2786_v33 = vsub.f32 %v2773_v23, %v2784_v32 }
0x1490   : > { %v2782_v34 = vpop.xlane.xlu0 %2781 }
0x1491   : > { %v2785_v35 = vmul.f32 0.03125, %v2782_v34  ;;  %v2788_v37 = vmul.f32 %v2786_v33, %v2786_v33 }
0x1493   : > { %v2787_v38 = vsub.f32 %v2774_v26, %v2785_v35  ;;  %v2790_v39 = vsel %vm1298_vm4, %v2788_v37, 0.0  ;;  %v8905_v26 = vld [vmem:[%s9586_s22 + $0x8] sm:$0xff] }
0x1494   : > { %2791 = vadd.xlane.f32.xlu0 %v2790_v39 }
0x1495   : > { %v2789_v41 = vmul.f32 %v2787_v38, %v2787_v38 }
0x1497   : > { %v2793_v42 = vsel %vm1298_vm4, %v2789_v41, 0.0 }
0x1498   : > { %2794 = vadd.xlane.f32.xlu0 %v2793_v42 }
0x1521   : > { %v2792_v50 = vpop.xlane.xlu0 %2791 }
0x1522   : > { %v2796_v51 = vmul.f32 0.03125, %v2792_v50 }
0x1524   : > { %v2798_v52 = vadd.f32 1e-05, %v2796_v51 }
0x1525   : > { %v2795_v53 = vpop.xlane.xlu0 %2794 }
0x1526   : > { %8172 = vrsqrt.f32 %v2798_v52  ;;  %v2797_v36 = vmul.f32 0.03125, %v2795_v53 }
0x1528   : > { %v2799_v40 = vadd.f32 1e-05, %v2797_v36 }
0x152a   : > { %8174 = vrsqrt.f32 %v2799_v40 }
0x1530   : > { %v8173_v54 = vpop.eup %8172 }
0x1531   : > { %v2802_v55 = vmul.f32 %v8173_v54, %v2786_v33 }
0x1533   : > { %v2810_v58 = vmul.f32 %v6999_v29, %v2802_v55 }
0x1534   : > { %v8175_v57 = vpop.eup %8174 }
0x1535   : > { %v2803_v60 = vmul.f32 %v8175_v57, %v2787_v38  ;;  %v8870_v63 = vadd.f32 %v7000_v61, %v2810_v58 }
0x1537   : > { %v2811_v62 = vmul.f32 %v6999_v29, %v2803_v60  ;;  %v2967_v60 = vld [vmem:[%s8547_s8] sm:$0xf] }
0x1539   : > { %v8872_v0 = vadd.f32 %v7000_v61, %v2811_v62  ;;  %v3301_v61 = vsel %vm1610_vm7, %v2967_v60, 0 }
0x153b   : > { %v2824_v1 = vpack.c.bf16 %v8872_v0, %v8870_v63 }
0x153d   : > { %7694 = vmatmul.mubr.msk.bf16.vlgmr.msra.gmra.mrb[48].mxu1 %vm1298_vm4, %v2824_v1 }
0x153e   : > { %7709 = vmatprep.mubr.msk.bf16.mxu1 %vm8322_vm3, %v8321_v17  ;;  %7706 = vmatpush3.bf16.xpose.msra.mxu1 %v2980_v11 }
0x153f   : > { %7707 = vmatprep.subr.bf16.mxu1 %v8321_v17 }
0x1546   : > { %7708 = vmatpush3.bf16.xpose.msra.mxu1 %v2983_v56 }
0x1547   : > { %7729 = vmatprep.subr.bf16.mxu1 %v8321_v17 }
0x1610   : > { %v2881_v13 = vpop.f32.mrb[48].mxu1 }
0x1611   : > { %v7695_v14 = vpop.f32.mrb[49].mxu1  ;;  %v2882_v16 = vadd.f32 %v7001_v59, %v2881_v13 }
0x1612   : > { %v2884_v15 = vpop.f32.mrb[50].mxu1 }
0x1613   : > { %v2885_v18 = vadd.f32 %v7001_v59, %v2884_v15  ;;  %v7696_v19 = vpop.f32.mrb[51].mxu1 }
0x1615   : > { %v8895_v20 = vpack.c.bf16 %v2885_v18, %v2882_v16 }
0x1617   : > { %7710 = vmatmul.mubr.msk.bf16.vlgmr.msra.gmra.mrb[52].mxu1 %vm1353_vm5, %v8895_v20 }
0x1618   : > { %7733 = vmatprep.mubr.msk.bf16.mxu1 %vm8322_vm3, %v8321_v17 }
0x16ea   : > { %v3019_v21 = vpop.f32.mrb[52].mxu1 }
0x16eb   : > { %v3026_v23 = vmul.f32 0.5, %v3019_v21  ;;  %v7711_v24 = vpop.f32.mrb[53].mxu1 }
0x16ec   : > { %v3022_v25 = vpop.f32.mrb[54].mxu1 }
0x16ed   : > { %v3027_v27 = vmul.f32 0.5, %v3022_v25  ;;  %v7712_v28 = vpop.f32.mrb[55].mxu1  ;;  %v3028_v30 = vadd.f32 %v3026_v23, %v8902_v22 }
0x16ef   : > { %v3031_v31 = vsel %vm3030_vm8, %v3028_v30, -inf  ;;  %v3029_v32 = vadd.f32 %v3027_v27, %v8905_v26 }
0x16f0   : > { %3032 = vmax.xlane.f32.xlu1 %v3031_v31 }
0x16f1   : > { %v3034_v33 = vsel %vm3030_vm8, %v3029_v32, -inf }
0x16f2   : > { %3035 = vmax.xlane.f32.xlu0 %v3034_v33 }
0x1701   : > { %3112 = vrot.lane.b32.xlu1 %v8882_v10, %s8323_s24 }
0x1708   : > { %3056 = vrot.lane.b32.xlu0 %v8882_v10, %s8324_s7 }
0x177d   : > { %v3033_v34 = vpop.xlane.xlu1 %3032 }
0x177e   : > { %v3037_v35 = vsub.f32 %v3028_v30, %v3033_v34 }
0x177f   : > { %v3036_v37 = vpop.xlane.xlu0 %3035 }
0x1780   : > { %v3039_v38 = vmul.f32 1.442695, %v3037_v35  ;;  %v3038_v39 = vsub.f32 %v3029_v32, %v3036_v37 }
0x1781   : > { %v3113_v40 = vpop.permute.xlu1 %3112 }
0x1782   : > { %8176 = vpow2.f32 %v3039_v38  ;;  %v3041_v41 = vmul.f32 1.442695, %v3038_v39  ;;  %v3120_v55 = vsel %vm1353_vm5, %v3113_v40, 0  ;;  %v7014_v39 = vcombine.low %v2967_v60, %v2967_v60 }
0x1783   : > { %v3057_v42 = vpop.permute.xlu0 %3056 }
0x1784   : > { %8178 = vpow2.f32 %v3041_v41  ;;  %7714 = vmatpush3.bf16.msra.mxu0 %v3057_v42 }
0x1785   : > { %7715 = vmatprep.subr.bf16.mxu0 %v8321_v17 }
0x178c   : > { %v8177_v43 = vpop.eup %8176 }
0x178d   : > { %v3043_v44 = vsel %vm3030_vm8, %v8177_v43, 0.0 }
0x178e   : > { %v8179_v45 = vpop.eup %8178  ;;  %3044 = vadd.xlane.f32.xlu0 %v3043_v44 }
0x178f   : > { %v3046_v46 = vsel %vm3030_vm8, %v8179_v45, 0.0 }
0x1792   : > { %3047 = vadd.xlane.f32.xlu0 %v3046_v46 }
0x17a8   : > { %3058 = vrot.lane.b32.xlu0 %v8886_v12, %s8324_s7  ;;  %s9590_s7 = smov 100  }
0x17ac   : > { %3114 = vrot.lane.b32.xlu0 %v8886_v12, %s8323_s24 }
0x17b0   : > { %3110 = vrot.lane.b32.xlu0 %v8895_v20, %s8323_s24  ;;  %s9589_s24 = smov 76  }
0x181b   : > { %v3045_v47 = vpop.xlane.xlu0 %3044 }
0x181c   : > { %8180 = vrcp.f32 %v3045_v47 }
0x181f   : > { %v3048_v48 = vpop.xlane.xlu0 %3047 }
0x1820   : > { %8182 = vrcp.f32 %v3048_v48 }
0x1823   : > { %v3059_v49 = vpop.permute.xlu0 %3058 }
0x1824   : > { %v3065_v50 = vsel %vm1610_vm7, %v3059_v49, 0 }
0x1825   : > { %7716 = vmatpush3.bf16.msra.mxu0 %v3065_v50 }
0x1826   : > { %7721 = vmatprep.subr.bf16.mxu0 %v8321_v17  ;;  %v8181_v51 = vpop.eup %8180 }
0x1827   : > { %v3051_v53 = vmul.f32 %v8181_v51, %v8177_v43  ;;  %v3115_v29 = vpop.permute.xlu0 %3114  ;;  %v3249_v43 = vrot.slane %v7014_v39, 2 }
0x1828   : > { %v3123_v57 = vsel %vm1353_vm5, %v3115_v29, 0 }
0x1829   : > { %v3254_v48 = vsel %vm1610_vm7, %v3249_v43, 0 }
0x182a   : > { %v8183_v52 = vpop.eup %8182 }
0x182b   : > { %v3052_v36 = vmul.f32 %v8183_v52, %v8179_v45  ;;  %v3111_v58 = vpop.permute.xlu0 %3110 }
0x182d   : > { %v3053_v54 = vpack.c.bf16 %v3052_v36, %v3051_v53 }
0x182f   : > { %7718 = vmatmul.mubr.msk.bf16.vlgmr.msra.gmra.mrb[56].mxu0 %vm3030_vm8, %v3053_v54 }
0x1830   : > { %7722 = vmatpush3.bf16.xpose.msra.mxu0 %v3120_v55  ;;  %7725 = vmatprep.mubr.msk.bf16.mxu0 %vm8322_vm3, %v8321_v17 }
0x1831   : > { %7723 = vmatprep.subr.bf16.mxu0 %v8321_v17 }
0x1838   : > { %7724 = vmatpush3.bf16.xpose.msra.mxu0 %v3123_v57 }
0x1839   : > { %7743 = vmatprep.subr.bf16.mxu0 %v8321_v17 }
0x183f   : > { %7726 = vmatmul.mubr.msk.bf16.vlgmr.msra.gmra.mrb[60].mxu0 %vm1353_vm5, %v3111_v58 }
0x1840   : > { %7745 = vmatprep.mubr.msk.bf16.mxu0 %vm8322_vm3, %v8321_v17  ;;  %7744 = vmatpush3.bf16.msra.mxu0 %v3301_v61 }
0x1841   : > { %7757 = vmatprep.subr.bf16.mxu0 %v8321_v17 }
0x1902   : > { %v3101_v62 = vpop.f32.mrb[56].mxu0 }
0x1903   : > { %v7719_v1 = vpop.f32.mrb[57].mxu0 }
0x1904   : > { %v3104_v2 = vpop.f32.mrb[58].mxu0 }
0x1905   : > { %v3108_v3 = vpack.c.bf16 %v3104_v2, %v3101_v62  ;;  %v7720_v4 = vpop.f32.mrb[59].mxu0 }
0x1907   : > { %7746 = vmatmul.mubr.msk.bf16.vlgmr.msra.gmra.mrb[64].mxu0 %vm1353_vm5, %v3108_v3 }
0x1908   : > { %7761 = vmatprep.mubr.msk.bf16.mxu0 %vm8322_vm3, %v8321_v17 }
0x1912   : > { %v3159_v5 = vpop.f32.mrb[60].mxu0 }
0x1913   : > { %v3166_v6 = vmul.f32 0.5, %v3159_v5  ;;  %v7727_v7 = vpop.f32.mrb[61].mxu0 }
0x1914   : > { %v3162_v8 = vpop.f32.mrb[62].mxu0 }
0x1915   : > { %v3167_v9 = vmul.f32 0.5, %v3162_v8  ;;  %v7728_v11 = vpop.f32.mrb[63].mxu0  ;;  %v3168_v56 = vadd.f32 %v3166_v6, %v8902_v22 }
0x1917   : > { %v3170_v59 = vsel %vm3030_vm8, %v3168_v56, -inf  ;;  %v3169_v13 = vadd.f32 %v3167_v9, %v8905_v26 }
0x1918   : > { %3171 = vmax.xlane.f32.xlu0 %v3170_v59 }
0x1919   : > { %v3173_v14 = vsel %vm3030_vm8, %v3169_v13, -inf }
0x191a   : > { %3174 = vmax.xlane.f32.xlu1 %v3173_v14 }
0x192b   : > { %3195 = vrot.lane.b32.xlu1 %v8886_v12, %s8325_s10 }
0x192f   : > { %3346 = vrot.lane.b32.xlu1 %v8882_v10, %s8329_s1 }
0x1933   : > { %3344 = vrot.lane.b32.xlu1 %v8895_v20, %s8329_s1 }
0x1937   : > { %3533 = vrot.lane.b32.xlu1 %v8886_v12, %s8332_s15 }
0x19a5   : > { %v3172_v15 = vpop.xlane.xlu0 %3171 }
0x19a6   : > { %v3176_v16 = vsub.f32 %v3168_v56, %v3172_v15 }
0x19a7   : > { %v3175_v18 = vpop.xlane.xlu1 %3174 }
0x19a8   : > { %v3178_v19 = vmul.f32 1.442695, %v3176_v16  ;;  %v3177_v21 = vsub.f32 %v3169_v13, %v3175_v18 }
0x19aa   : > { %8184 = vpow2.f32 %v3178_v19  ;;  %v3180_v23 = vmul.f32 1.442695, %v3177_v21 }
0x19ab   : > { %v3196_v38 = vpop.permute.xlu1 %3195 }
0x19ac   : > { %8186 = vpow2.f32 %v3180_v23  ;;  %v3202_v41 = vsel %vm1610_vm7, %v3196_v38, 0 }
0x19af   : > { %v3347_v51 = vpop.permute.xlu1 %3346 }
0x19b0   : > { %v3354_v40 = vsel %vm1353_vm5, %v3347_v51, 0 }
0x19b3   : > { %v3345_v57 = vpop.permute.xlu1 %3344 }
0x19b4   : > { %v8185_v24 = vpop.eup %8184 }
0x19b5   : > { %v3182_v25 = vsel %vm3030_vm8, %v8185_v24, 0.0 }
0x19b6   : > { %v8187_v27 = vpop.eup %8186  ;;  %3183 = vadd.xlane.f32.xlu0 %v3182_v25 }
0x19b7   : > { %v3185_v28 = vsel %vm3030_vm8, %v8187_v27, 0.0  ;;  %v3534_v60 = vpop.permute.xlu1 %3533 }
0x19b8   : > { %v3542_v61 = vsel %vm1353_vm5, %v3534_v60, 0 }
0x19ba   : > { %3186 = vadd.xlane.f32.xlu0 %v3185_v28 }
0x19d0   : > { %3193 = vrot.lane.b32.xlu0 %v8882_v10, %s8325_s10  ;;  %s9591_s10 = smov 72  }
0x19d4   : > { %3348 = vrot.lane.b32.xlu0 %v8886_v12, %s8329_s1  ;;  %s9594_s1 = scalar_lea.vmem %s8455_s13, %s8519_s0 }
0x19d8   : > { %3531 = vrot.lane.b32.xlu0 %v8882_v10, %s8332_s15 }
0x19da   : > { %v3337_v30 = vpop.f32.mrb[64].mxu0 }
0x19db   : > { %v7747_v31 = vpop.f32.mrb[65].mxu0 }
0x19dc   : > { %3529 = vrot.lane.b32.xlu0 %v8895_v20, %s8332_s15  ;;  %v3340_v32 = vpop.f32.mrb[66].mxu0 }
0x19dd   : > { %v7748_v33 = vpop.f32.mrb[67].mxu0 }
0x1a43   : > { %v3184_v34 = vpop.xlane.xlu0 %3183 }
0x1a44   : > { %8188 = vrcp.f32 %v3184_v34 }
0x1a47   : > { %v3187_v35 = vpop.xlane.xlu0 %3186 }
0x1a48   : > { %8190 = vrcp.f32 %v3187_v35 }
0x1a4b   : > { %v3194_v37 = vpop.permute.xlu0 %3193 }
0x1a4c   : > { %7730 = vmatpush3.bf16.msra.mxu1 %v3194_v37 }
0x1a4d   : > { %7731 = vmatprep.subr.bf16.mxu1 %v8321_v17 }
0x1a4e   : > { %v8189_v42 = vpop.eup %8188 }
0x1a4f   : > { %v3190_v45 = vmul.f32 %v8189_v42, %v8185_v24  ;;  %v3349_v54 = vpop.permute.xlu0 %3348 }
0x1a50   : > { %7732 = vmatpush3.bf16.msra.mxu1 %v3202_v41  ;;  %v3357_v55 = vsel %vm1353_vm5, %v3349_v54, 0 }
0x1a51   : > { %7737 = vmatprep.subr.bf16.mxu1 %v8321_v17 }
0x1a52   : > { %v8191_v44 = vpop.eup %8190 }
0x1a53   : > { %v3191_v46 = vmul.f32 %v8191_v44, %v8187_v27  ;;  %v3532_v29 = vpop.permute.xlu0 %3531 }
0x1a54   : > { %v3539_v58 = vsel %vm1353_vm5, %v3532_v29, 0 }
0x1a55   : > { %v3192_v47 = vpack.c.bf16 %v3191_v46, %v3190_v45 }
0x1a57   : > { %7734 = vmatmul.mubr.msk.bf16.vlgmr.msra.gmra.mrb[56].mxu1 %vm3030_vm8, %v3192_v47  ;;  %v3530_v62 = vpop.permute.xlu0 %3529 }
0x1a58   : > { %7738 = vmatpush3.bf16.msra.mxu1 %v3254_v48  ;;  %7739 = vmatprep.mubr.msk.bf16.mxu1 %vm8322_vm3, %v8321_v17 }
0x1a59   : > { %7749 = vmatprep.subr.bf16.mxu1 %v8321_v17 }
0x1b2a   : > { %v3238_v49 = vpop.f32.mrb[56].mxu1 }
0x1b2b   : > { %v7735_v50 = vpop.f32.mrb[57].mxu1 }
0x1b2c   : > { %v3241_v52 = vpop.f32.mrb[58].mxu1 }
0x1b2d   : > { %v3245_v53 = vpack.c.bf16 %v3241_v52, %v3238_v49  ;;  %v7736_v36 = vpop.f32.mrb[59].mxu1 }
0x1b2f   : > { %7740 = vmatmul.mubr.msk.bf16.vlgmr.msra.gmra.mrb[60].mxu1 %vm1353_vm5, %v3245_v53 }
0x1b30   : > { %7750 = vmatpush3.bf16.xpose.msra.mxu1 %v3354_v40  ;;  %7753 = vmatprep.mubr.msk.bf16.mxu1 %vm8322_vm3, %v8321_v17 }
0x1b31   : > { %7751 = vmatprep.subr.bf16.mxu1 %v8321_v17 }
0x1b38   : > { %7752 = vmatpush3.bf16.xpose.msra.mxu1 %v3357_v55 }
0x1b39   : > { %7771 = vmatprep.subr.bf16.mxu1 %v8321_v17 }
0x1b3f   : > { %7754 = vmatmul.mubr.msk.bf16.vlgmr.msra.gmra.mrb[64].mxu1 %vm1353_vm5, %v3345_v57 }
0x1b40   : > { %7772 = vmatpush3.bf16.xpose.msra.mxu1 %v3539_v58  ;;  %7775 = vmatprep.mubr.msk.bf16.mxu1 %vm8322_vm3, %v8321_v17 }
0x1b41   : > { %7773 = vmatprep.subr.bf16.mxu1 %v8321_v17 }
0x1b48   : > { %7774 = vmatpush3.bf16.xpose.msra.mxu1 %v3542_v61 }
0x1b49   : > { %7793 = vmatprep.subr.bf16.mxu1 %v8321_v17 }
0x1b4f   : > { %7776 = vmatmul.mubr.msk.bf16.vlgmr.msra.gmra.mrb[68].mxu1 %vm1353_vm5, %v3530_v62 }
0x1b50   : > { %7797 = vmatprep.mubr.msk.bf16.mxu1 %vm8322_vm3, %v8321_v17 }
0x1c02   : > { %v3290_v1 = vpop.f32.mrb[60].mxu1 }
0x1c03   : > { %v8989_v2 = vadd.f32 %v3337_v30, %v3290_v1  ;;  %v7741_v3 = vpop.f32.mrb[61].mxu1 }
0x1c04   : > { %v3293_v4 = vpop.f32.mrb[62].mxu1 }
0x1c05   : > { %v8991_v5 = vadd.f32 %v3340_v32, %v3293_v4  ;;  %v7742_v6 = vpop.f32.mrb[63].mxu1 }
0x1c12   : > { %v3393_v7 = vpop.f32.mrb[64].mxu1 }
0x1c13   : > { %v3400_v8 = vmul.f32 0.5, %v3393_v7  ;;  %v7755_v9 = vpop.f32.mrb[65].mxu1 }
0x1c14   : > { %v3396_v11 = vpop.f32.mrb[66].mxu1 }
0x1c15   : > { %v3401_v56 = vmul.f32 0.5, %v3396_v11  ;;  %v7756_v59 = vpop.f32.mrb[67].mxu1  ;;  %v3402_v13 = vadd.f32 %v3400_v8, %v8902_v22 }
0x1c17   : > { %v3404_v14 = vsel %vm3030_vm8, %v3402_v13, -inf  ;;  %v3403_v15 = vadd.f32 %v3401_v56, %v8905_v26 }
0x1c18   : > { %3405 = vmax.xlane.f32.xlu1 %v3404_v14 }
0x1c19   : > { %v3407_v16 = vsel %vm3030_vm8, %v3403_v15, -inf }
0x1c1a   : > { %3408 = vmax.xlane.f32.xlu0 %v3407_v16 }
0x1c22   : > { %v3578_v18 = vpop.f32.mrb[68].mxu1 }
0x1c23   : > { %v7777_v19 = vpop.f32.mrb[69].mxu1  ;;  %v3585_v37 = vmul.f32 0.5, %v3578_v18 }
0x1c24   : > { %v3581_v21 = vpop.f32.mrb[70].mxu1 }
0x1c25   : > { %v7778_v23 = vpop.f32.mrb[71].mxu1  ;;  %v3587_v38 = vadd.f32 %v3585_v37, %v8902_v22  ;;  %v3586_v39 = vmul.f32 0.5, %v3581_v21 }
0x1c27   : > { %v3589_v41 = vsel %vm3030_vm8, %v3587_v38, -inf  ;;  %v3588_v42 = vadd.f32 %v3586_v39, %v8905_v26 }
0x1c29   : > { %v3592_v43 = vsel %vm3030_vm8, %v3588_v42, -inf }
0x1ca5   : > { %v3406_v24 = vpop.xlane.xlu1 %3405 }
0x1ca6   : > { %v3410_v25 = vsub.f32 %v3402_v13, %v3406_v24  ;;  %v2968_v13 = vld [vmem:[%s8547_s8 + $0x4] sm:$0xf] }
0x1ca7   : > { %v3409_v27 = vpop.xlane.xlu0 %3408  ;;  %v3484_v14 = vsel %vm1610_vm7, %v2968_v13, 0 }
0x1ca8   : > { %v3412_v28 = vmul.f32 1.442695, %v3410_v25  ;;  %v3411_v30 = vsub.f32 %v3403_v15, %v3409_v27 }
0x1caa   : > { %8192 = vpow2.f32 %v3412_v28  ;;  %v3414_v31 = vmul.f32 1.442695, %v3411_v30 }
0x1cac   : > { %8194 = vpow2.f32 %v3414_v31 }
0x1cb4   : > { %v8193_v32 = vpop.eup %8192 }
0x1cb5   : > { %v3416_v33 = vsel %vm3030_vm8, %v8193_v32, 0.0 }
0x1cb6   : > { %v8195_v34 = vpop.eup %8194  ;;  %3417 = vadd.xlane.f32.xlu0 %v3416_v33 }
0x1cb7   : > { %v3419_v35 = vsel %vm3030_vm8, %v8195_v34, 0.0 }
0x1cb8   : > { %3420 = vadd.xlane.f32.xlu1 %v3419_v35 }
0x1cc9   : > { %3429 = vrot.lane.b32.xlu1 %v8886_v12, %s8328_s26 }
0x1ccc   : > { %3427 = vrot.lane.b32.xlu0 %v8882_v10, %s8328_s26  ;;  %s9592_s26 = smov 68  }
0x1ccd   : > { %3720 = vrot.lane.b32.xlu1 %v8882_v10, %s8334_s14 }
0x1cd0   : > { %3722 = vrot.lane.b32.xlu0 %v8886_v12, %s8334_s14 }
0x1cd1   : > { %3718 = vrot.lane.b32.xlu1 %v8895_v20, %s8334_s14  ;;  %s9600_s14 = scalar_lea.vmem %s8490_s29, %s8519_s0 }
0x1cef   : > { %3590 = vmax.xlane.f32.xlu0 %v3589_v41 }
0x1cf5   : > { %3593 = vmax.xlane.f32.xlu1 %v3592_v43 }
0x1d06   : > { %3612 = vrot.lane.b32.xlu1 %v8882_v10, %s8330_s3 }
0x1d0a   : > { %3905 = vrot.lane.b32.xlu1 %v8882_v10, %s8338_s9 }
0x1d0e   : > { %3907 = vrot.lane.b32.xlu1 %v8886_v12, %s8338_s9 }
0x1d43   : > { %v3418_v44 = vpop.xlane.xlu0 %3417 }
0x1d44   : > { %8196 = vrcp.f32 %v3418_v44 }
0x1d45   : > { %v3421_v45 = vpop.xlane.xlu1 %3420 }
0x1d46   : > { %8198 = vrcp.f32 %v3421_v45 }
0x1d47   : > { %v3428_v46 = vpop.permute.xlu0 %3427 }
0x1d48   : > { %7758 = vmatpush3.bf16.msra.mxu0 %v3428_v46 }
0x1d49   : > { %v3430_v47 = vpop.permute.xlu1 %3429  ;;  %7759 = vmatprep.subr.bf16.mxu0 %v8321_v17 }
0x1d4a   : > { %v3436_v48 = vsel %vm1610_vm7, %v3430_v47, 0  ;;  %v7022_v47 = vcombine.low %v2968_v13, %v2968_v13 }
0x1d4b   : > { %v3723_v40 = vpop.permute.xlu0 %3722 }
0x1d4c   : > { %7760 = vmatpush3.bf16.msra.mxu0 %v3436_v48  ;;  %v3731_v55 = vsel %vm1353_vm5, %v3723_v40, 0  ;;  %v3668_v48 = vrot.slane %v7022_v47, 2 }
0x1d4d   : > { %v3721_v49 = vpop.permute.xlu1 %3720  ;;  %7765 = vmatprep.subr.bf16.mxu0 %v8321_v17 }
0x1d4e   : > { %v8197_v50 = vpop.eup %8196  ;;  %v3728_v51 = vsel %vm1353_vm5, %v3721_v49, 0  ;;  %v3673_v49 = vsel %vm1610_vm7, %v3668_v48, 0 }
0x1d4f   : > { %7794 = vmatpush3.bf16.xpose.msra.mxu1 %v3728_v51  ;;  %v3424_v53 = vmul.f32 %v8197_v50, %v8193_v32 }
0x1d50   : > { %v8199_v52 = vpop.eup %8198  ;;  %7795 = vmatprep.subr.bf16.mxu1 %v8321_v17 }
0x1d51   : > { %v3425_v36 = vmul.f32 %v8199_v52, %v8195_v34  ;;  %v3719_v29 = vpop.permute.xlu1 %3718 }
0x1d53   : > { %v3426_v54 = vpack.c.bf16 %v3425_v36, %v3424_v53 }
0x1d55   : > { %7762 = vmatmul.mubr.msk.bf16.vlgmr.msra.gmra.mrb[68].mxu0 %vm3030_vm8, %v3426_v54 }
0x1d56   : > { %7767 = vmatprep.mubr.msk.bf16.mxu0 %vm8322_vm3, %v8321_v17  ;;  %7766 = vmatpush3.bf16.msra.mxu0 %v3484_v14 }
0x1d57   : > { %7796 = vmatpush3.bf16.xpose.msra.mxu1 %v3731_v55  ;;  %7779 = vmatprep.subr.bf16.mxu0 %v8321_v17 }
0x1d58   : > { %7815 = vmatprep.subr.bf16.mxu1 %v8321_v17 }
0x1d5e   : > { %7798 = vmatmul.mubr.msk.bf16.vlgmr.msra.gmra.mrb[72].mxu1 %vm1353_vm5, %v3719_v29 }
0x1d5f   : > { %7819 = vmatprep.mubr.msk.bf16.mxu1 %vm8322_vm3, %v8321_v17 }
0x1d7c   : > { %v3591_v57 = vpop.xlane.xlu0 %3590 }
0x1d7d   : > { %v3595_v58 = vsub.f32 %v3587_v38, %v3591_v57 }
0x1d7f   : > { %v3597_v60 = vmul.f32 1.442695, %v3595_v58 }
0x1d81   : > { %8200 = vpow2.f32 %v3597_v60 }
0x1d82   : > { %v3594_v61 = vpop.xlane.xlu1 %3593 }
0x1d83   : > { %v3596_v62 = vsub.f32 %v3588_v42, %v3594_v61 }
0x1d85   : > { %v3599_v1 = vmul.f32 1.442695, %v3596_v62 }
0x1d86   : > { %v3613_v3 = vpop.permute.xlu1 %3612 }
0x1d87   : > { %8202 = vpow2.f32 %v3599_v1 }
0x1d8a   : > { %v3906_v4 = vpop.permute.xlu1 %3905 }
0x1d8b   : > { %v8201_v6 = vpop.eup %8200  ;;  %v3913_v7 = vsel %vm1353_vm5, %v3906_v4, 0 }
0x1d8c   : > { %7816 = vmatpush3.bf16.xpose.msra.mxu1 %v3913_v7  ;;  %v3601_v8 = vsel %vm3030_vm8, %v8201_v6, 0.0 }
0x1d8d   : > { %3602 = vadd.xlane.f32.xlu0 %v3601_v8  ;;  %7817 = vmatprep.subr.bf16.mxu1 %v8321_v17 }
0x1d8e   : > { %v3908_v9 = vpop.permute.xlu1 %3907 }
0x1d8f   : > { %v3916_v59 = vsel %vm1353_vm5, %v3908_v9, 0 }
0x1d91   : > { %v8203_v11 = vpop.eup %8202 }
0x1d92   : > { %v3604_v56 = vsel %vm3030_vm8, %v8203_v11, 0.0 }
0x1d93   : > { %3605 = vadd.xlane.f32.xlu0 %v3604_v56 }
0x1d94   : > { %7818 = vmatpush3.bf16.xpose.msra.mxu1 %v3916_v59 }
0x1d95   : > { %7837 = vmatprep.subr.bf16.mxu1 %v8321_v17 }
0x1da9   : > { %3614 = vrot.lane.b32.xlu0 %v8886_v12, %s8330_s3  ;;  %s9595_s3 = scalar_lea.vmem %s8460_s17, %s8519_s0 }
0x1dad   : > { %3903 = vrot.lane.b32.xlu0 %v8895_v20, %s8338_s9  ;;  %s9588_s9 = smov 104  }
0x1e1a   : > { %v3603_v15 = vpop.xlane.xlu0 %3602 }
0x1e20   : > { %v3606_v16 = vpop.xlane.xlu0 %3605 }
0x1e21   : > { %8204 = vrcp.f32 %v3606_v16 }
0x1e22   : > { %8206 = vrcp.f32 %v3603_v15 }
0x1e24   : > { %v3615_v18 = vpop.permute.xlu0 %3614 }
0x1e25   : > { %v3621_v33 = vsel %vm1610_vm7, %v3615_v18, 0 }
0x1e28   : > { %v3472_v19 = vpop.f32.mrb[68].mxu0  ;;  %v3904_v21 = vpop.permute.xlu0 %3903 }
0x1e29   : > { %v7763_v23 = vpop.f32.mrb[69].mxu0  ;;  %7820 = vmatmul.mubr.msk.bf16.vlgmr.msra.gmra.mrb[76].mxu1 %vm1353_vm5, %v3904_v21 }
0x1e2a   : > { %v3475_v24 = vpop.f32.mrb[70].mxu0  ;;  %7841 = vmatprep.mubr.msk.bf16.mxu1 %vm8322_vm3, %v8321_v17 }
0x1e2b   : > { %v3479_v25 = vpack.c.bf16 %v3475_v24, %v3472_v19  ;;  %v7764_v27 = vpop.f32.mrb[71].mxu0  ;;  %v8205_v28 = vpop.eup %8204 }
0x1e2c   : > { %v8207_v30 = vpop.eup %8206  ;;  %v3610_v31 = vmul.f32 %v8205_v28, %v8203_v11 }
0x1e2d   : > { %7768 = vmatmul.mubr.msk.bf16.vlgmr.msra.gmra.mrb[72].mxu0 %vm1353_vm5, %v3479_v25  ;;  %v3609_v32 = vmul.f32 %v8207_v30, %v8201_v6 }
0x1e2e   : > { %7780 = vmatpush3.bf16.msra.mxu0 %v3613_v3  ;;  %7783 = vmatprep.mubr.msk.bf16.mxu0 %vm8322_vm3, %v8321_v17 }
0x1e2f   : > { %7781 = vmatprep.subr.bf16.mxu0 %v8321_v17  ;;  %v3611_v39 = vpack.c.bf16 %v3610_v31, %v3609_v32 }
0x1e31   : > { %v3767_v34 = vpop.f32.mrb[72].mxu1 }
0x1e32   : > { %7782 = vmatpush3.bf16.msra.mxu0 %v3621_v33  ;;  %v3774_v35 = vmul.f32 0.5, %v3767_v34  ;;  %v7799_v37 = vpop.f32.mrb[73].mxu1 }
0x1e33   : > { %v3770_v38 = vpop.f32.mrb[74].mxu1  ;;  %7787 = vmatprep.subr.bf16.mxu0 %v8321_v17 }
0x1e34   : > { %v3775_v41 = vmul.f32 0.5, %v3770_v38  ;;  %v7800_v42 = vpop.f32.mrb[75].mxu1  ;;  %v3776_v43 = vadd.f32 %v3774_v35, %v8902_v22 }
0x1e35   : > { %7784 = vmatmul.mubr.msk.bf16.vlgmr.msra.gmra.mrb[76].mxu0 %vm3030_vm8, %v3611_v39 }
0x1e36   : > { %v3777_v44 = vadd.f32 %v3775_v41, %v8905_v26  ;;  %v3778_v45 = vsel %vm3030_vm8, %v3776_v43, -inf  ;;  %7789 = vmatprep.mubr.msk.bf16.mxu0 %vm8322_vm3, %v8321_v17  ;;  %7788 = vmatpush3.bf16.msra.mxu0 %v3673_v49 }
0x1e37   : > { %3779 = vmax.xlane.f32.xlu1 %v3778_v45  ;;  %7801 = vmatprep.subr.bf16.mxu0 %v8321_v17 }
0x1e38   : > { %v3781_v46 = vsel %vm3030_vm8, %v3777_v44, -inf }
0x1e39   : > { %3782 = vmax.xlane.f32.xlu0 %v3781_v46 }
0x1ec4   : > { %v3780_v50 = vpop.xlane.xlu1 %3779 }
0x1ec5   : > { %v3784_v51 = vsub.f32 %v3776_v43, %v3780_v50 }
0x1ec6   : > { %v3783_v52 = vpop.xlane.xlu0 %3782 }
0x1ec7   : > { %v3786_v53 = vmul.f32 1.442695, %v3784_v51  ;;  %v3785_v36 = vsub.f32 %v3777_v44, %v3783_v52 }
0x1ec9   : > { %8208 = vpow2.f32 %v3786_v53  ;;  %v3788_v40 = vmul.f32 1.442695, %v3785_v36 }
0x1ecb   : > { %8210 = vpow2.f32 %v3788_v40  ;;  %v2969_v40 = vld [vmem:[%s8547_s8 + $0x8] sm:$0xf] }
0x1ed3   : > { %v8209_v54 = vpop.eup %8208 }
0x1ed4   : > { %v3790_v55 = vsel %vm3030_vm8, %v8209_v54, 0.0 }
0x1ed5   : > { %v8211_v29 = vpop.eup %8210  ;;  %3791 = vadd.xlane.f32.xlu0 %v3790_v55 }
0x1ed6   : > { %v3793_v57 = vsel %vm3030_vm8, %v8211_v29, 0.0 }
0x1ed7   : > { %3794 = vadd.xlane.f32.xlu1 %v3793_v57 }
0x1ee8   : > { %3803 = vrot.lane.b32.xlu1 %v8886_v12, %s8335_s18 }
0x1eeb   : > { %3801 = vrot.lane.b32.xlu0 %v8882_v10, %s8335_s18  ;;  %s9601_s18 = sld [smem:[#allocation29_spill]] }
0x1eec   : > { %4094 = vrot.lane.b32.xlu1 %v8882_v10, %s9588_s9 }
0x1eef   : > { %4096 = vrot.lane.b32.xlu0 %v8886_v12, %s9588_s9 }
0x1ef0   : > { %4092 = vrot.lane.b32.xlu1 %v8895_v20, %s9588_s9 }
0x1ef1   : > { %p7212_p5 = scmp.ne.s32.totalorder %s9601_s18, 1 }
0x1ef2   : > { %s9602_s5 = sld [smem:[#allocation25_spill]] (!%p7212_p5)  ;;  %s9603_s16 = sld [smem:[#allocation26_spill]] (!%p7212_p5)  ;;  %vm8348_vm9 = vmmov (!%p7212_p5), 0  }
0x1efc   : > { %v3952_v58 = vpop.f32.mrb[76].mxu1 }
0x1efd   : > { %v7821_v60 = vpop.f32.mrb[77].mxu1  ;;  %v3959_v9 = vmul.f32 0.5, %v3952_v58 }
0x1efe   : > { %v3955_v61 = vpop.f32.mrb[78].mxu1 }
0x1eff   : > { %v7822_v62 = vpop.f32.mrb[79].mxu1  ;;  %v3961_v56 = vadd.f32 %v3959_v9, %v8902_v22  ;;  %v3960_v14 = vmul.f32 0.5, %v3955_v61 }
0x1f00   : > { %v3520_v1 = vpop.f32.mrb[72].mxu0 }
0x1f01   : > { %v9076_v3 = vadd.f32 %v3520_v1, %v8989_v2  ;;  %v7769_v4 = vpop.f32.mrb[73].mxu0  ;;  %v3963_v2 = vsel %vm3030_vm8, %v3961_v56, -inf }
0x1f02   : > { %v3523_v6 = vpop.f32.mrb[74].mxu0 }
0x1f03   : > { %v9079_v7 = vadd.f32 %v3523_v6, %v8991_v5  ;;  %v7770_v8 = vpop.f32.mrb[75].mxu0  ;;  %v3962_v5 = vadd.f32 %v3960_v14, %v8905_v26 }
0x1f05   : > { %v3966_v18 = vsel %vm3030_vm8, %v3962_v5, -inf }
0x1f08   : > { %v3657_v11 = vpop.f32.mrb[76].mxu0 }
0x1f09   : > { %v7785_v59 = vpop.f32.mrb[77].mxu0 }
0x1f0a   : > { %v3660_v13 = vpop.f32.mrb[78].mxu0 }
0x1f0b   : > { %v3664_v15 = vpack.c.bf16 %v3660_v13, %v3657_v11  ;;  %v7786_v16 = vpop.f32.mrb[79].mxu0 }
0x1f0d   : > { %7790 = vmatmul.mubr.msk.bf16.vlgmr.msra.gmra.mrb[80].mxu0 %vm1353_vm5, %v3664_v15 }
0x1f0e   : > { %3964 = vmax.xlane.f32.xlu0 %v3963_v2  ;;  %7805 = vmatprep.mubr.msk.bf16.mxu0 %vm8322_vm3, %v8321_v17 }
0x1f14   : > { %3967 = vmax.xlane.f32.xlu1 %v3966_v18 }
0x1f25   : > { %3986 = vrot.lane.b32.xlu1 %v8882_v10, %s9589_s24 }
0x1f29   : > { %4279 = vrot.lane.b32.xlu1 %v8882_v10, %s9590_s7 }
0x1f2d   : > { %4281 = vrot.lane.b32.xlu1 %v8886_v12, %s9590_s7 }
0x1f62   : > { %v3792_v19 = vpop.xlane.xlu0 %3791 }
0x1f63   : > { %8212 = vrcp.f32 %v3792_v19 }
0x1f64   : > { %v3795_v21 = vpop.xlane.xlu1 %3794 }
0x1f65   : > { %8214 = vrcp.f32 %v3795_v21 }
0x1f66   : > { %v3802_v23 = vpop.permute.xlu0 %3801 }
0x1f67   : > { %7802 = vmatpush3.bf16.msra.mxu0 %v3802_v23 }
0x1f68   : > { %v3804_v24 = vpop.permute.xlu1 %3803  ;;  %7803 = vmatprep.subr.bf16.mxu0 %v8321_v17 }
0x1f69   : > { %v3810_v25 = vsel %vm1610_vm7, %v3804_v24, 0 }
0x1f6a   : > { %v4097_v34 = vpop.permute.xlu0 %4096 }
0x1f6b   : > { %7804 = vmatpush3.bf16.msra.mxu0 %v3810_v25  ;;  %v4105_v37 = vsel %vm1353_vm5, %v4097_v34, 0 }
0x1f6c   : > { %v4095_v27 = vpop.permute.xlu1 %4094  ;;  %7809 = vmatprep.subr.bf16.mxu0 %v8321_v17 }
0x1f6d   : > { %v8213_v28 = vpop.eup %8212  ;;  %v4102_v30 = vsel %vm1353_vm5, %v4095_v27, 0 }
0x1f6e   : > { %7838 = vmatpush3.bf16.xpose.msra.mxu1 %v4102_v30  ;;  %v3798_v32 = vmul.f32 %v8213_v28, %v8209_v54  ;;  %v3858_v54 = vsel %vm1610_vm7, %v2969_v40, 0  ;;  %v7029_v28 = vcombine.low %v2969_v40, %v2969_v40 }
0x1f6f   : > { %v8215_v31 = vpop.eup %8214  ;;  %7839 = vmatprep.subr.bf16.mxu1 %v8321_v17 }
0x1f70   : > { %v3799_v33 = vmul.f32 %v8215_v31, %v8211_v29  ;;  %v4093_v38 = vpop.permute.xlu1 %4092  ;;  %v4042_v30 = vrot.slane %v7029_v28, 2 }
0x1f72   : > { %v3800_v35 = vpack.c.bf16 %v3799_v33, %v3798_v32  ;;  %v4047_v31 = vsel %vm1610_vm7, %v4042_v30, 0 }
0x1f74   : > { %7806 = vmatmul.mubr.msk.bf16.vlgmr.msra.gmra.mrb[84].mxu0 %vm3030_vm8, %v3800_v35 }
0x1f75   : > { %7811 = vmatprep.mubr.msk.bf16.mxu0 %vm8322_vm3, %v8321_v17  ;;  %7810 = vmatpush3.bf16.msra.mxu0 %v3858_v54 }
0x1f76   : > { %7840 = vmatpush3.bf16.xpose.msra.mxu1 %v4105_v37  ;;  %7823 = vmatprep.subr.bf16.mxu0 %v8321_v17 }
0x1f77   : > { %7859 = vmatprep.subr.bf16.mxu1 %v8321_v17 }
0x1f7d   : > { %7842 = vmatmul.mubr.msk.bf16.vlgmr.msra.gmra.mrb[80].mxu1 %vm1353_vm5, %v4093_v38 }
0x1f7e   : > { %7863 = vmatprep.mubr.msk.bf16.mxu1 %vm8322_vm3, %v8321_v17 }
0x1f9b   : > { %v3965_v39 = vpop.xlane.xlu0 %3964 }
0x1f9c   : > { %v3969_v41 = vsub.f32 %v3961_v56, %v3965_v39 }
0x1f9e   : > { %v3971_v42 = vmul.f32 1.442695, %v3969_v41 }
0x1fa0   : > { %8216 = vpow2.f32 %v3971_v42 }
0x1fa1   : > { %v3968_v43 = vpop.xlane.xlu1 %3967 }
0x1fa2   : > { %v3970_v44 = vsub.f32 %v3962_v5, %v3968_v43 }
0x1fa4   : > { %v3973_v45 = vmul.f32 1.442695, %v3970_v44 }
0x1fa5   : > { %v3987_v46 = vpop.permute.xlu1 %3986 }
0x1fa6   : > { %8218 = vpow2.f32 %v3973_v45 }
0x1fa9   : > { %v4280_v47 = vpop.permute.xlu1 %4279 }
0x1faa   : > { %v8217_v48 = vpop.eup %8216  ;;  %v4287_v49 = vsel %vm1353_vm5, %v4280_v47, 0 }
0x1fab   : > { %7860 = vmatpush3.bf16.xpose.msra.mxu1 %v4287_v49  ;;  %v3975_v50 = vsel %vm3030_vm8, %v8217_v48, 0.0 }
0x1fac   : > { %3976 = vadd.xlane.f32.xlu0 %v3975_v50  ;;  %7861 = vmatprep.subr.bf16.mxu1 %v8321_v17 }
0x1fad   : > { %v4282_v51 = vpop.permute.xlu1 %4281 }
0x1fae   : > { %v4290_v36 = vsel %vm1353_vm5, %v4282_v51, 0 }
0x1fb0   : > { %v8219_v52 = vpop.eup %8218 }
0x1fb1   : > { %v3978_v53 = vsel %vm3030_vm8, %v8219_v52, 0.0 }
0x1fb2   : > { %3979 = vadd.xlane.f32.xlu0 %v3978_v53 }
0x1fb3   : > { %7862 = vmatpush3.bf16.xpose.msra.mxu1 %v4290_v36 }
0x1fc8   : > { %3988 = vrot.lane.b32.xlu0 %v8886_v12, %s9589_s24 }
0x1fcc   : > { %4277 = vrot.lane.b32.xlu0 %v8895_v20, %s9590_s7 }
0x1fe0   : > { %v3709_v55 = vpop.f32.mrb[80].mxu0 }
0x1fe1   : > { %v9120_v29 = vadd.f32 %v3709_v55, %v9076_v3  ;;  %v7791_v57 = vpop.f32.mrb[81].mxu0 }
0x1fe2   : > { %v3712_v58 = vpop.f32.mrb[82].mxu0 }
0x1fe3   : > { %v9123_v60 = vadd.f32 %v3712_v58, %v9079_v7  ;;  %v7792_v61 = vpop.f32.mrb[83].mxu0 }
0x2039   : > { %v3977_v62 = vpop.xlane.xlu0 %3976 }
0x203f   : > { %v3980_v1 = vpop.xlane.xlu0 %3979 }
0x2040   : > { %8220 = vrcp.f32 %v3980_v1 }
0x2041   : > { %8222 = vrcp.f32 %v3977_v62 }
0x2043   : > { %v3989_v4 = vpop.permute.xlu0 %3988 }
0x2044   : > { %v3995_v14 = vsel %vm1610_vm7, %v3989_v4, 0 }
0x2047   : > { %v3846_v6 = vpop.f32.mrb[84].mxu0  ;;  %v4278_v8 = vpop.permute.xlu0 %4277 }
0x2048   : > { %v7807_v9 = vpop.f32.mrb[85].mxu0  ;;  %7864 = vmatmul.mubr.msk.bf16.vlgmr.msra.gmra.mrb[84].mxu1 %vm1353_vm5, %v4278_v8 }
0x2049   : > { %v3849_v20 = vpop.f32.mrb[86].mxu0 }
0x204a   : > { %v3853_v11 = vpack.c.bf16 %v3849_v20, %v3846_v6  ;;  %v7808_v3 = vpop.f32.mrb[87].mxu0  ;;  %v8221_v56 = vpop.eup %8220 }
0x204b   : > { %v8223_v59 = vpop.eup %8222  ;;  %v3984_v7 = vmul.f32 %v8221_v56, %v8219_v52 }
0x204c   : > { %7812 = vmatmul.mubr.msk.bf16.vlgmr.msra.gmra.mrb[88].mxu0 %vm1353_vm5, %v3853_v11  ;;  %v3983_v13 = vmul.f32 %v8223_v59, %v8217_v48 }
0x204d   : > { %7824 = vmatpush3.bf16.msra.mxu0 %v3987_v46  ;;  %7827 = vmatprep.mubr.msk.bf16.mxu0 %vm8322_vm3, %v8321_v17 }
0x204e   : > { %7825 = vmatprep.subr.bf16.mxu0 %v8321_v17  ;;  %v3985_v18 = vpack.c.bf16 %v3984_v7, %v3983_v13 }
0x2050   : > { %v4141_v15 = vpop.f32.mrb[80].mxu1 }
0x2051   : > { %7826 = vmatpush3.bf16.msra.mxu0 %v3995_v14  ;;  %v4148_v16 = vmul.f32 0.5, %v4141_v15  ;;  %v7843_v2 = vpop.f32.mrb[81].mxu1 }
0x2052   : > { %v4144_v5 = vpop.f32.mrb[82].mxu1  ;;  %7831 = vmatprep.subr.bf16.mxu0 %v8321_v17 }
0x2053   : > { %v4150_v19 = vadd.f32 %v4148_v16, %v8902_v22  ;;  %v4149_v21 = vmul.f32 0.5, %v4144_v5  ;;  %v7844_v23 = vpop.f32.mrb[83].mxu1 }
0x2054   : > { %7828 = vmatmul.mubr.msk.bf16.vlgmr.msra.gmra.mrb[92].mxu0 %vm3030_vm8, %v3985_v18 }
0x2055   : > { %v4151_v24 = vadd.f32 %v4149_v21, %v8905_v26  ;;  %v4152_v25 = vsel %vm3030_vm8, %v4150_v19, -inf  ;;  %7833 = vmatprep.mubr.msk.bf16.mxu0 %vm8322_vm3, %v8321_v17  ;;  %7832 = vmatpush3.bf16.msra.mxu0 %v4047_v31  ;;  %v2970_v21 = vld [vmem:[%s8547_s8 + $0xc] sm:$0xf]  ;;  %s9593_s8 = scalar_lea.vmem %s8450_s21, %s8519_s0 }
0x2056   : > { %4153 = vmax.xlane.f32.xlu1 %v4152_v25  ;;  %7845 = vmatprep.subr.bf16.mxu0 %v8321_v17  ;;  %v4232_v23 = vsel %vm1610_vm7, %v2970_v21, 0 }
0x2057   : > { %v4155_v27 = vsel %vm3030_vm8, %v4151_v24, -inf }
0x2058   : > { %4156 = vmax.xlane.f32.xlu0 %v4155_v27 }
0x20e3   : > { %v4154_v32 = vpop.xlane.xlu1 %4153 }
0x20e4   : > { %v4158_v33 = vsub.f32 %v4150_v19, %v4154_v32 }
0x20e5   : > { %v4157_v34 = vpop.xlane.xlu0 %4156 }
0x20e6   : > { %v4160_v35 = vmul.f32 1.442695, %v4158_v33  ;;  %v4159_v37 = vsub.f32 %v4151_v24, %v4157_v34 }
0x20e8   : > { %8224 = vpow2.f32 %v4160_v35  ;;  %v4162_v38 = vmul.f32 1.442695, %v4159_v37 }
0x20ea   : > { %8226 = vpow2.f32 %v4162_v38 }
0x20f2   : > { %v8225_v39 = vpop.eup %8224 }
0x20f3   : > { %v4164_v41 = vsel %vm3030_vm8, %v8225_v39, 0.0 }
0x20f4   : > { %v8227_v42 = vpop.eup %8226  ;;  %4165 = vadd.xlane.f32.xlu0 %v4164_v41 }
0x20f5   : > { %v4167_v43 = vsel %vm3030_vm8, %v8227_v42, 0.0 }
0x20f6   : > { %4168 = vadd.xlane.f32.xlu1 %v4167_v43 }
0x2107   : > { %4177 = vrot.lane.b32.xlu1 %v8886_v12, %s9591_s10 }
0x210a   : > { %4175 = vrot.lane.b32.xlu0 %v8882_v10, %s9591_s10 }
0x211b   : > { %v4326_v44 = vpop.f32.mrb[84].mxu1 }
0x211c   : > { %v7865_v45 = vpop.f32.mrb[85].mxu1  ;;  %v4333_v53 = vmul.f32 0.5, %v4326_v44 }
0x211d   : > { %v4329_v46 = vpop.f32.mrb[86].mxu1 }
0x211e   : > { %v7866_v47 = vpop.f32.mrb[87].mxu1  ;;  %v4334_v49 = vmul.f32 0.5, %v4329_v46  ;;  %v4335_v55 = vadd.f32 %v4333_v53, %v8902_v22 }
0x211f   : > { %v3894_v48 = vpop.f32.mrb[88].mxu0  ;;  %v7036_v47 = vcombine.low %v2970_v21, %v2970_v21  ;;  %v4530_v21 = vld [vmem:[%s8557_s28 + $0x48] sm:$0xff] }
0x2120   : > { %v3901_v50 = vadd.f32 %v3894_v48, %v9120_v29  ;;  %v7813_v51 = vpop.f32.mrb[89].mxu0  ;;  %v4336_v54 = vadd.f32 %v4334_v49, %v8905_v26  ;;  %v4337_v29 = vsel %vm3030_vm8, %v4335_v55, -inf }
0x2121   : > { %v3897_v52 = vpop.f32.mrb[90].mxu0  ;;  %v4416_v48 = vrot.slane %v7036_v47, 2 }
0x2122   : > { %v3902_v36 = vadd.f32 %v3897_v52, %v9123_v60  ;;  %v7814_v40 = vpop.f32.mrb[91].mxu0  ;;  %v4340_v61 = vsel %vm3030_vm8, %v4336_v54, -inf }
0x2123   : > { %v4421_v49 = vsel %vm1610_vm7, %v4416_v48, 0 }
0x2127   : > { %v4031_v57 = vpop.f32.mrb[92].mxu0 }
0x2128   : > { %v7829_v58 = vpop.f32.mrb[93].mxu0 }
0x2129   : > { %v4034_v62 = vpop.f32.mrb[94].mxu0  ;;  %4341 = vmax.xlane.f32.xlu0 %v4340_v61 }
0x212a   : > { %v4038_v1 = vpack.c.bf16 %v4034_v62, %v4031_v57  ;;  %v7830_v4 = vpop.f32.mrb[95].mxu0  ;;  %v7038_v62 = vld [vmem:[%s9593_s8] ss:$0 sm:$0xff] }
0x212b   : > { %4338 = vmax.xlane.f32.xlu1 %v4337_v29 }
0x212c   : > { %7834 = vmatmul.mubr.msk.bf16.vlgmr.msra.gmra.mrb[96].mxu0 %vm1353_vm5, %v4038_v1 }
0x212d   : > { %7849 = vmatprep.mubr.msk.bf16.mxu0 %vm8322_vm3, %v8321_v17 }
0x2181   : > { %v4166_v60 = vpop.xlane.xlu0 %4165 }
0x2182   : > { %8228 = vrcp.f32 %v4166_v60 }
0x2183   : > { %v4169_v26 = vpop.xlane.xlu1 %4168 }
0x2184   : > { %8230 = vrcp.f32 %v4169_v26 }
0x2185   : > { %v4176_v22 = vpop.permute.xlu0 %4175 }
0x2186   : > { %7846 = vmatpush3.bf16.msra.mxu0 %v4176_v22 }
0x2187   : > { %v4178_v6 = vpop.permute.xlu1 %4177  ;;  %7847 = vmatprep.subr.bf16.mxu0 %v8321_v17 }
0x2188   : > { %v4184_v8 = vsel %vm1610_vm7, %v4178_v6, 0 }
0x218a   : > { %7848 = vmatpush3.bf16.msra.mxu0 %v4184_v8 }
0x218b   : > { %7853 = vmatprep.subr.bf16.mxu0 %v8321_v17 }
0x218c   : > { %v8229_v9 = vpop.eup %8228 }
0x218d   : > { %v4172_v11 = vmul.f32 %v8229_v9, %v8225_v39 }
0x218e   : > { %v8231_v20 = vpop.eup %8230 }
0x218f   : > { %v4173_v3 = vmul.f32 %v8231_v20, %v8227_v42 }
0x2191   : > { %v4174_v56 = vpack.c.bf16 %v4173_v3, %v4172_v11 }
0x2193   : > { %7850 = vmatmul.mubr.msk.bf16.vlgmr.msra.gmra.mrb[100].mxu0 %vm3030_vm8, %v4174_v56 }
0x2194   : > { %7855 = vmatprep.mubr.msk.bf16.mxu0 %vm8322_vm3, %v8321_v17  ;;  %7854 = vmatpush3.bf16.msra.mxu0 %v4232_v23 }
0x2195   : > { %7867 = vmatprep.subr.bf16.mxu0 %v8321_v17 }
0x21b6   : > { %v4342_v59 = vpop.xlane.xlu0 %4341 }
0x21b7   : > { %v4344_v7 = vsub.f32 %v4336_v54, %v4342_v59 }
0x21b8   : > { %v4339_v13 = vpop.xlane.xlu1 %4338 }
0x21b9   : > { %v4347_v14 = vmul.f32 1.442695, %v4344_v7  ;;  %v4343_v15 = vsub.f32 %v4335_v55, %v4339_v13 }
0x21bb   : > { %8232 = vpow2.f32 %v4347_v14  ;;  %v4345_v16 = vmul.f32 1.442695, %v4343_v15 }
0x21bd   : > { %8234 = vpow2.f32 %v4345_v16 }
0x21c5   : > { %v8233_v2 = vpop.eup %8232 }
0x21c6   : > { %v4352_v5 = vsel %vm3030_vm8, %v8233_v2, 0.0 }
0x21c7   : > { %v8235_v18 = vpop.eup %8234  ;;  %4353 = vadd.xlane.f32.xlu1 %v4352_v5  ;;  %v4529_v5 = vld [vmem:[%s8557_s28 + $0x40] sm:$0xff] }
0x21c8   : > { %v4349_v19 = vsel %vm3030_vm8, %v8235_v18, 0.0 }
0x21c9   : > { %4350 = vadd.xlane.f32.xlu0 %v4349_v19 }
0x21d8   : > { %4362 = vrot.lane.b32.xlu1 %v8886_v12, %s9592_s26 }
0x21df   : > { %4360 = vrot.lane.b32.xlu0 %v8882_v10, %s9592_s26 }
0x21ff   : > { %v4083_v24 = vpop.f32.mrb[96].mxu0 }
0x2200   : > { %v4090_v25 = vadd.f32 %v4083_v24, %v3901_v50  ;;  %v7835_v27 = vpop.f32.mrb[97].mxu0 }
0x2201   : > { %v4086_v28 = vpop.f32.mrb[98].mxu0  ;;  %v4537_v27 = vld [vmem:[%s8557_s28 + $0x80] sm:$0xff] }
0x2202   : > { %v4091_v30 = vadd.f32 %v4086_v28, %v3902_v36  ;;  %v7836_v31 = vpop.f32.mrb[99].mxu0  ;;  %v4545_v28 = vld [vmem:[%s8557_s28 + $0xc0] sm:$0xff] }
0x2203   : > { %v7058_v31 = vcombine.high %v4537_v27, %v4545_v28 }
0x2254   : > { %v4354_v33 = vpop.xlane.xlu1 %4353 }
0x2256   : > { %v4351_v32 = vpop.xlane.xlu0 %4350 }
0x2257   : > { %8236 = vrcp.f32 %v4351_v32  ;;  %v4546_v32 = vld [vmem:[%s8557_s28 + $0xc8] sm:$0xff] }
0x2258   : > { %8238 = vrcp.f32 %v4354_v33  ;;  %v4363_v42 = vpop.permute.xlu1 %4362  ;;  %v7057_v33 = vcombine.low %v4537_v27, %v4545_v28  ;;  %v4543_v27 = vld [vmem:[%s8557_s28 + $0xb0] sm:$0xff] }
0x2259   : > { %v4369_v45 = vsel %vm1610_vm7, %v4363_v42, 0  ;;  %v4551_v28 = vld [vmem:[%s8557_s28 + $0xf0] sm:$0xff] }
0x225a   : > { %v4361_v39 = vpop.permute.xlu0 %4360 }
0x2261   : > { %v8237_v38 = vpop.eup %8236 }
0x2262   : > { %v8239_v41 = vpop.eup %8238  ;;  %v4357_v43 = vmul.f32 %v8237_v38, %v8235_v18  ;;  %v4522_v18 = vld [vmem:[%s8557_s28 + $0x8] sm:$0xff]  ;;  %v8346_v38 = vmov 0  }
0x2263   : > { %v4358_v44 = vmul.f32 %v8239_v41, %v8233_v2  ;;  %v4521_v2 = vld [vmem:[%s8557_s28] sm:$0xff]  ;;  %v7043_v24 = vcombine.low %v4522_v18, %v4530_v21  ;;  %4833 = vmatprep.mubr.bf16.mxu1 %v8346_v38  ;;  %v4532_v41 = vld [vmem:[%s8557_s28 + $0x58] sm:$0xff] }
0x2264   : > { %v7042_v19 = vcombine.high %v4521_v2, %v4529_v5  ;;  %v7041_v23 = vcombine.low %v4521_v2, %v4529_v5  ;;  %v4527_v2 = vld [vmem:[%s8557_s28 + $0x30] sm:$0xff] }
0x2265   : > { %v4359_v46 = vpack.c.bf16 %v4358_v44, %v4357_v43  ;;  %v4535_v5 = vld [vmem:[%s8557_s28 + $0x70] sm:$0xff] }
0x2266   : > { %v4220_v12 = vpop.f32.mrb[100].mxu0  ;;  %4801 = vmatprep.subr.bf16.mxu1 %v7042_v19  ;;  %v4536_v19 = vld [vmem:[%s8557_s28 + $0x78] sm:$0xff] }
0x2267   : > { %v7851_v34 = vpop.f32.mrb[101].mxu0  ;;  %4802 = vmatpush1.bf16.msra.mxu1 %v7041_v23 }
0x2268   : > { %v4223_v35 = vpop.f32.mrb[102].mxu0  ;;  %4803 = vmatprep.subr.bf16.mxu1 %v7058_v31  ;;  %v4552_v31 = vld [vmem:[%s8557_s28 + $0xf8] sm:$0xff] }
0x2269   : > { %v4227_v10 = vpack.c.bf16 %v4223_v35, %v4220_v12  ;;  %v7852_v37 = vpop.f32.mrb[103].mxu0  ;;  %v4523_v35 = vld [vmem:[%s8557_s28 + $0x10] sm:$0xff] }
0x226a   : > { %v4524_v37 = vld [vmem:[%s8557_s28 + $0x18] sm:$0xff] }
0x226b   : > { %7856 = vmatmul.mubr.msk.bf16.vlgmr.msra.gmra.mrb[104].mxu0 %vm1353_vm5, %v4227_v10  ;;  %4804 = vmatpush1.bf16.msra.mxu1 %v7057_v33  ;;  %v4531_v10 = vld [vmem:[%s8557_s28 + $0x50] sm:$0xff]  ;;  %v7047_v43 = vcombine.low %v4524_v37, %v4532_v41  ;;  %v7048_v44 = vcombine.high %v4524_v37, %v4532_v41  ;;  %v7980_v37 = vld [vmem:[%s8566_s30 + $0x40] sm:$0xff]  }
0x226c   : > { %7868 = vmatpush3.bf16.msra.mxu0 %v4361_v39  ;;  %7871 = vmatprep.mubr.msk.bf16.mxu0 %vm8322_vm3, %v8321_v17  ;;  %v7046_v39 = vcombine.high %v4523_v35, %v4531_v10  ;;  %v7045_v42 = vcombine.low %v4523_v35, %v4531_v10  ;;  %v7069_v35 = vcombine.low %v4543_v27, %v4551_v28  ;;  %v7982_v41 = vld [vmem:[%s8566_s30] sm:$0xff]  }
0x226d   : > { %7869 = vmatprep.subr.bf16.mxu0 %v8321_v17 }
0x226e   : > { %4887 = vmatprep.subr.bf16.mxu1 %v7046_v39  ;;  %v7981_v39 = vld [vmem:[%s8566_s30 + $0xc0] sm:$0xff]  }
0x2270   : > { %7870 = vmatpush3.bf16.msra.mxu0 %v4369_v45 }
0x2271   : > { %7875 = vmatprep.subr.bf16.mxu0 %v8321_v17 }
0x2273   : > { %7872 = vmatmul.mubr.msk.bf16.vlgmr.msra.gmra.mrb[108].mxu0 %vm3030_vm8, %v4359_v46 }
0x2274   : > { %7877 = vmatprep.mubr.msk.bf16.mxu0 %vm8322_vm3, %v8321_v17  ;;  %7876 = vmatpush3.bf16.msra.mxu0 %v4421_v49 }
0x233e   : > { %v4268_v50 = vpop.f32.mrb[104].mxu0 }
0x233f   : > { %v4275_v51 = vadd.f32 %v4268_v50, %v4090_v25  ;;  %v7857_v52 = vpop.f32.mrb[105].mxu0  ;;  %v7044_v25 = vcombine.high %v4522_v18, %v4530_v21  ;;  %v4528_v18 = vld [vmem:[%s8557_s28 + $0x38] sm:$0xff] }
0x2340   : > { %v4271_v53 = vpop.f32.mrb[106].mxu0  ;;  %v7039_v52 = vld [vmem:[%s9594_s1] ss:$0 sm:$0xff]  ;;  %v7055_v33 = vcombine.low %v4528_v18, %v4536_v19 }
0x2341   : > { %v4276_v36 = vadd.f32 %v4271_v53, %v4091_v30  ;;  %v7858_v40 = vpop.f32.mrb[107].mxu0  ;;  %4844 = vmatprep.subr.bf16.mxu0 %v7044_v25  ;;  %v4538_v30 = vld [vmem:[%s8557_s28 + $0x88] sm:$0xff]  ;;  %v7056_v25 = vcombine.high %v4528_v18, %v4536_v19 }
0x2342   : > { %v7059_v12 = vcombine.low %v4538_v30, %v4546_v32  ;;  %v7060_v34 = vcombine.high %v4538_v30, %v4546_v32  ;;  %v4544_v30 = vld [vmem:[%s8557_s28 + $0xb8] sm:$0xff]  ;;  %v7053_v32 = vcombine.low %v4527_v2, %v4535_v5 }
0x2343   : > { %v7071_v10 = vcombine.low %v4544_v30, %v4552_v31 }
0x2346   : > { %v4405_v54 = vpop.f32.mrb[108].mxu0 }
0x2347   : > { %v7873_v55 = vpop.f32.mrb[109].mxu0 }
0x2348   : > { %v4408_v57 = vpop.f32.mrb[110].mxu0  ;;  %v7040_v55 = vld [vmem:[%s9595_s3] ss:$0 sm:$0xff] }
0x2349   : > { %v4412_v58 = vpack.c.bf16 %v4408_v57, %v4405_v54  ;;  %v7874_v61 = vpop.f32.mrb[111].mxu0 }
0x234a   : > { %v4547_v61 = vld [vmem:[%s8557_s28 + $0xd0] sm:$0xff] }
0x234b   : > { %7878 = vmatmul.mubr.msk.bf16.vlgmr.msra.gmra.mrb[112].mxu0 %vm1353_vm5, %v4412_v58  ;;  %v4539_v58 = vld [vmem:[%s8557_s28 + $0x90] sm:$0xff] }
0x234c   : > { %4845 = vmatpush1.bf16.msra.mxu0 %v7043_v24  ;;  %4876 = vmatprep.mubr.bf16.mxu0 %v8346_v38  ;;  %v7054_v24 = vcombine.high %v4527_v2, %v4535_v5 }
0x234d   : > { %4846 = vmatprep.subr.bf16.mxu0 %v7060_v34  ;;  %v7072_v34 = vcombine.high %v4544_v30, %v4552_v31 }
0x2350   : > { %4847 = vmatpush1.bf16.msra.mxu0 %v7059_v12  ;;  %v7070_v12 = vcombine.high %v4543_v27, %v4551_v28 }
0x2351   : > { %4930 = vmatprep.subr.bf16.mxu0 %v7048_v44  ;;  %v7985_v44 = vld [vmem:[%s8566_s30 + $0xc8] sm:$0xff]  }
0x241e   : > { %v4457_v17 = vpop.f32.mrb[112].mxu0 }
0x241f   : > { %v4464_v1 = vadd.f32 %v4457_v17, %v4275_v51  ;;  %v7879_v4 = vpop.f32.mrb[113].mxu0  ;;  %v4540_v17 = vld [vmem:[%s8557_s28 + $0x98] sm:$0xff] }
0x2420   : > { %v4460_v29 = vpop.f32.mrb[114].mxu0 }
0x2421   : > { %v4473_v60 = vadd.f32 %v7038_v62, %v4464_v1  ;;  %v4465_v26 = vadd.f32 %v4460_v29, %v4276_v36  ;;  %v7880_v22 = vpop.f32.mrb[115].mxu0 }
0x2422   : > { %v4525_v22 = vld [vmem:[%s8557_s28 + $0x20] sm:$0xff] }
0x2423   : > { %v4474_v6 = vadd.f32 %v7038_v62, %v4465_v26  ;;  %v4475_v8 = vadd.f32 %v4473_v60, %v8870_v63  ;;  %v4548_v62 = vld [vmem:[%s8557_s28 + $0xd8] sm:$0xff]  ;;  %v7062_v60 = vcombine.high %v4539_v58, %v4547_v61 }
0x2424   : > { %v7064_v26 = vcombine.high %v4540_v17, %v4548_v62 }
0x2425   : > { %v4479_v9 = vsel %vm1298_vm4, %v4475_v8, 0.0  ;;  %v4476_v20 = vadd.f32 %v4474_v6, %v8872_v0  ;;  %v4533_v6 = vld [vmem:[%s8557_s28 + $0x60] sm:$0xff] }
0x2426   : > { %4480 = vadd.xlane.f32.xlu1 %v4479_v9  ;;  %v4534_v9 = vld [vmem:[%s8557_s28 + $0x68] sm:$0xff] }
0x2427   : > { %v4482_v11 = vsel %vm1298_vm4, %v4476_v20, 0.0 }
0x2428   : > { %4483 = vadd.xlane.f32.xlu0 %v4482_v11  ;;  %v7063_v11 = vcombine.low %v4540_v17, %v4548_v62  ;;  %v8003_v17 = vld [vmem:[%s8566_s30 + $0xa8] sm:$0xff]   ;;  %v8004_v62 = vld [vmem:[%s8566_s30 + $0x70] sm:$0xff]  }
0x24b3   : > { %v4481_v3 = vpop.xlane.xlu1 %4480 }
0x24b4   : > { %v4485_v56 = vmul.f32 0.03125, %v4481_v3  ;;  %v7050_v3 = vcombine.high %v4525_v22, %v4533_v6 }
0x24b5   : > { %v4484_v59 = vpop.xlane.xlu0 %4483 }
0x24b6   : > { %v4487_v7 = vsub.f32 %v4475_v8, %v4485_v56  ;;  %v4486_v13 = vmul.f32 0.03125, %v4484_v59  ;;  %v4526_v8 = vld [vmem:[%s8557_s28 + $0x28] sm:$0xff]  ;;  %v4541_v59 = vld [vmem:[%s8557_s28 + $0xa0] sm:$0xff] }
0x24b7   : > { %v7052_v56 = vcombine.high %v4526_v8, %v4534_v9 }
0x24b8   : > { %v4488_v14 = vsub.f32 %v4476_v20, %v4486_v13  ;;  %v4489_v15 = vmul.f32 %v4487_v7, %v4487_v7  ;;  %v7061_v20 = vcombine.low %v4539_v58, %v4547_v61  ;;  %v4542_v13 = vld [vmem:[%s8557_s28 + $0xa8] sm:$0xff] }
0x24b9   : > { %v8001_v58 = vld [vmem:[%s8566_s30 + $0xe8] sm:$0xff]  }
0x24ba   : > { %v4491_v63 = vsel %vm1298_vm4, %v4489_v15, 0.0  ;;  %v4490_v16 = vmul.f32 %v4488_v14, %v4488_v14  ;;  %v7049_v15 = vcombine.low %v4525_v22, %v4533_v6  ;;  %v8002_v61 = vld [vmem:[%s8566_s30 + $0x28] sm:$0xff]   ;;  %v8008_v22 = vld [vmem:[%s8566_s30 + $0x78] sm:$0xff]  }
0x24bb   : > { %4492 = vadd.xlane.f32.xlu0 %v4491_v63  ;;  %v7051_v63 = vcombine.low %v4526_v8, %v4534_v9  ;;  %v8009_v6 = vld [vmem:[%s8566_s30 + $0xf8] sm:$0xff]  }
0x24bc   : > { %v4494_v0 = vsel %vm1298_vm4, %v4490_v16, 0.0  ;;  %v8010_v8 = vld [vmem:[%s8566_s30 + $0x38] sm:$0xff]  }
0x24bd   : > { %4495 = vadd.xlane.f32.xlu1 %v4494_v0  ;;  %v8011_v9 = vld [vmem:[%s8566_s30 + $0xb8] sm:$0xff]  }
0x2548   : > { %v4493_v45 = vpop.xlane.xlu0 %4492 }
0x2549   : > { %v4497_v46 = vmul.f32 0.03125, %v4493_v45  ;;  %v7987_v45 = vld [vmem:[%s8566_s30 + $0x88] sm:$0xff]  }
0x254a   : > { %v4496_v47 = vpop.xlane.xlu1 %4495 }
0x254b   : > { %v4499_v48 = vadd.f32 1e-05, %v4497_v46  ;;  %v4498_v49 = vmul.f32 0.03125, %v4496_v47  ;;  %v7988_v46 = vld [vmem:[%s8566_s30 + $0x50] sm:$0xff]  }
0x254c   : > { %v7989_v47 = vld [vmem:[%s8566_s30 + $0xd0] sm:$0xff]  }
0x254d   : > { %8240 = vrsqrt.f32 %v4499_v48  ;;  %v4500_v50 = vadd.f32 1e-05, %v4498_v49  ;;  %v7990_v48 = vld [vmem:[%s8566_s30 + $0x10] sm:$0xff]  }
0x254e   : > { %v7991_v49 = vld [vmem:[%s8566_s30 + $0x90] sm:$0xff]  }
0x254f   : > { %8242 = vrsqrt.f32 %v4500_v50  ;;  %v7992_v50 = vld [vmem:[%s8566_s30 + $0x58] sm:$0xff]  }
0x2557   : > { %v8241_v51 = vpop.eup %8240 }
0x2558   : > { %v4503_v53 = vmul.f32 %v8241_v51, %v4487_v7  ;;  %v4549_v7 = vld [vmem:[%s8557_s28 + $0xe0] sm:$0xff]  ;;  %v7993_v51 = vld [vmem:[%s8566_s30 + $0xd8] sm:$0xff]  }
0x2559   : > { %v8243_v36 = vpop.eup %8242  ;;  %v7066_v16 = vcombine.high %v4541_v59, %v4549_v7  ;;  %v7065_v21 = vcombine.low %v4541_v59, %v4549_v7  ;;  %v9299_v7 = vld [vmem:[%s8560_s2 + $0x8] sm:$0xff] }
0x255a   : > { %v4511_v40 = vmul.f32 %v7039_v52, %v4503_v53  ;;  %v4504_v54 = vmul.f32 %v8243_v36, %v4488_v14  ;;  %v4550_v14 = vld [vmem:[%s8557_s28 + $0xe8] sm:$0xff]  ;;  %v7995_v53 = vld [vmem:[%s8566_s30 + $0x98] sm:$0xff]   ;;  %v7996_v36 = vld [vmem:[%s8566_s30 + $0x60] sm:$0xff]   ;;  %s9596_s28 = sld [smem:[#allocation23_spill]] }
0x255b   : > { %v7068_v0 = vcombine.high %v4542_v13, %v4550_v14  ;;  %v7067_v23 = vcombine.low %v4542_v13, %v4550_v14 }
0x255c   : > { %v4512_v57 = vmul.f32 %v7039_v52, %v4504_v54  ;;  %v9215_v1 = vadd.f32 %v7040_v55, %v4511_v40  ;;  %v7994_v52 = vld [vmem:[%s8566_s30 + $0x18] sm:$0xff]   ;;  %v7997_v40 = vld [vmem:[%s8566_s30 + $0xe0] sm:$0xff]  }
0x255d   : > { %v7998_v54 = vld [vmem:[%s8566_s30 + $0x20] sm:$0xff]  }
0x255e   : > { %v9217_v4 = vadd.f32 %v7040_v55, %v4512_v57  ;;  %v7999_v55 = vld [vmem:[%s8566_s30 + $0xa0] sm:$0xff]   ;;  %v8000_v57 = vld [vmem:[%s8566_s30 + $0x68] sm:$0xff]  }
0x2560   : > { %v9221_v29 = vpack.c.bf16 %v9217_v4, %v9215_v1 }
0x2562   : > { %7073 = vmatmul.mubr.msk.bf16.vlgmr.msra.gmra.mrb[88].mxu1 %vm1298_vm4, %v9221_v29  ;;  %7074 = vmatmul.mubr.msk.bf16.vlgmr.msra.gmra.mrb[116].mxu0 %vm1298_vm4, %v9221_v29 }
0x2563   : > { %4888 = vmatpush1.bf16.msra.mxu1 %v7045_v42  ;;  %4931 = vmatpush1.bf16.msra.mxu0 %v7047_v43  ;;  %v7983_v42 = vld [vmem:[%s8566_s30 + $0x80] sm:$0xff]   ;;  %v7984_v43 = vld [vmem:[%s8566_s30 + $0x48] sm:$0xff]  }
0x2564   : > { %4889 = vmatprep.subr.bf16.mxu1 %v7062_v60  ;;  %4932 = vmatprep.subr.bf16.mxu0 %v7064_v26  ;;  %v8006_v60 = vld [vmem:[%s8566_s30 + $0x30] sm:$0xff]  }
0x2565   : > { %4919 = vmatprep.mubr.bf16.mxu1 %v8346_v38  ;;  %4962 = vmatprep.mubr.bf16.mxu0 %v8346_v38  ;;  %v8007_v26 = vld [vmem:[%s8566_s30 + $0xb0] sm:$0xff]  }
0x2567   : > { %4890 = vmatpush1.bf16.msra.mxu1 %v7061_v20  ;;  %4933 = vmatpush1.bf16.msra.mxu0 %v7063_v11  ;;  %v8012_v20 = vld [vmem:[%s8566_s30 + $0x140] sm:$0xff]  }
0x2568   : > { %4973 = vmatprep.subr.bf16.mxu1 %v7050_v3  ;;  %5016 = vmatprep.subr.bf16.mxu0 %v7052_v56  ;;  %v8013_v11 = vld [vmem:[%s8566_s30 + $0x1c0] sm:$0xff]   ;;  %v4558_v3 = vlaneseq }
0x256a   : > { %7075 = vmatmul.mubr.msk.bf16.vlgmr.msra.gmra.mrb[92].mxu1 %vm1298_vm4, %v9221_v29  ;;  %7076 = vmatmul.mubr.msk.bf16.vlgmr.msra.gmra.mrb[120].mxu0 %vm1298_vm4, %v9221_v29  ;;  %v9295_v56 = vshrl.u32 %v4558_v3, 7 }
0x256b   : > { %4974 = vmatpush1.bf16.msra.mxu1 %v7049_v15  ;;  %5017 = vmatpush1.bf16.msra.mxu0 %v7051_v63  ;;  %v4554_v63 = vld [vmem:[%s8560_s2] sm:$0xff]  ;;  %s9597_s2 = scalar_lea.vmem %s9596_s28, %s8519_s0 }
0x256c   : > { %4975 = vmatprep.subr.bf16.mxu1 %v7066_v16  ;;  %5018 = vmatprep.subr.bf16.mxu0 %v7068_v0  ;;  %v4584_v59 = vsub.s32 6, %v9295_v56  ;;  %v4560_v14 = vsub.s32 0, %v9295_v56  ;;  %v4568_v15 = vsub.s32 2, %v9295_v56  ;;  %v4564_v16 = vsub.s32 1, %v9295_v56 }
0x256d   : > { %5005 = vmatprep.mubr.bf16.mxu1 %v8346_v38  ;;  %5048 = vmatprep.mubr.bf16.mxu0 %v8346_v38  ;;  %v4572_v0 = vsub.s32 3, %v9295_v56  ;;  %v4588_v27 = vsub.s32 7, %v9295_v56 }
0x256e   : > { %v9302_v13 = vrot.slane %v9299_v7, %v4584_v59  ;;  %v4561_v2 = vrot.slane %v4554_v63, %v4560_v14  ;;  %v4569_v5 = vrot.slane %v4554_v63, %v4568_v15  ;;  %v4565_v18 = vrot.slane %v4554_v63, %v4564_v16 }
0x256f   : > { %4976 = vmatpush1.bf16.msra.mxu1 %v7065_v21  ;;  %5019 = vmatpush1.bf16.msra.mxu0 %v7067_v23  ;;  %v4573_v19 = vrot.slane %v4554_v63, %v4572_v0  ;;  %v4576_v21 = vsub.s32 4, %v9295_v56 }
0x2570   : > { %5059 = vmatprep.subr.bf16.mxu1 %v7054_v24  ;;  %5102 = vmatprep.subr.bf16.mxu0 %v7056_v25  ;;  %v4580_v25 = vsub.s32 5, %v9295_v56 }
0x2572   : > { %7077 = vmatmul.mubr.msk.bf16.vlgmr.msra.gmra.mrb[96].mxu1 %vm1298_vm4, %v9221_v29  ;;  %7078 = vmatmul.mubr.msk.bf16.vlgmr.msra.gmra.mrb[124].mxu0 %vm1298_vm4, %v9221_v29 }
0x2573   : > { %5060 = vmatpush1.bf16.msra.mxu1 %v7053_v32  ;;  %5103 = vmatpush1.bf16.msra.mxu0 %v7055_v33 }
0x2574   : > { %5061 = vmatprep.subr.bf16.mxu1 %v7070_v12  ;;  %5104 = vmatprep.subr.bf16.mxu0 %v7072_v34 }
0x2575   : > { %5091 = vmatprep.mubr.bf16.mxu1 %v8346_v38  ;;  %5134 = vmatprep.mubr.bf16.mxu0 %v8346_v38  ;;  %v7986_v38 = vld [vmem:[%s8566_s30 + $0x8] sm:$0xff]  }
0x2577   : > { %5062 = vmatpush1.bf16.msra.mxu1 %v7069_v35  ;;  %5105 = vmatpush1.bf16.msra.mxu0 %v7071_v10 }
0x2578   : > { %7352 = vmatprep.subr.bf16.mxu1 %v7980_v37  ;;  %7374 = vmatprep.subr.bf16.mxu0 %v7981_v39 }
0x257a   : > { %7079 = vmatmul.mubr.msk.bf16.vlgmr.msra.gmra.mrb[100].mxu1 %vm1298_vm4, %v9221_v29  ;;  %7080 = vmatmul.mubr.msk.bf16.vlgmr.msra.gmra.mrb[128].mxu0 %vm1298_vm4, %v9221_v29  ;;  %v8005_v29 = vld [vmem:[%s8566_s30 + $0xf0] sm:$0xff]  }
0x257b   : > { %7353 = vmatpush3.bf16.msra.mxu1 %v7982_v41  ;;  %7375 = vmatpush3.bf16.msra.mxu0 %v7983_v42  ;;  %v4577_v42 = vrot.slane %v4554_v63, %v4576_v21 }
0x257c   : > { %7354 = vmatprep.subr.bf16.mxu1 %v7984_v43  ;;  %7376 = vmatprep.subr.bf16.mxu0 %v7985_v44  ;;  %v4585_v43 = vrot.slane %v4554_v63, %v4584_v59 }
0x257f   : > { %7355 = vmatpush3.bf16.msra.mxu1 %v7986_v38  ;;  %7377 = vmatpush3.bf16.msra.mxu0 %v7987_v45  ;;  %v4581_v45 = vrot.slane %v4554_v63, %v4580_v25 }
0x2580   : > { %7356 = vmatprep.subr.bf16.mxu1 %v7988_v46  ;;  %7378 = vmatprep.subr.bf16.mxu0 %v7989_v47  ;;  %v4589_v46 = vrot.slane %v4554_v63, %v4588_v27  ;;  %v4601_v63 = vrot.slane %v9299_v7, %v4568_v15  ;;  %v4605_v15 = vrot.slane %v9299_v7, %v4572_v0 }
0x2583   : > { %7357 = vmatpush3.bf16.msra.mxu1 %v7990_v48  ;;  %7379 = vmatpush3.bf16.msra.mxu0 %v7991_v49 }
0x2584   : > { %7358 = vmatprep.subr.bf16.mxu1 %v7992_v50  ;;  %7380 = vmatprep.subr.bf16.mxu0 %v7993_v51 }
0x2587   : > { %7359 = vmatpush3.bf16.msra.mxu1 %v7994_v52  ;;  %7381 = vmatpush3.bf16.msra.mxu0 %v7995_v53 }
0x2588   : > { %7360 = vmatprep.subr.bf16.mxu1 %v7996_v36  ;;  %7382 = vmatprep.subr.bf16.mxu0 %v7997_v40 }
0x258b   : > { %7361 = vmatpush3.bf16.msra.mxu1 %v7998_v54  ;;  %7383 = vmatpush3.bf16.msra.mxu0 %v7999_v55 }
0x258c   : > { %7362 = vmatprep.subr.bf16.mxu1 %v8000_v57  ;;  %7384 = vmatprep.subr.bf16.mxu0 %v8001_v58 }
0x258f   : > { %7363 = vmatpush3.bf16.msra.mxu1 %v8002_v61  ;;  %7385 = vmatpush3.bf16.msra.mxu0 %v8003_v17  ;;  %v8014_v17 = vld [vmem:[%s8566_s30 + $0x100] sm:$0xff]  }
0x2590   : > { %7364 = vmatprep.subr.bf16.mxu1 %v8004_v62  ;;  %7386 = vmatprep.subr.bf16.mxu0 %v8005_v29  ;;  %v8015_v62 = vld [vmem:[%s8566_s30 + $0x180] sm:$0xff]  }
0x2593   : > { %7365 = vmatpush3.bf16.msra.mxu1 %v8006_v60  ;;  %7387 = vmatpush3.bf16.msra.mxu0 %v8007_v26 }
0x2594   : > { %7366 = vmatprep.subr.bf16.mxu1 %v8008_v22  ;;  %7388 = vmatprep.subr.bf16.mxu0 %v8009_v6  ;;  %v8016_v6 = vld [vmem:[%s8566_s30 + $0x148] sm:$0xff]  }
0x2597   : > { %7367 = vmatpush3.bf16.msra.mxu1 %v8010_v8  ;;  %7389 = vmatpush3.bf16.msra.mxu0 %v8011_v9  ;;  %v8017_v8 = vld [vmem:[%s8566_s30 + $0x1c8] sm:$0xff]   ;;  %v4593_v9 = vrot.slane %v9299_v7, %v4560_v14  ;;  %v4597_v14 = vrot.slane %v9299_v7, %v4564_v16  ;;  %v8021_v16 = vld [vmem:[%s8566_s30 + $0x1d0] sm:$0xff]  }
0x2598   : > { %7396 = vmatprep.subr.bf16.mxu1 %v8012_v20  ;;  %7418 = vmatprep.subr.bf16.mxu0 %v8013_v11 }
0x2635   : > { %v4835_v23 = vpop.f32.mrb[88].mxu1  ;;  %v4878_v24 = vpop.f32.mrb[116].mxu0 }
0x2636   : > { %v4836_v28 = vadd.f32 %v4835_v23, %v4561_v2  ;;  %v4879_v30 = vadd.f32 %v4878_v24, %v4569_v5  ;;  %v4837_v31 = vpop.f32.mrb[89].mxu1  ;;  %v4880_v32 = vpop.f32.mrb[117].mxu0 }
0x2637   : > { %v4838_v33 = vadd.f32 %v4837_v31, %v4565_v18  ;;  %v4881_v12 = vadd.f32 %v4880_v32, %v4573_v19  ;;  %v4839_v34 = vpop.f32.mrb[90].mxu1  ;;  %v4882_v35 = vpop.f32.mrb[118].mxu0 }
0x2638   : > { %v4840_v10 = vadd.f32 %v4839_v34, %v4561_v2  ;;  %v4883_v37 = vadd.f32 %v4882_v35, %v4569_v5  ;;  %v4841_v39 = vpop.f32.mrb[91].mxu1  ;;  %v4884_v41 = vpop.f32.mrb[119].mxu0  ;;  %v5145_v47 = vmax.f32 %v4836_v28, 0.0  ;;  %v5147_v48 = vmax.f32 %v4879_v30, 0.0  ;;  %v8018_v28 = vld [vmem:[%s8566_s30 + $0x108] sm:$0xff]   ;;  %v8020_v34 = vld [vmem:[%s8566_s30 + $0x150] sm:$0xff]  }
0x2639   : > { %v4842_v44 = vadd.f32 %v4841_v39, %v4565_v18  ;;  %v4885_v38 = vadd.f32 %v4884_v41, %v4573_v19  ;;  %v5146_v51 = vmax.f32 %v4838_v33, 0.0  ;;  %v5148_v52 = vmax.f32 %v4881_v12, 0.0  ;;  %v8019_v30 = vld [vmem:[%s8566_s30 + $0x188] sm:$0xff]  }
0x263a   : > { %v5161_v49 = vmax.f32 %v4840_v10, 0.0  ;;  %v5163_v50 = vmax.f32 %v4883_v37, 0.0 }
0x263b   : > { %v5162_v53 = vmax.f32 %v4842_v44, 0.0  ;;  %v5164_v36 = vmax.f32 %v4885_v38, 0.0 }
0x263c   : > { %v5433_v40 = vpack.c.bf16 %v5161_v49, %v5145_v47  ;;  %v5435_v54 = vpack.c.bf16 %v5163_v50, %v5147_v48 }
0x263d   : > { %v5434_v55 = vpack.c.bf16 %v5162_v53, %v5146_v51  ;;  %v5436_v57 = vpack.c.bf16 %v5164_v36, %v5148_v52  ;;  %v4921_v58 = vpop.f32.mrb[92].mxu1  ;;  %v4964_v61 = vpop.f32.mrb[120].mxu0  ;;  %v8024_v51 = vld [vmem:[%s8566_s30 + $0x158] sm:$0xff]  }
0x263e   : > { %v4922_v29 = vadd.f32 %v4921_v58, %v4577_v42  ;;  %v4965_v60 = vadd.f32 %v4964_v61, %v4585_v43  ;;  %v4923_v26 = vpop.f32.mrb[93].mxu1  ;;  %v4966_v22 = vpop.f32.mrb[121].mxu0  ;;  %v8025_v52 = vld [vmem:[%s8566_s30 + $0x1d8] sm:$0xff]  }
0x263f   : > { %v4924_v20 = vadd.f32 %v4923_v26, %v4581_v45  ;;  %v4967_v11 = vadd.f32 %v4966_v22, %v4589_v46  ;;  %v4925_v3 = vpop.f32.mrb[94].mxu1  ;;  %v4968_v59 = vpop.f32.mrb[122].mxu0  ;;  %6256 = vmatprep.mubr.bf16.mxu1 %v5434_v55  ;;  %6297 = vmatprep.mubr.bf16.mxu0 %v5436_v57  ;;  %v8026_v26 = vld [vmem:[%s8566_s30 + $0x118] sm:$0xff]  }
0x2640   : > { %v4926_v2 = vadd.f32 %v4925_v3, %v4577_v42  ;;  %v4969_v5 = vadd.f32 %v4968_v59, %v4585_v43  ;;  %v4927_v18 = vpop.f32.mrb[95].mxu1  ;;  %v4970_v19 = vpop.f32.mrb[123].mxu0  ;;  %6257 = vmatmul.mubr.bf16.vlgmr.msra.gmra.mrb[104].mxu1 %v5433_v40  ;;  %6298 = vmatmul.mubr.bf16.vlgmr.msra.gmra.mrb[132].mxu0 %v5435_v54  ;;  %v5149_v31 = vmax.f32 %v4922_v29, 0.0  ;;  %v5151_v32 = vmax.f32 %v4965_v60, 0.0  ;;  %v8027_v22 = vld [vmem:[%s8566_s30 + $0x198] sm:$0xff]  }
0x2641   : > { %v4928_v23 = vadd.f32 %v4927_v18, %v4581_v45  ;;  %v4971_v24 = vadd.f32 %v4970_v19, %v4589_v46  ;;  %7397 = vmatpush3.bf16.msra.mxu1 %v8014_v17  ;;  %7419 = vmatpush3.bf16.msra.mxu0 %v8015_v62  ;;  %v5150_v35 = vmax.f32 %v4924_v20, 0.0  ;;  %v5152_v10 = vmax.f32 %v4967_v11, 0.0  ;;  %v8022_v45 = vld [vmem:[%s8566_s30 + $0x110] sm:$0xff]  }
0x2642   : > { %v5165_v33 = vmax.f32 %v4926_v2, 0.0  ;;  %v5167_v12 = vmax.f32 %v4969_v5, 0.0  ;;  %7398 = vmatprep.subr.bf16.mxu1 %v8016_v6  ;;  %7420 = vmatprep.subr.bf16.mxu0 %v8017_v8  ;;  %v8023_v46 = vld [vmem:[%s8566_s30 + $0x190] sm:$0xff]   ;;  %v4609_v17 = vrot.slane %v9299_v7, %v4576_v21  ;;  %v4613_v62 = vrot.slane %v9299_v7, %v4580_v25  ;;  %v8028_v21 = vld [vmem:[%s8566_s30 + $0x160] sm:$0xff]  }
0x2643   : > { %v5166_v37 = vmax.f32 %v4928_v23, 0.0  ;;  %v5168_v39 = vmax.f32 %v4971_v24, 0.0  ;;  %v4621_v6 = vrot.slane %v9299_v7, %v4588_v27  ;;  %v8029_v25 = vld [vmem:[%s8566_s30 + $0x1e0] sm:$0xff]  }
0x2644   : > { %v9338_v41 = vpack.c.bf16 %v5165_v33, %v5149_v31  ;;  %v9340_v42 = vpack.c.bf16 %v5167_v12, %v5151_v32  ;;  %v8031_v23 = vld [vmem:[%s8566_s30 + $0x1a0] sm:$0xff]   ;;  %v8032_v31 = vld [vmem:[%s8566_s30 + $0x168] sm:$0xff]  }
0x2645   : > { %v5438_v0 = vpack.c.bf16 %v5166_v37, %v5150_v35  ;;  %v5440_v43 = vpack.c.bf16 %v5168_v39, %v5152_v10  ;;  %7399 = vmatpush3.bf16.msra.mxu1 %v8018_v28  ;;  %7421 = vmatpush3.bf16.msra.mxu0 %v8019_v30  ;;  %v5007_v44 = vpop.f32.mrb[96].mxu1  ;;  %v5050_v38 = vpop.f32.mrb[124].mxu0  ;;  %v8033_v32 = vld [vmem:[%s8566_s30 + $0x1e8] sm:$0xff]  }
0x2646   : > { %v5008_v47 = vadd.f32 %v5007_v44, %v4593_v9  ;;  %v5051_v48 = vadd.f32 %v5050_v38, %v4601_v63  ;;  %v5009_v49 = vpop.f32.mrb[97].mxu1  ;;  %v5052_v50 = vpop.f32.mrb[125].mxu0  ;;  %7400 = vmatprep.subr.bf16.mxu1 %v8020_v34  ;;  %7422 = vmatprep.subr.bf16.mxu0 %v8021_v16  ;;  %v8034_v44 = vld [vmem:[%s8566_s30 + $0x128] sm:$0xff]  }
0x2647   : > { %v5010_v53 = vadd.f32 %v5009_v49, %v4597_v14  ;;  %v5053_v36 = vadd.f32 %v5052_v50, %v4605_v15  ;;  %v5011_v40 = vpop.f32.mrb[98].mxu1  ;;  %v5054_v54 = vpop.f32.mrb[126].mxu0  ;;  %6338 = vmatprep.mubr.bf16.mxu1 %v5438_v0  ;;  %6379 = vmatprep.mubr.bf16.mxu0 %v5440_v43  ;;  %v8035_v38 = vld [vmem:[%s8566_s30 + $0x1a8] sm:$0xff]   ;;  %v8036_v49 = vld [vmem:[%s8566_s30 + $0x170] sm:$0xff]  }
0x2648   : > { %v5012_v55 = vadd.f32 %v5011_v40, %v4593_v9  ;;  %v5055_v57 = vadd.f32 %v5054_v54, %v4601_v63  ;;  %v5013_v58 = vpop.f32.mrb[99].mxu1  ;;  %v5056_v61 = vpop.f32.mrb[127].mxu0  ;;  %v5153_v8 = vmax.f32 %v5008_v47, 0.0  ;;  %v5155_v9 = vmax.f32 %v5051_v48, 0.0 }
0x2649   : > { %v5014_v29 = vadd.f32 %v5013_v58, %v4597_v14  ;;  %v5057_v60 = vadd.f32 %v5056_v61, %v4605_v15  ;;  %7401 = vmatpush3.bf16.msra.mxu1 %v8022_v45  ;;  %7423 = vmatpush3.bf16.msra.mxu0 %v8023_v46  ;;  %v5154_v3 = vmax.f32 %v5010_v53, 0.0  ;;  %v5156_v59 = vmax.f32 %v5053_v36, 0.0  ;;  %v8030_v14 = vld [vmem:[%s8566_s30 + $0x120] sm:$0xff]   ;;  %v8039_v58 = vld [vmem:[%s8566_s30 + $0x1b0] sm:$0xff]   ;;  %v8040_v61 = vld [vmem:[%s8566_s30 + $0x178] sm:$0xff]  }
0x264a   : > { %v5169_v20 = vmax.f32 %v5012_v55, 0.0  ;;  %v5171_v11 = vmax.f32 %v5055_v57, 0.0  ;;  %7402 = vmatprep.subr.bf16.mxu1 %v8024_v51  ;;  %7424 = vmatprep.subr.bf16.mxu0 %v8025_v52  ;;  %v8038_v57 = vld [vmem:[%s8566_s30 + $0x130] sm:$0xff]  }
0x264b   : > { %v5170_v63 = vmax.f32 %v5014_v29, 0.0  ;;  %v5172_v2 = vmax.f32 %v5057_v60, 0.0  ;;  %v8043_v29 = vld [vmem:[%s8566_s30 + $0x1b8] sm:$0xff]   ;;  %v8044_v60 = vld [vmem:[%s8566_s30 + $0x240] sm:$0xff]  }
0x264c   : > { %v9359_v5 = vpack.c.bf16 %v5169_v20, %v5153_v8  ;;  %v9361_v56 = vpack.c.bf16 %v5171_v11, %v5155_v9  ;;  %v8048_v8 = vld [vmem:[%s8566_s30 + $0x248] sm:$0xff]  }
0x264d   : > { %v9363_v7 = vpack.c.bf16 %v5170_v63, %v5154_v3  ;;  %v9365_v27 = vpack.c.bf16 %v5172_v2, %v5156_v59  ;;  %7403 = vmatpush3.bf16.msra.mxu1 %v8026_v26  ;;  %7425 = vmatpush3.bf16.msra.mxu0 %v8027_v22  ;;  %v5093_v18 = vpop.f32.mrb[100].mxu1  ;;  %v5136_v19 = vpop.f32.mrb[128].mxu0  ;;  %v8045_v26 = vld [vmem:[%s8566_s30 + $0x2c0] sm:$0xff]   ;;  %v8049_v9 = vld [vmem:[%s8566_s30 + $0x2c8] sm:$0xff]   ;;  %v8056_v3 = vld [vmem:[%s8566_s30 + $0x258] sm:$0xff]  }
0x264e   : > { %v5094_v24 = vadd.f32 %v5093_v18, %v4609_v17  ;;  %v5137_v28 = vadd.f32 %v5136_v19, %v9302_v13  ;;  %v5095_v30 = vpop.f32.mrb[101].mxu1  ;;  %v5138_v15 = vpop.f32.mrb[129].mxu0  ;;  %7404 = vmatprep.subr.bf16.mxu1 %v8028_v21  ;;  %7426 = vmatprep.subr.bf16.mxu0 %v8029_v25  ;;  %v8046_v22 = vld [vmem:[%s8566_s30 + $0x200] sm:$0xff]   ;;  %v8050_v20 = vld [vmem:[%s8566_s30 + $0x208] sm:$0xff]   ;;  %v8052_v21 = vld [vmem:[%s8566_s30 + $0x250] sm:$0xff]  }
0x264f   : > { %v5096_v33 = vadd.f32 %v5095_v30, %v4613_v62  ;;  %v5139_v12 = vadd.f32 %v5138_v15, %v4621_v6  ;;  %v5097_v34 = vpop.f32.mrb[102].mxu1  ;;  %v5140_v16 = vpop.f32.mrb[130].mxu0  ;;  %v8051_v11 = vld [vmem:[%s8566_s30 + $0x288] sm:$0xff]   ;;  %v8055_v25 = vld [vmem:[%s8566_s30 + $0x290] sm:$0xff]   ;;  %v8057_v59 = vld [vmem:[%s8566_s30 + $0x2d8] sm:$0xff]  }
0x2650   : > { %v5098_v35 = vadd.f32 %v5097_v34, %v4609_v17  ;;  %v5141_v10 = vadd.f32 %v5140_v16, %v9302_v13  ;;  %v5099_v37 = vpop.f32.mrb[103].mxu1  ;;  %v5142_v39 = vpop.f32.mrb[131].mxu0  ;;  %v5157_v45 = vmax.f32 %v5094_v24, 0.0  ;;  %v5159_v46 = vmax.f32 %v5137_v28, 0.0  ;;  %v8037_v13 = vld [vmem:[%s8566_s30 + $0x1f0] sm:$0xff]   ;;  %v8041_v17 = vld [vmem:[%s8566_s30 + $0x1f8] sm:$0xff]  }
0x2651   : > { %v5100_v0 = vadd.f32 %v5099_v37, %v4613_v62  ;;  %v5143_v43 = vadd.f32 %v5142_v39, %v4621_v6  ;;  %7405 = vmatpush3.bf16.msra.mxu1 %v8030_v14  ;;  %7427 = vmatpush3.bf16.msra.mxu0 %v8031_v23  ;;  %v5158_v50 = vmax.f32 %v5096_v33, 0.0  ;;  %v5160_v51 = vmax.f32 %v5139_v12, 0.0  ;;  %v8042_v62 = vld [vmem:[%s8566_s30 + $0x138] sm:$0xff]   ;;  %v8047_v6 = vld [vmem:[%s8566_s30 + $0x280] sm:$0xff]   ;;  %v8064_v14 = vld [vmem:[%s8566_s30 + $0x268] sm:$0xff]  }
0x2652   : > { %v5173_v47 = vmax.f32 %v5098_v35, 0.0  ;;  %v5175_v48 = vmax.f32 %v5141_v10, 0.0  ;;  %7406 = vmatprep.subr.bf16.mxu1 %v8032_v31  ;;  %7428 = vmatprep.subr.bf16.mxu0 %v8033_v32  ;;  %v8058_v63 = vld [vmem:[%s8566_s30 + $0x218] sm:$0xff]   ;;  %v8062_v18 = vld [vmem:[%s8566_s30 + $0x220] sm:$0xff]   ;;  %v8065_v23 = vld [vmem:[%s8566_s30 + $0x2e8] sm:$0xff]  }
0x2653   : > { %v5174_v52 = vmax.f32 %v5100_v0, 0.0  ;;  %v5176_v53 = vmax.f32 %v5143_v43, 0.0  ;;  %v8059_v2 = vld [vmem:[%s8566_s30 + $0x298] sm:$0xff]   ;;  %v8063_v19 = vld [vmem:[%s8566_s30 + $0x2a0] sm:$0xff]   ;;  %v8066_v24 = vld [vmem:[%s8566_s30 + $0x228] sm:$0xff]  }
0x2654   : > { %v9377_v36 = vpack.c.bf16 %v5173_v47, %v5157_v45  ;;  %v9379_v40 = vpack.c.bf16 %v5175_v48, %v5159_v46  ;;  %v8067_v28 = vld [vmem:[%s8566_s30 + $0x2a8] sm:$0xff]   ;;  %v8068_v30 = vld [vmem:[%s8566_s30 + $0x270] sm:$0xff]   ;;  %v8072_v33 = vld [vmem:[%s8566_s30 + $0x278] sm:$0xff]  }
0x2655   : > { %v9381_v54 = vpack.c.bf16 %v5174_v52, %v5158_v50  ;;  %v9383_v55 = vpack.c.bf16 %v5176_v53, %v5160_v51  ;;  %7407 = vmatpush3.bf16.msra.mxu1 %v8034_v44  ;;  %7429 = vmatpush3.bf16.msra.mxu0 %v8035_v38  ;;  %v8069_v15 = vld [vmem:[%s8566_s30 + $0x2f0] sm:$0xff]   ;;  %v8073_v12 = vld [vmem:[%s8566_s30 + $0x2f8] sm:$0xff]   ;;  %v8076_v35 = vld [vmem:[%s8566_s30 + $0x340] sm:$0xff]  }
0x2656   : > { %7408 = vmatprep.subr.bf16.mxu1 %v8036_v49  ;;  %7430 = vmatprep.subr.bf16.mxu0 %v8037_v13  ;;  %v8070_v31 = vld [vmem:[%s8566_s30 + $0x230] sm:$0xff]   ;;  %v8074_v34 = vld [vmem:[%s8566_s30 + $0x238] sm:$0xff]   ;;  %v8077_v10 = vld [vmem:[%s8566_s30 + $0x3c0] sm:$0xff]  }
0x2657   : > { %v8071_v32 = vld [vmem:[%s8566_s30 + $0x2b0] sm:$0xff]   ;;  %v8075_v16 = vld [vmem:[%s8566_s30 + $0x2b8] sm:$0xff]   ;;  %v8078_v37 = vld [vmem:[%s8566_s30 + $0x300] sm:$0xff]  }
0x2658   : > { %v8079_v39 = vld [vmem:[%s8566_s30 + $0x380] sm:$0xff]   ;;  %v8080_v0 = vld [vmem:[%s8566_s30 + $0x348] sm:$0xff]   ;;  %v8084_v45 = vld [vmem:[%s8566_s30 + $0x350] sm:$0xff]  }
0x2659   : > { %7409 = vmatpush3.bf16.msra.mxu1 %v8038_v57  ;;  %7431 = vmatpush3.bf16.msra.mxu0 %v8039_v58  ;;  %v8081_v43 = vld [vmem:[%s8566_s30 + $0x3c8] sm:$0xff]   ;;  %v8087_v46 = vld [vmem:[%s8566_s30 + $0x390] sm:$0xff]   ;;  %v8088_v47 = vld [vmem:[%s8566_s30 + $0x358] sm:$0xff]  }
0x265a   : > { %7410 = vmatprep.subr.bf16.mxu1 %v8040_v61  ;;  %7432 = vmatprep.subr.bf16.mxu0 %v8041_v17  ;;  %v8082_v44 = vld [vmem:[%s8566_s30 + $0x308] sm:$0xff]   ;;  %v8089_v48 = vld [vmem:[%s8566_s30 + $0x3d8] sm:$0xff]   ;;  %v8092_v50 = vld [vmem:[%s8566_s30 + $0x360] sm:$0xff]  }
0x265b   : > { %v8083_v38 = vld [vmem:[%s8566_s30 + $0x388] sm:$0xff]   ;;  %v8090_v49 = vld [vmem:[%s8566_s30 + $0x318] sm:$0xff]   ;;  %v8093_v51 = vld [vmem:[%s8566_s30 + $0x3e0] sm:$0xff]  }
0x265c   : > { %v8091_v13 = vld [vmem:[%s8566_s30 + $0x398] sm:$0xff]   ;;  %v8094_v52 = vld [vmem:[%s8566_s30 + $0x320] sm:$0xff]   ;;  %v8098_v57 = vld [vmem:[%s8566_s30 + $0x328] sm:$0xff]  }
0x265d   : > { %7411 = vmatpush3.bf16.msra.mxu1 %v8042_v62  ;;  %7433 = vmatpush3.bf16.msra.mxu0 %v8043_v29  ;;  %v8095_v53 = vld [vmem:[%s8566_s30 + $0x3a0] sm:$0xff]   ;;  %v8099_v58 = vld [vmem:[%s8566_s30 + $0x3a8] sm:$0xff]   ;;  %v8100_v61 = vld [vmem:[%s8566_s30 + $0x370] sm:$0xff]  }
0x265e   : > { %7440 = vmatprep.subr.bf16.mxu1 %v8044_v60  ;;  %7462 = vmatprep.subr.bf16.mxu0 %v8045_v26  ;;  %v8101_v17 = vld [vmem:[%s8566_s30 + $0x3f0] sm:$0xff]   ;;  %v8104_v60 = vld [vmem:[%s8566_s30 + $0x378] sm:$0xff]  }
0x265f   : > { %v8102_v62 = vld [vmem:[%s8566_s30 + $0x330] sm:$0xff]   ;;  %v8105_v26 = vld [vmem:[%s8566_s30 + $0x3f8] sm:$0xff]  }
0x2660   : > { %6339 = vmatmul.mubr.bf16.vlgmr.msra.gmra.mrb[108].mxu1 %v9338_v41  ;;  %6380 = vmatmul.mubr.bf16.vlgmr.msra.gmra.mrb[136].mxu0 %v9340_v42  ;;  %v8053_v41 = vld [vmem:[%s8566_s30 + $0x2d0] sm:$0xff]  }
0x2661   : > { %7441 = vmatpush3.bf16.msra.mxu1 %v8046_v22  ;;  %6420 = vmatprep.mubr.bf16.mxu1 %v9363_v7  ;;  %v8054_v42 = vld [vmem:[%s8566_s30 + $0x210] sm:$0xff]   ;;  %v8060_v7 = vld [vmem:[%s8566_s30 + $0x260] sm:$0xff]   ;;  %v8106_v22 = vld [vmem:[%s8566_s30 + $0x338] sm:$0xff]  }
0x2662   : > { %7463 = vmatpush3.bf16.msra.mxu0 %v8047_v6  ;;  %6461 = vmatprep.mubr.bf16.mxu0 %v9365_v27  ;;  %v8061_v27 = vld [vmem:[%s8566_s30 + $0x2e0] sm:$0xff]   ;;  %v8103_v29 = vld [vmem:[%s8566_s30 + $0x3b0] sm:$0xff]   ;;  %v8107_v6 = vld [vmem:[%s8566_s30 + $0x3b8] sm:$0xff]  }
0x2663   : > { %7442 = vmatprep.subr.bf16.mxu1 %v8048_v8  ;;  %7464 = vmatprep.subr.bf16.mxu0 %v8049_v9 }
0x2665   : > { %7443 = vmatpush3.bf16.msra.mxu1 %v8050_v20  ;;  %v7081_v20 = vld [vmem:[%s9597_s2] ss:$0 sm:$0xff] }
0x2666   : > { %7465 = vmatpush3.bf16.msra.mxu0 %v8051_v11  ;;  %7444 = vmatprep.subr.bf16.mxu1 %v8052_v21 }
0x2667   : > { %7466 = vmatprep.subr.bf16.mxu0 %v8053_v41 }
0x2669   : > { %7445 = vmatpush3.bf16.msra.mxu1 %v8054_v42 }
0x266a   : > { %7467 = vmatpush3.bf16.msra.mxu0 %v8055_v25  ;;  %7446 = vmatprep.subr.bf16.mxu1 %v8056_v3 }
0x266b   : > { %7468 = vmatprep.subr.bf16.mxu0 %v8057_v59 }
0x266d   : > { %7447 = vmatpush3.bf16.msra.mxu1 %v8058_v63 }
0x266e   : > { %7469 = vmatpush3.bf16.msra.mxu0 %v8059_v2  ;;  %7448 = vmatprep.subr.bf16.mxu1 %v8060_v7 }
0x266f   : > { %7470 = vmatprep.subr.bf16.mxu0 %v8061_v27 }
0x2671   : > { %7449 = vmatpush3.bf16.msra.mxu1 %v8062_v18 }
0x2672   : > { %7471 = vmatpush3.bf16.msra.mxu0 %v8063_v19  ;;  %7450 = vmatprep.subr.bf16.mxu1 %v8064_v14 }
0x2673   : > { %7472 = vmatprep.subr.bf16.mxu0 %v8065_v23 }
0x2675   : > { %7451 = vmatpush3.bf16.msra.mxu1 %v8066_v24 }
0x2676   : > { %7473 = vmatpush3.bf16.msra.mxu0 %v8067_v28  ;;  %7452 = vmatprep.subr.bf16.mxu1 %v8068_v30 }
0x2677   : > { %7474 = vmatprep.subr.bf16.mxu0 %v8069_v15 }
0x2679   : > { %7453 = vmatpush3.bf16.msra.mxu1 %v8070_v31 }
0x267a   : > { %7475 = vmatpush3.bf16.msra.mxu0 %v8071_v32  ;;  %7454 = vmatprep.subr.bf16.mxu1 %v8072_v33 }
0x267b   : > { %7476 = vmatprep.subr.bf16.mxu0 %v8073_v12 }
0x267d   : > { %7455 = vmatpush3.bf16.msra.mxu1 %v8074_v34 }
0x267e   : > { %7477 = vmatpush3.bf16.msra.mxu0 %v8075_v16  ;;  %7484 = vmatprep.subr.bf16.mxu1 %v8076_v35 }
0x267f   : > { %7506 = vmatprep.subr.bf16.mxu0 %v8077_v10 }
0x2680   : > { %6421 = vmatmul.mubr.bf16.vlgmr.msra.gmra.mrb[112].mxu1 %v9359_v5  ;;  %v8085_v5 = vld [vmem:[%s8566_s30 + $0x3d0] sm:$0xff]  }
0x2681   : > { %6462 = vmatmul.mubr.bf16.vlgmr.msra.gmra.mrb[140].mxu0 %v9361_v56  ;;  %7485 = vmatpush3.bf16.msra.mxu1 %v8078_v37  ;;  %v8086_v56 = vld [vmem:[%s8566_s30 + $0x310] sm:$0xff]  }
0x2682   : > { %6502 = vmatprep.mubr.bf16.mxu1 %v9381_v54  ;;  %7507 = vmatpush3.bf16.msra.mxu0 %v8079_v39  ;;  %v8096_v54 = vld [vmem:[%s8566_s30 + $0x368] sm:$0xff]  }
0x2683   : > { %6543 = vmatprep.mubr.bf16.mxu0 %v9383_v55  ;;  %7486 = vmatprep.subr.bf16.mxu1 %v8080_v0  ;;  %v8097_v55 = vld [vmem:[%s8566_s30 + $0x3e8] sm:$0xff]   ;;  %s9598_s30 = sld [smem:[#allocation24_spill]] }
0x2684   : > { %7508 = vmatprep.subr.bf16.mxu0 %v8081_v43 }
0x2685   : > { %7487 = vmatpush3.bf16.msra.mxu1 %v8082_v44 }
0x2686   : > { %7509 = vmatpush3.bf16.msra.mxu0 %v8083_v38  ;;  %7488 = vmatprep.subr.bf16.mxu1 %v8084_v45 }
0x2687   : > { %7510 = vmatprep.subr.bf16.mxu0 %v8085_v5 }
0x2689   : > { %7489 = vmatpush3.bf16.msra.mxu1 %v8086_v56  ;;  %s9599_s15 = scalar_lea.vmem %s9598_s30, %s8519_s0 }
0x268a   : > { %7511 = vmatpush3.bf16.msra.mxu0 %v8087_v46  ;;  %7490 = vmatprep.subr.bf16.mxu1 %v8088_v47 }
0x268b   : > { %7512 = vmatprep.subr.bf16.mxu0 %v8089_v48 }
0x268d   : > { %7491 = vmatpush3.bf16.msra.mxu1 %v8090_v49 }
0x268e   : > { %7513 = vmatpush3.bf16.msra.mxu0 %v8091_v13  ;;  %7492 = vmatprep.subr.bf16.mxu1 %v8092_v50 }
0x268f   : > { %7514 = vmatprep.subr.bf16.mxu0 %v8093_v51 }
0x2691   : > { %7493 = vmatpush3.bf16.msra.mxu1 %v8094_v52 }
0x2692   : > { %7515 = vmatpush3.bf16.msra.mxu0 %v8095_v53  ;;  %7494 = vmatprep.subr.bf16.mxu1 %v8096_v54 }
0x2693   : > { %7516 = vmatprep.subr.bf16.mxu0 %v8097_v55 }
0x2695   : > { %7495 = vmatpush3.bf16.msra.mxu1 %v8098_v57 }
0x2696   : > { %7517 = vmatpush3.bf16.msra.mxu0 %v8099_v58  ;;  %7496 = vmatprep.subr.bf16.mxu1 %v8100_v61 }
0x2697   : > { %7518 = vmatprep.subr.bf16.mxu0 %v8101_v17 }
0x2699   : > { %7497 = vmatpush3.bf16.msra.mxu1 %v8102_v62 }
0x269a   : > { %7519 = vmatpush3.bf16.msra.mxu0 %v8103_v29  ;;  %7498 = vmatprep.subr.bf16.mxu1 %v8104_v60 }
0x269b   : > { %7520 = vmatprep.subr.bf16.mxu0 %v8105_v26 }
0x269d   : > { %7499 = vmatpush3.bf16.msra.mxu1 %v8106_v22 }
0x269e   : > { %7521 = vmatpush3.bf16.msra.mxu0 %v8107_v6 }
0x26a0   : > { %6503 = vmatmul.mubr.bf16.vlgmr.msra.gmra.mrb[116].mxu1 %v9377_v36 }
0x26a1   : > { %6544 = vmatmul.mubr.bf16.vlgmr.msra.gmra.mrb[144].mxu0 %v9379_v40 }
0x2713   : > { %v7368_v8 = vpop.f32.mrb[104].mxu1  ;;  %v7390_v9 = vpop.f32.mrb[132].mxu0 }
0x2714   : > { %v7369_v11 = vpop.f32.mrb[105].mxu1  ;;  %v7391_v21 = vpop.f32.mrb[133].mxu0 }
0x2715   : > { %v7370_v41 = vadd.f32 %v7369_v11, %v7368_v8  ;;  %v7392_v42 = vadd.f32 %v7391_v21, %v7390_v9  ;;  %v7371_v25 = vpop.f32.mrb[106].mxu1  ;;  %v7393_v3 = vpop.f32.mrb[134].mxu0 }
0x2716   : > { %v7372_v59 = vpop.f32.mrb[107].mxu1  ;;  %v7394_v63 = vpop.f32.mrb[135].mxu0 }
0x2717   : > { %v6259_v2 = vadd.f32 %v7370_v41, %v7081_v20  ;;  %v7373_v7 = vadd.f32 %v7372_v59, %v7371_v25  ;;  %v7395_v27 = vadd.f32 %v7394_v63, %v7393_v3 }
0x2719   : > { %v6300_v18 = vadd.f32 %v7392_v42, %v6259_v2  ;;  %v6262_v19 = vadd.f32 %v7373_v7, %v7081_v20 }
0x271b   : > { %v6303_v36 = vadd.f32 %v7395_v27, %v6262_v19 }
0x2733   : > { %v7412_v14 = vpop.f32.mrb[108].mxu1  ;;  %v7434_v40 = vpop.f32.mrb[136].mxu0 }
0x2734   : > { %v7413_v23 = vpop.f32.mrb[109].mxu1  ;;  %v7435_v24 = vpop.f32.mrb[137].mxu0 }
0x2735   : > { %v7414_v28 = vadd.f32 %v7413_v23, %v7412_v14  ;;  %v7436_v30 = vadd.f32 %v7435_v24, %v7434_v40  ;;  %v7415_v15 = vpop.f32.mrb[110].mxu1  ;;  %v7437_v31 = vpop.f32.mrb[138].mxu0 }
0x2736   : > { %v7416_v32 = vpop.f32.mrb[111].mxu1  ;;  %v7438_v33 = vpop.f32.mrb[139].mxu0 }
0x2737   : > { %v6341_v12 = vadd.f32 %v7414_v28, %v6300_v18  ;;  %v7417_v34 = vadd.f32 %v7416_v32, %v7415_v15  ;;  %v7439_v16 = vadd.f32 %v7438_v33, %v7437_v31  ;;  %v7211_v32 = vld [vmem:[%s9600_s14] ss:$0 sm:$0xff] }
0x2739   : > { %v6382_v35 = vadd.f32 %v7436_v30, %v6341_v12  ;;  %v6344_v10 = vadd.f32 %v7417_v34, %v6303_v36  ;;  %v7210_v30 = vld [vmem:[%s9599_s15] ss:$0 sm:$0xff] }
0x273b   : > { %v6385_v37 = vadd.f32 %v7439_v16, %v6344_v10  ;;  %v8250_v10 = vld [vmem:[%s9602_s5] sm:$0xff] (!%p7212_p5)  }
0x2753   : > { %v7456_v39 = vpop.f32.mrb[112].mxu1 }
0x2754   : > { %v7478_v0 = vpop.f32.mrb[140].mxu0  ;;  %v7457_v43 = vpop.f32.mrb[113].mxu1 }
0x2755   : > { %v7458_v44 = vadd.f32 %v7457_v43, %v7456_v39  ;;  %v7479_v38 = vpop.f32.mrb[141].mxu0  ;;  %v7459_v45 = vpop.f32.mrb[114].mxu1  ;;  %v8251_v39 = vld [vmem:[%s9602_s5 + $0x8] sm:$0xff] (!%p7212_p5)   ;;  %v7213_v43 = vld [vmem:[%s9603_s16] ss:$0 sm:$0xff] (!%p7212_p5) }
0x2756   : > { %v7480_v5 = vadd.f32 %v7479_v38, %v7478_v0  ;;  %v7481_v56 = vpop.f32.mrb[142].mxu0  ;;  %v7460_v46 = vpop.f32.mrb[115].mxu1 }
0x2757   : > { %v6423_v47 = vadd.f32 %v7458_v44, %v6382_v35  ;;  %v7461_v48 = vadd.f32 %v7460_v46, %v7459_v45  ;;  %v7482_v49 = vpop.f32.mrb[143].mxu0 }
0x2758   : > { %v7483_v13 = vadd.f32 %v7482_v49, %v7481_v56 }
0x2759   : > { %v6464_v50 = vadd.f32 %v7480_v5, %v6423_v47  ;;  %v6426_v51 = vadd.f32 %v7461_v48, %v6385_v37  ;;  %v8347_v37 = vmov (!%p7212_p5), 0.0  }
0x275a   : > { %7881 = vmatprep.subr.bf16.mxu0 (!%p7212_p5), %v8347_v37  ;;  %7885 = vmatprep.mubr.msk.bf16.mxu0 (!%p7212_p5), %vm8348_vm9, %v8347_v37 }
0x275b   : > { %v6467_v52 = vadd.f32 %v7483_v13, %v6426_v51  ;;  %7882 = vmatpush3.bf16.msra.mxu0 (!%p7212_p5), %v8250_v10 }
0x275c   : > { %7883 = vmatprep.subr.bf16.mxu0 (!%p7212_p5), %v8347_v37 }
0x275f   : > { %7884 = vmatpush3.bf16.msra.mxu0 (!%p7212_p5), %v8251_v39 }
0x2773   : > { %v7500_v53 = vpop.f32.mrb[116].mxu1 }
0x2774   : > { %v7522_v54 = vpop.f32.mrb[144].mxu0  ;;  %v7501_v55 = vpop.f32.mrb[117].mxu1 }
0x2775   : > { %v7502_v57 = vadd.f32 %v7501_v55, %v7500_v53  ;;  %v7523_v58 = vpop.f32.mrb[145].mxu0  ;;  %v7503_v61 = vpop.f32.mrb[118].mxu1 }
0x2776   : > { %v7524_v17 = vadd.f32 %v7523_v58, %v7522_v54  ;;  %v7525_v62 = vpop.f32.mrb[146].mxu0  ;;  %v7504_v29 = vpop.f32.mrb[119].mxu1 }
0x2777   : > { %v6505_v60 = vadd.f32 %v7502_v57, %v6464_v50  ;;  %v7505_v26 = vadd.f32 %v7504_v29, %v7503_v61  ;;  %v7526_v22 = vpop.f32.mrb[147].mxu0 }
0x2778   : > { %v7527_v6 = vadd.f32 %v7526_v22, %v7525_v62 }
0x2779   : > { %v6546_v8 = vadd.f32 %v7524_v17, %v6505_v60  ;;  %v6508_v9 = vadd.f32 %v7505_v26, %v6467_v52 }
0x277b   : > { %v6549_v20 = vadd.f32 %v7527_v6, %v6508_v9  ;;  %v6552_v11 = vadd.f32 %v6546_v8, %v9215_v1 }
0x277d   : > { %v6556_v21 = vsel %vm1298_vm4, %v6552_v11, 0.0  ;;  %v6553_v41 = vadd.f32 %v6549_v20, %v9217_v4 }
0x277e   : > { %6557 = vadd.xlane.f32.xlu0 %v6556_v21 }
0x277f   : > { %v6559_v42 = vsel %vm1298_vm4, %v6553_v41, 0.0 }
0x2780   : > { %6560 = vadd.xlane.f32.xlu1 %v6559_v42 }
0x280b   : > { %v6558_v25 = vpop.xlane.xlu0 %6557 }
0x280c   : > { %v6562_v3 = vmul.f32 0.03125, %v6558_v25 }
0x280d   : > { %v6561_v59 = vpop.xlane.xlu1 %6560 }
0x280e   : > { %v6564_v63 = vsub.f32 %v6552_v11, %v6562_v3  ;;  %v6563_v2 = vmul.f32 0.03125, %v6561_v59 }
0x2810   : > { %v6565_v7 = vsub.f32 %v6553_v41, %v6563_v2  ;;  %v6566_v27 = vmul.f32 %v6564_v63, %v6564_v63 }
0x2812   : > { %v6568_v18 = vsel %vm1298_vm4, %v6566_v27, 0.0  ;;  %v6567_v1 = vmul.f32 %v6565_v7, %v6565_v7 }
0x2813   : > { %6569 = vadd.xlane.f32.xlu0 %v6568_v18 }
0x2814   : > { %v6571_v4 = vsel %vm1298_vm4, %v6567_v1, 0.0 }
0x2815   : > { %6572 = vadd.xlane.f32.xlu1 %v6571_v4 }
0x28a0   : > { %v6570_v19 = vpop.xlane.xlu0 %6569 }
0x28a1   : > { %v6574_v36 = vmul.f32 0.03125, %v6570_v19 }
0x28a2   : > { %v6573_v14 = vpop.xlane.xlu1 %6572 }
0x28a3   : > { %v6576_v40 = vadd.f32 1e-05, %v6574_v36  ;;  %v6575_v23 = vmul.f32 0.03125, %v6573_v14 }
0x28a5   : > { %8244 = vrsqrt.f32 %v6576_v40  ;;  %v6577_v24 = vadd.f32 1e-05, %v6575_v23 }
0x28a7   : > { %8246 = vrsqrt.f32 %v6577_v24 }
0x28af   : > { %v8245_v28 = vpop.eup %8244 }
0x28b0   : > { %v6580_v15 = vmul.f32 %v8245_v28, %v6564_v63 }
0x28b1   : > { %v8247_v31 = vpop.eup %8246 }
0x28b2   : > { %v6588_v33 = vmul.f32 %v7210_v30, %v6580_v15  ;;  %v6581_v12 = vmul.f32 %v8247_v31, %v6565_v7  ;;  %6603 = sbr.rel (%p7212_p5) target bundleno = 10643 (0x2993), region = 144 }
0x28b4   : > { %v6596_v34 = vadd.f32 %v7211_v32, %v6588_v33  ;;  %v6589_v16 = vmul.f32 %v7210_v30, %v6581_v12 }
0x28b6   : > { %6598 = vst.msk [vmem:[#allocation2] sm:$0xff] %vm1298_vm4, %v6596_v34  ;;  %v6597_v35 = vadd.f32 %v7211_v32, %v6589_v16 }
0x28b8   : > { %6599 = vst.msk [vmem:[#allocation2 + $0x8] sm:$0xff] %vm1298_vm4, %v6597_v35  ;;  %v6608_v0 = vpack.c.bf16 (!%p7212_p5), %v6597_v35, %v6596_v34 }
0x28ba   : > { %7886 = vmatmul.mubr.msk.bf16.vlgmr.msra.gmra.mrb[0].mxu0 %vm1298_vm4, %v6608_v0 }
0x298d   : > { %v6665_v44 = vpop.f32.mrb[0].mxu0 }
0x298e   : > { %v6666_v38 = vadd.f32 %v7213_v43, %v6665_v44  ;;  %v7887_v45 = vpop.f32.mrb[1].mxu0 }
0x298f   : > { %v6668_v5 = vpop.f32.mrb[2].mxu0 }
0x2990   : > { %6672 = vst [vmem:[#allocation3] sm:$0xff] %v6666_v38  ;;  %v6669_v56 = vadd.f32 %v7213_v43, %v6668_v5  ;;  %v7888_v46 = vpop.f32.mrb[3].mxu0 }
0x2992   : > { %6673 = vst [vmem:[#allocation3 + $0x8] sm:$0xff] %v6669_v56 }
0x2993 PF: > { %s9604_s0 = sld [smem:[#allocation29_spill]]  ;;  %s8349_s6 = smov [#allocation3]  }
0x2994   : > { %s6680_s9 = sshll.u32 %s8349_s6, 4  ;;  %s6681_s9 = int_to_ptr.vmem [resolvable:$true] %s6680_s9 }
0x2995   : > { %s8252_s24 = scalar_lea.vmem %s6681_s9, 256  ;;  %p8259_p10 = scmp.lt.s32.totalorder %s6681_s9, %s6681_s9 }
0x2996   : > { %p8253_p7 = scmp.ne.s32.totalorder %s6681_s9, %s8252_s24  ;;  %p8260_p11 = scmp.lt.s32.totalorder %s8252_s24, %s8252_s24 }
0x2998   : > { %p8261_p12 = por %p8260_p11, %p8259_p10 }
0x2999   : > { %p7893_p6 = scmp.eq.s32.totalorder %s9604_s0, 1 }
0x299b   : > { %p8254_p8 = pnand %p8253_p7, %p7893_p6 }
0x299d   : > { %p8255_p9 = pneg %p8254_p8 }
0x299f   : > { %p8262_p13 = pnand %p8261_p12, %p8255_p9 }
0x29a1   : > { %8265 = shalt.err (!%p8262_p13)
}
0x29a2   : > { %s9605_s7 = sld [smem:[#allocation27_spill]] }
0x29a8   : > { %s9606_s10 = smov %s9605_s7  ;;  %s8266_s26 = scalar_lea.hbm %s9605_s7, 256 }
0x29a9   : > { %p8267_p0 = scmp.ne.s32.totalorder %s9606_s10, %s8266_s26  ;;  %p8272_p3 = scmp.lt.u32.totalorder %s8266_s26, %s9606_s10 }
0x29ab   : > { %p8268_p1 = pnand %p8267_p0, %p7893_p6 }
0x29ad   : > { %p8269_p2 = pneg %p8268_p1 }
0x29af   : > { %p8274_p4 = pnand %p8272_p3, %p8269_p2 }
0x29b1   : > { %8277 = shalt.err (!%p8274_p4)
}
0x29b2   : > { %s8350_s8 = smov 128   ;;  %s8351_s1 = smov 8  }
0x29b3   : > { %7890 = dma.vmem_to_hbm [thread:$0]  (%p7893_p6), %s6681_s9, 256, %s9606_s10, [#allocation4], %s8350_s8, %s8350_s8, %s8351_s1  }
0x29b4   : > { %8283 = dma.done.wait (%p7893_p6), [#allocation4], 256  }
0x29b5   : > { %8285 = vsyncadd (%p7893_p6), [#allocation4], 4294967040 }
0x29b6 PF: > { %s9607_s3 = sld [smem:[#allocation28_spill]] }
0x29bc   : > { %s70_s7 = sadd.s32 1, %s9607_s3  }
0x29bd   : > { %p67_p5 = scmp.ge.s32.totalorder %s70_s7, 4  }
0x29bf   :  { %69 = sbr.rel (!%p67_p5) target bundleno = 58 (0x3a), region = 257 }
0x29c6   :  { %6696 = vsyncpa [#allocation4], 1 }
0x29c7   :  { %6698 = vsyncpa [#allocation4 + $0x1], 1 }

</bundles_post_ra>
